<compile_context>
chip_gen: v7x
topology: tpu7x:2x2x1
jax: 0.10.0
libtpu: 0.0.40
codegen_flags: <defaults>
</compile_context>

<pallas_src>
import functools

import numpy as np
import jax
import jax.numpy as jnp
from jax.experimental import pallas as pl
from jax.experimental.pallas import tpu as pltpu


_CPARAMS = pltpu.CompilerParams(
    dimension_semantics=("parallel",),      # batch axis -> both TCs on v7x
    vmem_limit_bytes=32 * 1024 * 1024,      # fits scoped VMEM on v5e/v6e/v7x
)


# ------------------------------ BlockSpec helpers ----------------------------

def _img_spec(shape):
    """Block = one batch element, full spatial/channel extent."""
    ndim = len(shape)
    block = (1,) + tuple(shape[1:])
    return pl.BlockSpec(block, lambda b: (b,) + (0,) * (ndim - 1))


def _full_spec(shape):
    """Whole (small) array, same block for every grid step (weights/tables)."""
    ndim = len(shape)
    return pl.BlockSpec(tuple(shape), lambda b: (0,) * ndim)


# ------------------------------- Pallas kernels -------------------------------

def _conv3x3_relu_kernel(xp_ref, w_ref, b_ref, o_ref, *, H, W, Cin, Cout):
    """Standard 3x3 conv (stride 1, zero pad applied outside) + bias + ReLU.
    In-kernel im2col: 9 shifted views, one small matmul per tap, f32 accumulate."""
    xp = xp_ref[0]                       # (H+2, W+2, Cin)
    w = w_ref[...]                       # (9, Cin, Cout)
    acc = jnp.zeros((H * W, Cout), jnp.float32)
    for t in range(9):
        dy, dx = divmod(t, 3)
        tap = xp[dy:dy + H, dx:dx + W, :].reshape(H * W, Cin)
        acc = acc + jnp.dot(tap, w[t], preferred_element_type=jnp.float32)
    acc = jnp.maximum(acc + b_ref[...], 0.0)
    o_ref[...] = acc.reshape(1, H, W, Cout)


def _pud_head_kernel(p00_ref, p01_ref, p10_ref, p11_ref, wg_ref, gsum_ref, b_ref,
                     o_ref, *, h, w, Cg, Cout):
    """MaxPool(2x2) of the pixel-unshuffled tensor (max of 4 pre-sliced,
    zero-padded candidates) fused with the grouped 3x3 conv:
    per-tap VPU channel multiplies + 0/1 group-sum matmul + bias."""
    m = jnp.maximum(jnp.maximum(p00_ref[0], p01_ref[0]),
                    jnp.maximum(p10_ref[0], p11_ref[0]))     # (h+2, w+2, Cg)
    wg = wg_ref[...]                                         # (9, Cg)
    acc = jnp.zeros((h, w, Cg), jnp.float32)
    for t in range(9):
        dy, dx = divmod(t, 3)
        acc = acc + m[dy:dy + h, dx:dx + w, :] * wg[t]
    out = jnp.dot(acc.reshape(h * w, Cg), gsum_ref[...],
                  preferred_element_type=jnp.float32) + b_ref[...]
    o_ref[...] = out.reshape(1, h, w, Cout)


def _pud_tail_kernel(g_ref, base_ref, up_ref, wpw_ref, bpw_ref, *rest,
                     relu, has_res, h, w, H, W, C):
    """Bilinear 4x upsample (one matmul against the precomputed interpolation
    matrix) + residual add with the PUD input + 1x1 conv + optional ReLU +
    optional outer residual, all fused."""
    if has_res:
        res_ref, o_ref = rest
    else:
        (o_ref,) = rest
    g = g_ref[0].reshape(h * w, C)
    up = jnp.dot(up_ref[...], g, preferred_element_type=jnp.float32)    # (H*W, C)
    s = up + base_ref[0].reshape(H * W, C)
    out = jnp.dot(s, wpw_ref[...], preferred_element_type=jnp.float32) + bpw_ref[...]
    if relu:
        out = jnp.maximum(out, 0.0)
    if has_res:
        out = out + res_ref[0].reshape(H * W, C)
    o_ref[...] = out.reshape(1, H, W, C)


def _dsc_kernel(xp_ref, wdw_ref, bdw_ref, wpw_ref, bpw_ref, *rest,
                relu, n_res, last_twice, H, W, C):
    """Depthwise 3x3 conv (pure VPU stencil) + self residual add + 1x1 conv +
    optional ReLU + optional fused residual chain."""
    res_refs = rest[:n_res]
    o_ref = rest[n_res]
    xp = xp_ref[0]                        # (H+2, W+2, C)
    wdw = wdw_ref[...]                    # (9, C)
    acc = jnp.zeros((H, W, C), jnp.float32)
    for t in range(9):
        dy, dx = divmod(t, 3)
        acc = acc + xp[dy:dy + H, dx:dx + W, :] * wdw[t]
    acc = acc + bdw_ref[...]
    s = (xp[1:1 + H, 1:1 + W, :] + acc).reshape(H * W, C)    # torch.add(x, d(x))
    out = jnp.dot(s, wpw_ref[...], preferred_element_type=jnp.float32) + bpw_ref[...]
    if relu:
        out = jnp.maximum(out, 0.0)
    for i in range(n_res):
        r = res_refs[i][0].reshape(H * W, C)
        out = out + r
        if last_twice and i == n_res - 1:
            out = out + r
    o_ref[...] = out.reshape(1, H, W, C)


# ------------------------------ kernel wrappers -------------------------------

def conv3x3_relu(x, w9, b):
    B, H, W, Cin = x.shape
    Cout = w9.shape[-1]
    xp = jnp.pad(x, ((0, 0), (1, 1), (1, 1), (0, 0)))
    b2 = b.reshape(1, Cout)
    return pl.pallas_call(
        functools.partial(_conv3x3_relu_kernel, H=H, W=W, Cin=Cin, Cout=Cout),
        out_shape=jax.ShapeDtypeStruct((B, H, W, Cout), jnp.float32),
        grid=(B,),
        in_specs=[_img_spec(xp.shape), _full_spec(w9.shape), _full_spec(b2.shape)],
        out_specs=_img_spec((B, H, W, Cout)),
        compiler_params=_CPARAMS,
    )(xp, w9, b2)


def pixel_unshuffle(x, r):
    """NHWC pixel-unshuffle with PyTorch channel ordering c*r*r + i*r + j."""
    B, H, W, C = x.shape
    h, w = H // r, W // r
    y = x.reshape(B, h, r, w, r, C)
    y = jnp.transpose(y, (0, 1, 3, 5, 2, 4))
    return y.reshape(B, h, w, C * r * r)


def pud_head(x, p, r=2):
    """PixelUnshuffle(r) -> MaxPool(r) -> grouped Conv3x3 (groups=C), fused."""
    B, H, W, C = x.shape
    z = pixel_unshuffle(x, r)                                 # (B, H/2, W/2, C*r*r)
    h, w, Cg = H // (2 * r), W // (2 * r), C * r * r
    pads = ((0, 0), (1, 1), (1, 1), (0, 0))
    # The 4 pooling candidates, zero-padded for the 3x3 conv (max(0,0,0,0)=0,
    # identical to zero-padding the pooled tensor).  Pure data movement.
    cands = [jnp.pad(z[:, i::2, j::2, :], pads) for i in (0, 1) for j in (0, 1)]
    b2 = p['gb'].reshape(1, C)
    return pl.pallas_call(
        functools.partial(_pud_head_kernel, h=h, w=w, Cg=Cg, Cout=C),
        out_shape=jax.ShapeDtypeStruct((B, h, w, C), jnp.float32),
        grid=(B,),
        in_specs=[_img_spec(c.shape) for c in cands]
        + [_full_spec(p['gw9'].shape), _full_spec(p['gsum'].shape),
           _full_spec(b2.shape)],
        out_specs=_img_spec((B, h, w, C)),
        compiler_params=_CPARAMS,
    )(*cands, p['gw9'], p['gsum'], b2)


def pud_tail(g, base, U, wpw, bpw, relu=False, extra_res=None):
    """Upsample(4x, bilinear) + add(base) + pointwise 1x1 conv (+ReLU) (+res)."""
    B, h, w, C = g.shape
    _, H, W, _ = base.shape
    bpw2 = bpw.reshape(1, C)
    has_res = extra_res is not None
    in_specs = [_img_spec(g.shape), _img_spec(base.shape), _full_spec(U.shape),
                _full_spec(wpw.shape), _full_spec(bpw2.shape)]
    args = [g, base, U, wpw, bpw2]
    if has_res:
        in_specs.append(_img_spec(extra_res.shape))
        args.append(extra_res)
    return pl.pallas_call(
        functools.partial(_pud_tail_kernel, relu=relu, has_res=has_res,
                          h=h, w=w, H=H, W=W, C=C),
        out_shape=jax.ShapeDtypeStruct((B, H, W, C), jnp.float32),
        grid=(B,),
        in_specs=in_specs,
        out_specs=_img_spec((B, H, W, C)),
        compiler_params=_CPARAMS,
    )(*args)


def dsc_step(x, wdw, bdw, wpw, bpw, relu, res_list=(), last_twice=False):
    """One SelfResidualDSCResBlock step: pw(add(x, dw(x))) (+ReLU) (+residuals)."""
    B, H, W, C = x.shape
    xp = jnp.pad(x, ((0, 0), (1, 1), (1, 1), (0, 0)))
    bdw2 = bdw.reshape(1, C)
    bpw2 = bpw.reshape(1, C)
    in_specs = [_img_spec(xp.shape), _full_spec(wdw.shape), _full_spec(bdw2.shape),
                _full_spec(wpw.shape), _full_spec(bpw2.shape)]
    args = [xp, wdw, bdw2, wpw, bpw2]
    for r in res_list:
        in_specs.append(_img_spec(r.shape))
        args.append(r)
    return pl.pallas_call(
        functools.partial(_dsc_kernel, relu=relu, n_res=len(res_list),
                          last_twice=last_twice, H=H, W=W, C=C),
        out_shape=jax.ShapeDtypeStruct((B, H, W, C), jnp.float32),
        grid=(B,),
        in_specs=in_specs,
        out_specs=_img_spec((B, H, W, C)),
        compiler_params=_CPARAMS,
    )(*args)


# ----------------------------- parameter construction -------------------------

def _interp_matrix(in_size, out_size):
    """1-D bilinear (align_corners=False) interpolation matrix (out, in)."""
    m = np.zeros((out_size, in_size), dtype=np.float32)
    scale = in_size / out_size
    for i in range(out_size):
        src = max((i + 0.5) * scale - 0.5, 0.0)
        i0 = min(int(np.floor(src)), in_size - 1)
        i1 = min(i0 + 1, in_size - 1)
        frac = src - i0
        m[i, i0] += 1.0 - frac
        m[i, i1] += frac
    return m


def init_params(C, H, W, rng, r=2):
    r2 = r * r
    Cg = C * r2

    def conv_w(cout, cin_g, k):
        fan = cin_g * k * k
        return rng.standard_normal((cout, cin_g, k, k)).astype(np.float32) / np.sqrt(fan)

    def bias(cout):
        return jnp.asarray(rng.standard_normal((cout,)).astype(np.float32) * 0.01)

    def std_w9(wt):                       # (Cout, Cin, 3, 3) -> (9, Cin, Cout)
        cout, cin = wt.shape[:2]
        return jnp.asarray(np.transpose(wt, (2, 3, 1, 0)).reshape(9, cin, cout))

    def grouped_w9(wt):                   # (C, r2, 3, 3) -> (9, C*r2) tap vectors
        cout, ipg = wt.shape[:2]
        return jnp.asarray(np.transpose(wt, (2, 3, 0, 1)).reshape(9, cout * ipg))

    def depthwise_w9(wt):                 # (C, 1, 3, 3) -> (9, C)
        return jnp.asarray(np.transpose(wt[:, 0], (1, 2, 0)).reshape(9, -1))

    def pw_mat(wt):                       # (Cout, Cin, 1, 1) -> (Cin, Cout)
        return jnp.asarray(np.transpose(wt[:, :, 0, 0], (1, 0)))

    gsum = np.zeros((Cg, C), np.float32)  # 0/1 group-sum matrix for grouped conv
    for c in range(C):
        gsum[c * r2:(c + 1) * r2, c] = 1.0
    gsum = jnp.asarray(gsum)

    def make_pud():
        return {'gw9': grouped_w9(conv_w(C, r2, 3)), 'gb': bias(C), 'gsum': gsum,
                'pw': pw_mat(conv_w(C, C, 1)), 'pb': bias(C)}

    # combined bilinear 4x upsample matrix: (H*W, h*w) = kron(Uh, Uw)
    h, w = H // (2 * r), W // (2 * r)
    U = jnp.asarray(np.kron(_interp_matrix(h, H), _interp_matrix(w, W)))

    return {
        'c0_w': std_w9(conv_w(C, C, 3)), 'c0_b': bias(C),
        'pud': make_pud(), 'pub_pud': make_pud(),
        'U': U,
        'srb': {
            'dw': [depthwise_w9(conv_w(C, 1, 3)) for _ in range(2)],
            'db': [bias(C) for _ in range(2)],
            'pw': [pw_mat(conv_w(C, C, 1)) for _ in range(2)],
            'pb': [bias(C) for _ in range(2)],
        },
    }


# --------------------------------- forward ------------------------------------

def hybrid_forward(x, params):
    """HybridPixelUnshuffledBlock.forward, x in NHWC."""
    # pud branch: Conv3x3 -> ReLU -> PUD; outer residual (+x) fused into tail.
    t = conv3x3_relu(x, params['c0_w'], params['c0_b'])
    g = pud_head(t, params['pud'])
    x1 = pud_tail(g, t, params['U'], params['pud']['pw'], params['pud']['pb'],
                  relu=False, extra_res=x)
    # pub branch: PixelUnshuffledBlock = (PUD -> ReLU -> SRB) + x1, then + x1.
    g2 = pud_head(x1, params['pub_pud'])
    u = pud_tail(g2, x1, params['U'], params['pub_pud']['pw'],
                 params['pub_pud']['pb'], relu=True)
    srb = params['srb']
    v = dsc_step(u, srb['dw'][0], srb['db'][0], srb['pw'][0], srb['pb'][0],
                 relu=True)
    # Second DSC step with the SRB residual (u) and the two block residuals
    # (x1, added twice) fused into the epilogue — same op order as the reference.
    out = dsc_step(v, srb['dw'][1], srb['db'][1], srb['pw'][1], srb['pb'][1],
                   relu=False, res_list=(u, x1), last_twice=True)
    return out


# ----------------------------------- main --------------------------------------

if __name__ == "__main__":
    B, C, H, W = 2, 4, 16, 16

    key = jax.random.PRNGKey(0)
    x_nchw = jax.random.normal(key, (B, C, H, W), dtype=jnp.float32)
    x = jnp.transpose(x_nchw, (0, 2, 3, 1))          # NCHW -> NHWC

    params = init_params(C, H, W, np.random.default_rng(0))

    out = jax.jit(hybrid_forward)(x, params)
    out = jax.block_until_ready(out)
    assert out.shape == (B, H, W, C) and out.dtype == jnp.float32

    print("KERNEL_OK")
</pallas_src>

<mosaic_0001>
module attributes {stable_mosaic.version = 11 : i64} {
  func.func @_conv3x3_relu_kernel(%arg0: i32, %arg1: memref<1x18x18x4xf32, #tpu.memory_space<vmem>>, %arg2: memref<9x4x4xf32, #tpu.memory_space<vmem>>, %arg3: memref<1x4xf32, #tpu.memory_space<vmem>>, %arg4: memref<1x16x16x4xf32, #tpu.memory_space<vmem>>) attributes {dimension_semantics = [#tpu.dimension_semantics<parallel>], iteration_bounds = array<i64: 2>, scalar_prefetch = 0 : i64, scratch_operands = 0 : i64, tpu.core_type = #tpu.core_type<tc>, window_params = [{transform_indices = @transform_0, window_bounds = array<i64: 1, 18, 18, 4>}, {pipeline_mode = #tpu.pipeline_mode<synchronous>, transform_indices = @transform_1, window_bounds = array<i64: 9, 4, 4>}, {pipeline_mode = #tpu.pipeline_mode<synchronous>, transform_indices = @transform_2, window_bounds = array<i64: 1, 4>}, {transform_indices = @transform_3, window_bounds = array<i64: 1, 16, 16, 4>}]} {
    %c0 = arith.constant 0 : index
    %c0_0 = arith.constant 0 : index
    %c0_1 = arith.constant 0 : index
    %c0_2 = arith.constant 0 : index
    %0 = vector.load %arg1[%c0, %c0_0, %c0_1, %c0_2] : memref<1x18x18x4xf32, #tpu.memory_space<vmem>>, vector<1x18x18x4xf32>
    %1 = vector.shape_cast %0 : vector<1x18x18x4xf32> to vector<18x18x4xf32>
    %c0_3 = arith.constant 0 : index
    %c0_4 = arith.constant 0 : index
    %c0_5 = arith.constant 0 : index
    %2 = vector.load %arg2[%c0_3, %c0_4, %c0_5] : memref<9x4x4xf32, #tpu.memory_space<vmem>>, vector<9x4x4xf32>
    %cst = arith.constant 0.000000e+00 : f32
    %3 = vector.broadcast %cst : f32 to vector<256x4xf32>
    %4 = vector.extract_strided_slice %1 {offsets = [0, 0, 0], sizes = [16, 16, 4], strides = [1, 1, 1]} : vector<18x18x4xf32> to vector<16x16x4xf32>
    %5 = vector.shape_cast %4 : vector<16x16x4xf32> to vector<256x4xf32>
    %6 = vector.extract_strided_slice %2 {offsets = [0, 0, 0], sizes = [1, 4, 4], strides = [1, 1, 1]} : vector<9x4x4xf32> to vector<1x4x4xf32>
    %7 = vector.shape_cast %6 : vector<1x4x4xf32> to vector<4x4xf32>
    %cst_6 = arith.constant dense<0.000000e+00> : vector<256x4xf32>
    %8 = tpu.matmul %5, %7, %cst_6 {dimension_numbers = #tpu.dot_dimension_numbers<[1], [0], [0], [1], [0, 0, 1, 1], [], []>} : vector<256x4xf32>, vector<4x4xf32>, vector<256x4xf32> -> vector<256x4xf32>
    %9 = arith.addf %3, %8 : vector<256x4xf32>
    %10 = vector.extract_strided_slice %1 {offsets = [0, 1, 0], sizes = [16, 16, 4], strides = [1, 1, 1]} : vector<18x18x4xf32> to vector<16x16x4xf32>
    %11 = vector.shape_cast %10 : vector<16x16x4xf32> to vector<256x4xf32>
    %12 = vector.extract_strided_slice %2 {offsets = [1, 0, 0], sizes = [1, 4, 4], strides = [1, 1, 1]} : vector<9x4x4xf32> to vector<1x4x4xf32>
    %13 = vector.shape_cast %12 : vector<1x4x4xf32> to vector<4x4xf32>
    %cst_7 = arith.constant dense<0.000000e+00> : vector<256x4xf32>
    %14 = tpu.matmul %11, %13, %cst_7 {dimension_numbers = #tpu.dot_dimension_numbers<[1], [0], [0], [1], [0, 0, 1, 1], [], []>} : vector<256x4xf32>, vector<4x4xf32>, vector<256x4xf32> -> vector<256x4xf32>
    %15 = arith.addf %9, %14 : vector<256x4xf32>
    %16 = vector.extract_strided_slice %1 {offsets = [0, 2, 0], sizes = [16, 16, 4], strides = [1, 1, 1]} : vector<18x18x4xf32> to vector<16x16x4xf32>
    %17 = vector.shape_cast %16 : vector<16x16x4xf32> to vector<256x4xf32>
    %18 = vector.extract_strided_slice %2 {offsets = [2, 0, 0], sizes = [1, 4, 4], strides = [1, 1, 1]} : vector<9x4x4xf32> to vector<1x4x4xf32>
    %19 = vector.shape_cast %18 : vector<1x4x4xf32> to vector<4x4xf32>
    %cst_8 = arith.constant dense<0.000000e+00> : vector<256x4xf32>
    %20 = tpu.matmul %17, %19, %cst_8 {dimension_numbers = #tpu.dot_dimension_numbers<[1], [0], [0], [1], [0, 0, 1, 1], [], []>} : vector<256x4xf32>, vector<4x4xf32>, vector<256x4xf32> -> vector<256x4xf32>
    %21 = arith.addf %15, %20 : vector<256x4xf32>
    %22 = vector.extract_strided_slice %1 {offsets = [1, 0, 0], sizes = [16, 16, 4], strides = [1, 1, 1]} : vector<18x18x4xf32> to vector<16x16x4xf32>
    %23 = vector.shape_cast %22 : vector<16x16x4xf32> to vector<256x4xf32>
    %24 = vector.extract_strided_slice %2 {offsets = [3, 0, 0], sizes = [1, 4, 4], strides = [1, 1, 1]} : vector<9x4x4xf32> to vector<1x4x4xf32>
    %25 = vector.shape_cast %24 : vector<1x4x4xf32> to vector<4x4xf32>
    %cst_9 = arith.constant dense<0.000000e+00> : vector<256x4xf32>
    %26 = tpu.matmul %23, %25, %cst_9 {dimension_numbers = #tpu.dot_dimension_numbers<[1], [0], [0], [1], [0, 0, 1, 1], [], []>} : vector<256x4xf32>, vector<4x4xf32>, vector<256x4xf32> -> vector<256x4xf32>
    %27 = arith.addf %21, %26 : vector<256x4xf32>
    %28 = vector.extract_strided_slice %1 {offsets = [1, 1, 0], sizes = [16, 16, 4], strides = [1, 1, 1]} : vector<18x18x4xf32> to vector<16x16x4xf32>
    %29 = vector.shape_cast %28 : vector<16x16x4xf32> to vector<256x4xf32>
    %30 = vector.extract_strided_slice %2 {offsets = [4, 0, 0], sizes = [1, 4, 4], strides = [1, 1, 1]} : vector<9x4x4xf32> to vector<1x4x4xf32>
    %31 = vector.shape_cast %30 : vector<1x4x4xf32> to vector<4x4xf32>
    %cst_10 = arith.constant dense<0.000000e+00> : vector<256x4xf32>
    %32 = tpu.matmul %29, %31, %cst_10 {dimension_numbers = #tpu.dot_dimension_numbers<[1], [0], [0], [1], [0, 0, 1, 1], [], []>} : vector<256x4xf32>, vector<4x4xf32>, vector<256x4xf32> -> vector<256x4xf32>
    %33 = arith.addf %27, %32 : vector<256x4xf32>
    %34 = vector.extract_strided_slice %1 {offsets = [1, 2, 0], sizes = [16, 16, 4], strides = [1, 1, 1]} : vector<18x18x4xf32> to vector<16x16x4xf32>
    %35 = vector.shape_cast %34 : vector<16x16x4xf32> to vector<256x4xf32>
    %36 = vector.extract_strided_slice %2 {offsets = [5, 0, 0], sizes = [1, 4, 4], strides = [1, 1, 1]} : vector<9x4x4xf32> to vector<1x4x4xf32>
    %37 = vector.shape_cast %36 : vector<1x4x4xf32> to vector<4x4xf32>
    %cst_11 = arith.constant dense<0.000000e+00> : vector<256x4xf32>
    %38 = tpu.matmul %35, %37, %cst_11 {dimension_numbers = #tpu.dot_dimension_numbers<[1], [0], [0], [1], [0, 0, 1, 1], [], []>} : vector<256x4xf32>, vector<4x4xf32>, vector<256x4xf32> -> vector<256x4xf32>
    %39 = arith.addf %33, %38 : vector<256x4xf32>
    %40 = vector.extract_strided_slice %1 {offsets = [2, 0, 0], sizes = [16, 16, 4], strides = [1, 1, 1]} : vector<18x18x4xf32> to vector<16x16x4xf32>
    %41 = vector.shape_cast %40 : vector<16x16x4xf32> to vector<256x4xf32>
    %42 = vector.extract_strided_slice %2 {offsets = [6, 0, 0], sizes = [1, 4, 4], strides = [1, 1, 1]} : vector<9x4x4xf32> to vector<1x4x4xf32>
    %43 = vector.shape_cast %42 : vector<1x4x4xf32> to vector<4x4xf32>
    %cst_12 = arith.constant dense<0.000000e+00> : vector<256x4xf32>
    %44 = tpu.matmul %41, %43, %cst_12 {dimension_numbers = #tpu.dot_dimension_numbers<[1], [0], [0], [1], [0, 0, 1, 1], [], []>} : vector<256x4xf32>, vector<4x4xf32>, vector<256x4xf32> -> vector<256x4xf32>
    %45 = arith.addf %39, %44 : vector<256x4xf32>
    %46 = vector.extract_strided_slice %1 {offsets = [2, 1, 0], sizes = [16, 16, 4], strides = [1, 1, 1]} : vector<18x18x4xf32> to vector<16x16x4xf32>
    %47 = vector.shape_cast %46 : vector<16x16x4xf32> to vector<256x4xf32>
    %48 = vector.extract_strided_slice %2 {offsets = [7, 0, 0], sizes = [1, 4, 4], strides = [1, 1, 1]} : vector<9x4x4xf32> to vector<1x4x4xf32>
    %49 = vector.shape_cast %48 : vector<1x4x4xf32> to vector<4x4xf32>
    %cst_13 = arith.constant dense<0.000000e+00> : vector<256x4xf32>
    %50 = tpu.matmul %47, %49, %cst_13 {dimension_numbers = #tpu.dot_dimension_numbers<[1], [0], [0], [1], [0, 0, 1, 1], [], []>} : vector<256x4xf32>, vector<4x4xf32>, vector<256x4xf32> -> vector<256x4xf32>
    %51 = arith.addf %45, %50 : vector<256x4xf32>
    %52 = vector.extract_strided_slice %1 {offsets = [2, 2, 0], sizes = [16, 16, 4], strides = [1, 1, 1]} : vector<18x18x4xf32> to vector<16x16x4xf32>
    %53 = vector.shape_cast %52 : vector<16x16x4xf32> to vector<256x4xf32>
    %54 = vector.extract_strided_slice %2 {offsets = [8, 0, 0], sizes = [1, 4, 4], strides = [1, 1, 1]} : vector<9x4x4xf32> to vector<1x4x4xf32>
    %55 = vector.shape_cast %54 : vector<1x4x4xf32> to vector<4x4xf32>
    %cst_14 = arith.constant dense<0.000000e+00> : vector<256x4xf32>
    %56 = tpu.matmul %53, %55, %cst_14 {dimension_numbers = #tpu.dot_dimension_numbers<[1], [0], [0], [1], [0, 0, 1, 1], [], []>} : vector<256x4xf32>, vector<4x4xf32>, vector<256x4xf32> -> vector<256x4xf32>
    %57 = arith.addf %51, %56 : vector<256x4xf32>
    %c0_15 = arith.constant 0 : index
    %c0_16 = arith.constant 0 : index
    %58 = vector.load %arg3[%c0_15, %c0_16] : memref<1x4xf32, #tpu.memory_space<vmem>>, vector<1x4xf32>
    %59 = vector.broadcast %58 : vector<1x4xf32> to vector<256x4xf32>
    %60 = arith.addf %57, %59 : vector<256x4xf32>
    %cst_17 = arith.constant 0.000000e+00 : f32
    %61 = vector.broadcast %cst_17 : f32 to vector<256x4xf32>
    %62 = arith.maximumf %60, %61 : vector<256x4xf32>
    %63 = vector.shape_cast %62 : vector<256x4xf32> to vector<1x16x16x4xf32>
    %c0_18 = arith.constant 0 : index
    %c0_19 = arith.constant 0 : index
    %c0_20 = arith.constant 0 : index
    %c0_21 = arith.constant 0 : index
    %64 = vector.load %arg4[%c0_18, %c0_19, %c0_20, %c0_21] : memref<1x16x16x4xf32, #tpu.memory_space<vmem>>, vector<1x16x16x4xf32>
    tpu.vector_store %arg4[%c0_18, %c0_19, %c0_20, %c0_21], %63 {strides = array<i32>} : memref<1x16x16x4xf32, #tpu.memory_space<vmem>>, vector<1x16x16x4xf32>,
    return
  }
  func.func @transform_0(%arg0: i32) -> (i32, i32, i32, i32) {
    %c0_i32 = arith.constant 0 : i32
    %c0_i32_0 = arith.constant 0 : i32
    %c0_i32_1 = arith.constant 0 : i32
    %c0_i32_2 = arith.constant 0 : i32
    return %arg0, %c0_i32, %c0_i32_0, %c0_i32_1 : i32, i32, i32, i32
  }
  func.func @transform_1(%arg0: i32) -> (i32, i32, i32) {
    %c0_i32 = arith.constant 0 : i32
    %c0_i32_0 = arith.constant 0 : i32
    %c0_i32_1 = arith.constant 0 : i32
    %c0_i32_2 = arith.constant 0 : i32
    return %c0_i32, %c0_i32_0, %c0_i32_1 : i32, i32, i32
  }
  func.func @transform_2(%arg0: i32) -> (i32, i32) {
    %c0_i32 = arith.constant 0 : i32
    %c0_i32_0 = arith.constant 0 : i32
    %c0_i32_1 = arith.constant 0 : i32
    return %c0_i32, %c0_i32_0 : i32, i32
  }
  func.func @transform_3(%arg0: i32) -> (i32, i32, i32, i32) {
    %c0_i32 = arith.constant 0 : i32
    %c0_i32_0 = arith.constant 0 : i32
    %c0_i32_1 = arith.constant 0 : i32
    %c0_i32_2 = arith.constant 0 : i32
    return %arg0, %c0_i32, %c0_i32_0, %c0_i32_1 : i32, i32, i32, i32
  }
}

module attributes {stable_mosaic.version = 11 : i64} {
  func.func @_pud_head_kernel(%arg0: i32, %arg1: memref<1x6x6x16xf32, #tpu.memory_space<vmem>>, %arg2: memref<1x6x6x16xf32, #tpu.memory_space<vmem>>, %arg3: memref<1x6x6x16xf32, #tpu.memory_space<vmem>>, %arg4: memref<1x6x6x16xf32, #tpu.memory_space<vmem>>, %arg5: memref<9x16xf32, #tpu.memory_space<vmem>>, %arg6: memref<16x4xf32, #tpu.memory_space<vmem>>, %arg7: memref<1x4xf32, #tpu.memory_space<vmem>>, %arg8: memref<1x4x4x4xf32, #tpu.memory_space<vmem>>) attributes {dimension_semantics = [#tpu.dimension_semantics<parallel>], iteration_bounds = array<i64: 2>, scalar_prefetch = 0 : i64, scratch_operands = 0 : i64, tpu.core_type = #tpu.core_type<tc>, window_params = [{transform_indices = @transform_0, window_bounds = array<i64: 1, 6, 6, 16>}, {transform_indices = @transform_1, window_bounds = array<i64: 1, 6, 6, 16>}, {transform_indices = @transform_2, window_bounds = array<i64: 1, 6, 6, 16>}, {transform_indices = @transform_3, window_bounds = array<i64: 1, 6, 6, 16>}, {pipeline_mode = #tpu.pipeline_mode<synchronous>, transform_indices = @transform_4, window_bounds = array<i64: 9, 16>}, {pipeline_mode = #tpu.pipeline_mode<synchronous>, transform_indices = @transform_5, window_bounds = array<i64: 16, 4>}, {pipeline_mode = #tpu.pipeline_mode<synchronous>, transform_indices = @transform_6, window_bounds = array<i64: 1, 4>}, {transform_indices = @transform_7, window_bounds = array<i64: 1, 4, 4, 4>}]} {
    %c0 = arith.constant 0 : index
    %c0_0 = arith.constant 0 : index
    %c0_1 = arith.constant 0 : index
    %c0_2 = arith.constant 0 : index
    %0 = vector.load %arg1[%c0, %c0_0, %c0_1, %c0_2] : memref<1x6x6x16xf32, #tpu.memory_space<vmem>>, vector<1x6x6x16xf32>
    %1 = vector.shape_cast %0 : vector<1x6x6x16xf32> to vector<6x6x16xf32>
    %c0_3 = arith.constant 0 : index
    %c0_4 = arith.constant 0 : index
    %c0_5 = arith.constant 0 : index
    %c0_6 = arith.constant 0 : index
    %2 = vector.load %arg2[%c0_3, %c0_4, %c0_5, %c0_6] : memref<1x6x6x16xf32, #tpu.memory_space<vmem>>, vector<1x6x6x16xf32>
    %3 = vector.shape_cast %2 : vector<1x6x6x16xf32> to vector<6x6x16xf32>
    %4 = arith.maximumf %1, %3 : vector<6x6x16xf32>
    %c0_7 = arith.constant 0 : index
    %c0_8 = arith.constant 0 : index
    %c0_9 = arith.constant 0 : index
    %c0_10 = arith.constant 0 : index
    %5 = vector.load %arg3[%c0_7, %c0_8, %c0_9, %c0_10] : memref<1x6x6x16xf32, #tpu.memory_space<vmem>>, vector<1x6x6x16xf32>
    %6 = vector.shape_cast %5 : vector<1x6x6x16xf32> to vector<6x6x16xf32>
    %c0_11 = arith.constant 0 : index
    %c0_12 = arith.constant 0 : index
    %c0_13 = arith.constant 0 : index
    %c0_14 = arith.constant 0 : index
    %7 = vector.load %arg4[%c0_11, %c0_12, %c0_13, %c0_14] : memref<1x6x6x16xf32, #tpu.memory_space<vmem>>, vector<1x6x6x16xf32>
    %8 = vector.shape_cast %7 : vector<1x6x6x16xf32> to vector<6x6x16xf32>
    %9 = arith.maximumf %6, %8 : vector<6x6x16xf32>
    %10 = arith.maximumf %4, %9 : vector<6x6x16xf32>
    %c0_15 = arith.constant 0 : index
    %c0_16 = arith.constant 0 : index
    %11 = vector.load %arg5[%c0_15, %c0_16] : memref<9x16xf32, #tpu.memory_space<vmem>>, vector<9x16xf32>
    %cst = arith.constant 0.000000e+00 : f32
    %12 = vector.broadcast %cst : f32 to vector<4x4x16xf32>
    %13 = vector.extract_strided_slice %10 {offsets = [0, 0, 0], sizes = [4, 4, 16], strides = [1, 1, 1]} : vector<6x6x16xf32> to vector<4x4x16xf32>
    %14 = vector.extract_strided_slice %11 {offsets = [0, 0], sizes = [1, 16], strides = [1, 1]} : vector<9x16xf32> to vector<1x16xf32>
    %15 = vector.shape_cast %14 : vector<1x16xf32> to vector<16xf32>
    %16 = vector.shape_cast %15 : vector<16xf32> to vector<1x1x16xf32>
    %17 = vector.broadcast %16 : vector<1x1x16xf32> to vector<4x4x16xf32>
    %18 = arith.mulf %13, %17 : vector<4x4x16xf32>
    %19 = arith.addf %12, %18 : vector<4x4x16xf32>
    %20 = vector.extract_strided_slice %10 {offsets = [0, 1, 0], sizes = [4, 4, 16], strides = [1, 1, 1]} : vector<6x6x16xf32> to vector<4x4x16xf32>
    %21 = vector.extract_strided_slice %11 {offsets = [1, 0], sizes = [1, 16], strides = [1, 1]} : vector<9x16xf32> to vector<1x16xf32>
    %22 = vector.shape_cast %21 : vector<1x16xf32> to vector<16xf32>
    %23 = vector.shape_cast %22 : vector<16xf32> to vector<1x1x16xf32>
    %24 = vector.broadcast %23 : vector<1x1x16xf32> to vector<4x4x16xf32>
    %25 = arith.mulf %20, %24 : vector<4x4x16xf32>
    %26 = arith.addf %19, %25 : vector<4x4x16xf32>
    %27 = vector.extract_strided_slice %10 {offsets = [0, 2, 0], sizes = [4, 4, 16], strides = [1, 1, 1]} : vector<6x6x16xf32> to vector<4x4x16xf32>
    %28 = vector.extract_strided_slice %11 {offsets = [2, 0], sizes = [1, 16], strides = [1, 1]} : vector<9x16xf32> to vector<1x16xf32>
    %29 = vector.shape_cast %28 : vector<1x16xf32> to vector<16xf32>
    %30 = vector.shape_cast %29 : vector<16xf32> to vector<1x1x16xf32>
    %31 = vector.broadcast %30 : vector<1x1x16xf32> to vector<4x4x16xf32>
    %32 = arith.mulf %27, %31 : vector<4x4x16xf32>
    %33 = arith.addf %26, %32 : vector<4x4x16xf32>
    %34 = vector.extract_strided_slice %10 {offsets = [1, 0, 0], sizes = [4, 4, 16], strides = [1, 1, 1]} : vector<6x6x16xf32> to vector<4x4x16xf32>
    %35 = vector.extract_strided_slice %11 {offsets = [3, 0], sizes = [1, 16], strides = [1, 1]} : vector<9x16xf32> to vector<1x16xf32>
    %36 = vector.shape_cast %35 : vector<1x16xf32> to vector<16xf32>
    %37 = vector.shape_cast %36 : vector<16xf32> to vector<1x1x16xf32>
    %38 = vector.broadcast %37 : vector<1x1x16xf32> to vector<4x4x16xf32>
    %39 = arith.mulf %34, %38 : vector<4x4x16xf32>
    %40 = arith.addf %33, %39 : vector<4x4x16xf32>
    %41 = vector.extract_strided_slice %10 {offsets = [1, 1, 0], sizes = [4, 4, 16], strides = [1, 1, 1]} : vector<6x6x16xf32> to vector<4x4x16xf32>
    %42 = vector.extract_strided_slice %11 {offsets = [4, 0], sizes = [1, 16], strides = [1, 1]} : vector<9x16xf32> to vector<1x16xf32>
    %43 = vector.shape_cast %42 : vector<1x16xf32> to vector<16xf32>
    %44 = vector.shape_cast %43 : vector<16xf32> to vector<1x1x16xf32>
    %45 = vector.broadcast %44 : vector<1x1x16xf32> to vector<4x4x16xf32>
    %46 = arith.mulf %41, %45 : vector<4x4x16xf32>
    %47 = arith.addf %40, %46 : vector<4x4x16xf32>
    %48 = vector.extract_strided_slice %10 {offsets = [1, 2, 0], sizes = [4, 4, 16], strides = [1, 1, 1]} : vector<6x6x16xf32> to vector<4x4x16xf32>
    %49 = vector.extract_strided_slice %11 {offsets = [5, 0], sizes = [1, 16], strides = [1, 1]} : vector<9x16xf32> to vector<1x16xf32>
    %50 = vector.shape_cast %49 : vector<1x16xf32> to vector<16xf32>
    %51 = vector.shape_cast %50 : vector<16xf32> to vector<1x1x16xf32>
    %52 = vector.broadcast %51 : vector<1x1x16xf32> to vector<4x4x16xf32>
    %53 = arith.mulf %48, %52 : vector<4x4x16xf32>
    %54 = arith.addf %47, %53 : vector<4x4x16xf32>
    %55 = vector.extract_strided_slice %10 {offsets = [2, 0, 0], sizes = [4, 4, 16], strides = [1, 1, 1]} : vector<6x6x16xf32> to vector<4x4x16xf32>
    %56 = vector.extract_strided_slice %11 {offsets = [6, 0], sizes = [1, 16], strides = [1, 1]} : vector<9x16xf32> to vector<1x16xf32>
    %57 = vector.shape_cast %56 : vector<1x16xf32> to vector<16xf32>
    %58 = vector.shape_cast %57 : vector<16xf32> to vector<1x1x16xf32>
    %59 = vector.broadcast %58 : vector<1x1x16xf32> to vector<4x4x16xf32>
    %60 = arith.mulf %55, %59 : vector<4x4x16xf32>
    %61 = arith.addf %54, %60 : vector<4x4x16xf32>
    %62 = vector.extract_strided_slice %10 {offsets = [2, 1, 0], sizes = [4, 4, 16], strides = [1, 1, 1]} : vector<6x6x16xf32> to vector<4x4x16xf32>
    %63 = vector.extract_strided_slice %11 {offsets = [7, 0], sizes = [1, 16], strides = [1, 1]} : vector<9x16xf32> to vector<1x16xf32>
    %64 = vector.shape_cast %63 : vector<1x16xf32> to vector<16xf32>
    %65 = vector.shape_cast %64 : vector<16xf32> to vector<1x1x16xf32>
    %66 = vector.broadcast %65 : vector<1x1x16xf32> to vector<4x4x16xf32>
    %67 = arith.mulf %62, %66 : vector<4x4x16xf32>
    %68 = arith.addf %61, %67 : vector<4x4x16xf32>
    %69 = vector.extract_strided_slice %10 {offsets = [2, 2, 0], sizes = [4, 4, 16], strides = [1, 1, 1]} : vector<6x6x16xf32> to vector<4x4x16xf32>
    %70 = vector.extract_strided_slice %11 {offsets = [8, 0], sizes = [1, 16], strides = [1, 1]} : vector<9x16xf32> to vector<1x16xf32>
    %71 = vector.shape_cast %70 : vector<1x16xf32> to vector<16xf32>
    %72 = vector.shape_cast %71 : vector<16xf32> to vector<1x1x16xf32>
    %73 = vector.broadcast %72 : vector<1x1x16xf32> to vector<4x4x16xf32>
    %74 = arith.mulf %69, %73 : vector<4x4x16xf32>
    %75 = arith.addf %68, %74 : vector<4x4x16xf32>
    %76 = vector.shape_cast %75 : vector<4x4x16xf32> to vector<16x16xf32>
    %c0_17 = arith.constant 0 : index
    %c0_18 = arith.constant 0 : index
    %77 = vector.load %arg6[%c0_17, %c0_18] : memref<16x4xf32, #tpu.memory_space<vmem>>, vector<16x4xf32>
    %cst_19 = arith.constant dense<0.000000e+00> : vector<16x4xf32>
    %78 = tpu.matmul %76, %77, %cst_19 {dimension_numbers = #tpu.dot_dimension_numbers<[1], [0], [0], [1], [0, 0, 1, 1], [], []>} : vector<16x16xf32>, vector<16x4xf32>, vector<16x4xf32> -> vector<16x4xf32>
    %c0_20 = arith.constant 0 : index
    %c0_21 = arith.constant 0 : index
    %79 = vector.load %arg7[%c0_20, %c0_21] : memref<1x4xf32, #tpu.memory_space<vmem>>, vector<1x4xf32>
    %80 = vector.broadcast %79 : vector<1x4xf32> to vector<16x4xf32>
    %81 = arith.addf %78, %80 : vector<16x4xf32>
    %82 = vector.shape_cast %81 : vector<16x4xf32> to vector<1x4x4x4xf32>
    %c0_22 = arith.constant 0 : index
    %c0_23 = arith.constant 0 : index
    %c0_24 = arith.constant 0 : index
    %c0_25 = arith.constant 0 : index
    %83 = vector.load %arg8[%c0_22, %c0_23, %c0_24, %c0_25] : memref<1x4x4x4xf32, #tpu.memory_space<vmem>>, vector<1x4x4x4xf32>
    tpu.vector_store %arg8[%c0_22, %c0_23, %c0_24, %c0_25], %82 {strides = array<i32>} : memref<1x4x4x4xf32, #tpu.memory_space<vmem>>, vector<1x4x4x4xf32>,
    return
  }
  func.func @transform_0(%arg0: i32) -> (i32, i32, i32, i32) {
    %c0_i32 = arith.constant 0 : i32
    %c0_i32_0 = arith.constant 0 : i32
    %c0_i32_1 = arith.constant 0 : i32
    %c0_i32_2 = arith.constant 0 : i32
    return %arg0, %c0_i32, %c0_i32_0, %c0_i32_1 : i32, i32, i32, i32
  }
  func.func @transform_1(%arg0: i32) -> (i32, i32, i32, i32) {
    %c0_i32 = arith.constant 0 : i32
    %c0_i32_0 = arith.constant 0 : i32
    %c0_i32_1 = arith.constant 0 : i32
    %c0_i32_2 = arith.constant 0 : i32
    return %arg0, %c0_i32, %c0_i32_0, %c0_i32_1 : i32, i32, i32, i32
  }
  func.func @transform_2(%arg0: i32) -> (i32, i32, i32, i32) {
    %c0_i32 = arith.constant 0 : i32
    %c0_i32_0 = arith.constant 0 : i32
    %c0_i32_1 = arith.constant 0 : i32
    %c0_i32_2 = arith.constant 0 : i32
    return %arg0, %c0_i32, %c0_i32_0, %c0_i32_1 : i32, i32, i32, i32
  }
  func.func @transform_3(%arg0: i32) -> (i32, i32, i32, i32) {
    %c0_i32 = arith.constant 0 : i32
    %c0_i32_0 = arith.constant 0 : i32
    %c0_i32_1 = arith.constant 0 : i32
    %c0_i32_2 = arith.constant 0 : i32
    return %arg0, %c0_i32, %c0_i32_0, %c0_i32_1 : i32, i32, i32, i32
  }
  func.func @transform_4(%arg0: i32) -> (i32, i32) {
    %c0_i32 = arith.constant 0 : i32
    %c0_i32_0 = arith.constant 0 : i32
    %c0_i32_1 = arith.constant 0 : i32
    return %c0_i32, %c0_i32_0 : i32, i32
  }
  func.func @transform_5(%arg0: i32) -> (i32, i32) {
    %c0_i32 = arith.constant 0 : i32
    %c0_i32_0 = arith.constant 0 : i32
    %c0_i32_1 = arith.constant 0 : i32
    return %c0_i32, %c0_i32_0 : i32, i32
  }
  func.func @transform_6(%arg0: i32) -> (i32, i32) {
    %c0_i32 = arith.constant 0 : i32
    %c0_i32_0 = arith.constant 0 : i32
    %c0_i32_1 = arith.constant 0 : i32
    return %c0_i32, %c0_i32_0 : i32, i32
  }
  func.func @transform_7(%arg0: i32) -> (i32, i32, i32, i32) {
    %c0_i32 = arith.constant 0 : i32
    %c0_i32_0 = arith.constant 0 : i32
    %c0_i32_1 = arith.constant 0 : i32
    %c0_i32_2 = arith.constant 0 : i32
    return %arg0, %c0_i32, %c0_i32_0, %c0_i32_1 : i32, i32, i32, i32
  }
}

module attributes {stable_mosaic.version = 11 : i64} {
  func.func @_pud_tail_kernel(%arg0: i32, %arg1: memref<1x4x4x4xf32, #tpu.memory_space<vmem>>, %arg2: memref<1x16x16x4xf32, #tpu.memory_space<vmem>>, %arg3: memref<256x16xf32, #tpu.memory_space<vmem>>, %arg4: memref<4x4xf32, #tpu.memory_space<vmem>>, %arg5: memref<1x4xf32, #tpu.memory_space<vmem>>, %arg6: memref<1x16x16x4xf32, #tpu.memory_space<vmem>>, %arg7: memref<1x16x16x4xf32, #tpu.memory_space<vmem>>) attributes {dimension_semantics = [#tpu.dimension_semantics<parallel>], iteration_bounds = array<i64: 2>, scalar_prefetch = 0 : i64, scratch_operands = 0 : i64, tpu.core_type = #tpu.core_type<tc>, window_params = [{transform_indices = @transform_0, window_bounds = array<i64: 1, 4, 4, 4>}, {transform_indices = @transform_1, window_bounds = array<i64: 1, 16, 16, 4>}, {pipeline_mode = #tpu.pipeline_mode<synchronous>, transform_indices = @transform_2, window_bounds = array<i64: 256, 16>}, {pipeline_mode = #tpu.pipeline_mode<synchronous>, transform_indices = @transform_3, window_bounds = array<i64: 4, 4>}, {pipeline_mode = #tpu.pipeline_mode<synchronous>, transform_indices = @transform_4, window_bounds = array<i64: 1, 4>}, {transform_indices = @transform_5, window_bounds = array<i64: 1, 16, 16, 4>}, {transform_indices = @transform_6, window_bounds = array<i64: 1, 16, 16, 4>}]} {
    %c0 = arith.constant 0 : index
    %c0_0 = arith.constant 0 : index
    %c0_1 = arith.constant 0 : index
    %c0_2 = arith.constant 0 : index
    %0 = vector.load %arg1[%c0, %c0_0, %c0_1, %c0_2] : memref<1x4x4x4xf32, #tpu.memory_space<vmem>>, vector<1x4x4x4xf32>
    %1 = vector.shape_cast %0 : vector<1x4x4x4xf32> to vector<4x4x4xf32>
    %2 = vector.shape_cast %1 : vector<4x4x4xf32> to vector<16x4xf32>
    %c0_3 = arith.constant 0 : index
    %c0_4 = arith.constant 0 : index
    %3 = vector.load %arg3[%c0_3, %c0_4] : memref<256x16xf32, #tpu.memory_space<vmem>>, vector<256x16xf32>
    %cst = arith.constant dense<0.000000e+00> : vector<256x4xf32>
    %4 = tpu.matmul %3, %2, %cst {dimension_numbers = #tpu.dot_dimension_numbers<[1], [0], [0], [1], [0, 0, 1, 1], [], []>} : vector<256x16xf32>, vector<16x4xf32>, vector<256x4xf32> -> vector<256x4xf32>
    %c0_5 = arith.constant 0 : index
    %c0_6 = arith.constant 0 : index
    %c0_7 = arith.constant 0 : index
    %c0_8 = arith.constant 0 : index
    %5 = vector.load %arg2[%c0_5, %c0_6, %c0_7, %c0_8] : memref<1x16x16x4xf32, #tpu.memory_space<vmem>>, vector<1x16x16x4xf32>
    %6 = vector.shape_cast %5 : vector<1x16x16x4xf32> to vector<16x16x4xf32>
    %7 = vector.shape_cast %6 : vector<16x16x4xf32> to vector<256x4xf32>
    %8 = arith.addf %4, %7 : vector<256x4xf32>
    %c0_9 = arith.constant 0 : index
    %c0_10 = arith.constant 0 : index
    %9 = vector.load %arg4[%c0_9, %c0_10] : memref<4x4xf32, #tpu.memory_space<vmem>>, vector<4x4xf32>
    %cst_11 = arith.constant dense<0.000000e+00> : vector<256x4xf32>
    %10 = tpu.matmul %8, %9, %cst_11 {dimension_numbers = #tpu.dot_dimension_numbers<[1], [0], [0], [1], [0, 0, 1, 1], [], []>} : vector<256x4xf32>, vector<4x4xf32>, vector<256x4xf32> -> vector<256x4xf32>
    %c0_12 = arith.constant 0 : index
    %c0_13 = arith.constant 0 : index
    %11 = vector.load %arg5[%c0_12, %c0_13] : memref<1x4xf32, #tpu.memory_space<vmem>>, vector<1x4xf32>
    %12 = vector.broadcast %11 : vector<1x4xf32> to vector<256x4xf32>
    %13 = arith.addf %10, %12 : vector<256x4xf32>
    %c0_14 = arith.constant 0 : index
    %c0_15 = arith.constant 0 : index
    %c0_16 = arith.constant 0 : index
    %c0_17 = arith.constant 0 : index
    %14 = vector.load %arg6[%c0_14, %c0_15, %c0_16, %c0_17] : memref<1x16x16x4xf32, #tpu.memory_space<vmem>>, vector<1x16x16x4xf32>
    %15 = vector.shape_cast %14 : vector<1x16x16x4xf32> to vector<16x16x4xf32>
    %16 = vector.shape_cast %15 : vector<16x16x4xf32> to vector<256x4xf32>
    %17 = arith.addf %13, %16 : vector<256x4xf32>
    %18 = vector.shape_cast %17 : vector<256x4xf32> to vector<1x16x16x4xf32>
    %c0_18 = arith.constant 0 : index
    %c0_19 = arith.constant 0 : index
    %c0_20 = arith.constant 0 : index
    %c0_21 = arith.constant 0 : index
    %19 = vector.load %arg7[%c0_18, %c0_19, %c0_20, %c0_21] : memref<1x16x16x4xf32, #tpu.memory_space<vmem>>, vector<1x16x16x4xf32>
    tpu.vector_store %arg7[%c0_18, %c0_19, %c0_20, %c0_21], %18 {strides = array<i32>} : memref<1x16x16x4xf32, #tpu.memory_space<vmem>>, vector<1x16x16x4xf32>,
    return
  }
  func.func @transform_0(%arg0: i32) -> (i32, i32, i32, i32) {
    %c0_i32 = arith.constant 0 : i32
    %c0_i32_0 = arith.constant 0 : i32
    %c0_i32_1 = arith.constant 0 : i32
    %c0_i32_2 = arith.constant 0 : i32
    return %arg0, %c0_i32, %c0_i32_0, %c0_i32_1 : i32, i32, i32, i32
  }
  func.func @transform_1(%arg0: i32) -> (i32, i32, i32, i32) {
    %c0_i32 = arith.constant 0 : i32
    %c0_i32_0 = arith.constant 0 : i32
    %c0_i32_1 = arith.constant 0 : i32
    %c0_i32_2 = arith.constant 0 : i32
    return %arg0, %c0_i32, %c0_i32_0, %c0_i32_1 : i32, i32, i32, i32
  }
  func.func @transform_2(%arg0: i32) -> (i32, i32) {
    %c0_i32 = arith.constant 0 : i32
    %c0_i32_0 = arith.constant 0 : i32
    %c0_i32_1 = arith.constant 0 : i32
    return %c0_i32, %c0_i32_0 : i32, i32
  }
  func.func @transform_3(%arg0: i32) -> (i32, i32) {
    %c0_i32 = arith.constant 0 : i32
    %c0_i32_0 = arith.constant 0 : i32
    %c0_i32_1 = arith.constant 0 : i32
    return %c0_i32, %c0_i32_0 : i32, i32
  }
  func.func @transform_4(%arg0: i32) -> (i32, i32) {
    %c0_i32 = arith.constant 0 : i32
    %c0_i32_0 = arith.constant 0 : i32
    %c0_i32_1 = arith.constant 0 : i32
    return %c0_i32, %c0_i32_0 : i32, i32
  }
  func.func @transform_5(%arg0: i32) -> (i32, i32, i32, i32) {
    %c0_i32 = arith.constant 0 : i32
    %c0_i32_0 = arith.constant 0 : i32
    %c0_i32_1 = arith.constant 0 : i32
    %c0_i32_2 = arith.constant 0 : i32
    return %arg0, %c0_i32, %c0_i32_0, %c0_i32_1 : i32, i32, i32, i32
  }
  func.func @transform_6(%arg0: i32) -> (i32, i32, i32, i32) {
    %c0_i32 = arith.constant 0 : i32
    %c0_i32_0 = arith.constant 0 : i32
    %c0_i32_1 = arith.constant 0 : i32
    %c0_i32_2 = arith.constant 0 : i32
    return %arg0, %c0_i32, %c0_i32_0, %c0_i32_1 : i32, i32, i32, i32
  }
}

module attributes {stable_mosaic.version = 11 : i64} {
  func.func @_pud_tail_kernel(%arg0: i32, %arg1: memref<1x4x4x4xf32, #tpu.memory_space<vmem>>, %arg2: memref<1x16x16x4xf32, #tpu.memory_space<vmem>>, %arg3: memref<256x16xf32, #tpu.memory_space<vmem>>, %arg4: memref<4x4xf32, #tpu.memory_space<vmem>>, %arg5: memref<1x4xf32, #tpu.memory_space<vmem>>, %arg6: memref<1x16x16x4xf32, #tpu.memory_space<vmem>>) attributes {dimension_semantics = [#tpu.dimension_semantics<parallel>], iteration_bounds = array<i64: 2>, scalar_prefetch = 0 : i64, scratch_operands = 0 : i64, tpu.core_type = #tpu.core_type<tc>, window_params = [{transform_indices = @transform_0, window_bounds = array<i64: 1, 4, 4, 4>}, {transform_indices = @transform_1, window_bounds = array<i64: 1, 16, 16, 4>}, {pipeline_mode = #tpu.pipeline_mode<synchronous>, transform_indices = @transform_2, window_bounds = array<i64: 256, 16>}, {pipeline_mode = #tpu.pipeline_mode<synchronous>, transform_indices = @transform_3, window_bounds = array<i64: 4, 4>}, {pipeline_mode = #tpu.pipeline_mode<synchronous>, transform_indices = @transform_4, window_bounds = array<i64: 1, 4>}, {transform_indices = @transform_5, window_bounds = array<i64: 1, 16, 16, 4>}]} {
    %c0 = arith.constant 0 : index
    %c0_0 = arith.constant 0 : index
    %c0_1 = arith.constant 0 : index
    %c0_2 = arith.constant 0 : index
    %0 = vector.load %arg1[%c0, %c0_0, %c0_1, %c0_2] : memref<1x4x4x4xf32, #tpu.memory_space<vmem>>, vector<1x4x4x4xf32>
    %1 = vector.shape_cast %0 : vector<1x4x4x4xf32> to vector<4x4x4xf32>
    %2 = vector.shape_cast %1 : vector<4x4x4xf32> to vector<16x4xf32>
    %c0_3 = arith.constant 0 : index
    %c0_4 = arith.constant 0 : index
    %3 = vector.load %arg3[%c0_3, %c0_4] : memref<256x16xf32, #tpu.memory_space<vmem>>, vector<256x16xf32>
    %cst = arith.constant dense<0.000000e+00> : vector<256x4xf32>
    %4 = tpu.matmul %3, %2, %cst {dimension_numbers = #tpu.dot_dimension_numbers<[1], [0], [0], [1], [0, 0, 1, 1], [], []>} : vector<256x16xf32>, vector<16x4xf32>, vector<256x4xf32> -> vector<256x4xf32>
    %c0_5 = arith.constant 0 : index
    %c0_6 = arith.constant 0 : index
    %c0_7 = arith.constant 0 : index
    %c0_8 = arith.constant 0 : index
    %5 = vector.load %arg2[%c0_5, %c0_6, %c0_7, %c0_8] : memref<1x16x16x4xf32, #tpu.memory_space<vmem>>, vector<1x16x16x4xf32>
    %6 = vector.shape_cast %5 : vector<1x16x16x4xf32> to vector<16x16x4xf32>
    %7 = vector.shape_cast %6 : vector<16x16x4xf32> to vector<256x4xf32>
    %8 = arith.addf %4, %7 : vector<256x4xf32>
    %c0_9 = arith.constant 0 : index
    %c0_10 = arith.constant 0 : index
    %9 = vector.load %arg4[%c0_9, %c0_10] : memref<4x4xf32, #tpu.memory_space<vmem>>, vector<4x4xf32>
    %cst_11 = arith.constant dense<0.000000e+00> : vector<256x4xf32>
    %10 = tpu.matmul %8, %9, %cst_11 {dimension_numbers = #tpu.dot_dimension_numbers<[1], [0], [0], [1], [0, 0, 1, 1], [], []>} : vector<256x4xf32>, vector<4x4xf32>, vector<256x4xf32> -> vector<256x4xf32>
    %c0_12 = arith.constant 0 : index
    %c0_13 = arith.constant 0 : index
    %11 = vector.load %arg5[%c0_12, %c0_13] : memref<1x4xf32, #tpu.memory_space<vmem>>, vector<1x4xf32>
    %12 = vector.broadcast %11 : vector<1x4xf32> to vector<256x4xf32>
    %13 = arith.addf %10, %12 : vector<256x4xf32>
    %cst_14 = arith.constant 0.000000e+00 : f32
    %14 = vector.broadcast %cst_14 : f32 to vector<256x4xf32>
    %15 = arith.maximumf %13, %14 : vector<256x4xf32>
    %16 = vector.shape_cast %15 : vector<256x4xf32> to vector<1x16x16x4xf32>
    %c0_15 = arith.constant 0 : index
    %c0_16 = arith.constant 0 : index
    %c0_17 = arith.constant 0 : index
    %c0_18 = arith.constant 0 : index
    %17 = vector.load %arg6[%c0_15, %c0_16, %c0_17, %c0_18] : memref<1x16x16x4xf32, #tpu.memory_space<vmem>>, vector<1x16x16x4xf32>
    tpu.vector_store %arg6[%c0_15, %c0_16, %c0_17, %c0_18], %16 {strides = array<i32>} : memref<1x16x16x4xf32, #tpu.memory_space<vmem>>, vector<1x16x16x4xf32>,
    return
  }
  func.func @transform_0(%arg0: i32) -> (i32, i32, i32, i32) {
    %c0_i32 = arith.constant 0 : i32
    %c0_i32_0 = arith.constant 0 : i32
    %c0_i32_1 = arith.constant 0 : i32
    %c0_i32_2 = arith.constant 0 : i32
    return %arg0, %c0_i32, %c0_i32_0, %c0_i32_1 : i32, i32, i32, i32
  }
  func.func @transform_1(%arg0: i32) -> (i32, i32, i32, i32) {
    %c0_i32 = arith.constant 0 : i32
    %c0_i32_0 = arith.constant 0 : i32
    %c0_i32_1 = arith.constant 0 : i32
    %c0_i32_2 = arith.constant 0 : i32
    return %arg0, %c0_i32, %c0_i32_0, %c0_i32_1 : i32, i32, i32, i32
  }
  func.func @transform_2(%arg0: i32) -> (i32, i32) {
    %c0_i32 = arith.constant 0 : i32
    %c0_i32_0 = arith.constant 0 : i32
    %c0_i32_1 = arith.constant 0 : i32
    return %c0_i32, %c0_i32_0 : i32, i32
  }
  func.func @transform_3(%arg0: i32) -> (i32, i32) {
    %c0_i32 = arith.constant 0 : i32
    %c0_i32_0 = arith.constant 0 : i32
    %c0_i32_1 = arith.constant 0 : i32
    return %c0_i32, %c0_i32_0 : i32, i32
  }
  func.func @transform_4(%arg0: i32) -> (i32, i32) {
    %c0_i32 = arith.constant 0 : i32
    %c0_i32_0 = arith.constant 0 : i32
    %c0_i32_1 = arith.constant 0 : i32
    return %c0_i32, %c0_i32_0 : i32, i32
  }
  func.func @transform_5(%arg0: i32) -> (i32, i32, i32, i32) {
    %c0_i32 = arith.constant 0 : i32
    %c0_i32_0 = arith.constant 0 : i32
    %c0_i32_1 = arith.constant 0 : i32
    %c0_i32_2 = arith.constant 0 : i32
    return %arg0, %c0_i32, %c0_i32_0, %c0_i32_1 : i32, i32, i32, i32
  }
}

module attributes {stable_mosaic.version = 11 : i64} {
  func.func @_dsc_kernel(%arg0: i32, %arg1: memref<1x18x18x4xf32, #tpu.memory_space<vmem>>, %arg2: memref<9x4xf32, #tpu.memory_space<vmem>>, %arg3: memref<1x4xf32, #tpu.memory_space<vmem>>, %arg4: memref<4x4xf32, #tpu.memory_space<vmem>>, %arg5: memref<1x4xf32, #tpu.memory_space<vmem>>, %arg6: memref<1x16x16x4xf32, #tpu.memory_space<vmem>>, %arg7: memref<1x16x16x4xf32, #tpu.memory_space<vmem>>, %arg8: memref<1x16x16x4xf32, #tpu.memory_space<vmem>>) attributes {dimension_semantics = [#tpu.dimension_semantics<parallel>], iteration_bounds = array<i64: 2>, scalar_prefetch = 0 : i64, scratch_operands = 0 : i64, tpu.core_type = #tpu.core_type<tc>, window_params = [{transform_indices = @transform_0, window_bounds = array<i64: 1, 18, 18, 4>}, {pipeline_mode = #tpu.pipeline_mode<synchronous>, transform_indices = @transform_1, window_bounds = array<i64: 9, 4>}, {pipeline_mode = #tpu.pipeline_mode<synchronous>, transform_indices = @transform_2, window_bounds = array<i64: 1, 4>}, {pipeline_mode = #tpu.pipeline_mode<synchronous>, transform_indices = @transform_3, window_bounds = array<i64: 4, 4>}, {pipeline_mode = #tpu.pipeline_mode<synchronous>, transform_indices = @transform_4, window_bounds = array<i64: 1, 4>}, {transform_indices = @transform_5, window_bounds = array<i64: 1, 16, 16, 4>}, {transform_indices = @transform_6, window_bounds = array<i64: 1, 16, 16, 4>}, {transform_indices = @transform_7, window_bounds = array<i64: 1, 16, 16, 4>}]} {
    %c0 = arith.constant 0 : index
    %c0_0 = arith.constant 0 : index
    %c0_1 = arith.constant 0 : index
    %c0_2 = arith.constant 0 : index
    %0 = vector.load %arg1[%c0, %c0_0, %c0_1, %c0_2] : memref<1x18x18x4xf32, #tpu.memory_space<vmem>>, vector<1x18x18x4xf32>
    %1 = vector.shape_cast %0 : vector<1x18x18x4xf32> to vector<18x18x4xf32>
    %c0_3 = arith.constant 0 : index
    %c0_4 = arith.constant 0 : index
    %2 = vector.load %arg2[%c0_3, %c0_4] : memref<9x4xf32, #tpu.memory_space<vmem>>, vector<9x4xf32>
    %cst = arith.constant 0.000000e+00 : f32
    %3 = vector.broadcast %cst : f32 to vector<16x16x4xf32>
    %4 = vector.extract_strided_slice %1 {offsets = [0, 0, 0], sizes = [16, 16, 4], strides = [1, 1, 1]} : vector<18x18x4xf32> to vector<16x16x4xf32>
    %5 = vector.extract_strided_slice %2 {offsets = [0, 0], sizes = [1, 4], strides = [1, 1]} : vector<9x4xf32> to vector<1x4xf32>
    %6 = vector.shape_cast %5 : vector<1x4xf32> to vector<4xf32>
    %7 = vector.shape_cast %6 : vector<4xf32> to vector<1x1x4xf32>
    %8 = vector.broadcast %7 : vector<1x1x4xf32> to vector<16x16x4xf32>
    %9 = arith.mulf %4, %8 : vector<16x16x4xf32>
    %10 = arith.addf %3, %9 : vector<16x16x4xf32>
    %11 = vector.extract_strided_slice %1 {offsets = [0, 1, 0], sizes = [16, 16, 4], strides = [1, 1, 1]} : vector<18x18x4xf32> to vector<16x16x4xf32>
    %12 = vector.extract_strided_slice %2 {offsets = [1, 0], sizes = [1, 4], strides = [1, 1]} : vector<9x4xf32> to vector<1x4xf32>
    %13 = vector.shape_cast %12 : vector<1x4xf32> to vector<4xf32>
    %14 = vector.shape_cast %13 : vector<4xf32> to vector<1x1x4xf32>
    %15 = vector.broadcast %14 : vector<1x1x4xf32> to vector<16x16x4xf32>
    %16 = arith.mulf %11, %15 : vector<16x16x4xf32>
    %17 = arith.addf %10, %16 : vector<16x16x4xf32>
    %18 = vector.extract_strided_slice %1 {offsets = [0, 2, 0], sizes = [16, 16, 4], strides = [1, 1, 1]} : vector<18x18x4xf32> to vector<16x16x4xf32>
    %19 = vector.extract_strided_slice %2 {offsets = [2, 0], sizes = [1, 4], strides = [1, 1]} : vector<9x4xf32> to vector<1x4xf32>
    %20 = vector.shape_cast %19 : vector<1x4xf32> to vector<4xf32>
    %21 = vector.shape_cast %20 : vector<4xf32> to vector<1x1x4xf32>
    %22 = vector.broadcast %21 : vector<1x1x4xf32> to vector<16x16x4xf32>
    %23 = arith.mulf %18, %22 : vector<16x16x4xf32>
    %24 = arith.addf %17, %23 : vector<16x16x4xf32>
    %25 = vector.extract_strided_slice %1 {offsets = [1, 0, 0], sizes = [16, 16, 4], strides = [1, 1, 1]} : vector<18x18x4xf32> to vector<16x16x4xf32>
    %26 = vector.extract_strided_slice %2 {offsets = [3, 0], sizes = [1, 4], strides = [1, 1]} : vector<9x4xf32> to vector<1x4xf32>
    %27 = vector.shape_cast %26 : vector<1x4xf32> to vector<4xf32>
    %28 = vector.shape_cast %27 : vector<4xf32> to vector<1x1x4xf32>
    %29 = vector.broadcast %28 : vector<1x1x4xf32> to vector<16x16x4xf32>
    %30 = arith.mulf %25, %29 : vector<16x16x4xf32>
    %31 = arith.addf %24, %30 : vector<16x16x4xf32>
    %32 = vector.extract_strided_slice %1 {offsets = [1, 1, 0], sizes = [16, 16, 4], strides = [1, 1, 1]} : vector<18x18x4xf32> to vector<16x16x4xf32>
    %33 = vector.extract_strided_slice %2 {offsets = [4, 0], sizes = [1, 4], strides = [1, 1]} : vector<9x4xf32> to vector<1x4xf32>
    %34 = vector.shape_cast %33 : vector<1x4xf32> to vector<4xf32>
    %35 = vector.shape_cast %34 : vector<4xf32> to vector<1x1x4xf32>
    %36 = vector.broadcast %35 : vector<1x1x4xf32> to vector<16x16x4xf32>
    %37 = arith.mulf %32, %36 : vector<16x16x4xf32>
    %38 = arith.addf %31, %37 : vector<16x16x4xf32>
    %39 = vector.extract_strided_slice %1 {offsets = [1, 2, 0], sizes = [16, 16, 4], strides = [1, 1, 1]} : vector<18x18x4xf32> to vector<16x16x4xf32>
    %40 = vector.extract_strided_slice %2 {offsets = [5, 0], sizes = [1, 4], strides = [1, 1]} : vector<9x4xf32> to vector<1x4xf32>
    %41 = vector.shape_cast %40 : vector<1x4xf32> to vector<4xf32>
    %42 = vector.shape_cast %41 : vector<4xf32> to vector<1x1x4xf32>
    %43 = vector.broadcast %42 : vector<1x1x4xf32> to vector<16x16x4xf32>
    %44 = arith.mulf %39, %43 : vector<16x16x4xf32>
    %45 = arith.addf %38, %44 : vector<16x16x4xf32>
    %46 = vector.extract_strided_slice %1 {offsets = [2, 0, 0], sizes = [16, 16, 4], strides = [1, 1, 1]} : vector<18x18x4xf32> to vector<16x16x4xf32>
    %47 = vector.extract_strided_slice %2 {offsets = [6, 0], sizes = [1, 4], strides = [1, 1]} : vector<9x4xf32> to vector<1x4xf32>
    %48 = vector.shape_cast %47 : vector<1x4xf32> to vector<4xf32>
    %49 = vector.shape_cast %48 : vector<4xf32> to vector<1x1x4xf32>
    %50 = vector.broadcast %49 : vector<1x1x4xf32> to vector<16x16x4xf32>
    %51 = arith.mulf %46, %50 : vector<16x16x4xf32>
    %52 = arith.addf %45, %51 : vector<16x16x4xf32>
    %53 = vector.extract_strided_slice %1 {offsets = [2, 1, 0], sizes = [16, 16, 4], strides = [1, 1, 1]} : vector<18x18x4xf32> to vector<16x16x4xf32>
    %54 = vector.extract_strided_slice %2 {offsets = [7, 0], sizes = [1, 4], strides = [1, 1]} : vector<9x4xf32> to vector<1x4xf32>
    %55 = vector.shape_cast %54 : vector<1x4xf32> to vector<4xf32>
    %56 = vector.shape_cast %55 : vector<4xf32> to vector<1x1x4xf32>
    %57 = vector.broadcast %56 : vector<1x1x4xf32> to vector<16x16x4xf32>
    %58 = arith.mulf %53, %57 : vector<16x16x4xf32>
    %59 = arith.addf %52, %58 : vector<16x16x4xf32>
    %60 = vector.extract_strided_slice %1 {offsets = [2, 2, 0], sizes = [16, 16, 4], strides = [1, 1, 1]} : vector<18x18x4xf32> to vector<16x16x4xf32>
    %61 = vector.extract_strided_slice %2 {offsets = [8, 0], sizes = [1, 4], strides = [1, 1]} : vector<9x4xf32> to vector<1x4xf32>
    %62 = vector.shape_cast %61 : vector<1x4xf32> to vector<4xf32>
    %63 = vector.shape_cast %62 : vector<4xf32> to vector<1x1x4xf32>
    %64 = vector.broadcast %63 : vector<1x1x4xf32> to vector<16x16x4xf32>
    %65 = arith.mulf %60, %64 : vector<16x16x4xf32>
    %66 = arith.addf %59, %65 : vector<16x16x4xf32>
    %c0_5 = arith.constant 0 : index
    %c0_6 = arith.constant 0 : index
    %67 = vector.load %arg3[%c0_5, %c0_6] : memref<1x4xf32, #tpu.memory_space<vmem>>, vector<1x4xf32>
    %68 = vector.shape_cast %67 : vector<1x4xf32> to vector<1x1x4xf32>
    %69 = vector.broadcast %68 : vector<1x1x4xf32> to vector<16x16x4xf32>
    %70 = arith.addf %66, %69 : vector<16x16x4xf32>
    %71 = vector.extract_strided_slice %1 {offsets = [1, 1, 0], sizes = [16, 16, 4], strides = [1, 1, 1]} : vector<18x18x4xf32> to vector<16x16x4xf32>
    %72 = arith.addf %71, %70 : vector<16x16x4xf32>
    %73 = vector.shape_cast %72 : vector<16x16x4xf32> to vector<256x4xf32>
    %c0_7 = arith.constant 0 : index
    %c0_8 = arith.constant 0 : index
    %74 = vector.load %arg4[%c0_7, %c0_8] : memref<4x4xf32, #tpu.memory_space<vmem>>, vector<4x4xf32>
    %cst_9 = arith.constant dense<0.000000e+00> : vector<256x4xf32>
    %75 = tpu.matmul %73, %74, %cst_9 {dimension_numbers = #tpu.dot_dimension_numbers<[1], [0], [0], [1], [0, 0, 1, 1], [], []>} : vector<256x4xf32>, vector<4x4xf32>, vector<256x4xf32> -> vector<256x4xf32>
    %c0_10 = arith.constant 0 : index
    %c0_11 = arith.constant 0 : index
    %76 = vector.load %arg5[%c0_10, %c0_11] : memref<1x4xf32, #tpu.memory_space<vmem>>, vector<1x4xf32>
    %77 = vector.broadcast %76 : vector<1x4xf32> to vector<256x4xf32>
    %78 = arith.addf %75, %77 : vector<256x4xf32>
    %c0_12 = arith.constant 0 : index
    %c0_13 = arith.constant 0 : index
    %c0_14 = arith.constant 0 : index
    %c0_15 = arith.constant 0 : index
    %79 = vector.load %arg6[%c0_12, %c0_13, %c0_14, %c0_15] : memref<1x16x16x4xf32, #tpu.memory_space<vmem>>, vector<1x16x16x4xf32>
    %80 = vector.shape_cast %79 : vector<1x16x16x4xf32> to vector<16x16x4xf32>
    %81 = vector.shape_cast %80 : vector<16x16x4xf32> to vector<256x4xf32>
    %82 = arith.addf %78, %81 : vector<256x4xf32>
    %c0_16 = arith.constant 0 : index
    %c0_17 = arith.constant 0 : index
    %c0_18 = arith.constant 0 : index
    %c0_19 = arith.constant 0 : index
    %83 = vector.load %arg7[%c0_16, %c0_17, %c0_18, %c0_19] : memref<1x16x16x4xf32, #tpu.memory_space<vmem>>, vector<1x16x16x4xf32>
    %84 = vector.shape_cast %83 : vector<1x16x16x4xf32> to vector<16x16x4xf32>
    %85 = vector.shape_cast %84 : vector<16x16x4xf32> to vector<256x4xf32>
    %86 = arith.addf %82, %85 : vector<256x4xf32>
    %87 = arith.addf %86, %85 : vector<256x4xf32>
    %88 = vector.shape_cast %87 : vector<256x4xf32> to vector<1x16x16x4xf32>
    %c0_20 = arith.constant 0 : index
    %c0_21 = arith.constant 0 : index
    %c0_22 = arith.constant 0 : index
    %c0_23 = arith.constant 0 : index
    %89 = vector.load %arg8[%c0_20, %c0_21, %c0_22, %c0_23] : memref<1x16x16x4xf32, #tpu.memory_space<vmem>>, vector<1x16x16x4xf32>
    tpu.vector_store %arg8[%c0_20, %c0_21, %c0_22, %c0_23], %88 {strides = array<i32>} : memref<1x16x16x4xf32, #tpu.memory_space<vmem>>, vector<1x16x16x4xf32>,
    return
  }
  func.func @transform_0(%arg0: i32) -> (i32, i32, i32, i32) {
    %c0_i32 = arith.constant 0 : i32
    %c0_i32_0 = arith.constant 0 : i32
    %c0_i32_1 = arith.constant 0 : i32
    %c0_i32_2 = arith.constant 0 : i32
    return %arg0, %c0_i32, %c0_i32_0, %c0_i32_1 : i32, i32, i32, i32
  }
  func.func @transform_1(%arg0: i32) -> (i32, i32) {
    %c0_i32 = arith.constant 0 : i32
    %c0_i32_0 = arith.constant 0 : i32
    %c0_i32_1 = arith.constant 0 : i32
    return %c0_i32, %c0_i32_0 : i32, i32
  }
  func.func @transform_2(%arg0: i32) -> (i32, i32) {
    %c0_i32 = arith.constant 0 : i32
    %c0_i32_0 = arith.constant 0 : i32
    %c0_i32_1 = arith.constant 0 : i32
    return %c0_i32, %c0_i32_0 : i32, i32
  }
  func.func @transform_3(%arg0: i32) -> (i32, i32) {
    %c0_i32 = arith.constant 0 : i32
    %c0_i32_0 = arith.constant 0 : i32
    %c0_i32_1 = arith.constant 0 : i32
    return %c0_i32, %c0_i32_0 : i32, i32
  }
  func.func @transform_4(%arg0: i32) -> (i32, i32) {
    %c0_i32 = arith.constant 0 : i32
    %c0_i32_0 = arith.constant 0 : i32
    %c0_i32_1 = arith.constant 0 : i32
    return %c0_i32, %c0_i32_0 : i32, i32
  }
  func.func @transform_5(%arg0: i32) -> (i32, i32, i32, i32) {
    %c0_i32 = arith.constant 0 : i32
    %c0_i32_0 = arith.constant 0 : i32
    %c0_i32_1 = arith.constant 0 : i32
    %c0_i32_2 = arith.constant 0 : i32
    return %arg0, %c0_i32, %c0_i32_0, %c0_i32_1 : i32, i32, i32, i32
  }
  func.func @transform_6(%arg0: i32) -> (i32, i32, i32, i32) {
    %c0_i32 = arith.constant 0 : i32
    %c0_i32_0 = arith.constant 0 : i32
    %c0_i32_1 = arith.constant 0 : i32
    %c0_i32_2 = arith.constant 0 : i32
    return %arg0, %c0_i32, %c0_i32_0, %c0_i32_1 : i32, i32, i32, i32
  }
  func.func @transform_7(%arg0: i32) -> (i32, i32, i32, i32) {
    %c0_i32 = arith.constant 0 : i32
    %c0_i32_0 = arith.constant 0 : i32
    %c0_i32_1 = arith.constant 0 : i32
    %c0_i32_2 = arith.constant 0 : i32
    return %arg0, %c0_i32, %c0_i32_0, %c0_i32_1 : i32, i32, i32, i32
  }
}

module attributes {stable_mosaic.version = 11 : i64} {
  func.func @_dsc_kernel(%arg0: i32, %arg1: memref<1x18x18x4xf32, #tpu.memory_space<vmem>>, %arg2: memref<9x4xf32, #tpu.memory_space<vmem>>, %arg3: memref<1x4xf32, #tpu.memory_space<vmem>>, %arg4: memref<4x4xf32, #tpu.memory_space<vmem>>, %arg5: memref<1x4xf32, #tpu.memory_space<vmem>>, %arg6: memref<1x16x16x4xf32, #tpu.memory_space<vmem>>) attributes {dimension_semantics = [#tpu.dimension_semantics<parallel>], iteration_bounds = array<i64: 2>, scalar_prefetch = 0 : i64, scratch_operands = 0 : i64, tpu.core_type = #tpu.core_type<tc>, window_params = [{transform_indices = @transform_0, window_bounds = array<i64: 1, 18, 18, 4>}, {pipeline_mode = #tpu.pipeline_mode<synchronous>, transform_indices = @transform_1, window_bounds = array<i64: 9, 4>}, {pipeline_mode = #tpu.pipeline_mode<synchronous>, transform_indices = @transform_2, window_bounds = array<i64: 1, 4>}, {pipeline_mode = #tpu.pipeline_mode<synchronous>, transform_indices = @transform_3, window_bounds = array<i64: 4, 4>}, {pipeline_mode = #tpu.pipeline_mode<synchronous>, transform_indices = @transform_4, window_bounds = array<i64: 1, 4>}, {transform_indices = @transform_5, window_bounds = array<i64: 1, 16, 16, 4>}]} {
    %c0 = arith.constant 0 : index
    %c0_0 = arith.constant 0 : index
    %c0_1 = arith.constant 0 : index
    %c0_2 = arith.constant 0 : index
    %0 = vector.load %arg1[%c0, %c0_0, %c0_1, %c0_2] : memref<1x18x18x4xf32, #tpu.memory_space<vmem>>, vector<1x18x18x4xf32>
    %1 = vector.shape_cast %0 : vector<1x18x18x4xf32> to vector<18x18x4xf32>
    %c0_3 = arith.constant 0 : index
    %c0_4 = arith.constant 0 : index
    %2 = vector.load %arg2[%c0_3, %c0_4] : memref<9x4xf32, #tpu.memory_space<vmem>>, vector<9x4xf32>
    %cst = arith.constant 0.000000e+00 : f32
    %3 = vector.broadcast %cst : f32 to vector<16x16x4xf32>
    %4 = vector.extract_strided_slice %1 {offsets = [0, 0, 0], sizes = [16, 16, 4], strides = [1, 1, 1]} : vector<18x18x4xf32> to vector<16x16x4xf32>
    %5 = vector.extract_strided_slice %2 {offsets = [0, 0], sizes = [1, 4], strides = [1, 1]} : vector<9x4xf32> to vector<1x4xf32>
    %6 = vector.shape_cast %5 : vector<1x4xf32> to vector<4xf32>
    %7 = vector.shape_cast %6 : vector<4xf32> to vector<1x1x4xf32>
    %8 = vector.broadcast %7 : vector<1x1x4xf32> to vector<16x16x4xf32>
    %9 = arith.mulf %4, %8 : vector<16x16x4xf32>
    %10 = arith.addf %3, %9 : vector<16x16x4xf32>
    %11 = vector.extract_strided_slice %1 {offsets = [0, 1, 0], sizes = [16, 16, 4], strides = [1, 1, 1]} : vector<18x18x4xf32> to vector<16x16x4xf32>
    %12 = vector.extract_strided_slice %2 {offsets = [1, 0], sizes = [1, 4], strides = [1, 1]} : vector<9x4xf32> to vector<1x4xf32>
    %13 = vector.shape_cast %12 : vector<1x4xf32> to vector<4xf32>
    %14 = vector.shape_cast %13 : vector<4xf32> to vector<1x1x4xf32>
    %15 = vector.broadcast %14 : vector<1x1x4xf32> to vector<16x16x4xf32>
    %16 = arith.mulf %11, %15 : vector<16x16x4xf32>
    %17 = arith.addf %10, %16 : vector<16x16x4xf32>
    %18 = vector.extract_strided_slice %1 {offsets = [0, 2, 0], sizes = [16, 16, 4], strides = [1, 1, 1]} : vector<18x18x4xf32> to vector<16x16x4xf32>
    %19 = vector.extract_strided_slice %2 {offsets = [2, 0], sizes = [1, 4], strides = [1, 1]} : vector<9x4xf32> to vector<1x4xf32>
    %20 = vector.shape_cast %19 : vector<1x4xf32> to vector<4xf32>
    %21 = vector.shape_cast %20 : vector<4xf32> to vector<1x1x4xf32>
    %22 = vector.broadcast %21 : vector<1x1x4xf32> to vector<16x16x4xf32>
    %23 = arith.mulf %18, %22 : vector<16x16x4xf32>
    %24 = arith.addf %17, %23 : vector<16x16x4xf32>
    %25 = vector.extract_strided_slice %1 {offsets = [1, 0, 0], sizes = [16, 16, 4], strides = [1, 1, 1]} : vector<18x18x4xf32> to vector<16x16x4xf32>
    %26 = vector.extract_strided_slice %2 {offsets = [3, 0], sizes = [1, 4], strides = [1, 1]} : vector<9x4xf32> to vector<1x4xf32>
    %27 = vector.shape_cast %26 : vector<1x4xf32> to vector<4xf32>
    %28 = vector.shape_cast %27 : vector<4xf32> to vector<1x1x4xf32>
    %29 = vector.broadcast %28 : vector<1x1x4xf32> to vector<16x16x4xf32>
    %30 = arith.mulf %25, %29 : vector<16x16x4xf32>
    %31 = arith.addf %24, %30 : vector<16x16x4xf32>
    %32 = vector.extract_strided_slice %1 {offsets = [1, 1, 0], sizes = [16, 16, 4], strides = [1, 1, 1]} : vector<18x18x4xf32> to vector<16x16x4xf32>
    %33 = vector.extract_strided_slice %2 {offsets = [4, 0], sizes = [1, 4], strides = [1, 1]} : vector<9x4xf32> to vector<1x4xf32>
    %34 = vector.shape_cast %33 : vector<1x4xf32> to vector<4xf32>
    %35 = vector.shape_cast %34 : vector<4xf32> to vector<1x1x4xf32>
    %36 = vector.broadcast %35 : vector<1x1x4xf32> to vector<16x16x4xf32>
    %37 = arith.mulf %32, %36 : vector<16x16x4xf32>
    %38 = arith.addf %31, %37 : vector<16x16x4xf32>
    %39 = vector.extract_strided_slice %1 {offsets = [1, 2, 0], sizes = [16, 16, 4], strides = [1, 1, 1]} : vector<18x18x4xf32> to vector<16x16x4xf32>
    %40 = vector.extract_strided_slice %2 {offsets = [5, 0], sizes = [1, 4], strides = [1, 1]} : vector<9x4xf32> to vector<1x4xf32>
    %41 = vector.shape_cast %40 : vector<1x4xf32> to vector<4xf32>
    %42 = vector.shape_cast %41 : vector<4xf32> to vector<1x1x4xf32>
    %43 = vector.broadcast %42 : vector<1x1x4xf32> to vector<16x16x4xf32>
    %44 = arith.mulf %39, %43 : vector<16x16x4xf32>
    %45 = arith.addf %38, %44 : vector<16x16x4xf32>
    %46 = vector.extract_strided_slice %1 {offsets = [2, 0, 0], sizes = [16, 16, 4], strides = [1, 1, 1]} : vector<18x18x4xf32> to vector<16x16x4xf32>
    %47 = vector.extract_strided_slice %2 {offsets = [6, 0], sizes = [1, 4], strides = [1, 1]} : vector<9x4xf32> to vector<1x4xf32>
    %48 = vector.shape_cast %47 : vector<1x4xf32> to vector<4xf32>
    %49 = vector.shape_cast %48 : vector<4xf32> to vector<1x1x4xf32>
    %50 = vector.broadcast %49 : vector<1x1x4xf32> to vector<16x16x4xf32>
    %51 = arith.mulf %46, %50 : vector<16x16x4xf32>
    %52 = arith.addf %45, %51 : vector<16x16x4xf32>
    %53 = vector.extract_strided_slice %1 {offsets = [2, 1, 0], sizes = [16, 16, 4], strides = [1, 1, 1]} : vector<18x18x4xf32> to vector<16x16x4xf32>
    %54 = vector.extract_strided_slice %2 {offsets = [7, 0], sizes = [1, 4], strides = [1, 1]} : vector<9x4xf32> to vector<1x4xf32>
    %55 = vector.shape_cast %54 : vector<1x4xf32> to vector<4xf32>
    %56 = vector.shape_cast %55 : vector<4xf32> to vector<1x1x4xf32>
    %57 = vector.broadcast %56 : vector<1x1x4xf32> to vector<16x16x4xf32>
    %58 = arith.mulf %53, %57 : vector<16x16x4xf32>
    %59 = arith.addf %52, %58 : vector<16x16x4xf32>
    %60 = vector.extract_strided_slice %1 {offsets = [2, 2, 0], sizes = [16, 16, 4], strides = [1, 1, 1]} : vector<18x18x4xf32> to vector<16x16x4xf32>
    %61 = vector.extract_strided_slice %2 {offsets = [8, 0], sizes = [1, 4], strides = [1, 1]} : vector<9x4xf32> to vector<1x4xf32>
    %62 = vector.shape_cast %61 : vector<1x4xf32> to vector<4xf32>
    %63 = vector.shape_cast %62 : vector<4xf32> to vector<1x1x4xf32>
    %64 = vector.broadcast %63 : vector<1x1x4xf32> to vector<16x16x4xf32>
    %65 = arith.mulf %60, %64 : vector<16x16x4xf32>
    %66 = arith.addf %59, %65 : vector<16x16x4xf32>
    %c0_5 = arith.constant 0 : index
    %c0_6 = arith.constant 0 : index
    %67 = vector.load %arg3[%c0_5, %c0_6] : memref<1x4xf32, #tpu.memory_space<vmem>>, vector<1x4xf32>
    %68 = vector.shape_cast %67 : vector<1x4xf32> to vector<1x1x4xf32>
    %69 = vector.broadcast %68 : vector<1x1x4xf32> to vector<16x16x4xf32>
    %70 = arith.addf %66, %69 : vector<16x16x4xf32>
    %71 = vector.extract_strided_slice %1 {offsets = [1, 1, 0], sizes = [16, 16, 4], strides = [1, 1, 1]} : vector<18x18x4xf32> to vector<16x16x4xf32>
    %72 = arith.addf %71, %70 : vector<16x16x4xf32>
    %73 = vector.shape_cast %72 : vector<16x16x4xf32> to vector<256x4xf32>
    %c0_7 = arith.constant 0 : index
    %c0_8 = arith.constant 0 : index
    %74 = vector.load %arg4[%c0_7, %c0_8] : memref<4x4xf32, #tpu.memory_space<vmem>>, vector<4x4xf32>
    %cst_9 = arith.constant dense<0.000000e+00> : vector<256x4xf32>
    %75 = tpu.matmul %73, %74, %cst_9 {dimension_numbers = #tpu.dot_dimension_numbers<[1], [0], [0], [1], [0, 0, 1, 1], [], []>} : vector<256x4xf32>, vector<4x4xf32>, vector<256x4xf32> -> vector<256x4xf32>
    %c0_10 = arith.constant 0 : index
    %c0_11 = arith.constant 0 : index
    %76 = vector.load %arg5[%c0_10, %c0_11] : memref<1x4xf32, #tpu.memory_space<vmem>>, vector<1x4xf32>
    %77 = vector.broadcast %76 : vector<1x4xf32> to vector<256x4xf32>
    %78 = arith.addf %75, %77 : vector<256x4xf32>
    %cst_12 = arith.constant 0.000000e+00 : f32
    %79 = vector.broadcast %cst_12 : f32 to vector<256x4xf32>
    %80 = arith.maximumf %78, %79 : vector<256x4xf32>
    %81 = vector.shape_cast %80 : vector<256x4xf32> to vector<1x16x16x4xf32>
    %c0_13 = arith.constant 0 : index
    %c0_14 = arith.constant 0 : index
    %c0_15 = arith.constant 0 : index
    %c0_16 = arith.constant 0 : index
    %82 = vector.load %arg6[%c0_13, %c0_14, %c0_15, %c0_16] : memref<1x16x16x4xf32, #tpu.memory_space<vmem>>, vector<1x16x16x4xf32>
    tpu.vector_store %arg6[%c0_13, %c0_14, %c0_15, %c0_16], %81 {strides = array<i32>} : memref<1x16x16x4xf32, #tpu.memory_space<vmem>>, vector<1x16x16x4xf32>,
    return
  }
  func.func @transform_0(%arg0: i32) -> (i32, i32, i32, i32) {
    %c0_i32 = arith.constant 0 : i32
    %c0_i32_0 = arith.constant 0 : i32
    %c0_i32_1 = arith.constant 0 : i32
    %c0_i32_2 = arith.constant 0 : i32
    return %arg0, %c0_i32, %c0_i32_0, %c0_i32_1 : i32, i32, i32, i32
  }
  func.func @transform_1(%arg0: i32) -> (i32, i32) {
    %c0_i32 = arith.constant 0 : i32
    %c0_i32_0 = arith.constant 0 : i32
    %c0_i32_1 = arith.constant 0 : i32
    return %c0_i32, %c0_i32_0 : i32, i32
  }
  func.func @transform_2(%arg0: i32) -> (i32, i32) {
    %c0_i32 = arith.constant 0 : i32
    %c0_i32_0 = arith.constant 0 : i32
    %c0_i32_1 = arith.constant 0 : i32
    return %c0_i32, %c0_i32_0 : i32, i32
  }
  func.func @transform_3(%arg0: i32) -> (i32, i32) {
    %c0_i32 = arith.constant 0 : i32
    %c0_i32_0 = arith.constant 0 : i32
    %c0_i32_1 = arith.constant 0 : i32
    return %c0_i32, %c0_i32_0 : i32, i32
  }
  func.func @transform_4(%arg0: i32) -> (i32, i32) {
    %c0_i32 = arith.constant 0 : i32
    %c0_i32_0 = arith.constant 0 : i32
    %c0_i32_1 = arith.constant 0 : i32
    return %c0_i32, %c0_i32_0 : i32, i32
  }
  func.func @transform_5(%arg0: i32) -> (i32, i32, i32, i32) {
    %c0_i32 = arith.constant 0 : i32
    %c0_i32_0 = arith.constant 0 : i32
    %c0_i32_1 = arith.constant 0 : i32
    %c0_i32_2 = arith.constant 0 : i32
    return %arg0, %c0_i32, %c0_i32_0, %c0_i32_1 : i32, i32, i32, i32
  }
}

</mosaic_0001>

<bundles_post_ra>
// kernel: hybrid_forward.7
= control target key start
LH: loop header
LB: loop body
LE: loop exit
PB: predicated region body
PF: predicated region fallthrough
CT: control target
= control target key end

     0   :  { %s4473_s12 = smov 0   ;;  %s5714_s0 = inlined_call_operand.vmem [shape: f32[2,18,18,4], index: 0, kind: input, shape index: {}]   ;;  %s5715_s1 = inlined_call_operand.vmem [shape: f32[9,4,4], index: 1, kind: input, shape index: {}]   ;;  %s5716_s2 = inlined_call_operand.vmem [shape: f32[1,4], index: 2, kind: input, shape index: {}]   ;;  %s5717_s3 = inlined_call_operand.vmem [shape: f32[2,16,16,4], index: 3, kind: output, shape index: {}]  }
   0x1 LB: > { %s3122_s13 = sadd.s32 4294967295, %s4451_s12   ;;  %p3126_p0 = scmp.ge.s32.totalorder %s4451_s12, 1  ;;  %s4451_s12 = sphi %s4473_s12, %s13_s12  }
   0x2   : > { %p137_p1 = scmp.lt.s32.totalorder %s4451_s12, 3 }
   0x4   : > { %p138_p2 = pnand %p3126_p0, %p137_p1 }
   0x6   : > { %141 = sbr.rel (%p138_p2) target bundleno = 529 (0x211), region = 32 }
   0xd   : > { %v226_v0 = vld [vmem:[%s5715_s1 + $0x4] sm:$0xf]  ;;  %vm428_vm0 = vcmask 1043456   ;;  %v4487_v1 = vld [vmem:[%s5715_s1 + $0x10] sm:$0xf]  ;;  %p161_p3 = scmp.lt.s32.totalorder %s3122_s13, 1 }
   0xe   : > { %3728 = vmatprep.subr.msk.mxu1 %vm428_vm0, %v226_v0  ;;  %3928 = vmatprep.subr.msk.mxu0 %vm428_vm0, %v4487_v1  ;;  %v225_v2 = vld [vmem:[%s5715_s1] sm:$0xf]  ;;  %v230_v3 = vld [vmem:[%s5715_s1 + $0x14] sm:$0xf]  ;;  %vm282_vm1 = vcmask 1046528   ;;  %vm363_vm2 = vcmask 31744  }
   0xf   : > { %3729 = vmatpush3.msk.msra.mxu1 %vm428_vm0, %v226_v0  ;;  %3929 = vmatpush3.msk.msra.mxu0 %vm428_vm0, %v4487_v1  ;;  %s5893_s13 = smov (!%p161_p3, %s3122_s13), 1  ;;  %v4574_v33 = vld [vmem:[%s5715_s1 + $0x18] sm:$0xf]  ;;  %v4584_v35 = vld [vmem:[%s5715_s1 + $0x8] sm:$0xf]  ;;  %vm949_vm3 = vcmask 1045504  }
  0x10   : > { %3778 = vmatprep.subr.msk.mxu1 %vm428_vm0, %v225_v2  ;;  %3978 = vmatprep.subr.msk.mxu0 %vm428_vm0, %v230_v3  ;;  %s4436_s22 = smul.u32 432, %s5893_s13  ;;  %s3430_s11 = sshll.u32 %s5893_s13, 8 }
  0x11   : > { %s5610_s16 = scalar_lea.vmem %s5717_s3, %s3430_s11 }
  0x12   : > { %s4509_s25 = scalar_lea.vmem %s5714_s0, %s4436_s22 }
  0x13   : > { %v4512_v4 = vld [vmem:[%s4509_s25] sm:$0xff]  ;;  %v4515_v5 = vld [vmem:[%s4509_s25 + $0x8] sm:$0xff]  ;;  %v4518_v6 = vld [vmem:[%s4509_s25 + $0x18] sm:$0xff] }
  0x14   : > { %5791 = vst [vmem:[#allocation2_spill] sm:$0xff] %v4518_v6  ;;  %v283_v7 = vrot.slane %v4512_v4, 1  ;;  %v284_v8 = vrot.slane %v4515_v5, 1  ;;  %v4523_v9 = vld [vmem:[%s4509_s25 + $0x20] sm:$0xff]  ;;  %v288_v10 = vrot.slane %v4518_v6, 1  ;;  %v4535_v15 = vld [vmem:[%s4509_s25 + $0x30] sm:$0xff] }
  0x15   : > { %5792 = vst [vmem:[#allocation3_spill] sm:$0xff] %v4523_v9  ;;  %v4527_v11 = vld [vmem:[%s4509_s25 + $0x10] sm:$0x3]  ;;  %v289_v12 = vrot.slane %v4523_v9, 1  ;;  %v4532_v14 = vld [vmem:[%s4509_s25 + $0x28] sm:$0x3] }
  0x16   : > { %v286_v13 = vrot.slane %v4527_v11, 1  ;;  %v285_v16 = vsel %vm282_vm1, %v283_v7, %v284_v8  ;;  %v291_v17 = vrot.slane %v4532_v14, 1  ;;  %v4540_v18 = vld [vmem:[%s4509_s25 + $0x38] sm:$0xff]  ;;  %v293_v19 = vrot.slane %v4535_v15, 1  ;;  %v4544_v20 = vld [vmem:[%s4509_s25 + $0x40] sm:$0x3] }
  0x17   : > { %3730 = vmatprep.mubr.msk.f32.mxu1 %vm363_vm2, %v285_v16  ;;  %v290_v21 = vsel %vm282_vm1, %v288_v10, %v289_v12  ;;  %v294_v23 = vrot.slane %v4540_v18, 1  ;;  %v296_v24 = vrot.slane %v4544_v20, 1  ;;  %v4552_v25 = vld [vmem:[%s4509_s25 + $0x48] sm:$0xff]  ;;  %v4555_v26 = vld [vmem:[%s4509_s25 + $0x50] sm:$0xff]  ;;  %v4558_v27 = vld [vmem:[%s4509_s25 + $0x58] sm:$0x3] }
  0x18   : > { %v287_v22 = vsel %vm282_vm1, %v284_v8, %v286_v13  ;;  %3930 = vmatprep.mubr.msk.f32.mxu0 %vm363_vm2, %v290_v21  ;;  %v292_v28 = vsel %vm282_vm1, %v289_v12, %v291_v17  ;;  %v298_v29 = vrot.slane %v4552_v25, 1  ;;  %v299_v30 = vrot.slane %v4555_v26, 1  ;;  %v4566_v31 = vld [vmem:[%s4509_s25 + $0x60] sm:$0xff]  ;;  %v4569_v32 = vld [vmem:[%s4509_s25 + $0x68] sm:$0xff]  ;;  %v4600_v41 = vld [vmem:[%s4509_s25 + $0x70] sm:$0x3] }
  0x19   : > { %3731 = vmatmul.mubr.msk.f32.vlgmr.msra.gmra.mrb[0].mxu1 %vm363_vm2, %v287_v22  ;;  %3931 = vmatmul.mubr.msk.f32.vlgmr.msra.gmra.mrb[0].mxu0 %vm363_vm2, %v292_v28  ;;  %v4579_v34 = vsel %vm282_vm1, %v293_v19, %v294_v23  ;;  %v4589_v36 = vsel %vm282_vm1, %v294_v23, %v296_v24  ;;  %v301_v37 = vrot.slane %v4558_v27, 1  ;;  %v303_v39 = vrot.slane %v4566_v31, 1  ;;  %v4606_v42 = vld [vmem:[%s4509_s25 + $0x78] sm:$0xff]  ;;  %v4609_v43 = vld [vmem:[%s4509_s25 + $0x80] sm:$0xff]  ;;  %v4629_v49 = vld [vmem:[%s4509_s25 + $0x88] sm:$0x3] }
  0x1a   : > { %3779 = vmatpush3.msk.msra.mxu1 %vm428_vm0, %v225_v2  ;;  %5793 = vst [vmem:[#allocation4_spill] sm:$0xff] %v4579_v34  ;;  %3979 = vmatpush3.msk.msra.mxu0 %vm428_vm0, %v230_v3  ;;  %5794 = vst [vmem:[#allocation5_spill] sm:$0xff] %v4589_v36  ;;  %v4595_v38 = vsel %vm282_vm1, %v298_v29, %v299_v30  ;;  %v304_v40 = vrot.slane %v4569_v32, 1  ;;  %v306_v45 = vrot.slane %v4600_v41, 1  ;;  %v308_v47 = vrot.slane %v4606_v42, 1  ;;  %v4634_v50 = vld [vmem:[%s4509_s25 + $0x90] sm:$0xff] }
  0x1b   : > { %3733 = vmatprep.mubr.msk.f32.mxu1 %vm363_vm2, %v290_v21  ;;  %3933 = vmatprep.mubr.msk.f32.mxu0 %vm363_vm2, %v4579_v34  ;;  %5795 = vst [vmem:[#allocation6_spill] sm:$0xff] %v4595_v38  ;;  %v4620_v44 = vsel %vm282_vm1, %v299_v30, %v301_v37  ;;  %v309_v48 = vrot.slane %v4609_v43, 1  ;;  %v4637_v51 = vld [vmem:[%s4509_s25 + $0x98] sm:$0xff]  ;;  %v311_v53 = vrot.slane %v4629_v49, 1  ;;  %v313_v55 = vrot.slane %v4634_v50, 1  ;;  %v4660_v58 = vld [vmem:[%s4509_s25 + $0xa8] sm:$0xff] }
  0x1c   : > { %4028 = vmatprep.subr.msk.mxu0 %vm428_vm0, %v4574_v33  ;;  %3828 = vmatprep.subr.msk.mxu1 %vm428_vm0, %v4584_v35  ;;  %5796 = vst [vmem:[#allocation7_spill] sm:$0xff] %v4620_v44  ;;  %v4624_v46 = vsel %vm282_vm1, %v303_v39, %v304_v40  ;;  %v4646_v52 = vsel %vm282_vm1, %v304_v40, %v306_v45  ;;  %v314_v56 = vrot.slane %v4637_v51, 1  ;;  %v4655_v57 = vld [vmem:[%s4509_s25 + $0xa0] sm:$0x3]  ;;  %v4663_v59 = vld [vmem:[%s4509_s25 + $0xb0] sm:$0xff]  ;;  %v318_v63 = vrot.slane %v4660_v58, 1 }
  0x1d   : > { %3734 = vmatmul.mubr.msk.f32.gmra.mrb[2].mxu1 %vm363_vm2, %v292_v28  ;;  %3934 = vmatmul.mubr.msk.f32.gmra.mrb[2].mxu0 %vm363_vm2, %v4589_v36  ;;  %5797 = vst [vmem:[#allocation8_spill] sm:$0xff] %v4624_v46  ;;  %5798 = vst [vmem:[#allocation9_spill] sm:$0xff] %v4646_v52  ;;  %v4650_v54 = vsel %vm282_vm1, %v308_v47, %v309_v48  ;;  %v4672_v60 = vsel %vm282_vm1, %v309_v48, %v311_v53  ;;  %v316_v61 = vrot.slane %v4655_v57, 1  ;;  %v4681_v2 = vld [vmem:[%s4509_s25 + $0xb8] sm:$0x3]  ;;  %v4686_v3 = vld [vmem:[%s4509_s25 + $0xc0] sm:$0xff] }
  0x1e   : > { %3736 = vmatprep.mubr.msk.f32.mxu1 %vm363_vm2, %v4579_v34  ;;  %3936 = vmatprep.mubr.msk.f32.mxu0 %vm363_vm2, %v4595_v38  ;;  %5799 = vst [vmem:[#allocation10_spill] sm:$0xff] %v4650_v54  ;;  %5800 = vst [vmem:[#allocation11_spill] sm:$0xff] %v4672_v60  ;;  %v4676_v62 = vsel %vm282_vm1, %v313_v55, %v314_v56  ;;  %v319_v0 = vrot.slane %v4663_v59, 1  ;;  %v4689_v7 = vld [vmem:[%s4509_s25 + $0xc8] sm:$0xff]  ;;  %v321_v10 = vrot.slane %v4681_v2, 1  ;;  %v323_v13 = vrot.slane %v4686_v3, 1 }
  0x1f   : > { %5801 = vst [vmem:[#allocation12_spill] sm:$0xff] %v4676_v62  ;;  %v4698_v8 = vsel %vm282_vm1, %v314_v56, %v316_v61  ;;  %v324_v16 = vrot.slane %v4689_v7, 1  ;;  %v4707_v17 = vld [vmem:[%s4509_s25 + $0xd0] sm:$0x3]  ;;  %v955_v23 = vrot.slane %v4518_v6, 2  ;;  %v956_v24 = vrot.slane %v4523_v9, 2 }
  0x20   : > { %5802 = vst [vmem:[#allocation13_spill] sm:$0xff] %v4698_v8  ;;  %v4702_v12 = vsel %vm282_vm1, %v318_v63, %v319_v0  ;;  %v4718_v19 = vsel %vm282_vm1, %v319_v0, %v321_v10  ;;  %v326_v21 = vrot.slane %v4707_v17, 1  ;;  %v4727_v28 = vld [vmem:[%s4509_s25 + $0xd8] sm:$0xff]  ;;  %v4730_v29 = vld [vmem:[%s4509_s25 + $0xe0] sm:$0xff]  ;;  %v958_v30 = vrot.slane %v4532_v14, 2  ;;  %v4755_v53 = vld [vmem:[%s4509_s25 + $0xf0] sm:$0xff] }
  0x21   : > { %3737 = vmatmul.mubr.msk.f32.gmra.mrb[4].mxu1 %vm363_vm2, %v4589_v36  ;;  %3937 = vmatmul.mubr.msk.f32.gmra.mrb[4].mxu0 %vm363_vm2, %v4620_v44  ;;  %5803 = vst [vmem:[#allocation14_spill] sm:$0xff] %v4702_v12  ;;  %5804 = vst [vmem:[#allocation15_spill] sm:$0xff] %v4718_v19  ;;  %v4722_v22 = vsel %vm282_vm1, %v323_v13, %v324_v16  ;;  %v328_v39 = vrot.slane %v4727_v28, 1  ;;  %v329_v40 = vrot.slane %v4730_v29, 1  ;;  %v4747_v45 = vld [vmem:[%s4509_s25 + $0xe8] sm:$0x3] }
  0x22   : > { %3739 = vmatprep.mubr.msk.f32.mxu1 %vm363_vm2, %v4595_v38  ;;  %3939 = vmatprep.mubr.msk.f32.mxu0 %vm363_vm2, %v4624_v46  ;;  %5805 = vst [vmem:[#allocation16_spill] sm:$0xff] %v4722_v22  ;;  %v4742_v37 = vsel %vm282_vm1, %v324_v16, %v326_v21  ;;  %v4750_v47 = vsel %vm949_vm3, %v955_v23, %v956_v24  ;;  %v960_v48 = vrot.slane %v4535_v15, 2  ;;  %v961_v14 = vrot.slane %v4540_v18, 2  ;;  %v4758_v55 = vld [vmem:[%s4509_s25 + $0xf8] sm:$0xff]  ;;  %v4779_v16 = vld [vmem:[%s4509_s25 + $0x100] sm:$0x3] }
  0x23   : > { %5806 = vst [vmem:[#allocation17_spill] sm:$0xff] %v4742_v37  ;;  %v331_v56 = vrot.slane %v4747_v45, 1  ;;  %v963_v61 = vrot.slane %v4544_v20, 2  ;;  %v4771_v63 = vsel %vm949_vm3, %v956_v24, %v958_v30  ;;  %v4774_v0 = vsel %vm282_vm1, %v328_v39, %v329_v40  ;;  %v4790_v24 = vld [vmem:[%s4509_s25 + $0x110] sm:$0xff]  ;;  %v4797_v30 = vld [vmem:[%s5715_s1 + $0x1c] sm:$0xf] }
  0x24   : > { %5807 = vst [vmem:[#allocation18_spill] sm:$0xff] %v4774_v0  ;;  %v333_v10 = vrot.slane %v4755_v53, 1  ;;  %v334_v13 = vrot.slane %v4758_v55, 1  ;;  %v4782_v21 = vsel %vm949_vm3, %v960_v48, %v961_v14  ;;  %v965_v20 = vrot.slane %v4552_v25, 2  ;;  %v4893_v36 = vld [vmem:[%s4509_s25 + $0x148] sm:$0x3] }
  0x25   : > { %3740 = vmatmul.mubr.msk.f32.gmra.mrb[6].mxu1 %vm363_vm2, %v4620_v44  ;;  %3940 = vmatmul.mubr.msk.f32.gmra.mrb[6].mxu0 %vm363_vm2, %v4646_v52  ;;  %v966_v23 = vrot.slane %v4555_v26, 2  ;;  %v4804_v39 = vsel %vm282_vm1, %v329_v40, %v331_v56  ;;  %v4807_v48 = vsel %vm949_vm3, %v961_v14, %v963_v61  ;;  %v339_v40 = vrot.slane %v4790_v24, 1  ;;  %v4821_v56 = vld [vmem:[%s4509_s25 + $0x118] sm:$0x3] }
  0x26   : > { %3742 = vmatprep.mubr.msk.f32.mxu1 %vm363_vm2, %v4624_v46  ;;  %3942 = vmatprep.mubr.msk.f32.mxu0 %vm363_vm2, %v4650_v54  ;;  %5808 = vst [vmem:[#allocation19_spill] sm:$0xff] %v4804_v39  ;;  %5809 = vst [vmem:[#allocation20_spill] sm:$0xff] %v4807_v48  ;;  %v970_v61 = vrot.slane %v4566_v31, 2  ;;  %v4866_v46 = vld [vmem:[%s4509_s25 + $0x138] sm:$0xff]  ;;  %v978_v44 = vrot.slane %v4629_v49, 2  ;;  %v983_v34 = vrot.slane %v4655_v57, 2 }
  0x27   : > { %v4824_v14 = vsel %vm949_vm3, %v965_v20, %v966_v23  ;;  %v341_v20 = vrot.slane %v4821_v56, 1  ;;  %v348_v38 = vrot.slane %v4866_v46, 1  ;;  %v985_v57 = vrot.slane %v4660_v58, 2 }
  0x28   : > { %5811 = vst [vmem:[#allocation22_spill] sm:$0xff] %v4824_v14 }
  0x29   : > { %3743 = vmatmul.mubr.msk.f32.gmra.mrb[8].mxu1 %vm363_vm2, %v4646_v52  ;;  %3943 = vmatmul.mubr.msk.f32.gmra.mrb[8].mxu0 %vm363_vm2, %v4672_v60  ;;  %v4858_v52 = vld [vmem:[%s4509_s25 + $0x130] sm:$0x3] }
  0x2a   : > { %3745 = vmatprep.mubr.msk.f32.mxu1 %vm363_vm2, %v4650_v54  ;;  %3945 = vmatprep.mubr.msk.f32.mxu0 %vm363_vm2, %v4676_v62 }
  0x2d   : > { %3746 = vmatmul.mubr.msk.f32.gmra.mrb[10].mxu1 %vm363_vm2, %v4672_v60  ;;  %3946 = vmatmul.mubr.msk.f32.gmra.mrb[10].mxu0 %vm363_vm2, %v4698_v8 }
  0x2e   : > { %3748 = vmatprep.mubr.msk.f32.mxu1 %vm363_vm2, %v4676_v62  ;;  %3948 = vmatprep.mubr.msk.f32.mxu0 %vm363_vm2, %v4702_v12  ;;  %v973_v62 = vrot.slane %v4600_v41, 2  ;;  %v975_v41 = vrot.slane %v4606_v42, 2 }
  0x31   : > { %3749 = vmatmul.mubr.msk.f32.gmra.mrb[12].mxu1 %vm363_vm2, %v4698_v8  ;;  %3949 = vmatmul.mubr.msk.f32.gmra.mrb[12].mxu0 %vm363_vm2, %v4718_v19  ;;  %v4829_v8 = vld [vmem:[%s4509_s25 + $0x120] sm:$0xff] }
  0x32   : > { %3751 = vmatprep.mubr.msk.f32.mxu1 %vm363_vm2, %v4702_v12  ;;  %3951 = vmatprep.mubr.msk.f32.mxu0 %vm363_vm2, %v4722_v22  ;;  %v968_v12 = vrot.slane %v4558_v27, 2  ;;  %v343_v54 = vrot.slane %v4829_v8, 1 }
  0x34   : > { %v4850_v60 = vsel %vm949_vm3, %v966_v23, %v968_v12  ;;  %v4869_v12 = vld [vmem:[%s4509_s25 + $0x140] sm:$0xff] }
  0x35   : > { %3752 = vmatmul.mubr.msk.f32.gmra.mrb[14].mxu1 %vm363_vm2, %v4718_v19  ;;  %3952 = vmatmul.mubr.msk.f32.gmra.mrb[14].mxu0 %vm363_vm2, %v4742_v37  ;;  %v4815_v19 = vsel %vm282_vm1, %v333_v10, %v334_v13  ;;  %v4832_v10 = vld [vmem:[%s4509_s25 + $0x128] sm:$0xff]  ;;  %5813 = vst [vmem:[#allocation24_spill] sm:$0xff] %v4850_v60 }
  0x36   : > { %3754 = vmatprep.mubr.msk.f32.mxu1 %vm363_vm2, %v4722_v22  ;;  %3980 = vmatprep.mubr.msk.f32.mxu0 %vm363_vm2, %v4750_v47  ;;  %v4787_v22 = vld [vmem:[%s4509_s25 + $0x108] sm:$0xff]  ;;  %5810 = vst [vmem:[#allocation21_spill] sm:$0xff] %v4815_v19 }
  0x39   : > { %3755 = vmatmul.mubr.msk.f32.gmra.mrb[16].mxu1 %vm363_vm2, %v4742_v37  ;;  %3981 = vmatmul.mubr.msk.f32.vlgmr.msra.gmra.mrb[0].mxu0 %vm363_vm2, %v4771_v63  ;;  %v336_v37 = vrot.slane %v4779_v16, 1 }
  0x3a   : > { %3757 = vmatprep.mubr.msk.f32.mxu1 %vm363_vm2, %v4774_v0  ;;  %4029 = vmatpush3.msk.msra.mxu0 %vm428_vm0, %v4574_v33  ;;  %v338_v0 = vrot.slane %v4787_v22, 1  ;;  %v971_v33 = vrot.slane %v4569_v32, 2 }
  0x3b   : > { %3983 = vmatprep.mubr.msk.f32.mxu0 %vm363_vm2, %v4782_v21  ;;  %4078 = vmatprep.subr.msk.mxu0 %vm428_vm0, %v4797_v30  ;;  %v4843_v27 = vsel %vm282_vm1, %v334_v13, %v336_v37  ;;  %v976_v13 = vrot.slane %v4609_v43, 2 }
  0x3c   : > { %5812 = vst [vmem:[#allocation23_spill] sm:$0xff] %v4843_v27  ;;  %v4861_v37 = vsel %vm949_vm3, %v970_v61, %v971_v33  ;;  %v4881_v23 = vsel %vm949_vm3, %v971_v33, %v973_v62  ;;  %v346_v61 = vrot.slane %v4858_v52, 1  ;;  %v980_v62 = vrot.slane %v4634_v50, 2 }
  0x3d   : > { %3758 = vmatmul.mubr.msk.f32.gmra.mrb[18].mxu1 %vm363_vm2, %v4804_v39  ;;  %3984 = vmatmul.mubr.msk.f32.gmra.mrb[2].mxu0 %vm363_vm2, %v4807_v48  ;;  %v4853_v39 = vsel %vm282_vm1, %v338_v0, %v339_v40  ;;  %5815 = vst [vmem:[#allocation26_spill] sm:$0xff] %v4861_v37  ;;  %v4878_v0 = vsel %vm282_vm1, %v339_v40, %v341_v20  ;;  %5817 = vst [vmem:[#allocation28_spill] sm:$0xff] %v4881_v23  ;;  %v981_v33 = vrot.slane %v4637_v51, 2  ;;  %v4901_v20 = vld [vmem:[%s4509_s25 + $0x150] sm:$0xff]  ;;  %v4963_v48 = vld [vmem:[%s4509_s25 + $0x178] sm:$0x3] }
  0x3e   : > { %3760 = vmatprep.mubr.msk.f32.mxu1 %vm363_vm2, %v4815_v19  ;;  %3986 = vmatprep.mubr.msk.f32.mxu0 %vm363_vm2, %v4824_v14  ;;  %5814 = vst [vmem:[#allocation25_spill] sm:$0xff] %v4853_v39  ;;  %v344_v19 = vrot.slane %v4832_v10, 1  ;;  %5816 = vst [vmem:[#allocation27_spill] sm:$0xff] %v4878_v0  ;;  %v4896_v40 = vsel %vm949_vm3, %v975_v41, %v976_v13  ;;  %v351_v41 = vrot.slane %v4893_v36, 1 }
  0x3f   : > { %5819 = vst [vmem:[#allocation30_spill] sm:$0xff] %v4896_v40 }
  0x40   : > { %v4913_v49 = vsel %vm282_vm1, %v344_v19, %v346_v61  ;;  %v986_v61 = vrot.slane %v4663_v59, 2 }
  0x41   : > { %3761 = vmatmul.mubr.msk.f32.gmra.mrb[20].mxu1 %vm363_vm2, %v4843_v27  ;;  %3987 = vmatmul.mubr.msk.f32.gmra.mrb[4].mxu0 %vm363_vm2, %v4850_v60  ;;  %v4887_v27 = vsel %vm282_vm1, %v343_v54, %v344_v19  ;;  %v4904_v54 = vld [vmem:[%s4509_s25 + $0x158] sm:$0xff]  ;;  %5820 = vst [vmem:[#allocation31_spill] sm:$0xff] %v4913_v49  ;;  %v4928_v60 = vld [vmem:[%s4509_s25 + $0x160] sm:$0x3]  ;;  %v4931_v19 = vsel %vm949_vm3, %v980_v62, %v981_v33 }
  0x42   : > { %3763 = vmatprep.mubr.msk.f32.mxu1 %vm363_vm2, %v4853_v39  ;;  %3989 = vmatprep.mubr.msk.f32.mxu0 %vm363_vm2, %v4861_v37  ;;  %5818 = vst [vmem:[#allocation29_spill] sm:$0xff] %v4887_v27  ;;  %v349_v39 = vrot.slane %v4869_v12, 1  ;;  %v4920_v37 = vsel %vm949_vm3, %v976_v13, %v978_v44  ;;  %v4939_v44 = vld [vmem:[%s4509_s25 + $0x170] sm:$0xff]  ;;  %v4951_v13 = vsel %vm949_vm3, %v981_v33, %v983_v34  ;;  %v356_v62 = vrot.slane %v4928_v60, 1 }
  0x43   : > { %5821 = vst [vmem:[#allocation32_spill] sm:$0xff] %v4920_v37  ;;  %5823 = vst [vmem:[#allocation34_spill] sm:$0xff] %v4939_v44  ;;  %v990_v34 = vrot.slane %v4686_v3, 2  ;;  %v991_v33 = vrot.slane %v4689_v7, 2 }
  0x44   : > { %5825 = vst [vmem:[#allocation36_spill] sm:$0xff] %v4951_v13 }
  0x45   : > { %3764 = vmatmul.mubr.msk.f32.gmra.mrb[22].mxu1 %vm363_vm2, %v4878_v0  ;;  %3990 = vmatmul.mubr.msk.f32.gmra.mrb[6].mxu0 %vm363_vm2, %v4881_v23  ;;  %v4923_v0 = vsel %vm282_vm1, %v348_v38, %v349_v39  ;;  %v353_v23 = vrot.slane %v4901_v20, 1  ;;  %v4948_v38 = vsel %vm282_vm1, %v349_v39, %v351_v41  ;;  %v4966_v39 = vsel %vm949_vm3, %v985_v57, %v986_v61 }
  0x46   : > { %3766 = vmatprep.mubr.msk.f32.mxu1 %vm363_vm2, %v4887_v27  ;;  %3992 = vmatprep.mubr.msk.f32.mxu0 %vm363_vm2, %v4896_v40  ;;  %5822 = vst [vmem:[#allocation33_spill] sm:$0xff] %v4923_v0  ;;  %v354_v27 = vrot.slane %v4904_v54, 1  ;;  %v4936_v40 = vld [vmem:[%s4509_s25 + $0x168] sm:$0xff]  ;;  %5824 = vst [vmem:[#allocation35_spill] sm:$0xff] %v4948_v38 }
  0x48   : > { %v4957_v14 = vsel %vm282_vm1, %v353_v23, %v354_v27  ;;  %v361_v23 = vrot.slane %v4963_v48, 1 }
  0x49   : > { %3767 = vmatmul.mubr.msk.f32.gmra.mrb[24].mxu1 %vm363_vm2, %v4913_v49  ;;  %3993 = vmatmul.mubr.msk.f32.gmra.mrb[8].mxu0 %vm363_vm2, %v4920_v37  ;;  %5826 = vst [vmem:[#allocation37_spill] sm:$0xff] %v4957_v14  ;;  %v988_v49 = vrot.slane %v4681_v2, 2  ;;  %v358_v37 = vrot.slane %v4936_v40, 1  ;;  %v4977_v2 = vsel %vm282_vm1, %v354_v27, %v356_v62  ;;  %v996_v27 = vrot.slane %v4730_v29, 2 }
  0x4a   : > { %3769 = vmatprep.mubr.msk.f32.mxu1 %vm363_vm2, %v4923_v0  ;;  %3995 = vmatprep.mubr.msk.f32.mxu0 %vm363_vm2, %v4931_v19  ;;  %v359_v0 = vrot.slane %v4939_v44, 1  ;;  %5827 = vst [vmem:[#allocation38_spill] sm:$0xff] %v4977_v2  ;;  %v1000_v62 = vrot.slane %v4755_v53, 2 }
  0x4b   : > { %v4983_v41 = vsel %vm949_vm3, %v986_v61, %v988_v49  ;;  %v998_v49 = vrot.slane %v4747_v45, 2 }
  0x4c   : > { %v4986_v57 = vsel %vm282_vm1, %v358_v37, %v359_v0  ;;  %v5001_v37 = vsel %vm282_vm1, %v359_v0, %v361_v23  ;;  %v5036_v23 = vld [vmem:[%s5715_s1 + $0xc] sm:$0xf] }
  0x4d   : > { %3770 = vmatmul.mubr.msk.f32.gmra.mrb[26].mxu1 %vm363_vm2, %v4948_v38  ;;  %3996 = vmatmul.mubr.msk.f32.gmra.mrb[10].mxu0 %vm363_vm2, %v4951_v13  ;;  %5828 = vst [vmem:[#allocation39_spill] sm:$0xff] %v4986_v57  ;;  %v993_v38 = vrot.slane %v4707_v17, 2  ;;  %v4990_v13 = vsel %vm949_vm3, %v990_v34, %v991_v33  ;;  %5829 = vst [vmem:[#allocation40_spill] sm:$0xff] %v5001_v37  ;;  %v1001_v34 = vrot.slane %v4758_v55, 2 }
  0x4e   : > { %3772 = vmatprep.mubr.msk.f32.mxu1 %vm363_vm2, %v4957_v14  ;;  %3998 = vmatprep.mubr.msk.f32.mxu0 %vm363_vm2, %v4966_v39  ;;  %v995_v14 = vrot.slane %v4727_v28, 2  ;;  %v5023_v45 = vsel %vm949_vm3, %v996_v27, %v998_v49 }
  0x4f   : > { %v5006_v17 = vsel %vm949_vm3, %v991_v33, %v993_v38  ;;  %v5027_v0 = vsel %vm949_vm3, %v1000_v62, %v1001_v34  ;;  %v1005_v38 = vrot.slane %v4787_v22, 2  ;;  %v1006_v33 = vrot.slane %v4790_v24, 2 }
  0x50   : > { %v5010_v61 = vsel %vm949_vm3, %v995_v14, %v996_v27  ;;  %v1003_v14 = vrot.slane %v4779_v16, 2  ;;  %v1008_v27 = vrot.slane %v4821_v56, 2  ;;  %v1010_v62 = vrot.slane %v4829_v8, 2 }
  0x51   : > { %3773 = vmatmul.mubr.msk.f32.gmra.mrb[28].mxu1 %vm363_vm2, %v4977_v2  ;;  %3999 = vmatmul.mubr.msk.f32.gmra.mrb[12].mxu0 %vm363_vm2, %v4983_v41  ;;  %v5051_v49 = vsel %vm949_vm3, %v1005_v38, %v1006_v33  ;;  %v1015_v38 = vrot.slane %v4866_v46, 2  ;;  %v1026_v2 = vrot.slane %v4939_v44, 2 }
  0x52   : > { %3775 = vmatprep.mubr.msk.f32.mxu1 %vm363_vm2, %v4986_v57  ;;  %4001 = vmatprep.mubr.msk.f32.mxu0 %vm363_vm2, %v4990_v13  ;;  %v5047_v16 = vsel %vm949_vm3, %v1001_v34, %v1003_v14  ;;  %5830 = vst [vmem:[#allocation41_spill] sm:$0xff] %v5051_v49  ;;  %v5066_v56 = vsel %vm949_vm3, %v1006_v33, %v1008_v27  ;;  %v1013_v34 = vrot.slane %v4858_v52, 2  ;;  %v1018_v33 = vrot.slane %v4893_v36, 2 }
  0x53   : > { %v1021_v57 = vrot.slane %v4904_v54, 2 }
  0x55   : > { %3776 = vmatmul.mubr.msk.f32.gmra.mrb[30].mxu1 %vm363_vm2, %v5001_v37  ;;  %4002 = vmatmul.mubr.msk.f32.gmra.mrb[14].mxu0 %vm363_vm2, %v5006_v17  ;;  %v1016_v37 = vrot.slane %v4869_v12, 2 }
  0x56   : > { %3780 = vmatprep.mubr.msk.f32.mxu1 %vm363_vm2, %v4512_v4  ;;  %4004 = vmatprep.mubr.msk.f32.mxu0 %vm363_vm2, %v5010_v61 }
  0x57   : > { %v5087_v27 = vsel %vm949_vm3, %v1015_v38, %v1016_v37  ;;  %v5100_v36 = vsel %vm949_vm3, %v1016_v37, %v1018_v33  ;;  %v1025_v38 = vrot.slane %v4936_v40, 2  ;;  %v1028_v37 = vrot.slane %v4963_v48, 2 }
  0x58   : > { %5832 = vst [vmem:[#allocation43_spill] sm:$0xff] %v5087_v27  ;;  %5833 = vst [vmem:[#allocation44_spill] sm:$0xff] %v5100_v36 }
  0x59   : > { %3781 = vmatmul.mubr.msk.f32.vlgmr.msra.gmra.mrb[0].mxu1 %vm363_vm2, %v4515_v5  ;;  %4005 = vmatmul.mubr.msk.f32.gmra.mrb[16].mxu0 %vm363_vm2, %v5023_v45  ;;  %v5127_v33 = vsel %vm949_vm3, %v1025_v38, %v1026_v2  ;;  %v5143_v48 = vsel %vm949_vm3, %v1026_v2, %v1028_v37  ;;  %v951_v38 = vrot.slane %v4515_v5, 2  ;;  %v953_v37 = vrot.slane %v4527_v11, 2  ;;  %v5840_v5 = vld [vmem:[#allocation20_spill] sm:$0xff]  ;;  %v5841_v11 = vld [vmem:[#allocation22_spill] sm:$0xff] }
  0x5a   : > { %3829 = vmatpush3.msk.msra.mxu1 %vm428_vm0, %v4584_v35  ;;  %3783 = vmatprep.mubr.msk.f32.mxu1 %vm363_vm2, %v4518_v6  ;;  %v1011_v35 = vrot.slane %v4832_v10, 2  ;;  %v5114_v6 = vld [vmem:[%s4509_s25 + $0x188] sm:$0xff]  ;;  %5836 = vst [vmem:[#allocation47_spill] sm:$0xff] %v5127_v33  ;;  %5837 = vst [vmem:[#allocation48_spill] sm:$0xff] %v5143_v48 }
  0x5b   : > { %4007 = vmatprep.mubr.msk.f32.mxu0 %vm363_vm2, %v5027_v0  ;;  %3878 = vmatprep.subr.msk.mxu1 %vm428_vm0, %v5036_v23 }
  0x5c   : > { %v5070_v14 = vsel %vm949_vm3, %v1010_v62, %v1011_v35  ;;  %v5083_v52 = vsel %vm949_vm3, %v1011_v35, %v1013_v34  ;;  %v1020_v62 = vrot.slane %v4901_v20, 2  ;;  %v1023_v35 = vrot.slane %v4928_v60, 2 }
  0x5d   : > { %3784 = vmatmul.mubr.msk.f32.gmra.mrb[2].mxu1 %vm363_vm2, %v4523_v9  ;;  %4008 = vmatmul.mubr.msk.f32.gmra.mrb[18].mxu0 %vm363_vm2, %v5047_v16  ;;  %5831 = vst [vmem:[#allocation42_spill] sm:$0xff] %v5083_v52  ;;  %v5111_v9 = vld [vmem:[%s4509_s25 + $0x180] sm:$0xff] }
  0x5e   : > { %3786 = vmatprep.mubr.msk.f32.mxu1 %vm363_vm2, %v4535_v15  ;;  %4010 = vmatprep.mubr.msk.f32.mxu0 %vm363_vm2, %v5051_v49  ;;  %v5104_v34 = vsel %vm949_vm3, %v1020_v62, %v1021_v57  ;;  %v5123_v60 = vsel %vm949_vm3, %v1021_v57, %v1023_v35  ;;  %v1890_v62 = vrot.slane %v5111_v9, 2 }
  0x5f   : > { %5834 = vst [vmem:[#allocation45_spill] sm:$0xff] %v5104_v34  ;;  %5835 = vst [vmem:[#allocation46_spill] sm:$0xff] %v5123_v60 }
  0x61   : > { %3787 = vmatmul.mubr.msk.f32.gmra.mrb[4].mxu1 %vm363_vm2, %v4540_v18  ;;  %4011 = vmatmul.mubr.msk.f32.gmra.mrb[20].mxu0 %vm363_vm2, %v5066_v56 }
  0x62   : > { %3789 = vmatprep.mubr.msk.f32.mxu1 %vm363_vm2, %v4552_v25  ;;  %4013 = vmatprep.mubr.msk.f32.mxu0 %vm363_vm2, %v5070_v14 }
  0x65   : > { %3790 = vmatmul.mubr.msk.f32.gmra.mrb[6].mxu1 %vm363_vm2, %v4555_v26  ;;  %4014 = vmatmul.mubr.msk.f32.gmra.mrb[22].mxu0 %vm363_vm2, %v5083_v52  ;;  %v5132_v52 = vld [vmem:[%s4509_s25 + $0x190] sm:$0x3] }
  0x66   : > { %3792 = vmatprep.mubr.msk.f32.mxu1 %vm363_vm2, %v4566_v31  ;;  %4016 = vmatprep.mubr.msk.f32.mxu0 %vm363_vm2, %v5087_v27  ;;  %v1891_v27 = vrot.slane %v5114_v6, 2  ;;  %v1893_v57 = vrot.slane %v5132_v52, 2 }
  0x68   : > { %v5147_v35 = vsel %vm949_vm3, %v1890_v62, %v1891_v27  ;;  %v5158_v2 = vsel %vm949_vm3, %v1891_v27, %v1893_v57  ;;  %v5173_v27 = vld [vmem:[%s5715_s1 + $0x20] sm:$0xf] }
  0x69   : > { %3793 = vmatmul.mubr.msk.f32.gmra.mrb[8].mxu1 %vm363_vm2, %v4569_v32  ;;  %4017 = vmatmul.mubr.msk.f32.gmra.mrb[24].mxu0 %vm363_vm2, %v5100_v36  ;;  %5838 = vst [vmem:[#allocation49_spill] sm:$0xff] %v5147_v35  ;;  %5839 = vst [vmem:[#allocation50_spill] sm:$0xff] %v5158_v2  ;;  %v5845_v57 = vld [vmem:[#allocation30_spill] sm:$0xff] }
  0x6a   : > { %3795 = vmatprep.mubr.msk.f32.mxu1 %vm363_vm2, %v4606_v42  ;;  %4019 = vmatprep.mubr.msk.f32.mxu0 %vm363_vm2, %v5104_v34 }
  0x6d   : > { %3796 = vmatmul.mubr.msk.f32.gmra.mrb[10].mxu1 %vm363_vm2, %v4609_v43  ;;  %4020 = vmatmul.mubr.msk.f32.gmra.mrb[26].mxu0 %vm363_vm2, %v5123_v60 }
  0x6e   : > { %3798 = vmatprep.mubr.msk.f32.mxu1 %vm363_vm2, %v4634_v50  ;;  %4022 = vmatprep.mubr.msk.f32.mxu0 %vm363_vm2, %v5127_v33 }
  0x71   : > { %3799 = vmatmul.mubr.msk.f32.gmra.mrb[12].mxu1 %vm363_vm2, %v4637_v51  ;;  %4023 = vmatmul.mubr.msk.f32.gmra.mrb[28].mxu0 %vm363_vm2, %v5143_v48 }
  0x72   : > { %3801 = vmatprep.mubr.msk.f32.mxu1 %vm363_vm2, %v4660_v58  ;;  %4025 = vmatprep.mubr.msk.f32.mxu0 %vm363_vm2, %v5147_v35  ;;  %v5850_v35 = vld [vmem:[#allocation6_spill] sm:$0xff] }
  0x75   : > { %3802 = vmatmul.mubr.msk.f32.gmra.mrb[14].mxu1 %vm363_vm2, %v4663_v59  ;;  %4026 = vmatmul.mubr.msk.f32.gmra.mrb[30].mxu0 %vm363_vm2, %v5158_v2  ;;  %v5849_v2 = vld [vmem:[#allocation5_spill] sm:$0xff] }
  0x76   : > { %3804 = vmatprep.mubr.msk.f32.mxu1 %vm363_vm2, %v4686_v3  ;;  %4030 = vmatprep.mubr.msk.f32.mxu0 %vm363_vm2, %v4535_v15 }
  0x79   : > { %3805 = vmatmul.mubr.msk.f32.gmra.mrb[16].mxu1 %vm363_vm2, %v4689_v7  ;;  %4031 = vmatmul.mubr.msk.f32.vlgmr.msra.gmra.mrb[0].mxu0 %vm363_vm2, %v4540_v18 }
  0x7a   : > { %3807 = vmatprep.mubr.msk.f32.mxu1 %vm363_vm2, %v4727_v28  ;;  %4079 = vmatpush3.msk.msra.mxu0 %vm428_vm0, %v4797_v30  ;;  %v950_v30 = vrot.slane %v4512_v4, 2  ;;  %v954_v4 = vsel %vm949_vm3, %v951_v38, %v953_v37  ;;  %v5847_v37 = vld [vmem:[#allocation36_spill] sm:$0xff] }
  0x7b   : > { %4033 = vmatprep.mubr.msk.f32.mxu0 %vm363_vm2, %v4552_v25  ;;  %4128 = vmatprep.subr.msk.mxu0 %vm428_vm0, %v5173_v27 }
  0x7c   : > { %v952_v62 = vsel %vm949_vm3, %v950_v30, %v951_v38  ;;  %v5846_v30 = vld [vmem:[#allocation32_spill] sm:$0xff]  ;;  %v5297_v38 = vld [vmem:[%s4509_s25 + $0x198] sm:$0xff] }
  0x7d   : > { %3808 = vmatmul.mubr.msk.f32.gmra.mrb[18].mxu1 %vm363_vm2, %v4730_v29  ;;  %4034 = vmatmul.mubr.msk.f32.gmra.mrb[2].mxu0 %vm363_vm2, %v4555_v26 }
  0x7e   : > { %3810 = vmatprep.mubr.msk.f32.mxu1 %vm363_vm2, %v4755_v53  ;;  %4036 = vmatprep.mubr.msk.f32.mxu0 %vm363_vm2, %v4566_v31 }
  0x81   : > { %3811 = vmatmul.mubr.msk.f32.gmra.mrb[20].mxu1 %vm363_vm2, %v4758_v55  ;;  %4037 = vmatmul.mubr.msk.f32.gmra.mrb[4].mxu0 %vm363_vm2, %v4569_v32 }
  0x82   : > { %3813 = vmatprep.mubr.msk.f32.mxu1 %vm363_vm2, %v4787_v22  ;;  %4039 = vmatprep.mubr.msk.f32.mxu0 %vm363_vm2, %v4606_v42 }
  0x85   : > { %3814 = vmatmul.mubr.msk.f32.gmra.mrb[22].mxu1 %vm363_vm2, %v4790_v24  ;;  %4040 = vmatmul.mubr.msk.f32.gmra.mrb[6].mxu0 %vm363_vm2, %v4609_v43 }
  0x86   : > { %3816 = vmatprep.mubr.msk.f32.mxu1 %vm363_vm2, %v4829_v8  ;;  %4042 = vmatprep.mubr.msk.f32.mxu0 %vm363_vm2, %v4634_v50 }
  0x89   : > { %3817 = vmatmul.mubr.msk.f32.gmra.mrb[24].mxu1 %vm363_vm2, %v4832_v10  ;;  %4043 = vmatmul.mubr.msk.f32.gmra.mrb[8].mxu0 %vm363_vm2, %v4637_v51 }
  0x8a   : > { %3819 = vmatprep.mubr.msk.f32.mxu1 %vm363_vm2, %v4866_v46  ;;  %4045 = vmatprep.mubr.msk.f32.mxu0 %vm363_vm2, %v4660_v58 }
  0x8d   : > { %3820 = vmatmul.mubr.msk.f32.gmra.mrb[26].mxu1 %vm363_vm2, %v4869_v12  ;;  %4046 = vmatmul.mubr.msk.f32.gmra.mrb[10].mxu0 %vm363_vm2, %v4663_v59 }
  0x8e   : > { %3822 = vmatprep.mubr.msk.f32.mxu1 %vm363_vm2, %v4901_v20  ;;  %4048 = vmatprep.mubr.msk.f32.mxu0 %vm363_vm2, %v4686_v3 }
  0x91   : > { %3823 = vmatmul.mubr.msk.f32.gmra.mrb[28].mxu1 %vm363_vm2, %v4904_v54  ;;  %4049 = vmatmul.mubr.msk.f32.gmra.mrb[12].mxu0 %vm363_vm2, %v4689_v7 }
  0x92   : > { %3825 = vmatprep.mubr.msk.f32.mxu1 %vm363_vm2, %v4936_v40  ;;  %4051 = vmatprep.mubr.msk.f32.mxu0 %vm363_vm2, %v4727_v28 }
  0x95   : > { %3826 = vmatmul.mubr.msk.f32.gmra.mrb[30].mxu1 %vm363_vm2, %v4939_v44  ;;  %4052 = vmatmul.mubr.msk.f32.gmra.mrb[14].mxu0 %vm363_vm2, %v4730_v29 }
  0x96   : > { %3830 = vmatprep.mubr.msk.f32.mxu1 %vm363_vm2, %v952_v62  ;;  %4054 = vmatprep.mubr.msk.f32.mxu0 %vm363_vm2, %v4755_v53  ;;  %v5308_v62 = vld [vmem:[%s4509_s25 + $0x1a0] sm:$0xff] }
  0x99   : > { %3831 = vmatmul.mubr.msk.f32.vlgmr.msra.gmra.mrb[0].mxu1 %vm363_vm2, %v954_v4  ;;  %4055 = vmatmul.mubr.msk.f32.gmra.mrb[16].mxu0 %vm363_vm2, %v4758_v55  ;;  %v5848_v4 = vld [vmem:[#allocation4_spill] sm:$0xff] }
  0x9a   : > { %3879 = vmatpush3.msk.msra.mxu1 %vm428_vm0, %v5036_v23  ;;  %3833 = vmatprep.mubr.msk.f32.mxu1 %vm363_vm2, %v4750_v47  ;;  %v5842_v47 = vld [vmem:[#allocation24_spill] sm:$0xff] }
  0x9b   : > { %4057 = vmatprep.mubr.msk.f32.mxu0 %vm363_vm2, %v4787_v22  ;;  %4178 = vmatprep.subr.msk.mxu1 %vm428_vm0, %v4487_v1  ;;  %v5844_v23 = vld [vmem:[#allocation28_spill] sm:$0xff] }
  0x9d   : > { %3834 = vmatmul.mubr.msk.f32.gmra.mrb[2].mxu1 %vm363_vm2, %v4771_v63  ;;  %4058 = vmatmul.mubr.msk.f32.gmra.mrb[18].mxu0 %vm363_vm2, %v4790_v24  ;;  %v5843_v63 = vld [vmem:[#allocation26_spill] sm:$0xff] }
  0x9e   : > { %3836 = vmatprep.mubr.msk.f32.mxu1 %vm363_vm2, %v4782_v21  ;;  %4060 = vmatprep.mubr.msk.f32.mxu0 %vm363_vm2, %v4829_v8 }
  0xa1   : > { %3837 = vmatmul.mubr.msk.f32.gmra.mrb[4].mxu1 %vm363_vm2, %v5840_v5  ;;  %4061 = vmatmul.mubr.msk.f32.gmra.mrb[20].mxu0 %vm363_vm2, %v4832_v10 }
  0xa2   : > { %3839 = vmatprep.mubr.msk.f32.mxu1 %vm363_vm2, %v5841_v11  ;;  %4063 = vmatprep.mubr.msk.f32.mxu0 %vm363_vm2, %v4866_v46 }
  0xa5   : > { %3840 = vmatmul.mubr.msk.f32.gmra.mrb[6].mxu1 %vm363_vm2, %v5842_v47  ;;  %4064 = vmatmul.mubr.msk.f32.gmra.mrb[22].mxu0 %vm363_vm2, %v4869_v12 }
  0xa6   : > { %3842 = vmatprep.mubr.msk.f32.mxu1 %vm363_vm2, %v5843_v63  ;;  %4066 = vmatprep.mubr.msk.f32.mxu0 %vm363_vm2, %v4901_v20 }
  0xa9   : > { %3843 = vmatmul.mubr.msk.f32.gmra.mrb[8].mxu1 %vm363_vm2, %v5844_v23  ;;  %4067 = vmatmul.mubr.msk.f32.gmra.mrb[24].mxu0 %vm363_vm2, %v4904_v54 }
  0xaa   : > { %3845 = vmatprep.mubr.msk.f32.mxu1 %vm363_vm2, %v5845_v57  ;;  %4069 = vmatprep.mubr.msk.f32.mxu0 %vm363_vm2, %v4936_v40 }
  0xad   : > { %3846 = vmatmul.mubr.msk.f32.gmra.mrb[10].mxu1 %vm363_vm2, %v5846_v30  ;;  %4070 = vmatmul.mubr.msk.f32.gmra.mrb[26].mxu0 %vm363_vm2, %v4939_v44  ;;  %v5851_v44 = vld [vmem:[#allocation7_spill] sm:$0xff] }
  0xae   : > { %3848 = vmatprep.mubr.msk.f32.mxu1 %vm363_vm2, %v4931_v19  ;;  %4072 = vmatprep.mubr.msk.f32.mxu0 %vm363_vm2, %v5111_v9 }
  0xb1   : > { %3849 = vmatmul.mubr.msk.f32.gmra.mrb[12].mxu1 %vm363_vm2, %v5847_v37  ;;  %4073 = vmatmul.mubr.msk.f32.gmra.mrb[28].mxu0 %vm363_vm2, %v5114_v6 }
  0xb2   : > { %3851 = vmatprep.mubr.msk.f32.mxu1 %vm363_vm2, %v4966_v39  ;;  %4075 = vmatprep.mubr.msk.f32.mxu0 %vm363_vm2, %v5297_v38 }
  0xb5   : > { %3852 = vmatmul.mubr.msk.f32.gmra.mrb[14].mxu1 %vm363_vm2, %v4983_v41  ;;  %4076 = vmatmul.mubr.msk.f32.gmra.mrb[30].mxu0 %vm363_vm2, %v5308_v62 }
  0xb6   : > { %3854 = vmatprep.mubr.msk.f32.mxu1 %vm363_vm2, %v4990_v13  ;;  %4080 = vmatprep.mubr.msk.f32.mxu0 %vm363_vm2, %v5848_v4  ;;  %v5852_v4 = vld [vmem:[#allocation8_spill] sm:$0xff] }
  0xb9   : > { %3855 = vmatmul.mubr.msk.f32.gmra.mrb[16].mxu1 %vm363_vm2, %v5006_v17  ;;  %4081 = vmatmul.mubr.msk.f32.vlgmr.msra.gmra.mrb[0].mxu0 %vm363_vm2, %v5849_v2  ;;  %v5853_v2 = vld [vmem:[#allocation9_spill] sm:$0xff] }
  0xba   : > { %3857 = vmatprep.mubr.msk.f32.mxu1 %vm363_vm2, %v5010_v61  ;;  %4129 = vmatpush3.msk.msra.mxu0 %vm428_vm0, %v5173_v27  ;;  %v5856_v27 = vld [vmem:[#allocation12_spill] sm:$0xff] }
  0xbb   : > { %4083 = vmatprep.mubr.msk.f32.mxu0 %vm363_vm2, %v5850_v35  ;;  %v5854_v35 = vld [vmem:[#allocation10_spill] sm:$0xff] }
  0xbd   : > { %3858 = vmatmul.mubr.msk.f32.gmra.mrb[18].mxu1 %vm363_vm2, %v5023_v45  ;;  %4084 = vmatmul.mubr.msk.f32.gmra.mrb[2].mxu0 %vm363_vm2, %v5851_v44  ;;  %v5855_v44 = vld [vmem:[#allocation11_spill] sm:$0xff] }
  0xbe   : > { %3860 = vmatprep.mubr.msk.f32.mxu1 %vm363_vm2, %v5027_v0  ;;  %4086 = vmatprep.mubr.msk.f32.mxu0 %vm363_vm2, %v5852_v4  ;;  %v5857_v4 = vld [vmem:[#allocation42_spill] sm:$0xff] }
  0xc1   : > { %3861 = vmatmul.mubr.msk.f32.gmra.mrb[20].mxu1 %vm363_vm2, %v5047_v16  ;;  %4087 = vmatmul.mubr.msk.f32.gmra.mrb[4].mxu0 %vm363_vm2, %v5853_v2  ;;  %v5858_v2 = vld [vmem:[#allocation13_spill] sm:$0xff] }
  0xc2   : > { %3863 = vmatprep.mubr.msk.f32.mxu1 %vm363_vm2, %v5051_v49  ;;  %4089 = vmatprep.mubr.msk.f32.mxu0 %vm363_vm2, %v5854_v35  ;;  %v5859_v49 = vld [vmem:[#allocation43_spill] sm:$0xff]  ;;  %v5860_v35 = vld [vmem:[#allocation14_spill] sm:$0xff] }
  0xc5   : > { %3864 = vmatmul.mubr.msk.f32.gmra.mrb[22].mxu1 %vm363_vm2, %v5066_v56  ;;  %4090 = vmatmul.mubr.msk.f32.gmra.mrb[6].mxu0 %vm363_vm2, %v5855_v44  ;;  %v5861_v44 = vld [vmem:[#allocation15_spill] sm:$0xff] }
  0xc6   : > { %3866 = vmatprep.mubr.msk.f32.mxu1 %vm363_vm2, %v5070_v14  ;;  %4092 = vmatprep.mubr.msk.f32.mxu0 %vm363_vm2, %v5856_v27  ;;  %v5862_v27 = vld [vmem:[#allocation16_spill] sm:$0xff] }
  0xc9   : > { %3867 = vmatmul.mubr.msk.f32.gmra.mrb[24].mxu1 %vm363_vm2, %v5857_v4  ;;  %4093 = vmatmul.mubr.msk.f32.gmra.mrb[8].mxu0 %vm363_vm2, %v5858_v2  ;;  %v5863_v2 = vld [vmem:[#allocation17_spill] sm:$0xff] }
  0xca   : > { %3869 = vmatprep.mubr.msk.f32.mxu1 %vm363_vm2, %v5859_v49  ;;  %4095 = vmatprep.mubr.msk.f32.mxu0 %vm363_vm2, %v5860_v35  ;;  %v5864_v35 = vld [vmem:[#allocation18_spill] sm:$0xff] }
  0xcd   : > { %3870 = vmatmul.mubr.msk.f32.gmra.mrb[26].mxu1 %vm363_vm2, %v5100_v36  ;;  %4096 = vmatmul.mubr.msk.f32.gmra.mrb[10].mxu0 %vm363_vm2, %v5861_v44  ;;  %v5865_v44 = vld [vmem:[#allocation19_spill] sm:$0xff] }
  0xce   : > { %3872 = vmatprep.mubr.msk.f32.mxu1 %vm363_vm2, %v5104_v34  ;;  %4098 = vmatprep.mubr.msk.f32.mxu0 %vm363_vm2, %v5862_v27  ;;  %v5866_v34 = vld [vmem:[#allocation2_spill] sm:$0xff]  ;;  %v5867_v27 = vld [vmem:[#allocation21_spill] sm:$0xff]  ;;  %v5435_v36 = vld [vmem:[%s4509_s25 + $0x1a8] sm:$0x3] }
  0xd1   : > { %3873 = vmatmul.mubr.msk.f32.gmra.mrb[28].mxu1 %vm363_vm2, %v5123_v60  ;;  %4099 = vmatmul.mubr.msk.f32.gmra.mrb[12].mxu0 %vm363_vm2, %v5863_v2  ;;  %v5868_v60 = vld [vmem:[#allocation3_spill] sm:$0xff] }
  0xd2   : > { %3875 = vmatprep.mubr.msk.f32.mxu1 %vm363_vm2, %v5127_v33  ;;  %4101 = vmatprep.mubr.msk.f32.mxu0 %vm363_vm2, %v5864_v35  ;;  %v5869_v2 = vld [vmem:[#allocation23_spill] sm:$0xff]  ;;  %v5877_v33 = vld [vmem:[#allocation38_spill] sm:$0xff] }
  0xd5   : > { %3876 = vmatmul.mubr.msk.f32.gmra.mrb[30].mxu1 %vm363_vm2, %v5143_v48  ;;  %4102 = vmatmul.mubr.msk.f32.gmra.mrb[14].mxu0 %vm363_vm2, %v5865_v44  ;;  %v5870_v48 = vld [vmem:[#allocation25_spill] sm:$0xff] }
  0xd6   : > { %3880 = vmatprep.mubr.msk.f32.mxu1 %vm363_vm2, %v5866_v34  ;;  %4104 = vmatprep.mubr.msk.f32.mxu0 %vm363_vm2, %v5867_v27  ;;  %v5871_v34 = vld [vmem:[#allocation27_spill] sm:$0xff] }
  0xd9   : > { %3881 = vmatmul.mubr.msk.f32.vlgmr.msra.gmra.mrb[0].mxu1 %vm363_vm2, %v5868_v60  ;;  %4105 = vmatmul.mubr.msk.f32.gmra.mrb[16].mxu0 %vm363_vm2, %v5869_v2  ;;  %v5872_v60 = vld [vmem:[#allocation29_spill] sm:$0xff] }
  0xda   : > { %4179 = vmatpush3.msk.msra.mxu1 %vm428_vm0, %v4487_v1  ;;  %3883 = vmatprep.mubr.msk.f32.mxu1 %vm363_vm2, %v4535_v15  ;;  %v5873_v1 = vld [vmem:[#allocation31_spill] sm:$0xff]  ;;  %v5874_v15 = vld [vmem:[#allocation33_spill] sm:$0xff] }
  0xdb   : > { %4107 = vmatprep.mubr.msk.f32.mxu0 %vm363_vm2, %v5870_v48 }
  0xdd   : > { %3884 = vmatmul.mubr.msk.f32.gmra.mrb[2].mxu1 %vm363_vm2, %v4540_v18  ;;  %4108 = vmatmul.mubr.msk.f32.gmra.mrb[18].mxu0 %vm363_vm2, %v5871_v34  ;;  %v5875_v18 = vld [vmem:[#allocation35_spill] sm:$0xff] }
  0xde   : > { %3886 = vmatprep.mubr.msk.f32.mxu1 %vm363_vm2, %v4552_v25  ;;  %4110 = vmatprep.mubr.msk.f32.mxu0 %vm363_vm2, %v5872_v60  ;;  %v5876_v25 = vld [vmem:[#allocation37_spill] sm:$0xff] }
  0xe1   : > { %3887 = vmatmul.mubr.msk.f32.gmra.mrb[4].mxu1 %vm363_vm2, %v4555_v26  ;;  %4111 = vmatmul.mubr.msk.f32.gmra.mrb[20].mxu0 %vm363_vm2, %v5873_v1  ;;  %v1621_v26 = vrot.slane %v5111_v9, 1 }
  0xe2   : > { %3889 = vmatprep.mubr.msk.f32.mxu1 %vm363_vm2, %v4566_v31  ;;  %4113 = vmatprep.mubr.msk.f32.mxu0 %vm363_vm2, %v5874_v15  ;;  %v1622_v31 = vrot.slane %v5114_v6, 1 }
  0xe4   : > { %v5432_v15 = vsel %vm282_vm1, %v1621_v26, %v1622_v31 }
  0xe5   : > { %3890 = vmatmul.mubr.msk.f32.gmra.mrb[6].mxu1 %vm363_vm2, %v4569_v32  ;;  %4114 = vmatmul.mubr.msk.f32.gmra.mrb[22].mxu0 %vm363_vm2, %v5875_v18  ;;  %v5878_v32 = vld [vmem:[#allocation39_spill] sm:$0xff]  ;;  %v2427_v18 = vrot.slane %v5308_v62, 1 }
  0xe6   : > { %3892 = vmatprep.mubr.msk.f32.mxu1 %vm363_vm2, %v4606_v42  ;;  %4116 = vmatprep.mubr.msk.f32.mxu0 %vm363_vm2, %v5876_v25  ;;  %v1624_v42 = vrot.slane %v5132_v52, 1  ;;  %v2426_v25 = vrot.slane %v5297_v38, 1  ;;  %v2429_v52 = vrot.slane %v5435_v36, 1 }
  0xe8   : > { %v2428_v26 = vsel %vm282_vm1, %v2426_v25, %v2427_v18 }
  0xe9   : > { %3893 = vmatmul.mubr.msk.f32.gmra.mrb[8].mxu1 %vm363_vm2, %v4609_v43  ;;  %4117 = vmatmul.mubr.msk.f32.gmra.mrb[24].mxu0 %vm363_vm2, %v5877_v33  ;;  %v5879_v43 = vld [vmem:[#allocation40_spill] sm:$0xff] }
  0xea   : > { %3895 = vmatprep.mubr.msk.f32.mxu1 %vm363_vm2, %v4634_v50  ;;  %4119 = vmatprep.mubr.msk.f32.mxu0 %vm363_vm2, %v5878_v32  ;;  %v5446_v50 = vsel %vm282_vm1, %v1622_v31, %v1624_v42 }
  0xed   : > { %3896 = vmatmul.mubr.msk.f32.gmra.mrb[10].mxu1 %vm363_vm2, %v4637_v51  ;;  %4120 = vmatmul.mubr.msk.f32.gmra.mrb[26].mxu0 %vm363_vm2, %v5879_v43  ;;  %v2430_v51 = vsel %vm282_vm1, %v2427_v18, %v2429_v52 }
  0xee   : > { %3898 = vmatprep.mubr.msk.f32.mxu1 %vm363_vm2, %v4660_v58  ;;  %4122 = vmatprep.mubr.msk.f32.mxu0 %vm363_vm2, %v5432_v15  ;;  %v5883_v58 = vld [vmem:[#allocation33_spill] sm:$0xff] }
  0xf1   : > { %3899 = vmatmul.mubr.msk.f32.gmra.mrb[12].mxu1 %vm363_vm2, %v4663_v59  ;;  %4123 = vmatmul.mubr.msk.f32.gmra.mrb[28].mxu0 %vm363_vm2, %v5446_v50  ;;  %v5884_v59 = vld [vmem:[#allocation45_spill] sm:$0xff] }
  0xf2   : > { %3901 = vmatprep.mubr.msk.f32.mxu1 %vm363_vm2, %v4686_v3  ;;  %4125 = vmatprep.mubr.msk.f32.mxu0 %vm363_vm2, %v2428_v26  ;;  %v5885_v3 = vld [vmem:[#allocation35_spill] sm:$0xff] }
  0xf5   : > { %3902 = vmatmul.mubr.msk.f32.gmra.mrb[14].mxu1 %vm363_vm2, %v4689_v7  ;;  %4126 = vmatmul.mubr.msk.f32.gmra.mrb[30].mxu0 %vm363_vm2, %v2430_v51  ;;  %v5886_v7 = vld [vmem:[#allocation46_spill] sm:$0xff] }
  0xf6   : > { %3904 = vmatprep.mubr.msk.f32.mxu1 %vm363_vm2, %v4727_v28  ;;  %4130 = vmatprep.mubr.msk.f32.mxu0 %vm363_vm2, %v4782_v21  ;;  %v2695_v28 = vrot.slane %v5297_v38, 2  ;;  %v2698_v21 = vrot.slane %v5435_v36, 2 }
  0xf9   : > { %3905 = vmatmul.mubr.msk.f32.gmra.mrb[16].mxu1 %vm363_vm2, %v4730_v29  ;;  %4131 = vmatmul.mubr.msk.f32.vlgmr.msra.gmra.mrb[0].mxu0 %vm363_vm2, %v5840_v5  ;;  %v2696_v29 = vrot.slane %v5308_v62, 2 }
  0xfa   : > { %3907 = vmatprep.mubr.msk.f32.mxu1 %vm363_vm2, %v4755_v53  ;;  %4133 = vmatprep.mubr.msk.f32.mxu0 %vm363_vm2, %v5841_v11  ;;  %v5889_v53 = vld [vmem:[#allocation48_spill] sm:$0xff] }
  0xfd   : > { %3908 = vmatmul.mubr.msk.f32.gmra.mrb[18].mxu1 %vm363_vm2, %v4758_v55  ;;  %4134 = vmatmul.mubr.msk.f32.gmra.mrb[2].mxu0 %vm363_vm2, %v5842_v47  ;;  %v5890_v55 = vld [vmem:[#allocation49_spill] sm:$0xff] }
  0xfe   : > { %3910 = vmatprep.mubr.msk.f32.mxu1 %vm363_vm2, %v4787_v22  ;;  %4136 = vmatprep.mubr.msk.f32.mxu0 %vm363_vm2, %v5843_v63  ;;  %v5888_v22 = vld [vmem:[#allocation47_spill] sm:$0xff] }
 0x101   : > { %3911 = vmatmul.mubr.msk.f32.gmra.mrb[20].mxu1 %vm363_vm2, %v4790_v24  ;;  %4137 = vmatmul.mubr.msk.f32.gmra.mrb[4].mxu0 %vm363_vm2, %v5844_v23  ;;  %v2697_v24 = vsel %vm949_vm3, %v2695_v28, %v2696_v29 }
 0x102   : > { %3913 = vmatprep.mubr.msk.f32.mxu1 %vm363_vm2, %v4829_v8  ;;  %4139 = vmatprep.mubr.msk.f32.mxu0 %vm363_vm2, %v5845_v57  ;;  %v5887_v8 = vld [vmem:[#allocation37_spill] sm:$0xff] }
 0x105   : > { %3914 = vmatmul.mubr.msk.f32.gmra.mrb[22].mxu1 %vm363_vm2, %v4832_v10  ;;  %4140 = vmatmul.mubr.msk.f32.gmra.mrb[6].mxu0 %vm363_vm2, %v5846_v30  ;;  %v5891_v10 = vld [vmem:[#allocation50_spill] sm:$0xff] }
 0x106   : > { %3916 = vmatprep.mubr.msk.f32.mxu1 %vm363_vm2, %v4866_v46  ;;  %4142 = vmatprep.mubr.msk.f32.mxu0 %vm363_vm2, %v4931_v19  ;;  %v5880_v46 = vld [vmem:[#allocation34_spill] sm:$0xff] }
 0x109   : > { %3917 = vmatmul.mubr.msk.f32.gmra.mrb[24].mxu1 %vm363_vm2, %v4869_v12  ;;  %4143 = vmatmul.mubr.msk.f32.gmra.mrb[8].mxu0 %vm363_vm2, %v5847_v37  ;;  %v2699_v12 = vsel %vm949_vm3, %v2696_v29, %v2698_v21 }
 0x10a   : > { %3919 = vmatprep.mubr.msk.f32.mxu1 %vm363_vm2, %v4901_v20  ;;  %4145 = vmatprep.mubr.msk.f32.mxu0 %vm363_vm2, %v4966_v39 }
 0x10d   : > { %3920 = vmatmul.mubr.msk.f32.gmra.mrb[26].mxu1 %vm363_vm2, %v4904_v54  ;;  %4146 = vmatmul.mubr.msk.f32.gmra.mrb[10].mxu0 %vm363_vm2, %v4983_v41 }
 0x10e   : > { %3922 = vmatprep.mubr.msk.f32.mxu1 %vm363_vm2, %v4936_v40  ;;  %4148 = vmatprep.mubr.msk.f32.mxu0 %vm363_vm2, %v4990_v13 }
 0x111   : > { %3923 = vmatmul.mubr.msk.f32.gmra.mrb[28].mxu1 %vm363_vm2, %v5880_v46  ;;  %4149 = vmatmul.mubr.msk.f32.gmra.mrb[12].mxu0 %vm363_vm2, %v5006_v17 }
 0x112   : > { %3925 = vmatprep.mubr.msk.f32.mxu1 %vm363_vm2, %v5111_v9  ;;  %4151 = vmatprep.mubr.msk.f32.mxu0 %vm363_vm2, %v5010_v61  ;;  %v5881_v9 = vld [vmem:[#allocation41_spill] sm:$0xff] }
 0x115   : > { %3926 = vmatmul.mubr.msk.f32.gmra.mrb[30].mxu1 %vm363_vm2, %v5114_v6  ;;  %4152 = vmatmul.mubr.msk.f32.gmra.mrb[14].mxu0 %vm363_vm2, %v5023_v45  ;;  %v5882_v6 = vld [vmem:[#allocation44_spill] sm:$0xff] }
 0x116   : > { %3954 = vmatprep.mubr.msk.f32.mxu1 %vm363_vm2, %v5864_v35  ;;  %4154 = vmatprep.mubr.msk.f32.mxu0 %vm363_vm2, %v5027_v0 }
 0x119   : > { %3955 = vmatmul.mubr.msk.f32.vlgmr.msra.gmra.mrb[16].mxu1 %vm363_vm2, %v5865_v44  ;;  %4155 = vmatmul.mubr.msk.f32.gmra.mrb[16].mxu0 %vm363_vm2, %v5047_v16 }
 0x11a   : > { %3957 = vmatprep.mubr.msk.f32.mxu1 %vm363_vm2, %v5867_v27  ;;  %4157 = vmatprep.mubr.msk.f32.mxu0 %vm363_vm2, %v5881_v9 }
 0x11d   : > { %3958 = vmatmul.mubr.msk.f32.gmra.mrb[18].mxu1 %vm363_vm2, %v5869_v2  ;;  %4158 = vmatmul.mubr.msk.f32.gmra.mrb[18].mxu0 %vm363_vm2, %v5066_v56 }
 0x11e   : > { %3960 = vmatprep.mubr.msk.f32.mxu1 %vm363_vm2, %v5870_v48  ;;  %4160 = vmatprep.mubr.msk.f32.mxu0 %vm363_vm2, %v5070_v14  ;;  %v5603_v48 = vld [vmem:[%s5716_s2] ss:$0 sm:$0xff] }
 0x121   : > { %3961 = vmatmul.mubr.msk.f32.gmra.mrb[20].mxu1 %vm363_vm2, %v5871_v34  ;;  %4161 = vmatmul.mubr.msk.f32.gmra.mrb[20].mxu0 %vm363_vm2, %v5857_v4 }
 0x122   : > { %3963 = vmatprep.mubr.msk.f32.mxu1 %vm363_vm2, %v5872_v60  ;;  %4163 = vmatprep.mubr.msk.f32.mxu0 %vm363_vm2, %v5859_v49 }
 0x125   : > { %3964 = vmatmul.mubr.msk.f32.gmra.mrb[22].mxu1 %vm363_vm2, %v5873_v1  ;;  %4164 = vmatmul.mubr.msk.f32.gmra.mrb[22].mxu0 %vm363_vm2, %v5882_v6 }
 0x126   : > { %3966 = vmatprep.mubr.msk.f32.mxu1 %vm363_vm2, %v5883_v58  ;;  %4166 = vmatprep.mubr.msk.f32.mxu0 %vm363_vm2, %v5884_v59 }
 0x129   : > { %3967 = vmatmul.mubr.msk.f32.gmra.mrb[24].mxu1 %vm363_vm2, %v5885_v3  ;;  %4167 = vmatmul.mubr.msk.f32.gmra.mrb[24].mxu0 %vm363_vm2, %v5886_v7 }
 0x12a   : > { %3969 = vmatprep.mubr.msk.f32.mxu1 %vm363_vm2, %v5887_v8  ;;  %4169 = vmatprep.mubr.msk.f32.mxu0 %vm363_vm2, %v5888_v22 }
 0x12d   : > { %3970 = vmatmul.mubr.msk.f32.gmra.mrb[26].mxu1 %vm363_vm2, %v5877_v33  ;;  %4170 = vmatmul.mubr.msk.f32.gmra.mrb[26].mxu0 %vm363_vm2, %v5889_v53 }
 0x12e   : > { %3972 = vmatprep.mubr.msk.f32.mxu1 %vm363_vm2, %v5878_v32  ;;  %4172 = vmatprep.mubr.msk.f32.mxu0 %vm363_vm2, %v5890_v55 }
 0x131   : > { %3973 = vmatmul.mubr.msk.f32.gmra.mrb[28].mxu1 %vm363_vm2, %v5879_v43  ;;  %4173 = vmatmul.mubr.msk.f32.gmra.mrb[28].mxu0 %vm363_vm2, %v5891_v10 }
 0x132   : > { %3975 = vmatprep.mubr.msk.f32.mxu1 %vm363_vm2, %v5432_v15  ;;  %4175 = vmatprep.mubr.msk.f32.mxu0 %vm363_vm2, %v2697_v24 }
 0x135   : > { %3976 = vmatmul.mubr.msk.f32.gmra.mrb[30].mxu1 %vm363_vm2, %v5446_v50  ;;  %4176 = vmatmul.mubr.msk.f32.gmra.mrb[30].mxu0 %vm363_vm2, %v2699_v12 }
 0x1ac   : > { %v3882_v40 = vpop.f32.mrb[0].mxu1 }
 0x1ad   : > { %v1429_v20 = vpop.f32.mrb[1].mxu1 }
 0x1b0   : > { %v3885_v54 = vpop.f32.mrb[2].mxu1 }
 0x1b1   : > { %v1439_v19 = vpop.f32.mrb[3].mxu1 }
 0x1b4   : > { %v3888_v13 = vpop.f32.mrb[4].mxu1 }
 0x1b5   : > { %v1449_v39 = vpop.f32.mrb[5].mxu1 }
 0x1b8   : > { %v3891_v41 = vpop.f32.mrb[6].mxu1 }
 0x1b9   : > { %v1459_v17 = vpop.f32.mrb[7].mxu1 }
 0x1bc   : > { %v3894_v61 = vpop.f32.mrb[8].mxu1 }
 0x1bd   : > { %v1469_v45 = vpop.f32.mrb[9].mxu1 }
 0x1c0   : > { %v3897_v0 = vpop.f32.mrb[10].mxu1 }
 0x1c1   : > { %v1479_v16 = vpop.f32.mrb[11].mxu1 }
 0x1c4   : > { %v5592_v49 = vpop.f32.mrb[12].mxu1 }
 0x1c5   : > { %v5594_v56 = vpop.f32.mrb[13].mxu1 }
 0x1c8   : > { %v5596_v14 = vpop.f32.mrb[14].mxu1 }
 0x1c9   : > { %v5598_v36 = vpop.f32.mrb[15].mxu1 }
 0x1cc   : > { %v4132_v33 = vpop.f32.mrb[0].mxu0 }
 0x1cd   : > { %v4180_v5 = vadd.f32 %v4132_v33, %v3882_v40  ;;  %v2773_v11 = vpop.f32.mrb[1].mxu0 }
 0x1ce   : > { %v4181_v47 = vadd.f32 %v2773_v11, %v1429_v20 }
 0x1cf   : > { %v2972_v63 = vadd.f32 %v4180_v5, %v5603_v48 }
 0x1d0   : > { %v2971_v23 = vadd.f32 %v4181_v47, %v5603_v48  ;;  %v4135_v57 = vpop.f32.mrb[2].mxu0 }
 0x1d1   : > { %v3004_v30 = vmax.f32 %v2972_v63, 0.0  ;;  %v4182_v38 = vadd.f32 %v4135_v57, %v3885_v54  ;;  %v2783_v37 = vpop.f32.mrb[3].mxu0 }
 0x1d2   : > { %v3003_v62 = vmax.f32 %v2971_v23, 0.0  ;;  %v4183_v4 = vadd.f32 %v2783_v37, %v1439_v19 }
 0x1d3   : > { %3036 = vst.msk [vmem:[%s5610_s16 + $0x8] sm:$0xff] %vm363_vm2, %v3004_v30  ;;  %v2974_v35 = vadd.f32 %v4182_v38, %v5603_v48 }
 0x1d4   : > { %3035 = vst.msk [vmem:[%s5610_s16] sm:$0xff] %vm363_vm2, %v3003_v62  ;;  %v2973_v44 = vadd.f32 %v4183_v4, %v5603_v48  ;;  %v4138_v27 = vpop.f32.mrb[4].mxu0 }
 0x1d5   : > { %v3006_v2 = vmax.f32 %v2974_v35, 0.0  ;;  %v4184_v34 = vadd.f32 %v4138_v27, %v3888_v13  ;;  %v2793_v60 = vpop.f32.mrb[5].mxu0 }
 0x1d6   : > { %v3005_v1 = vmax.f32 %v2973_v44, 0.0  ;;  %v4185_v15 = vadd.f32 %v2793_v60, %v1449_v39 }
 0x1d7   : > { %3038 = vst.msk [vmem:[%s5610_s16 + $0x18] sm:$0xff] %vm363_vm2, %v3006_v2  ;;  %v2976_v18 = vadd.f32 %v4184_v34, %v5603_v48 }
 0x1d8   : > { %3037 = vst.msk [vmem:[%s5610_s16 + $0x10] sm:$0xff] %vm363_vm2, %v3005_v1  ;;  %v2975_v25 = vadd.f32 %v4185_v15, %v5603_v48  ;;  %v4141_v31 = vpop.f32.mrb[6].mxu0 }
 0x1d9   : > { %v3008_v32 = vmax.f32 %v2976_v18, 0.0  ;;  %v4186_v42 = vadd.f32 %v4141_v31, %v3891_v41  ;;  %v2803_v43 = vpop.f32.mrb[7].mxu0 }
 0x1da   : > { %v3007_v50 = vmax.f32 %v2975_v25, 0.0  ;;  %v4187_v52 = vadd.f32 %v2803_v43, %v1459_v17 }
 0x1db   : > { %3040 = vst.msk [vmem:[%s5610_s16 + $0x28] sm:$0xff] %vm363_vm2, %v3008_v32  ;;  %v2978_v26 = vadd.f32 %v4186_v42, %v5603_v48 }
 0x1dc   : > { %3039 = vst.msk [vmem:[%s5610_s16 + $0x20] sm:$0xff] %vm363_vm2, %v3007_v50  ;;  %v2977_v51 = vadd.f32 %v4187_v52, %v5603_v48  ;;  %v4144_v46 = vpop.f32.mrb[8].mxu0 }
 0x1dd   : > { %v3010_v9 = vmax.f32 %v2978_v26, 0.0  ;;  %v4188_v6 = vadd.f32 %v4144_v46, %v3894_v61  ;;  %v2813_v58 = vpop.f32.mrb[9].mxu0 }
 0x1de   : > { %v3009_v59 = vmax.f32 %v2977_v51, 0.0  ;;  %v4189_v3 = vadd.f32 %v2813_v58, %v1469_v45 }
 0x1df   : > { %3042 = vst.msk [vmem:[%s5610_s16 + $0x38] sm:$0xff] %vm363_vm2, %v3010_v9  ;;  %v2980_v7 = vadd.f32 %v4188_v6, %v5603_v48 }
 0x1e0   : > { %3041 = vst.msk [vmem:[%s5610_s16 + $0x30] sm:$0xff] %vm363_vm2, %v3009_v59  ;;  %v2979_v8 = vadd.f32 %v4189_v3, %v5603_v48  ;;  %v4147_v22 = vpop.f32.mrb[10].mxu0 }
 0x1e1   : > { %v3012_v28 = vmax.f32 %v2980_v7, 0.0  ;;  %v4190_v29 = vadd.f32 %v4147_v22, %v3897_v0  ;;  %v2823_v53 = vpop.f32.mrb[11].mxu0 }
 0x1e2   : > { %v3011_v55 = vmax.f32 %v2979_v8, 0.0  ;;  %v4191_v21 = vadd.f32 %v2823_v53, %v1479_v16 }
 0x1e3   : > { %3044 = vst.msk [vmem:[%s5610_s16 + $0x48] sm:$0xff] %vm363_vm2, %v3012_v28  ;;  %v2982_v24 = vadd.f32 %v4190_v29, %v5603_v48 }
 0x1e4   : > { %3043 = vst.msk [vmem:[%s5610_s16 + $0x40] sm:$0xff] %vm363_vm2, %v3011_v55  ;;  %v2981_v10 = vadd.f32 %v4191_v21, %v5603_v48  ;;  %v4150_v12 = vpop.f32.mrb[12].mxu0 }
 0x1e5   : > { %v3014_v40 = vmax.f32 %v2982_v24, 0.0  ;;  %v4192_v20 = vadd.f32 %v4150_v12, %v5592_v49  ;;  %v2833_v54 = vpop.f32.mrb[13].mxu0 }
 0x1e6   : > { %v3013_v19 = vmax.f32 %v2981_v10, 0.0  ;;  %v4193_v13 = vadd.f32 %v2833_v54, %v5594_v56 }
 0x1e7   : > { %3046 = vst.msk [vmem:[%s5610_s16 + $0x58] sm:$0xff] %vm363_vm2, %v3014_v40  ;;  %v2984_v39 = vadd.f32 %v4192_v20, %v5603_v48 }
 0x1e8   : > { %3045 = vst.msk [vmem:[%s5610_s16 + $0x50] sm:$0xff] %vm363_vm2, %v3013_v19  ;;  %v2983_v41 = vadd.f32 %v4193_v13, %v5603_v48  ;;  %v4153_v17 = vpop.f32.mrb[14].mxu0 }
 0x1e9   : > { %v3016_v61 = vmax.f32 %v2984_v39, 0.0  ;;  %v4194_v45 = vadd.f32 %v4153_v17, %v5596_v14  ;;  %v2843_v0 = vpop.f32.mrb[15].mxu0 }
 0x1ea   : > { %v3015_v16 = vmax.f32 %v2983_v41, 0.0  ;;  %v4195_v49 = vadd.f32 %v2843_v0, %v5598_v36 }
 0x1eb   : > { %3048 = vst.msk [vmem:[%s5610_s16 + $0x68] sm:$0xff] %vm363_vm2, %v3016_v61  ;;  %v2986_v56 = vadd.f32 %v4194_v45, %v5603_v48 }
 0x1ec   : > { %v3956_v33 = vpop.f32.mrb[16].mxu1  ;;  %3047 = vst.msk [vmem:[%s5610_s16 + $0x60] sm:$0xff] %vm363_vm2, %v3015_v16  ;;  %v2985_v5 = vadd.f32 %v4195_v49, %v5603_v48  ;;  %v4156_v11 = vpop.f32.mrb[16].mxu0 }
 0x1ed   : > { %v1779_v47 = vpop.f32.mrb[17].mxu1  ;;  %v3018_v63 = vmax.f32 %v2986_v56, 0.0  ;;  %v4196_v23 = vadd.f32 %v4156_v11, %v3956_v33  ;;  %v2853_v14 = vpop.f32.mrb[17].mxu0 }
 0x1ee   : > { %v3017_v57 = vmax.f32 %v2985_v5, 0.0  ;;  %v4197_v30 = vadd.f32 %v2853_v14, %v1779_v47 }
 0x1ef   : > { %3050 = vst.msk [vmem:[%s5610_s16 + $0x78] sm:$0xff] %vm363_vm2, %v3018_v63  ;;  %v2988_v36 = vadd.f32 %v4196_v23, %v5603_v48 }
 0x1f0   : > { %v3959_v38 = vpop.f32.mrb[18].mxu1  ;;  %3049 = vst.msk [vmem:[%s5610_s16 + $0x70] sm:$0xff] %vm363_vm2, %v3017_v57  ;;  %v2987_v37 = vadd.f32 %v4197_v30, %v5603_v48  ;;  %v4159_v62 = vpop.f32.mrb[18].mxu0 }
 0x1f1   : > { %v1789_v4 = vpop.f32.mrb[19].mxu1  ;;  %v3020_v35 = vmax.f32 %v2988_v36, 0.0  ;;  %v4198_v44 = vadd.f32 %v4159_v62, %v3959_v38  ;;  %v2863_v27 = vpop.f32.mrb[19].mxu0 }
 0x1f2   : > { %v3019_v2 = vmax.f32 %v2987_v37, 0.0  ;;  %v4199_v34 = vadd.f32 %v2863_v27, %v1789_v4 }
 0x1f3   : > { %3052 = vst.msk [vmem:[%s5610_s16 + $0x88] sm:$0xff] %vm363_vm2, %v3020_v35  ;;  %v2990_v60 = vadd.f32 %v4198_v44, %v5603_v48 }
 0x1f4   : > { %v3962_v1 = vpop.f32.mrb[20].mxu1  ;;  %3051 = vst.msk [vmem:[%s5610_s16 + $0x80] sm:$0xff] %vm363_vm2, %v3019_v2  ;;  %v2989_v15 = vadd.f32 %v4199_v34, %v5603_v48  ;;  %v4162_v18 = vpop.f32.mrb[20].mxu0 }
 0x1f5   : > { %v1799_v25 = vpop.f32.mrb[21].mxu1  ;;  %v3022_v31 = vmax.f32 %v2990_v60, 0.0  ;;  %v4200_v32 = vadd.f32 %v4162_v18, %v3962_v1  ;;  %v2873_v42 = vpop.f32.mrb[21].mxu0 }
 0x1f6   : > { %v3021_v43 = vmax.f32 %v2989_v15, 0.0  ;;  %v4201_v50 = vadd.f32 %v2873_v42, %v1799_v25 }
 0x1f7   : > { %3054 = vst.msk [vmem:[%s5610_s16 + $0x98] sm:$0xff] %vm363_vm2, %v3022_v31  ;;  %v2992_v52 = vadd.f32 %v4200_v32, %v5603_v48 }
 0x1f8   : > { %v3965_v26 = vpop.f32.mrb[22].mxu1  ;;  %3053 = vst.msk [vmem:[%s5610_s16 + $0x90] sm:$0xff] %vm363_vm2, %v3021_v43  ;;  %v2991_v51 = vadd.f32 %v4201_v50, %v5603_v48  ;;  %v4165_v46 = vpop.f32.mrb[22].mxu0 }
 0x1f9   : > { %v1809_v9 = vpop.f32.mrb[23].mxu1  ;;  %v3024_v6 = vmax.f32 %v2992_v52, 0.0  ;;  %v4202_v58 = vadd.f32 %v4165_v46, %v3965_v26  ;;  %v2883_v59 = vpop.f32.mrb[23].mxu0 }
 0x1fa   : > { %v3023_v3 = vmax.f32 %v2991_v51, 0.0  ;;  %v4203_v7 = vadd.f32 %v2883_v59, %v1809_v9 }
 0x1fb   : > { %3056 = vst.msk [vmem:[%s5610_s16 + $0xa8] sm:$0xff] %vm363_vm2, %v3024_v6  ;;  %v2994_v8 = vadd.f32 %v4202_v58, %v5603_v48 }
 0x1fc   : > { %v3968_v22 = vpop.f32.mrb[24].mxu1  ;;  %3055 = vst.msk [vmem:[%s5610_s16 + $0xa0] sm:$0xff] %vm363_vm2, %v3023_v3  ;;  %v2993_v28 = vadd.f32 %v4203_v7, %v5603_v48  ;;  %v4168_v29 = vpop.f32.mrb[24].mxu0 }
 0x1fd   : > { %v1819_v53 = vpop.f32.mrb[25].mxu1  ;;  %v3026_v55 = vmax.f32 %v2994_v8, 0.0  ;;  %v4204_v21 = vadd.f32 %v4168_v29, %v3968_v22  ;;  %v2893_v24 = vpop.f32.mrb[25].mxu0 }
 0x1fe   : > { %v3025_v10 = vmax.f32 %v2993_v28, 0.0  ;;  %v4205_v12 = vadd.f32 %v2893_v24, %v1819_v53 }
 0x1ff   : > { %3058 = vst.msk [vmem:[%s5610_s16 + $0xb8] sm:$0xff] %vm363_vm2, %v3026_v55  ;;  %v2996_v40 = vadd.f32 %v4204_v21, %v5603_v48 }
 0x200   : > { %v3971_v20 = vpop.f32.mrb[26].mxu1  ;;  %3057 = vst.msk [vmem:[%s5610_s16 + $0xb0] sm:$0xff] %vm363_vm2, %v3025_v10  ;;  %v2995_v54 = vadd.f32 %v4205_v12, %v5603_v48  ;;  %v4171_v19 = vpop.f32.mrb[26].mxu0 }
 0x201   : > { %v1829_v13 = vpop.f32.mrb[27].mxu1  ;;  %v3028_v39 = vmax.f32 %v2996_v40, 0.0  ;;  %v4206_v41 = vadd.f32 %v4171_v19, %v3971_v20  ;;  %v2903_v17 = vpop.f32.mrb[27].mxu0 }
 0x202   : > { %v3027_v61 = vmax.f32 %v2995_v54, 0.0  ;;  %v4207_v45 = vadd.f32 %v2903_v17, %v1829_v13 }
 0x203   : > { %3060 = vst.msk [vmem:[%s5610_s16 + $0xc8] sm:$0xff] %vm363_vm2, %v3028_v39  ;;  %v2998_v0 = vadd.f32 %v4206_v41, %v5603_v48 }
 0x204   : > { %v3974_v16 = vpop.f32.mrb[28].mxu1  ;;  %3059 = vst.msk [vmem:[%s5610_s16 + $0xc0] sm:$0xff] %vm363_vm2, %v3027_v61  ;;  %v2997_v49 = vadd.f32 %v4207_v45, %v5603_v48  ;;  %v4174_v56 = vpop.f32.mrb[28].mxu0 }
 0x205   : > { %v1839_v33 = vpop.f32.mrb[29].mxu1  ;;  %v3030_v5 = vmax.f32 %v2998_v0, 0.0  ;;  %v4208_v11 = vadd.f32 %v4174_v56, %v3974_v16  ;;  %v2913_v47 = vpop.f32.mrb[29].mxu0 }
 0x206   : > { %v3029_v63 = vmax.f32 %v2997_v49, 0.0  ;;  %v4209_v23 = vadd.f32 %v2913_v47, %v1839_v33 }
 0x207   : > { %3062 = vst.msk [vmem:[%s5610_s16 + $0xd8] sm:$0xff] %vm363_vm2, %v3030_v5  ;;  %v3000_v14 = vadd.f32 %v4208_v11, %v5603_v48 }
 0x208   : > { %v3977_v57 = vpop.f32.mrb[30].mxu1  ;;  %3061 = vst.msk [vmem:[%s5610_s16 + $0xd0] sm:$0xff] %vm363_vm2, %v3029_v63  ;;  %v2999_v30 = vadd.f32 %v4209_v23, %v5603_v48  ;;  %v4177_v36 = vpop.f32.mrb[30].mxu0 }
 0x209   : > { %v1849_v38 = vpop.f32.mrb[31].mxu1  ;;  %v3032_v37 = vmax.f32 %v3000_v14, 0.0  ;;  %v4210_v62 = vadd.f32 %v4177_v36, %v3977_v57  ;;  %v2923_v4 = vpop.f32.mrb[31].mxu0 }
 0x20a   : > { %v3031_v35 = vmax.f32 %v2999_v30, 0.0  ;;  %v4211_v44 = vadd.f32 %v2923_v4, %v1849_v38 }
 0x20b   : > { %3064 = vst.msk [vmem:[%s5610_s16 + $0xe8] sm:$0xff] %vm363_vm2, %v3032_v37  ;;  %v3002_v27 = vadd.f32 %v4210_v62, %v5603_v48 }
 0x20c   : > { %3063 = vst.msk [vmem:[%s5610_s16 + $0xe0] sm:$0xff] %vm363_vm2, %v3031_v35  ;;  %v3001_v2 = vadd.f32 %v4211_v44, %v5603_v48 }
 0x20d   : > { %v3034_v34 = vmax.f32 %v3002_v27, 0.0 }
 0x20e   : > { %v3033_v60 = vmax.f32 %v3001_v2, 0.0 }
 0x20f   : > { %3066 = vst.msk [vmem:[%s5610_s16 + $0xf8] sm:$0xff] %vm363_vm2, %v3034_v34 }
 0x210   : > { %3065 = vst.msk [vmem:[%s5610_s16 + $0xf0] sm:$0xff] %vm363_vm2, %v3033_v60 }
 0x211 PF: > { %s13_s12 = sadd.s32 1, %s4451_s12  }
 0x212   : > { %p10_p4 = scmp.ge.s32.totalorder %s13_s12, 4  }
 0x214   :  { %12 = sbr.rel (!%p10_p4) target bundleno = 1 (0x1), region = 62 }

// kernel: hybrid_forward.8
= control target key start
LH: loop header
LB: loop body
LE: loop exit
PB: predicated region body
PF: predicated region fallthrough
CT: control target
= control target key end

     0   :  { %s850_s24 = smov 0   ;;  %s994_s0 = inlined_call_operand.vmem [shape: f32[2,6,6,16], index: 0, kind: input, shape index: {}]   ;;  %s995_s1 = inlined_call_operand.vmem [shape: f32[2,6,6,16], index: 1, kind: input, shape index: {}]   ;;  %s996_s2 = inlined_call_operand.vmem [shape: f32[2,6,6,16], index: 2, kind: input, shape index: {}]   ;;  %s997_s3 = inlined_call_operand.vmem [shape: f32[2,6,6,16], index: 3, kind: input, shape index: {}]   ;;  %s998_s4 = inlined_call_operand.vmem [shape: f32[9,16], index: 4, kind: input, shape index: {}]   ;;  %s999_s5 = inlined_call_operand.vmem [shape: f32[16,4], index: 5, kind: input, shape index: {}]   ;;  %s1000_s6 = inlined_call_operand.vmem [shape: f32[1,4], index: 6, kind: input, shape index: {}]   ;;  %s1001_s7 = inlined_call_operand.vmem [shape: f32[2,4,4,4], index: 7, kind: output, shape index: {}]  }
   0x1 LB: > { %s760_s25 = sadd.s32 4294967295, %s808_s24   ;;  %p764_p0 = scmp.ge.s32.totalorder %s808_s24, 1  ;;  %s808_s24 = sphi %s850_s24, %s17_s24  }
   0x2   : > { %p267_p1 = scmp.lt.s32.totalorder %s808_s24, 3 }
   0x4   : > { %p268_p2 = pnand %p764_p0, %p267_p1 }
   0x5   : > { %v563_v0 = vld [vmem:[%s999_s5] sm:$0xff] (!%p268_p2)  ;;  %v564_v1 = vld [vmem:[%s999_s5 + $0x8] sm:$0xff] (!%p268_p2)  ;;  %p314_p3 = scmp.lt.s32.totalorder (!%p268_p2), %s760_s25, 1  ;;  %v383_v2 = vlaneseq (!%p268_p2)  ;;  %vm578_vm0 = vcmask (!%p268_p2), 130048   ;;  %vm664_vm1 = vcmask (!%p268_p2), 27648  }
   0x6   : > { %271 = sbr.rel (%p268_p2) target bundleno = 276 (0x114), region = 48  ;;  %v789_v3 = vpack.c.bf16 (!%p268_p2), %v564_v1, %v563_v0  ;;  %v381_v9 = vld [vmem:[%s998_s4] sm:$0xff] (!%p268_p2) }
   0x7   : > { %v384_v4 = vshrl.u32 (!%p268_p2), %v383_v2, 7 }
   0x8   : > { %790 = vmatprep.subr.bf16.mxu0 (!%p268_p2), %v789_v3 }
   0x9   : > { %792 = vmatpush3.bf16.msra.mxu0 (!%p268_p2), %v789_v3  ;;  %v385_v5 = vsub.s32 (!%p268_p2), 0, %v384_v4  ;;  %v397_v6 = vsub.s32 (!%p268_p2), 1, %v384_v4  ;;  %v421_v7 = vsub.s32 (!%p268_p2), 2, %v384_v4  ;;  %v445_v8 = vsub.s32 (!%p268_p2), 3, %v384_v4 }
   0xa   : > { %v457_v10 = vsub.s32 (!%p268_p2), 4, %v384_v4  ;;  %v481_v11 = vsub.s32 (!%p268_p2), 5, %v384_v4  ;;  %v505_v12 = vsub.s32 (!%p268_p2), 6, %v384_v4  ;;  %v517_v13 = vsub.s32 (!%p268_p2), 7, %v384_v4 }
   0xb   : > { %v902_v29 = vrot.slane (!%p268_p2), %v381_v9, %v385_v5  ;;  %v907_v34 = vrot.slane (!%p268_p2), %v381_v9, %v397_v6  ;;  %v909_v35 = vrot.slane (!%p268_p2), %v381_v9, %v421_v7  ;;  %v911_v36 = vrot.slane (!%p268_p2), %v381_v9, %v445_v8 }
   0xc   : > { %v914_v41 = vrot.slane (!%p268_p2), %v381_v9, %v457_v10  ;;  %v918_v45 = vrot.slane (!%p268_p2), %v381_v9, %v481_v11  ;;  %v920_v46 = vrot.slane (!%p268_p2), %v381_v9, %v505_v12  ;;  %v922_v47 = vrot.slane (!%p268_p2), %v381_v9, %v517_v13 }
   0xd   : > { %s1003_s25 = smov (!%p314_p3, %s760_s25), 1 }
   0xe   : > { %s793_s30 = smul.u32 48, %s1003_s25  ;;  %s777_s26 = sshll.u32 %s1003_s25, 4 }
   0xf   : > { %s338_s8 = scalar_lea.vmem %s1001_s7, %s777_s26 }
  0x10   : > { %s870_s10 = scalar_lea.vmem %s994_s0, %s793_s30  ;;  %s875_s13 = scalar_lea.vmem %s995_s1, %s793_s30 }
  0x11   : > { %s883_s18 = scalar_lea.vmem %s996_s2, %s793_s30  ;;  %v339_v14 = vld [vmem:[%s870_s10] sm:$0x3f]  ;;  %v340_v15 = vld [vmem:[%s870_s10 + $0x8] sm:$0x3f]  ;;  %v341_v16 = vld [vmem:[%s870_s10 + $0x10] sm:$0x3f]  ;;  %s891_s21 = scalar_lea.vmem %s997_s3, %s793_s30 }
  0x12   : > { %v342_v17 = vld [vmem:[%s870_s10 + $0x18] sm:$0x3f]  ;;  %v345_v18 = vld [vmem:[%s875_s13] sm:$0x3f]  ;;  %v346_v19 = vld [vmem:[%s875_s13 + $0x8] sm:$0x3f] }
  0x13   : > { %v347_v20 = vld [vmem:[%s875_s13 + $0x10] sm:$0x3f]  ;;  %v348_v21 = vld [vmem:[%s875_s13 + $0x18] sm:$0x3f]  ;;  %v357_v22 = vld [vmem:[%s883_s18] sm:$0x3f]  ;;  %v351_v23 = vmax.f32 %v339_v14, %v345_v18  ;;  %v352_v24 = vmax.f32 %v340_v15, %v346_v19 }
  0x14   : > { %v353_v25 = vmax.f32 %v341_v16, %v347_v20  ;;  %v358_v26 = vld [vmem:[%s883_s18 + $0x8] sm:$0x3f]  ;;  %v359_v27 = vld [vmem:[%s883_s18 + $0x10] sm:$0x3f]  ;;  %v360_v28 = vld [vmem:[%s883_s18 + $0x18] sm:$0x3f]  ;;  %v354_v30 = vmax.f32 %v342_v17, %v348_v21 }
  0x15   : > { %v363_v31 = vld [vmem:[%s891_s21] sm:$0x3f]  ;;  %v364_v32 = vld [vmem:[%s891_s21 + $0x8] sm:$0x3f]  ;;  %v365_v33 = vld [vmem:[%s891_s21 + $0x10] sm:$0x3f] }
  0x16   : > { %v366_v37 = vld [vmem:[%s891_s21 + $0x18] sm:$0x3f]  ;;  %v369_v38 = vmax.f32 %v357_v22, %v363_v31  ;;  %v370_v39 = vmax.f32 %v358_v26, %v364_v32  ;;  %v371_v40 = vmax.f32 %v359_v27, %v365_v33  ;;  %v343_v42 = vld [vmem:[%s870_s10 + $0x20] sm:$0x3f]  ;;  %v344_v43 = vld [vmem:[%s870_s10 + $0x28] sm:$0x3f] }
  0x17   : > { %v372_v44 = vmax.f32 %v360_v28, %v366_v37  ;;  %v349_v48 = vld [vmem:[%s875_s13 + $0x20] sm:$0x3f]  ;;  %v350_v49 = vld [vmem:[%s875_s13 + $0x28] sm:$0x3f] }
  0x18   : > { %v361_v50 = vld [vmem:[%s883_s18 + $0x20] sm:$0x3f]  ;;  %v375_v51 = vmax.f32 %v351_v23, %v369_v38  ;;  %v376_v52 = vmax.f32 %v352_v24, %v370_v39  ;;  %v377_v53 = vmax.f32 %v353_v25, %v371_v40  ;;  %v355_v54 = vmax.f32 %v343_v42, %v349_v48  ;;  %v362_v55 = vld [vmem:[%s883_s18 + $0x28] sm:$0x3f] }
  0x19   : > { %v367_v56 = vld [vmem:[%s891_s21 + $0x20] sm:$0x3f]  ;;  %v368_v57 = vld [vmem:[%s891_s21 + $0x28] sm:$0x3f]  ;;  %v930_v58 = vmax.f32 %v354_v30, %v372_v44  ;;  %v356_v59 = vmax.f32 %v344_v43, %v350_v49 }
  0x1a   : > { %v373_v60 = vmax.f32 %v361_v50, %v367_v56  ;;  %v374_v61 = vmax.f32 %v362_v55, %v368_v57  ;;  %v387_v62 = vmul.f32 %v902_v29, %v375_v51  ;;  %v388_v63 = vmul.f32 %v902_v29, %v376_v52  ;;  %v947_v14 = vld [vmem:[%s998_s4 + $0x8] ss:$0 sm:$0xff] }
  0x1b   : > { %v399_v0 = vmul.f32 %v907_v34, %v375_v51  ;;  %v400_v1 = vmul.f32 %v907_v34, %v376_v52  ;;  %v423_v2 = vmul.f32 %v909_v35, %v375_v51  ;;  %v424_v3 = vmul.f32 %v909_v35, %v376_v52 }
  0x1c   : > { %v447_v4 = vmul.f32 %v911_v36, %v376_v52  ;;  %v448_v5 = vmul.f32 %v911_v36, %v377_v53  ;;  %v459_v8 = vmul.f32 %v914_v41, %v376_v52  ;;  %v460_v9 = vmul.f32 %v914_v41, %v377_v53 }
  0x1d   : > { %v407_v6 = vrot.slane %v399_v0, 1  ;;  %v408_v7 = vrot.slane %v400_v1, 1  ;;  %v431_v10 = vrot.slane %v423_v2, 2  ;;  %v432_v11 = vrot.slane %v424_v3, 2 }
  0x1e   : > { %v483_v12 = vmul.f32 %v918_v45, %v376_v52  ;;  %v484_v13 = vmul.f32 %v918_v45, %v377_v53  ;;  %v467_v17 = vrot.slane %v459_v8, 1  ;;  %v468_v18 = vrot.slane %v460_v9, 1 }
  0x1f   : > { %v415_v15 = vadd.f32 %v407_v6, %v387_v62  ;;  %v416_v16 = vadd.f32 %v408_v7, %v388_v63  ;;  %v507_v21 = vmul.f32 %v920_v46, %v377_v53  ;;  %v508_v22 = vmul.f32 %v920_v46, %v930_v58 }
  0x20   : > { %v491_v19 = vrot.slane %v483_v12, 2  ;;  %v492_v20 = vrot.slane %v484_v13, 2  ;;  %v519_v25 = vmul.f32 %v922_v47, %v377_v53  ;;  %v520_v26 = vmul.f32 %v922_v47, %v930_v58 }
  0x21   : > { %v439_v23 = vadd.f32 %v431_v10, %v415_v15  ;;  %v440_v24 = vadd.f32 %v432_v11, %v416_v16  ;;  %v543_v27 = vmul.f32 %v947_v14, %v377_v53  ;;  %v544_v28 = vmul.f32 %v947_v14, %v930_v58 }
  0x22   : > { %v379_v30 = vmax.f32 %v355_v54, %v373_v60  ;;  %v380_v31 = vmax.f32 %v356_v59, %v374_v61  ;;  %v527_v37 = vrot.slane %v519_v25, 1  ;;  %v528_v38 = vrot.slane %v520_v26, 1 }
  0x23   : > { %v451_v32 = vadd.f32 %v447_v4, %v439_v23  ;;  %v452_v33 = vadd.f32 %v448_v5, %v440_v24  ;;  %v551_v39 = vrot.slane %v543_v27, 2  ;;  %v552_v40 = vrot.slane %v544_v28, 2 }
  0x24   : > { %v389_v42 = vmul.f32 %v902_v29, %v377_v53  ;;  %v390_v43 = vmul.f32 %v902_v29, %v930_v58  ;;  %v401_v49 = vmul.f32 %v907_v34, %v377_v53  ;;  %v402_v50 = vmul.f32 %v907_v34, %v930_v58 }
  0x25   : > { %v475_v44 = vadd.f32 %v467_v17, %v451_v32  ;;  %v476_v48 = vadd.f32 %v468_v18, %v452_v33  ;;  %v425_v51 = vmul.f32 %v909_v35, %v377_v53  ;;  %v426_v52 = vmul.f32 %v909_v35, %v930_v58 }
  0x26   : > { %v449_v54 = vmul.f32 %v911_v36, %v930_v58  ;;  %v450_v55 = vmul.f32 %v911_v36, %v379_v30  ;;  %v409_v29 = vrot.slane %v401_v49, 1  ;;  %v410_v59 = vrot.slane %v402_v50, 1 }
  0x27   : > { %v499_v56 = vadd.f32 %v491_v19, %v475_v44  ;;  %v500_v57 = vadd.f32 %v492_v20, %v476_v48  ;;  %v433_v60 = vrot.slane %v425_v51, 2  ;;  %v434_v61 = vrot.slane %v426_v52, 2 }
  0x28   : > { %v461_v62 = vmul.f32 %v914_v41, %v930_v58  ;;  %v462_v34 = vmul.f32 %v914_v41, %v379_v30  ;;  %v417_v0 = vadd.f32 %v409_v29, %v389_v42  ;;  %v418_v35 = vadd.f32 %v410_v59, %v390_v43 }
  0x29   : > { %v511_v53 = vadd.f32 %v507_v21, %v499_v56  ;;  %v512_v63 = vadd.f32 %v508_v22, %v500_v57  ;;  %v485_v36 = vmul.f32 %v918_v45, %v930_v58  ;;  %v486_v3 = vmul.f32 %v918_v45, %v379_v30 }
  0x2a   : > { %v469_v1 = vrot.slane %v461_v62, 1  ;;  %v470_v2 = vrot.slane %v462_v34, 1  ;;  %v441_v6 = vadd.f32 %v433_v60, %v417_v0  ;;  %v442_v7 = vadd.f32 %v434_v61, %v418_v35 }
  0x2b   : > { %v535_v4 = vadd.f32 %v527_v37, %v511_v53  ;;  %v536_v5 = vadd.f32 %v528_v38, %v512_v63  ;;  %v493_v8 = vrot.slane %v485_v36, 2  ;;  %v494_v9 = vrot.slane %v486_v3, 2 }
  0x2c   : > { %v509_v41 = vmul.f32 %v920_v46, %v379_v30  ;;  %v453_v12 = vadd.f32 %v449_v54, %v441_v6  ;;  %v454_v13 = vadd.f32 %v450_v55, %v442_v7  ;;  %v510_v15 = vmul.f32 %v920_v46, %v380_v31 }
  0x2d   : > { %v559_v10 = vadd.f32 %v551_v39, %v535_v4  ;;  %v560_v11 = vadd.f32 %v552_v40, %v536_v5  ;;  %v521_v16 = vmul.f32 %v922_v47, %v379_v30  ;;  %v522_v58 = vmul.f32 %v922_v47, %v380_v31 }
  0x2e   : > { %v545_v45 = vmul.f32 %v947_v14, %v379_v30  ;;  %v477_v18 = vadd.f32 %v469_v1, %v453_v12  ;;  %v478_v19 = vadd.f32 %v470_v2, %v454_v13  ;;  %v546_v20 = vmul.f32 %v947_v14, %v380_v31  ;;  %v772_v14 = vld [vmem:[%s1000_s6] ss:$0 sm:$0xff] }
  0x2f   : > { %v576_v17 = vcombine.low %v559_v10, %v560_v11  ;;  %v529_v23 = vrot.slane %v521_v16, 1  ;;  %v530_v24 = vrot.slane %v522_v58, 1 }
  0x30   : > { %v501_v21 = vadd.f32 %v493_v8, %v477_v18  ;;  %v502_v22 = vadd.f32 %v494_v9, %v478_v19  ;;  %v553_v26 = vrot.slane %v545_v45, 2  ;;  %v554_v27 = vrot.slane %v546_v20, 2 }
  0x31   : > { %786 = vmatprep.mubr.msk.f32.mxu0 %vm578_vm0, %v576_v17 }
  0x32   : > { %v513_v25 = vadd.f32 %v509_v41, %v501_v21  ;;  %v514_v46 = vadd.f32 %v510_v15, %v502_v22 }
  0x34   : > { %v537_v28 = vadd.f32 %v529_v23, %v513_v25  ;;  %v538_v47 = vadd.f32 %v530_v24, %v514_v46 }
  0x36   : > { %v561_v32 = vadd.f32 %v553_v26, %v537_v28  ;;  %v562_v30 = vadd.f32 %v554_v27, %v538_v47 }
  0x38   : > { %v577_v33 = vcombine.low %v561_v32, %v562_v30 }
  0x3a   : > { %787 = vmatmul.mubr.msk.f32.vlgmr.msra.gmra.mrb[0].mxu0 %vm578_vm0, %v577_v33 }
 0x10d   : > { %v788_v31 = vpop.f32.mrb[0].mxu0 }
 0x10e   : > { %v655_v37 = vadd.f32 %v788_v31, %v772_v14  ;;  %v649_v38 = vpop.f32.mrb[1].mxu0 }
 0x10f   : > { %v650_v39 = vadd.f32 %v772_v14, %v649_v38 }
 0x110   : > { %v661_v40 = vcombine.high %v655_v37, %v655_v37  ;;  %667 = vst.msk [vmem:[%s338_s8 + $0x8] sm:$0xf] %vm664_vm1, %v655_v37 }
 0x111   : > { %v660_v42 = vcombine.high %v650_v39, %v650_v39  ;;  %665 = vst.msk [vmem:[%s338_s8] sm:$0xf] %vm664_vm1, %v650_v39 }
 0x112   : > { %668 = vst.msk [vmem:[%s338_s8 + $0xc] sm:$0xf] %vm664_vm1, %v661_v40 }
 0x113   : > { %666 = vst.msk [vmem:[%s338_s8 + $0x4] sm:$0xf] %vm664_vm1, %v660_v42 }
 0x114 PF: > { %s17_s24 = sadd.s32 1, %s808_s24  }
 0x115   : > { %p14_p4 = scmp.ge.s32.totalorder %s17_s24, 4  }
 0x117   :  { %16 = sbr.rel (!%p14_p4) target bundleno = 1 (0x1), region = 87 }

// kernel: hybrid_forward.9
= control target key start
LH: loop header
LB: loop body
LE: loop exit
PB: predicated region body
PF: predicated region fallthrough
CT: control target
= control target key end

     0   :  { %s1510_s21 = smov 0   ;;  %s1876_s0 = inlined_call_operand.vmem [shape: f32[2,4,4,4], index: 0, kind: input, shape index: {}]   ;;  %s1877_s1 = inlined_call_operand.vmem [shape: f32[2,16,16,4], index: 1, kind: input, shape index: {}]   ;;  %s1878_s2 = inlined_call_operand.vmem [shape: f32[256,16], index: 2, kind: input, shape index: {}]   ;;  %s1879_s3 = inlined_call_operand.vmem [shape: f32[4,4], index: 3, kind: input, shape index: {}]   ;;  %s1880_s4 = inlined_call_operand.vmem [shape: f32[1,4], index: 4, kind: input, shape index: {}]   ;;  %s1881_s5 = inlined_call_operand.vmem [shape: f32[2,16,16,4], index: 5, kind: input, shape index: {}]   ;;  %s1882_s6 = inlined_call_operand.vmem [shape: f32[2,16,16,4], index: 6, kind: output, shape index: {}]  }
   0x1 LB: > { %s1199_s22 = sadd.s32 4294967295, %s1473_s21   ;;  %p1203_p0 = scmp.ge.s32.totalorder %s1473_s21, 1  ;;  %s1473_s21 = sphi %s1510_s21, %s16_s21  }
   0x2   : > { %p232_p1 = scmp.lt.s32.totalorder %s1473_s21, 3 }
   0x4   : > { %p233_p2 = pnand %p1203_p0, %p232_p1 }
   0x5   : > { %p272_p3 = scmp.lt.s32.totalorder (!%p233_p2), %s1199_s22, 1  ;;  %v296_v0 = vld [vmem:[%s1878_s2] sm:$0xff] (!%p233_p2)  ;;  %vm368_vm0 = vcmask (!%p233_p2), 130048   ;;  %v297_v4 = vld [vmem:[%s1878_s2 + $0x8] sm:$0xff] (!%p233_p2)  ;;  %v298_v5 = vld [vmem:[%s1878_s2 + $0x10] sm:$0xff] (!%p233_p2)  ;;  %vm795_vm1 = vcmask (!%p233_p2), 1043456  }
   0x6   : > { %236 = sbr.rel (%p233_p2) target bundleno = 517 (0x205), region = 44  ;;  %1355 = vmatprep.mubr.msk.f32.mxu0 (!%p233_p2), %vm368_vm0, %v296_v0  ;;  %v299_v6 = vld [vmem:[%s1878_s2 + $0x18] sm:$0xff] (!%p233_p2)  ;;  %v300_v7 = vld [vmem:[%s1878_s2 + $0x20] sm:$0xff] (!%p233_p2)  ;;  %v301_v8 = vld [vmem:[%s1878_s2 + $0x28] sm:$0xff] (!%p233_p2)  ;;  %vm698_vm2 = vcmask (!%p233_p2), 31744  }
   0x7   : > { %v302_v9 = vld [vmem:[%s1878_s2 + $0x30] sm:$0xff] (!%p233_p2)  ;;  %v303_v10 = vld [vmem:[%s1878_s2 + $0x38] sm:$0xff] (!%p233_p2)  ;;  %v304_v11 = vld [vmem:[%s1878_s2 + $0x40] sm:$0xff] (!%p233_p2) }
   0x8   : > { %v305_v12 = vld [vmem:[%s1878_s2 + $0x48] sm:$0xff] (!%p233_p2)  ;;  %v306_v13 = vld [vmem:[%s1878_s2 + $0x50] sm:$0xff] (!%p233_p2)  ;;  %v307_v14 = vld [vmem:[%s1878_s2 + $0x58] sm:$0xff] (!%p233_p2) }
   0x9   : > { %v308_v15 = vld [vmem:[%s1878_s2 + $0x60] sm:$0xff] (!%p233_p2)  ;;  %v309_v16 = vld [vmem:[%s1878_s2 + $0x68] sm:$0xff] (!%p233_p2)  ;;  %v310_v17 = vld [vmem:[%s1878_s2 + $0x70] sm:$0xff] (!%p233_p2) }
   0xa   : > { %v311_v18 = vld [vmem:[%s1878_s2 + $0x78] sm:$0xff] (!%p233_p2)  ;;  %v312_v19 = vld [vmem:[%s1878_s2 + $0x80] sm:$0xff] (!%p233_p2)  ;;  %v313_v20 = vld [vmem:[%s1878_s2 + $0x88] sm:$0xff] (!%p233_p2) }
   0xb   : > { %v314_v21 = vld [vmem:[%s1878_s2 + $0x90] sm:$0xff] (!%p233_p2)  ;;  %v315_v22 = vld [vmem:[%s1878_s2 + $0x98] sm:$0xff] (!%p233_p2)  ;;  %v316_v23 = vld [vmem:[%s1878_s2 + $0xa0] sm:$0xff] (!%p233_p2) }
   0xc   : > { %v317_v24 = vld [vmem:[%s1878_s2 + $0xa8] sm:$0xff] (!%p233_p2)  ;;  %v318_v25 = vld [vmem:[%s1878_s2 + $0xb0] sm:$0xff] (!%p233_p2)  ;;  %v319_v26 = vld [vmem:[%s1878_s2 + $0xb8] sm:$0xff] (!%p233_p2) }
   0xd   : > { %s1884_s22 = smov (!%p272_p3, %s1199_s22), 1  ;;  %v320_v27 = vld [vmem:[%s1878_s2 + $0xc0] sm:$0xff]  ;;  %v321_v28 = vld [vmem:[%s1878_s2 + $0xc8] sm:$0xff]  ;;  %v322_v29 = vld [vmem:[%s1878_s2 + $0xd0] sm:$0xff] }
   0xe   : > { %s1280_s25 = sshll.u32 %s1884_s22, 4  ;;  %v323_v30 = vld [vmem:[%s1878_s2 + $0xd8] sm:$0xff]  ;;  %v324_v31 = vld [vmem:[%s1878_s2 + $0xe0] sm:$0xff]  ;;  %v325_v32 = vld [vmem:[%s1878_s2 + $0xe8] sm:$0xff]  ;;  %s1656_s27 = sshll.u32 %s1884_s22, 8 }
   0xf   : > { %s276_s28 = scalar_lea.vmem %s1876_s0, %s1280_s25  ;;  %v326_v33 = vld [vmem:[%s1878_s2 + $0xf0] sm:$0xff]  ;;  %v327_v34 = vld [vmem:[%s1878_s2 + $0xf8] sm:$0xff]  ;;  %v690_v35 = vld [vmem:[%s1879_s3] sm:$0xf]  ;;  %s1662_s30 = scalar_lea.vmem %s1877_s1, %s1656_s27 }
  0x10   : > { %v1465_v1 = vld [vmem:[%s276_s28] sm:$0xff]   ;;  %v1466_v2 = vld [vmem:[%s276_s28 + $0x8] sm:$0xff]   ;;  %1403 = vmatprep.subr.msk.mxu1 %vm795_vm1, %v690_v35  ;;  %v330_v42 = vld [vmem:[%s1662_s30 + $0x10] sm:$0xff]  ;;  %s1732_s8 = scalar_lea.vmem %s1881_s5, %s1656_s27  ;;  %s1746_s13 = scalar_lea.vmem %s1882_s6, %s1656_s27 }
  0x11   : > { %v1453_v3 = vpack.c.bf16 %v1466_v2, %v1465_v1  ;;  %1404 = vmatpush3.msk.msra.mxu1 %vm795_vm1, %v690_v35  ;;  %v328_v36 = vld [vmem:[%s1662_s30] sm:$0xff]  ;;  %v329_v37 = vld [vmem:[%s1662_s30 + $0x8] sm:$0xff]  ;;  %v331_v43 = vld [vmem:[%s1662_s30 + $0x18] sm:$0xff] }
  0x12   : > { %v332_v48 = vld [vmem:[%s1662_s30 + $0x20] sm:$0xff]  ;;  %v333_v49 = vld [vmem:[%s1662_s30 + $0x28] sm:$0xff]  ;;  %v334_v54 = vld [vmem:[%s1662_s30 + $0x30] sm:$0xff] }
  0x13   : > { %1454 = vmatprep.subr.bf16.mxu0 %v1453_v3  ;;  %v335_v55 = vld [vmem:[%s1662_s30 + $0x38] sm:$0xff]  ;;  %v336_v60 = vld [vmem:[%s1662_s30 + $0x40] sm:$0xff]  ;;  %v337_v61 = vld [vmem:[%s1662_s30 + $0x48] sm:$0xff] }
  0x14   : > { %1456 = vmatpush3.bf16.msra.mxu0 %v1453_v3  ;;  %v338_v2 = vld [vmem:[%s1662_s30 + $0x50] sm:$0xff]  ;;  %v339_v3 = vld [vmem:[%s1662_s30 + $0x58] sm:$0xff] }
  0x17   : > { %1356 = vmatmul.mubr.msk.f32.vlgmr.msra.gmra.mrb[0].mxu0 %vm368_vm0, %v297_v4 }
  0x18   : > { %1358 = vmatprep.mubr.msk.f32.mxu0 %vm368_vm0, %v298_v5 }
  0x1b   : > { %1359 = vmatmul.mubr.msk.f32.gmra.mrb[2].mxu0 %vm368_vm0, %v299_v6 }
  0x1c   : > { %1361 = vmatprep.mubr.msk.f32.mxu0 %vm368_vm0, %v300_v7 }
  0x1f   : > { %1362 = vmatmul.mubr.msk.f32.gmra.mrb[4].mxu0 %vm368_vm0, %v301_v8  ;;  %v340_v8 = vld [vmem:[%s1662_s30 + $0x60] sm:$0xff] }
  0x20   : > { %1364 = vmatprep.mubr.msk.f32.mxu0 %vm368_vm0, %v302_v9  ;;  %v341_v9 = vld [vmem:[%s1662_s30 + $0x68] sm:$0xff] }
  0x23   : > { %1365 = vmatmul.mubr.msk.f32.gmra.mrb[6].mxu0 %vm368_vm0, %v303_v10 }
  0x24   : > { %1367 = vmatprep.mubr.msk.f32.mxu0 %vm368_vm0, %v304_v11 }
  0x27   : > { %1368 = vmatmul.mubr.msk.f32.gmra.mrb[8].mxu0 %vm368_vm0, %v305_v12 }
  0x28   : > { %1370 = vmatprep.mubr.msk.f32.mxu0 %vm368_vm0, %v306_v13 }
  0x2b   : > { %1371 = vmatmul.mubr.msk.f32.gmra.mrb[10].mxu0 %vm368_vm0, %v307_v14  ;;  %v342_v14 = vld [vmem:[%s1662_s30 + $0x70] sm:$0xff] }
  0x2c   : > { %1373 = vmatprep.mubr.msk.f32.mxu0 %vm368_vm0, %v308_v15  ;;  %v343_v15 = vld [vmem:[%s1662_s30 + $0x78] sm:$0xff] }
  0x2f   : > { %1374 = vmatmul.mubr.msk.f32.gmra.mrb[12].mxu0 %vm368_vm0, %v309_v16 }
  0x30   : > { %1376 = vmatprep.mubr.msk.f32.mxu0 %vm368_vm0, %v310_v17 }
  0x33   : > { %1377 = vmatmul.mubr.msk.f32.gmra.mrb[14].mxu0 %vm368_vm0, %v311_v18 }
  0x34   : > { %1379 = vmatprep.mubr.msk.f32.mxu0 %vm368_vm0, %v312_v19 }
  0x37   : > { %1380 = vmatmul.mubr.msk.f32.gmra.mrb[16].mxu0 %vm368_vm0, %v313_v20  ;;  %v344_v20 = vld [vmem:[%s1662_s30 + $0x80] sm:$0xff] }
  0x38   : > { %1382 = vmatprep.mubr.msk.f32.mxu0 %vm368_vm0, %v314_v21  ;;  %v345_v21 = vld [vmem:[%s1662_s30 + $0x88] sm:$0xff] }
  0x3b   : > { %1383 = vmatmul.mubr.msk.f32.gmra.mrb[18].mxu0 %vm368_vm0, %v315_v22 }
  0x3c   : > { %1385 = vmatprep.mubr.msk.f32.mxu0 %vm368_vm0, %v316_v23 }
  0x3f   : > { %1386 = vmatmul.mubr.msk.f32.gmra.mrb[20].mxu0 %vm368_vm0, %v317_v24 }
  0x40   : > { %1388 = vmatprep.mubr.msk.f32.mxu0 %vm368_vm0, %v318_v25 }
  0x43   : > { %1389 = vmatmul.mubr.msk.f32.gmra.mrb[22].mxu0 %vm368_vm0, %v319_v26  ;;  %v346_v26 = vld [vmem:[%s1662_s30 + $0x90] sm:$0xff] }
  0x44   : > { %1391 = vmatprep.mubr.msk.f32.mxu0 %vm368_vm0, %v320_v27  ;;  %v347_v27 = vld [vmem:[%s1662_s30 + $0x98] sm:$0xff] }
  0x47   : > { %1392 = vmatmul.mubr.msk.f32.gmra.mrb[24].mxu0 %vm368_vm0, %v321_v28 }
  0x48   : > { %1394 = vmatprep.mubr.msk.f32.mxu0 %vm368_vm0, %v322_v29 }
  0x4b   : > { %1395 = vmatmul.mubr.msk.f32.gmra.mrb[26].mxu0 %vm368_vm0, %v323_v30 }
  0x4c   : > { %1397 = vmatprep.mubr.msk.f32.mxu0 %vm368_vm0, %v324_v31 }
  0x4f   : > { %1398 = vmatmul.mubr.msk.f32.gmra.mrb[28].mxu0 %vm368_vm0, %v325_v32  ;;  %v348_v32 = vld [vmem:[%s1662_s30 + $0xa0] sm:$0xff] }
  0x50   : > { %1400 = vmatprep.mubr.msk.f32.mxu0 %vm368_vm0, %v326_v33  ;;  %v349_v33 = vld [vmem:[%s1662_s30 + $0xa8] sm:$0xff] }
  0x53   : > { %1401 = vmatmul.mubr.msk.f32.gmra.mrb[30].mxu0 %vm368_vm0, %v327_v34 }
  0xea   : > { %v1357_v38 = vpop.f32.mrb[0].mxu0 }
  0xeb   : > { %v531_v39 = vpop.f32.mrb[1].mxu0  ;;  %v537_v41 = vadd.f32 %v1357_v38, %v329_v37  ;;  %v350_v38 = vld [vmem:[%s1662_s30 + $0xb0] sm:$0xff] }
  0xec   : > { %v532_v40 = vadd.f32 %v531_v39, %v328_v36  ;;  %v351_v39 = vld [vmem:[%s1662_s30 + $0xb8] sm:$0xff] }
  0xee   : > { %v1360_v44 = vpop.f32.mrb[2].mxu0  ;;  %1405 = vmatprep.mubr.msk.f32.mxu1 %vm698_vm2, %v532_v40 }
  0xef   : > { %v541_v45 = vpop.f32.mrb[3].mxu0  ;;  %1406 = vmatmul.mubr.msk.f32.vlgmr.msra.gmra.mrb[0].mxu1 %vm698_vm2, %v537_v41  ;;  %v547_v47 = vadd.f32 %v1360_v44, %v331_v43  ;;  %v352_v44 = vld [vmem:[%s1662_s30 + $0xc0] sm:$0xff] }
  0xf0   : > { %v542_v46 = vadd.f32 %v541_v45, %v330_v42  ;;  %v353_v45 = vld [vmem:[%s1662_s30 + $0xc8] sm:$0xff] }
  0xf2   : > { %v1363_v50 = vpop.f32.mrb[4].mxu0  ;;  %1408 = vmatprep.mubr.msk.f32.mxu1 %vm698_vm2, %v542_v46 }
  0xf3   : > { %v551_v51 = vpop.f32.mrb[5].mxu0  ;;  %1409 = vmatmul.mubr.msk.f32.gmra.mrb[2].mxu1 %vm698_vm2, %v547_v47  ;;  %v557_v53 = vadd.f32 %v1363_v50, %v333_v49  ;;  %v354_v50 = vld [vmem:[%s1662_s30 + $0xd0] sm:$0xff] }
  0xf4   : > { %v552_v52 = vadd.f32 %v551_v51, %v332_v48  ;;  %v355_v51 = vld [vmem:[%s1662_s30 + $0xd8] sm:$0xff] }
  0xf6   : > { %v1366_v56 = vpop.f32.mrb[6].mxu0  ;;  %1411 = vmatprep.mubr.msk.f32.mxu1 %vm698_vm2, %v552_v52 }
  0xf7   : > { %v561_v57 = vpop.f32.mrb[7].mxu0  ;;  %1412 = vmatmul.mubr.msk.f32.gmra.mrb[4].mxu1 %vm698_vm2, %v557_v53  ;;  %v567_v59 = vadd.f32 %v1366_v56, %v335_v55  ;;  %v356_v56 = vld [vmem:[%s1662_s30 + $0xe0] sm:$0xff] }
  0xf8   : > { %v562_v58 = vadd.f32 %v561_v57, %v334_v54  ;;  %v357_v57 = vld [vmem:[%s1662_s30 + $0xe8] sm:$0xff] }
  0xfa   : > { %v1369_v62 = vpop.f32.mrb[8].mxu0  ;;  %1414 = vmatprep.mubr.msk.f32.mxu1 %vm698_vm2, %v562_v58 }
  0xfb   : > { %v571_v63 = vpop.f32.mrb[9].mxu0  ;;  %1415 = vmatmul.mubr.msk.f32.gmra.mrb[6].mxu1 %vm698_vm2, %v567_v59  ;;  %v577_v1 = vadd.f32 %v1369_v62, %v337_v61  ;;  %v358_v62 = vld [vmem:[%s1662_s30 + $0xf0] sm:$0xff] }
  0xfc   : > { %v572_v0 = vadd.f32 %v571_v63, %v336_v60  ;;  %v359_v63 = vld [vmem:[%s1662_s30 + $0xf8] sm:$0xff] }
  0xfe   : > { %v1372_v4 = vpop.f32.mrb[10].mxu0  ;;  %1417 = vmatprep.mubr.msk.f32.mxu1 %vm698_vm2, %v572_v0 }
  0xff   : > { %v581_v5 = vpop.f32.mrb[11].mxu0  ;;  %1418 = vmatmul.mubr.msk.f32.gmra.mrb[8].mxu1 %vm698_vm2, %v577_v1  ;;  %v587_v7 = vadd.f32 %v1372_v4, %v339_v3  ;;  %v1737_v4 = vld [vmem:[%s1880_s4] ss:$0 sm:$0xff] }
 0x100   : > { %v582_v6 = vadd.f32 %v581_v5, %v338_v2 }
 0x102   : > { %v1375_v10 = vpop.f32.mrb[12].mxu0  ;;  %1420 = vmatprep.mubr.msk.f32.mxu1 %vm698_vm2, %v582_v6  ;;  %v1025_v6 = vld [vmem:[%s1732_s8 + $0x8] sm:$0xff] }
 0x103   : > { %v591_v11 = vpop.f32.mrb[13].mxu0  ;;  %1421 = vmatmul.mubr.msk.f32.gmra.mrb[10].mxu1 %vm698_vm2, %v587_v7  ;;  %v597_v13 = vadd.f32 %v1375_v10, %v341_v9  ;;  %v1024_v9 = vld [vmem:[%s1732_s8] sm:$0xff] }
 0x104   : > { %v592_v12 = vadd.f32 %v591_v11, %v340_v8 }
 0x106   : > { %v1378_v16 = vpop.f32.mrb[14].mxu0  ;;  %1423 = vmatprep.mubr.msk.f32.mxu1 %vm698_vm2, %v592_v12 }
 0x107   : > { %v601_v17 = vpop.f32.mrb[15].mxu0  ;;  %1424 = vmatmul.mubr.msk.f32.gmra.mrb[12].mxu1 %vm698_vm2, %v597_v13  ;;  %v607_v19 = vadd.f32 %v1378_v16, %v343_v15 }
 0x108   : > { %v602_v18 = vadd.f32 %v601_v17, %v342_v14  ;;  %v1027_v14 = vld [vmem:[%s1732_s8 + $0x18] sm:$0xff]  ;;  %v1026_v17 = vld [vmem:[%s1732_s8 + $0x10] sm:$0xff] }
 0x10a   : > { %v1381_v22 = vpop.f32.mrb[16].mxu0  ;;  %1426 = vmatprep.mubr.msk.f32.mxu1 %vm698_vm2, %v602_v18 }
 0x10b   : > { %v611_v23 = vpop.f32.mrb[17].mxu0  ;;  %1427 = vmatmul.mubr.msk.f32.gmra.mrb[14].mxu1 %vm698_vm2, %v607_v19  ;;  %v617_v25 = vadd.f32 %v1381_v22, %v345_v21  ;;  %v1029_v22 = vld [vmem:[%s1732_s8 + $0x28] sm:$0xff] }
 0x10c   : > { %v612_v24 = vadd.f32 %v611_v23, %v344_v20 }
 0x10e   : > { %v1384_v28 = vpop.f32.mrb[18].mxu0  ;;  %1429 = vmatprep.mubr.msk.f32.mxu1 %vm698_vm2, %v612_v24 }
 0x10f   : > { %v621_v29 = vpop.f32.mrb[19].mxu0  ;;  %1430 = vmatmul.mubr.msk.f32.gmra.mrb[16].mxu1 %vm698_vm2, %v617_v25  ;;  %v627_v31 = vadd.f32 %v1384_v28, %v347_v27  ;;  %v1028_v25 = vld [vmem:[%s1732_s8 + $0x20] sm:$0xff] }
 0x110   : > { %v622_v30 = vadd.f32 %v621_v29, %v346_v26 }
 0x112   : > { %v1387_v34 = vpop.f32.mrb[20].mxu0  ;;  %1432 = vmatprep.mubr.msk.f32.mxu1 %vm698_vm2, %v622_v30  ;;  %v1031_v30 = vld [vmem:[%s1732_s8 + $0x38] sm:$0xff] }
 0x113   : > { %v631_v35 = vpop.f32.mrb[21].mxu0  ;;  %1433 = vmatmul.mubr.msk.f32.gmra.mrb[18].mxu1 %vm698_vm2, %v627_v31  ;;  %v637_v37 = vadd.f32 %v1387_v34, %v349_v33  ;;  %v1030_v33 = vld [vmem:[%s1732_s8 + $0x30] sm:$0xff] }
 0x114   : > { %v632_v36 = vadd.f32 %v631_v35, %v348_v32 }
 0x116   : > { %v1390_v40 = vpop.f32.mrb[22].mxu0  ;;  %1435 = vmatprep.mubr.msk.f32.mxu1 %vm698_vm2, %v632_v36 }
 0x117   : > { %v641_v41 = vpop.f32.mrb[23].mxu0  ;;  %1436 = vmatmul.mubr.msk.f32.gmra.mrb[20].mxu1 %vm698_vm2, %v637_v37  ;;  %v647_v43 = vadd.f32 %v1390_v40, %v351_v39 }
 0x118   : > { %v642_v42 = vadd.f32 %v641_v41, %v350_v38  ;;  %v1033_v38 = vld [vmem:[%s1732_s8 + $0x48] sm:$0xff]  ;;  %v1032_v41 = vld [vmem:[%s1732_s8 + $0x40] sm:$0xff] }
 0x11a   : > { %v1393_v46 = vpop.f32.mrb[24].mxu0  ;;  %1438 = vmatprep.mubr.msk.f32.mxu1 %vm698_vm2, %v642_v42 }
 0x11b   : > { %v651_v47 = vpop.f32.mrb[25].mxu0  ;;  %1439 = vmatmul.mubr.msk.f32.gmra.mrb[22].mxu1 %vm698_vm2, %v647_v43  ;;  %v657_v49 = vadd.f32 %v1393_v46, %v353_v45  ;;  %v1035_v46 = vld [vmem:[%s1732_s8 + $0x58] sm:$0xff] }
 0x11c   : > { %v652_v48 = vadd.f32 %v651_v47, %v352_v44 }
 0x11e   : > { %v1396_v52 = vpop.f32.mrb[26].mxu0  ;;  %1441 = vmatprep.mubr.msk.f32.mxu1 %vm698_vm2, %v652_v48 }
 0x11f   : > { %v661_v53 = vpop.f32.mrb[27].mxu0  ;;  %1442 = vmatmul.mubr.msk.f32.gmra.mrb[24].mxu1 %vm698_vm2, %v657_v49  ;;  %v667_v55 = vadd.f32 %v1396_v52, %v355_v51  ;;  %v1034_v49 = vld [vmem:[%s1732_s8 + $0x50] sm:$0xff] }
 0x120   : > { %v662_v54 = vadd.f32 %v661_v53, %v354_v50 }
 0x122   : > { %v1399_v58 = vpop.f32.mrb[28].mxu0  ;;  %1444 = vmatprep.mubr.msk.f32.mxu1 %vm698_vm2, %v662_v54  ;;  %v1037_v54 = vld [vmem:[%s1732_s8 + $0x68] sm:$0xff] }
 0x123   : > { %v671_v59 = vpop.f32.mrb[29].mxu0  ;;  %1445 = vmatmul.mubr.msk.f32.gmra.mrb[26].mxu1 %vm698_vm2, %v667_v55  ;;  %v677_v61 = vadd.f32 %v1399_v58, %v357_v57  ;;  %v1036_v57 = vld [vmem:[%s1732_s8 + $0x60] sm:$0xff] }
 0x124   : > { %v672_v60 = vadd.f32 %v671_v59, %v356_v56 }
 0x126   : > { %v1402_v0 = vpop.f32.mrb[30].mxu0  ;;  %1447 = vmatprep.mubr.msk.f32.mxu1 %vm698_vm2, %v672_v60 }
 0x127   : > { %v681_v1 = vpop.f32.mrb[31].mxu0  ;;  %1448 = vmatmul.mubr.msk.f32.gmra.mrb[28].mxu1 %vm698_vm2, %v677_v61  ;;  %v687_v3 = vadd.f32 %v1402_v0, %v359_v63 }
 0x128   : > { %v682_v2 = vadd.f32 %v681_v1, %v358_v62  ;;  %v1039_v62 = vld [vmem:[%s1732_s8 + $0x78] sm:$0xff]  ;;  %v1038_v1 = vld [vmem:[%s1732_s8 + $0x70] sm:$0xff] }
 0x12a   : > { %1450 = vmatprep.mubr.msk.f32.mxu1 %vm698_vm2, %v682_v2 }
 0x12b   : > { %1451 = vmatmul.mubr.msk.f32.gmra.mrb[30].mxu1 %vm698_vm2, %v687_v3 }
 0x1c2   : > { %v1407_v5 = vpop.f32.mrb[0].mxu1 }
 0x1c3   : > { %v871_v7 = vadd.f32 %v1407_v5, %v1737_v4  ;;  %v865_v8 = vpop.f32.mrb[1].mxu1 }
 0x1c4   : > { %v866_v10 = vadd.f32 %v1737_v4, %v865_v8 }
 0x1c5   : > { %v1057_v11 = vadd.f32 %v1025_v6, %v871_v7  ;;  %v1041_v7 = vld [vmem:[%s1732_s8 + $0x88] sm:$0xff] }
 0x1c6   : > { %v1056_v12 = vadd.f32 %v1024_v9, %v866_v10  ;;  %v1410_v13 = vpop.f32.mrb[2].mxu1  ;;  %v1040_v10 = vld [vmem:[%s1732_s8 + $0x80] sm:$0xff] }
 0x1c7   : > { %1089 = vst.msk [vmem:[%s1746_s13 + $0x8] sm:$0xff] %vm698_vm2, %v1057_v11  ;;  %v881_v15 = vadd.f32 %v1410_v13, %v1737_v4  ;;  %v875_v16 = vpop.f32.mrb[3].mxu1 }
 0x1c8   : > { %1088 = vst.msk [vmem:[%s1746_s13] sm:$0xff] %vm698_vm2, %v1056_v12  ;;  %v876_v18 = vadd.f32 %v1737_v4, %v875_v16 }
 0x1c9   : > { %v1059_v19 = vadd.f32 %v1027_v14, %v881_v15  ;;  %v1043_v15 = vld [vmem:[%s1732_s8 + $0x98] sm:$0xff] }
 0x1ca   : > { %v1058_v20 = vadd.f32 %v1026_v17, %v876_v18  ;;  %v1413_v21 = vpop.f32.mrb[4].mxu1  ;;  %v1042_v18 = vld [vmem:[%s1732_s8 + $0x90] sm:$0xff] }
 0x1cb   : > { %1091 = vst.msk [vmem:[%s1746_s13 + $0x18] sm:$0xff] %vm698_vm2, %v1059_v19  ;;  %v891_v23 = vadd.f32 %v1413_v21, %v1737_v4  ;;  %v885_v24 = vpop.f32.mrb[5].mxu1 }
 0x1cc   : > { %1090 = vst.msk [vmem:[%s1746_s13 + $0x10] sm:$0xff] %vm698_vm2, %v1058_v20  ;;  %v886_v26 = vadd.f32 %v1737_v4, %v885_v24 }
 0x1cd   : > { %v1061_v27 = vadd.f32 %v1029_v22, %v891_v23  ;;  %v1045_v23 = vld [vmem:[%s1732_s8 + $0xa8] sm:$0xff] }
 0x1ce   : > { %v1060_v28 = vadd.f32 %v1028_v25, %v886_v26  ;;  %v1416_v29 = vpop.f32.mrb[6].mxu1  ;;  %v1044_v26 = vld [vmem:[%s1732_s8 + $0xa0] sm:$0xff] }
 0x1cf   : > { %1093 = vst.msk [vmem:[%s1746_s13 + $0x28] sm:$0xff] %vm698_vm2, %v1061_v27  ;;  %v901_v31 = vadd.f32 %v1416_v29, %v1737_v4  ;;  %v895_v32 = vpop.f32.mrb[7].mxu1 }
 0x1d0   : > { %1092 = vst.msk [vmem:[%s1746_s13 + $0x20] sm:$0xff] %vm698_vm2, %v1060_v28  ;;  %v896_v34 = vadd.f32 %v1737_v4, %v895_v32 }
 0x1d1   : > { %v1063_v35 = vadd.f32 %v1031_v30, %v901_v31  ;;  %v1047_v31 = vld [vmem:[%s1732_s8 + $0xb8] sm:$0xff] }
 0x1d2   : > { %v1062_v36 = vadd.f32 %v1030_v33, %v896_v34  ;;  %v1419_v37 = vpop.f32.mrb[8].mxu1  ;;  %v1046_v34 = vld [vmem:[%s1732_s8 + $0xb0] sm:$0xff] }
 0x1d3   : > { %1095 = vst.msk [vmem:[%s1746_s13 + $0x38] sm:$0xff] %vm698_vm2, %v1063_v35  ;;  %v911_v39 = vadd.f32 %v1419_v37, %v1737_v4  ;;  %v905_v40 = vpop.f32.mrb[9].mxu1 }
 0x1d4   : > { %1094 = vst.msk [vmem:[%s1746_s13 + $0x30] sm:$0xff] %vm698_vm2, %v1062_v36  ;;  %v906_v42 = vadd.f32 %v1737_v4, %v905_v40 }
 0x1d5   : > { %v1065_v43 = vadd.f32 %v1033_v38, %v911_v39  ;;  %v1049_v39 = vld [vmem:[%s1732_s8 + $0xc8] sm:$0xff] }
 0x1d6   : > { %v1064_v44 = vadd.f32 %v1032_v41, %v906_v42  ;;  %v1422_v45 = vpop.f32.mrb[10].mxu1  ;;  %v1048_v42 = vld [vmem:[%s1732_s8 + $0xc0] sm:$0xff] }
 0x1d7   : > { %1097 = vst.msk [vmem:[%s1746_s13 + $0x48] sm:$0xff] %vm698_vm2, %v1065_v43  ;;  %v921_v47 = vadd.f32 %v1422_v45, %v1737_v4  ;;  %v915_v48 = vpop.f32.mrb[11].mxu1 }
 0x1d8   : > { %1096 = vst.msk [vmem:[%s1746_s13 + $0x40] sm:$0xff] %vm698_vm2, %v1064_v44  ;;  %v916_v50 = vadd.f32 %v1737_v4, %v915_v48 }
 0x1d9   : > { %v1067_v51 = vadd.f32 %v1035_v46, %v921_v47  ;;  %v1051_v47 = vld [vmem:[%s1732_s8 + $0xd8] sm:$0xff] }
 0x1da   : > { %v1066_v52 = vadd.f32 %v1034_v49, %v916_v50  ;;  %v1425_v53 = vpop.f32.mrb[12].mxu1  ;;  %v1050_v50 = vld [vmem:[%s1732_s8 + $0xd0] sm:$0xff] }
 0x1db   : > { %1099 = vst.msk [vmem:[%s1746_s13 + $0x58] sm:$0xff] %vm698_vm2, %v1067_v51  ;;  %v931_v55 = vadd.f32 %v1425_v53, %v1737_v4  ;;  %v925_v56 = vpop.f32.mrb[13].mxu1 }
 0x1dc   : > { %1098 = vst.msk [vmem:[%s1746_s13 + $0x50] sm:$0xff] %vm698_vm2, %v1066_v52  ;;  %v926_v58 = vadd.f32 %v1737_v4, %v925_v56 }
 0x1dd   : > { %v1069_v59 = vadd.f32 %v1037_v54, %v931_v55  ;;  %v1053_v55 = vld [vmem:[%s1732_s8 + $0xe8] sm:$0xff] }
 0x1de   : > { %v1068_v60 = vadd.f32 %v1036_v57, %v926_v58  ;;  %v1428_v61 = vpop.f32.mrb[14].mxu1  ;;  %v1052_v58 = vld [vmem:[%s1732_s8 + $0xe0] sm:$0xff] }
 0x1df   : > { %1101 = vst.msk [vmem:[%s1746_s13 + $0x68] sm:$0xff] %vm698_vm2, %v1069_v59  ;;  %v941_v63 = vadd.f32 %v1428_v61, %v1737_v4  ;;  %v935_v0 = vpop.f32.mrb[15].mxu1 }
 0x1e0   : > { %1100 = vst.msk [vmem:[%s1746_s13 + $0x60] sm:$0xff] %vm698_vm2, %v1068_v60  ;;  %v936_v2 = vadd.f32 %v1737_v4, %v935_v0 }
 0x1e1   : > { %v1071_v3 = vadd.f32 %v1039_v62, %v941_v63  ;;  %v1055_v63 = vld [vmem:[%s1732_s8 + $0xf8] sm:$0xff] }
 0x1e2   : > { %v1070_v5 = vadd.f32 %v1038_v1, %v936_v2  ;;  %v1431_v6 = vpop.f32.mrb[16].mxu1  ;;  %v1054_v2 = vld [vmem:[%s1732_s8 + $0xf0] sm:$0xff] }
 0x1e3   : > { %1103 = vst.msk [vmem:[%s1746_s13 + $0x78] sm:$0xff] %vm698_vm2, %v1071_v3  ;;  %v951_v8 = vadd.f32 %v1431_v6, %v1737_v4  ;;  %v945_v9 = vpop.f32.mrb[17].mxu1 }
 0x1e4   : > { %1102 = vst.msk [vmem:[%s1746_s13 + $0x70] sm:$0xff] %vm698_vm2, %v1070_v5  ;;  %v946_v11 = vadd.f32 %v1737_v4, %v945_v9 }
 0x1e5   : > { %v1073_v12 = vadd.f32 %v1041_v7, %v951_v8 }
 0x1e6   : > { %v1072_v13 = vadd.f32 %v1040_v10, %v946_v11  ;;  %v1434_v14 = vpop.f32.mrb[18].mxu1 }
 0x1e7   : > { %1105 = vst.msk [vmem:[%s1746_s13 + $0x88] sm:$0xff] %vm698_vm2, %v1073_v12  ;;  %v961_v16 = vadd.f32 %v1434_v14, %v1737_v4  ;;  %v955_v17 = vpop.f32.mrb[19].mxu1 }
 0x1e8   : > { %1104 = vst.msk [vmem:[%s1746_s13 + $0x80] sm:$0xff] %vm698_vm2, %v1072_v13  ;;  %v956_v19 = vadd.f32 %v1737_v4, %v955_v17 }
 0x1e9   : > { %v1075_v20 = vadd.f32 %v1043_v15, %v961_v16 }
 0x1ea   : > { %v1074_v21 = vadd.f32 %v1042_v18, %v956_v19  ;;  %v1437_v22 = vpop.f32.mrb[20].mxu1 }
 0x1eb   : > { %1107 = vst.msk [vmem:[%s1746_s13 + $0x98] sm:$0xff] %vm698_vm2, %v1075_v20  ;;  %v971_v24 = vadd.f32 %v1437_v22, %v1737_v4  ;;  %v965_v25 = vpop.f32.mrb[21].mxu1 }
 0x1ec   : > { %1106 = vst.msk [vmem:[%s1746_s13 + $0x90] sm:$0xff] %vm698_vm2, %v1074_v21  ;;  %v966_v27 = vadd.f32 %v1737_v4, %v965_v25 }
 0x1ed   : > { %v1077_v28 = vadd.f32 %v1045_v23, %v971_v24 }
 0x1ee   : > { %v1076_v29 = vadd.f32 %v1044_v26, %v966_v27  ;;  %v1440_v30 = vpop.f32.mrb[22].mxu1 }
 0x1ef   : > { %1109 = vst.msk [vmem:[%s1746_s13 + $0xa8] sm:$0xff] %vm698_vm2, %v1077_v28  ;;  %v981_v32 = vadd.f32 %v1440_v30, %v1737_v4  ;;  %v975_v33 = vpop.f32.mrb[23].mxu1 }
 0x1f0   : > { %1108 = vst.msk [vmem:[%s1746_s13 + $0xa0] sm:$0xff] %vm698_vm2, %v1076_v29  ;;  %v976_v35 = vadd.f32 %v1737_v4, %v975_v33 }
 0x1f1   : > { %v1079_v36 = vadd.f32 %v1047_v31, %v981_v32 }
 0x1f2   : > { %v1078_v37 = vadd.f32 %v1046_v34, %v976_v35  ;;  %v1443_v38 = vpop.f32.mrb[24].mxu1 }
 0x1f3   : > { %1111 = vst.msk [vmem:[%s1746_s13 + $0xb8] sm:$0xff] %vm698_vm2, %v1079_v36  ;;  %v991_v40 = vadd.f32 %v1443_v38, %v1737_v4  ;;  %v985_v41 = vpop.f32.mrb[25].mxu1 }
 0x1f4   : > { %1110 = vst.msk [vmem:[%s1746_s13 + $0xb0] sm:$0xff] %vm698_vm2, %v1078_v37  ;;  %v986_v43 = vadd.f32 %v1737_v4, %v985_v41 }
 0x1f5   : > { %v1081_v44 = vadd.f32 %v1049_v39, %v991_v40 }
 0x1f6   : > { %v1080_v45 = vadd.f32 %v1048_v42, %v986_v43  ;;  %v1446_v46 = vpop.f32.mrb[26].mxu1 }
 0x1f7   : > { %1113 = vst.msk [vmem:[%s1746_s13 + $0xc8] sm:$0xff] %vm698_vm2, %v1081_v44  ;;  %v1001_v48 = vadd.f32 %v1446_v46, %v1737_v4  ;;  %v995_v49 = vpop.f32.mrb[27].mxu1 }
 0x1f8   : > { %1112 = vst.msk [vmem:[%s1746_s13 + $0xc0] sm:$0xff] %vm698_vm2, %v1080_v45  ;;  %v996_v51 = vadd.f32 %v1737_v4, %v995_v49 }
 0x1f9   : > { %v1083_v52 = vadd.f32 %v1051_v47, %v1001_v48 }
 0x1fa   : > { %v1082_v53 = vadd.f32 %v1050_v50, %v996_v51  ;;  %v1449_v54 = vpop.f32.mrb[28].mxu1 }
 0x1fb   : > { %1115 = vst.msk [vmem:[%s1746_s13 + $0xd8] sm:$0xff] %vm698_vm2, %v1083_v52  ;;  %v1011_v56 = vadd.f32 %v1449_v54, %v1737_v4  ;;  %v1005_v57 = vpop.f32.mrb[29].mxu1 }
 0x1fc   : > { %1114 = vst.msk [vmem:[%s1746_s13 + $0xd0] sm:$0xff] %vm698_vm2, %v1082_v53  ;;  %v1006_v59 = vadd.f32 %v1737_v4, %v1005_v57 }
 0x1fd   : > { %v1085_v60 = vadd.f32 %v1053_v55, %v1011_v56 }
 0x1fe   : > { %v1084_v61 = vadd.f32 %v1052_v58, %v1006_v59  ;;  %v1452_v62 = vpop.f32.mrb[30].mxu1 }
 0x1ff   : > { %1117 = vst.msk [vmem:[%s1746_s13 + $0xe8] sm:$0xff] %vm698_vm2, %v1085_v60  ;;  %v1021_v0 = vadd.f32 %v1452_v62, %v1737_v4  ;;  %v1015_v1 = vpop.f32.mrb[31].mxu1 }
 0x200   : > { %1116 = vst.msk [vmem:[%s1746_s13 + $0xe0] sm:$0xff] %vm698_vm2, %v1084_v61  ;;  %v1016_v3 = vadd.f32 %v1737_v4, %v1015_v1 }
 0x201   : > { %v1087_v5 = vadd.f32 %v1055_v63, %v1021_v0 }
 0x202   : > { %v1086_v6 = vadd.f32 %v1054_v2, %v1016_v3 }
 0x203   : > { %1119 = vst.msk [vmem:[%s1746_s13 + $0xf8] sm:$0xff] %vm698_vm2, %v1087_v5 }
 0x204   : > { %1118 = vst.msk [vmem:[%s1746_s13 + $0xf0] sm:$0xff] %vm698_vm2, %v1086_v6 }
 0x205 PF: > { %s16_s21 = sadd.s32 1, %s1473_s21  }
 0x206   : > { %p13_p4 = scmp.ge.s32.totalorder %s16_s21, 4  }
 0x208   :  { %15 = sbr.rel (!%p13_p4) target bundleno = 1 (0x1), region = 80 }

// kernel: hybrid_forward.11
= control target key start
LH: loop header
LB: loop body
LE: loop exit
PB: predicated region body
PF: predicated region fallthrough
CT: control target
= control target key end

     0   :  { %s1411_s18 = smov 0   ;;  %s1739_s0 = inlined_call_operand.vmem [shape: f32[2,4,4,4], index: 0, kind: input, shape index: {}]   ;;  %s1740_s1 = inlined_call_operand.vmem [shape: f32[2,16,16,4], index: 1, kind: input, shape index: {}]   ;;  %s1741_s2 = inlined_call_operand.vmem [shape: f32[256,16], index: 2, kind: input, shape index: {}]   ;;  %s1742_s3 = inlined_call_operand.vmem [shape: f32[4,4], index: 3, kind: input, shape index: {}]   ;;  %s1743_s4 = inlined_call_operand.vmem [shape: f32[1,4], index: 4, kind: input, shape index: {}]   ;;  %s1744_s5 = inlined_call_operand.vmem [shape: f32[2,16,16,4], index: 5, kind: output, shape index: {}]  }
   0x1 LB: > { %s1108_s19 = sadd.s32 4294967295, %s1379_s18   ;;  %p1112_p0 = scmp.ge.s32.totalorder %s1379_s18, 1  ;;  %s1379_s18 = sphi %s1411_s18, %s15_s18  }
   0x2   : > { %p197_p1 = scmp.lt.s32.totalorder %s1379_s18, 3 }
   0x4   : > { %p198_p2 = pnand %p1112_p0, %p197_p1 }
   0x5   : > { %p230_p3 = scmp.lt.s32.totalorder (!%p198_p2), %s1108_s19, 1  ;;  %v249_v0 = vld [vmem:[%s1741_s2] sm:$0xff] (!%p198_p2)  ;;  %vm321_vm0 = vcmask (!%p198_p2), 130048   ;;  %v250_v4 = vld [vmem:[%s1741_s2 + $0x8] sm:$0xff] (!%p198_p2)  ;;  %v251_v5 = vld [vmem:[%s1741_s2 + $0x10] sm:$0xff] (!%p198_p2)  ;;  %vm748_vm1 = vcmask (!%p198_p2), 1043456  }
   0x6   : > { %201 = sbr.rel (%p198_p2) target bundleno = 517 (0x205), region = 40  ;;  %1261 = vmatprep.mubr.msk.f32.mxu0 (!%p198_p2), %vm321_vm0, %v249_v0  ;;  %v252_v6 = vld [vmem:[%s1741_s2 + $0x18] sm:$0xff] (!%p198_p2)  ;;  %v253_v7 = vld [vmem:[%s1741_s2 + $0x20] sm:$0xff] (!%p198_p2)  ;;  %v254_v8 = vld [vmem:[%s1741_s2 + $0x28] sm:$0xff] (!%p198_p2)  ;;  %vm651_vm2 = vcmask (!%p198_p2), 31744  }
   0x7   : > { %v255_v9 = vld [vmem:[%s1741_s2 + $0x30] sm:$0xff] (!%p198_p2)  ;;  %v256_v10 = vld [vmem:[%s1741_s2 + $0x38] sm:$0xff] (!%p198_p2)  ;;  %v257_v11 = vld [vmem:[%s1741_s2 + $0x40] sm:$0xff] (!%p198_p2) }
   0x8   : > { %v258_v12 = vld [vmem:[%s1741_s2 + $0x48] sm:$0xff] (!%p198_p2)  ;;  %v259_v13 = vld [vmem:[%s1741_s2 + $0x50] sm:$0xff] (!%p198_p2)  ;;  %v260_v14 = vld [vmem:[%s1741_s2 + $0x58] sm:$0xff] (!%p198_p2) }
   0x9   : > { %v261_v15 = vld [vmem:[%s1741_s2 + $0x60] sm:$0xff] (!%p198_p2)  ;;  %v262_v16 = vld [vmem:[%s1741_s2 + $0x68] sm:$0xff] (!%p198_p2)  ;;  %v263_v17 = vld [vmem:[%s1741_s2 + $0x70] sm:$0xff] (!%p198_p2) }
   0xa   : > { %v264_v18 = vld [vmem:[%s1741_s2 + $0x78] sm:$0xff] (!%p198_p2)  ;;  %v265_v19 = vld [vmem:[%s1741_s2 + $0x80] sm:$0xff] (!%p198_p2)  ;;  %v266_v20 = vld [vmem:[%s1741_s2 + $0x88] sm:$0xff] (!%p198_p2) }
   0xb   : > { %v267_v21 = vld [vmem:[%s1741_s2 + $0x90] sm:$0xff] (!%p198_p2)  ;;  %v268_v22 = vld [vmem:[%s1741_s2 + $0x98] sm:$0xff] (!%p198_p2)  ;;  %v269_v23 = vld [vmem:[%s1741_s2 + $0xa0] sm:$0xff] (!%p198_p2) }
   0xc   : > { %v270_v24 = vld [vmem:[%s1741_s2 + $0xa8] sm:$0xff] (!%p198_p2)  ;;  %v271_v25 = vld [vmem:[%s1741_s2 + $0xb0] sm:$0xff] (!%p198_p2)  ;;  %v272_v26 = vld [vmem:[%s1741_s2 + $0xb8] sm:$0xff] (!%p198_p2) }
   0xd   : > { %s1746_s19 = smov (!%p230_p3, %s1108_s19), 1  ;;  %v273_v27 = vld [vmem:[%s1741_s2 + $0xc0] sm:$0xff]  ;;  %v274_v28 = vld [vmem:[%s1741_s2 + $0xc8] sm:$0xff]  ;;  %v275_v29 = vld [vmem:[%s1741_s2 + $0xd0] sm:$0xff] }
   0xe   : > { %s1187_s22 = sshll.u32 %s1746_s19, 4  ;;  %v276_v30 = vld [vmem:[%s1741_s2 + $0xd8] sm:$0xff]  ;;  %v277_v31 = vld [vmem:[%s1741_s2 + $0xe0] sm:$0xff]  ;;  %v278_v32 = vld [vmem:[%s1741_s2 + $0xe8] sm:$0xff]  ;;  %s1188_s21 = sshll.u32 %s1746_s19, 8 }
   0xf   : > { %s234_s25 = scalar_lea.vmem %s1739_s0, %s1187_s22  ;;  %v279_v33 = vld [vmem:[%s1741_s2 + $0xf0] sm:$0xff]  ;;  %v280_v34 = vld [vmem:[%s1741_s2 + $0xf8] sm:$0xff]  ;;  %v643_v35 = vld [vmem:[%s1742_s3] sm:$0xf]  ;;  %s1562_s24 = scalar_lea.vmem %s1740_s1, %s1188_s21 }
  0x10   : > { %v1371_v1 = vld [vmem:[%s234_s25] sm:$0xff]   ;;  %v1372_v2 = vld [vmem:[%s234_s25 + $0x8] sm:$0xff]   ;;  %1309 = vmatprep.subr.msk.mxu1 %vm748_vm1, %v643_v35  ;;  %v284_v42 = vld [vmem:[%s1562_s24 + $0x18] sm:$0xff]  ;;  %s1639_s29 = scalar_lea.vmem %s1744_s5, %s1188_s21 }
  0x11   : > { %v1359_v3 = vpack.c.bf16 %v1372_v2, %v1371_v1  ;;  %1310 = vmatpush3.msk.msra.mxu1 %vm748_vm1, %v643_v35  ;;  %v282_v36 = vld [vmem:[%s1562_s24 + $0x8] sm:$0xff]  ;;  %v281_v37 = vld [vmem:[%s1562_s24] sm:$0xff]  ;;  %v283_v43 = vld [vmem:[%s1562_s24 + $0x10] sm:$0xff] }
  0x12   : > { %v286_v48 = vld [vmem:[%s1562_s24 + $0x28] sm:$0xff]  ;;  %v285_v49 = vld [vmem:[%s1562_s24 + $0x20] sm:$0xff]  ;;  %v288_v54 = vld [vmem:[%s1562_s24 + $0x38] sm:$0xff] }
  0x13   : > { %1360 = vmatprep.subr.bf16.mxu0 %v1359_v3  ;;  %v287_v55 = vld [vmem:[%s1562_s24 + $0x30] sm:$0xff]  ;;  %v290_v60 = vld [vmem:[%s1562_s24 + $0x48] sm:$0xff]  ;;  %v289_v61 = vld [vmem:[%s1562_s24 + $0x40] sm:$0xff] }
  0x14   : > { %1362 = vmatpush3.bf16.msra.mxu0 %v1359_v3  ;;  %v292_v2 = vld [vmem:[%s1562_s24 + $0x58] sm:$0xff]  ;;  %v291_v3 = vld [vmem:[%s1562_s24 + $0x50] sm:$0xff] }
  0x17   : > { %1262 = vmatmul.mubr.msk.f32.vlgmr.msra.gmra.mrb[0].mxu0 %vm321_vm0, %v250_v4 }
  0x18   : > { %1264 = vmatprep.mubr.msk.f32.mxu0 %vm321_vm0, %v251_v5 }
  0x1b   : > { %1265 = vmatmul.mubr.msk.f32.gmra.mrb[2].mxu0 %vm321_vm0, %v252_v6 }
  0x1c   : > { %1267 = vmatprep.mubr.msk.f32.mxu0 %vm321_vm0, %v253_v7 }
  0x1f   : > { %1268 = vmatmul.mubr.msk.f32.gmra.mrb[4].mxu0 %vm321_vm0, %v254_v8  ;;  %v294_v8 = vld [vmem:[%s1562_s24 + $0x68] sm:$0xff] }
  0x20   : > { %1270 = vmatprep.mubr.msk.f32.mxu0 %vm321_vm0, %v255_v9  ;;  %v293_v9 = vld [vmem:[%s1562_s24 + $0x60] sm:$0xff] }
  0x23   : > { %1271 = vmatmul.mubr.msk.f32.gmra.mrb[6].mxu0 %vm321_vm0, %v256_v10 }
  0x24   : > { %1273 = vmatprep.mubr.msk.f32.mxu0 %vm321_vm0, %v257_v11 }
  0x27   : > { %1274 = vmatmul.mubr.msk.f32.gmra.mrb[8].mxu0 %vm321_vm0, %v258_v12 }
  0x28   : > { %1276 = vmatprep.mubr.msk.f32.mxu0 %vm321_vm0, %v259_v13 }
  0x2b   : > { %1277 = vmatmul.mubr.msk.f32.gmra.mrb[10].mxu0 %vm321_vm0, %v260_v14  ;;  %v296_v14 = vld [vmem:[%s1562_s24 + $0x78] sm:$0xff] }
  0x2c   : > { %1279 = vmatprep.mubr.msk.f32.mxu0 %vm321_vm0, %v261_v15  ;;  %v295_v15 = vld [vmem:[%s1562_s24 + $0x70] sm:$0xff] }
  0x2f   : > { %1280 = vmatmul.mubr.msk.f32.gmra.mrb[12].mxu0 %vm321_vm0, %v262_v16 }
  0x30   : > { %1282 = vmatprep.mubr.msk.f32.mxu0 %vm321_vm0, %v263_v17 }
  0x33   : > { %1283 = vmatmul.mubr.msk.f32.gmra.mrb[14].mxu0 %vm321_vm0, %v264_v18 }
  0x34   : > { %1285 = vmatprep.mubr.msk.f32.mxu0 %vm321_vm0, %v265_v19 }
  0x37   : > { %1286 = vmatmul.mubr.msk.f32.gmra.mrb[16].mxu0 %vm321_vm0, %v266_v20  ;;  %v298_v20 = vld [vmem:[%s1562_s24 + $0x88] sm:$0xff] }
  0x38   : > { %1288 = vmatprep.mubr.msk.f32.mxu0 %vm321_vm0, %v267_v21  ;;  %v297_v21 = vld [vmem:[%s1562_s24 + $0x80] sm:$0xff] }
  0x3b   : > { %1289 = vmatmul.mubr.msk.f32.gmra.mrb[18].mxu0 %vm321_vm0, %v268_v22 }
  0x3c   : > { %1291 = vmatprep.mubr.msk.f32.mxu0 %vm321_vm0, %v269_v23 }
  0x3f   : > { %1292 = vmatmul.mubr.msk.f32.gmra.mrb[20].mxu0 %vm321_vm0, %v270_v24 }
  0x40   : > { %1294 = vmatprep.mubr.msk.f32.mxu0 %vm321_vm0, %v271_v25 }
  0x43   : > { %1295 = vmatmul.mubr.msk.f32.gmra.mrb[22].mxu0 %vm321_vm0, %v272_v26  ;;  %v300_v26 = vld [vmem:[%s1562_s24 + $0x98] sm:$0xff] }
  0x44   : > { %1297 = vmatprep.mubr.msk.f32.mxu0 %vm321_vm0, %v273_v27  ;;  %v299_v27 = vld [vmem:[%s1562_s24 + $0x90] sm:$0xff] }
  0x47   : > { %1298 = vmatmul.mubr.msk.f32.gmra.mrb[24].mxu0 %vm321_vm0, %v274_v28 }
  0x48   : > { %1300 = vmatprep.mubr.msk.f32.mxu0 %vm321_vm0, %v275_v29 }
  0x4b   : > { %1301 = vmatmul.mubr.msk.f32.gmra.mrb[26].mxu0 %vm321_vm0, %v276_v30 }
  0x4c   : > { %1303 = vmatprep.mubr.msk.f32.mxu0 %vm321_vm0, %v277_v31 }
  0x4f   : > { %1304 = vmatmul.mubr.msk.f32.gmra.mrb[28].mxu0 %vm321_vm0, %v278_v32  ;;  %v302_v32 = vld [vmem:[%s1562_s24 + $0xa8] sm:$0xff] }
  0x50   : > { %1306 = vmatprep.mubr.msk.f32.mxu0 %vm321_vm0, %v279_v33  ;;  %v301_v33 = vld [vmem:[%s1562_s24 + $0xa0] sm:$0xff] }
  0x53   : > { %1307 = vmatmul.mubr.msk.f32.gmra.mrb[30].mxu0 %vm321_vm0, %v280_v34 }
  0xea   : > { %v1263_v38 = vpop.f32.mrb[0].mxu0 }
  0xeb   : > { %v490_v39 = vadd.f32 %v1263_v38, %v282_v36  ;;  %v484_v40 = vpop.f32.mrb[1].mxu0  ;;  %v304_v38 = vld [vmem:[%s1562_s24 + $0xb8] sm:$0xff] }
  0xec   : > { %v485_v41 = vadd.f32 %v484_v40, %v281_v37 }
  0xee   : > { %v1266_v44 = vpop.f32.mrb[2].mxu0  ;;  %1311 = vmatprep.mubr.msk.f32.mxu1 %vm651_vm2, %v485_v41 }
  0xef   : > { %v500_v45 = vadd.f32 %v1266_v44, %v284_v42  ;;  %v494_v46 = vpop.f32.mrb[3].mxu0  ;;  %1312 = vmatmul.mubr.msk.f32.vlgmr.msra.gmra.mrb[0].mxu1 %vm651_vm2, %v490_v39  ;;  %v303_v39 = vld [vmem:[%s1562_s24 + $0xb0] sm:$0xff]  ;;  %v306_v44 = vld [vmem:[%s1562_s24 + $0xc8] sm:$0xff] }
  0xf0   : > { %v495_v47 = vadd.f32 %v494_v46, %v283_v43 }
  0xf2   : > { %v1269_v50 = vpop.f32.mrb[4].mxu0  ;;  %1314 = vmatprep.mubr.msk.f32.mxu1 %vm651_vm2, %v495_v47 }
  0xf3   : > { %v510_v51 = vadd.f32 %v1269_v50, %v286_v48  ;;  %v504_v52 = vpop.f32.mrb[5].mxu0  ;;  %1315 = vmatmul.mubr.msk.f32.gmra.mrb[2].mxu1 %vm651_vm2, %v500_v45  ;;  %v305_v45 = vld [vmem:[%s1562_s24 + $0xc0] sm:$0xff]  ;;  %v308_v50 = vld [vmem:[%s1562_s24 + $0xd8] sm:$0xff] }
  0xf4   : > { %v505_v53 = vadd.f32 %v504_v52, %v285_v49 }
  0xf6   : > { %v1272_v56 = vpop.f32.mrb[6].mxu0  ;;  %1317 = vmatprep.mubr.msk.f32.mxu1 %vm651_vm2, %v505_v53 }
  0xf7   : > { %v520_v57 = vadd.f32 %v1272_v56, %v288_v54  ;;  %v514_v58 = vpop.f32.mrb[7].mxu0  ;;  %1318 = vmatmul.mubr.msk.f32.gmra.mrb[4].mxu1 %vm651_vm2, %v510_v51  ;;  %v307_v51 = vld [vmem:[%s1562_s24 + $0xd0] sm:$0xff]  ;;  %v310_v56 = vld [vmem:[%s1562_s24 + $0xe8] sm:$0xff] }
  0xf8   : > { %v515_v59 = vadd.f32 %v514_v58, %v287_v55 }
  0xfa   : > { %v1275_v62 = vpop.f32.mrb[8].mxu0  ;;  %1320 = vmatprep.mubr.msk.f32.mxu1 %vm651_vm2, %v515_v59 }
  0xfb   : > { %v530_v63 = vadd.f32 %v1275_v62, %v290_v60  ;;  %v524_v0 = vpop.f32.mrb[9].mxu0  ;;  %1321 = vmatmul.mubr.msk.f32.gmra.mrb[6].mxu1 %vm651_vm2, %v520_v57  ;;  %v309_v57 = vld [vmem:[%s1562_s24 + $0xe0] sm:$0xff]  ;;  %v312_v62 = vld [vmem:[%s1562_s24 + $0xf8] sm:$0xff] }
  0xfc   : > { %v525_v1 = vadd.f32 %v524_v0, %v289_v61 }
  0xfe   : > { %v1278_v4 = vpop.f32.mrb[10].mxu0  ;;  %1323 = vmatprep.mubr.msk.f32.mxu1 %vm651_vm2, %v525_v1 }
  0xff   : > { %v540_v5 = vadd.f32 %v1278_v4, %v292_v2  ;;  %v534_v6 = vpop.f32.mrb[11].mxu0  ;;  %1324 = vmatmul.mubr.msk.f32.gmra.mrb[8].mxu1 %vm651_vm2, %v530_v63  ;;  %v311_v63 = vld [vmem:[%s1562_s24 + $0xf0] sm:$0xff]  ;;  %v1631_v4 = vld [vmem:[%s1743_s4] ss:$0 sm:$0xff] }
 0x100   : > { %v535_v7 = vadd.f32 %v534_v6, %v291_v3 }
 0x102   : > { %v1281_v10 = vpop.f32.mrb[12].mxu0  ;;  %1326 = vmatprep.mubr.msk.f32.mxu1 %vm651_vm2, %v535_v7 }
 0x103   : > { %v550_v11 = vadd.f32 %v1281_v10, %v294_v8  ;;  %v544_v12 = vpop.f32.mrb[13].mxu0  ;;  %1327 = vmatmul.mubr.msk.f32.gmra.mrb[10].mxu1 %vm651_vm2, %v540_v5 }
 0x104   : > { %v545_v13 = vadd.f32 %v544_v12, %v293_v9 }
 0x106   : > { %v1284_v16 = vpop.f32.mrb[14].mxu0  ;;  %1329 = vmatprep.mubr.msk.f32.mxu1 %vm651_vm2, %v545_v13 }
 0x107   : > { %v560_v17 = vadd.f32 %v1284_v16, %v296_v14  ;;  %v554_v18 = vpop.f32.mrb[15].mxu0  ;;  %1330 = vmatmul.mubr.msk.f32.gmra.mrb[12].mxu1 %vm651_vm2, %v550_v11 }
 0x108   : > { %v555_v19 = vadd.f32 %v554_v18, %v295_v15 }
 0x10a   : > { %v1287_v22 = vpop.f32.mrb[16].mxu0  ;;  %1332 = vmatprep.mubr.msk.f32.mxu1 %vm651_vm2, %v555_v19 }
 0x10b   : > { %v570_v23 = vadd.f32 %v1287_v22, %v298_v20  ;;  %v564_v24 = vpop.f32.mrb[17].mxu0  ;;  %1333 = vmatmul.mubr.msk.f32.gmra.mrb[14].mxu1 %vm651_vm2, %v560_v17 }
 0x10c   : > { %v565_v25 = vadd.f32 %v564_v24, %v297_v21 }
 0x10e   : > { %v1290_v28 = vpop.f32.mrb[18].mxu0  ;;  %1335 = vmatprep.mubr.msk.f32.mxu1 %vm651_vm2, %v565_v25 }
 0x10f   : > { %v580_v29 = vadd.f32 %v1290_v28, %v300_v26  ;;  %v574_v30 = vpop.f32.mrb[19].mxu0  ;;  %1336 = vmatmul.mubr.msk.f32.gmra.mrb[16].mxu1 %vm651_vm2, %v570_v23 }
 0x110   : > { %v575_v31 = vadd.f32 %v574_v30, %v299_v27 }
 0x112   : > { %v1293_v34 = vpop.f32.mrb[20].mxu0  ;;  %1338 = vmatprep.mubr.msk.f32.mxu1 %vm651_vm2, %v575_v31 }
 0x113   : > { %v590_v35 = vadd.f32 %v1293_v34, %v302_v32  ;;  %v584_v36 = vpop.f32.mrb[21].mxu0  ;;  %1339 = vmatmul.mubr.msk.f32.gmra.mrb[18].mxu1 %vm651_vm2, %v580_v29 }
 0x114   : > { %v585_v37 = vadd.f32 %v584_v36, %v301_v33 }
 0x116   : > { %v1296_v40 = vpop.f32.mrb[22].mxu0  ;;  %1341 = vmatprep.mubr.msk.f32.mxu1 %vm651_vm2, %v585_v37 }
 0x117   : > { %v600_v41 = vadd.f32 %v1296_v40, %v304_v38  ;;  %v594_v42 = vpop.f32.mrb[23].mxu0  ;;  %1342 = vmatmul.mubr.msk.f32.gmra.mrb[20].mxu1 %vm651_vm2, %v590_v35 }
 0x118   : > { %v595_v43 = vadd.f32 %v594_v42, %v303_v39 }
 0x11a   : > { %v1299_v46 = vpop.f32.mrb[24].mxu0  ;;  %1344 = vmatprep.mubr.msk.f32.mxu1 %vm651_vm2, %v595_v43 }
 0x11b   : > { %v610_v47 = vadd.f32 %v1299_v46, %v306_v44  ;;  %v604_v48 = vpop.f32.mrb[25].mxu0  ;;  %1345 = vmatmul.mubr.msk.f32.gmra.mrb[22].mxu1 %vm651_vm2, %v600_v41 }
 0x11c   : > { %v605_v49 = vadd.f32 %v604_v48, %v305_v45 }
 0x11e   : > { %v1302_v52 = vpop.f32.mrb[26].mxu0  ;;  %1347 = vmatprep.mubr.msk.f32.mxu1 %vm651_vm2, %v605_v49 }
 0x11f   : > { %v620_v53 = vadd.f32 %v1302_v52, %v308_v50  ;;  %v614_v54 = vpop.f32.mrb[27].mxu0  ;;  %1348 = vmatmul.mubr.msk.f32.gmra.mrb[24].mxu1 %vm651_vm2, %v610_v47 }
 0x120   : > { %v615_v55 = vadd.f32 %v614_v54, %v307_v51 }
 0x122   : > { %v1305_v58 = vpop.f32.mrb[28].mxu0  ;;  %1350 = vmatprep.mubr.msk.f32.mxu1 %vm651_vm2, %v615_v55 }
 0x123   : > { %v630_v59 = vadd.f32 %v1305_v58, %v310_v56  ;;  %v624_v60 = vpop.f32.mrb[29].mxu0  ;;  %1351 = vmatmul.mubr.msk.f32.gmra.mrb[26].mxu1 %vm651_vm2, %v620_v53 }
 0x124   : > { %v625_v61 = vadd.f32 %v624_v60, %v309_v57 }
 0x126   : > { %v1308_v0 = vpop.f32.mrb[30].mxu0  ;;  %1353 = vmatprep.mubr.msk.f32.mxu1 %vm651_vm2, %v625_v61 }
 0x127   : > { %v640_v1 = vadd.f32 %v1308_v0, %v312_v62  ;;  %v634_v2 = vpop.f32.mrb[31].mxu0  ;;  %1354 = vmatmul.mubr.msk.f32.gmra.mrb[28].mxu1 %vm651_vm2, %v630_v59 }
 0x128   : > { %v635_v3 = vadd.f32 %v634_v2, %v311_v63 }
 0x12a   : > { %1356 = vmatprep.mubr.msk.f32.mxu1 %vm651_vm2, %v635_v3 }
 0x12b   : > { %1357 = vmatmul.mubr.msk.f32.gmra.mrb[30].mxu1 %vm651_vm2, %v640_v1 }
 0x1c2   : > { %v1313_v5 = vpop.f32.mrb[0].mxu1 }
 0x1c3   : > { %v824_v6 = vadd.f32 %v1313_v5, %v1631_v4  ;;  %v818_v7 = vpop.f32.mrb[1].mxu1 }
 0x1c4   : > { %v819_v8 = vadd.f32 %v1631_v4, %v818_v7 }
 0x1c5   : > { %v978_v9 = vmax.f32 %v824_v6, 0.0 }
 0x1c6   : > { %v977_v10 = vmax.f32 %v819_v8, 0.0  ;;  %v1316_v11 = vpop.f32.mrb[2].mxu1 }
 0x1c7   : > { %1010 = vst.msk [vmem:[%s1639_s29 + $0x8] sm:$0xff] %vm651_vm2, %v978_v9  ;;  %v834_v12 = vadd.f32 %v1316_v11, %v1631_v4  ;;  %v828_v13 = vpop.f32.mrb[3].mxu1 }
 0x1c8   : > { %1009 = vst.msk [vmem:[%s1639_s29] sm:$0xff] %vm651_vm2, %v977_v10  ;;  %v829_v14 = vadd.f32 %v1631_v4, %v828_v13 }
 0x1c9   : > { %v980_v15 = vmax.f32 %v834_v12, 0.0 }
 0x1ca   : > { %v979_v16 = vmax.f32 %v829_v14, 0.0  ;;  %v1319_v17 = vpop.f32.mrb[4].mxu1 }
 0x1cb   : > { %1012 = vst.msk [vmem:[%s1639_s29 + $0x18] sm:$0xff] %vm651_vm2, %v980_v15  ;;  %v844_v18 = vadd.f32 %v1319_v17, %v1631_v4  ;;  %v838_v19 = vpop.f32.mrb[5].mxu1 }
 0x1cc   : > { %1011 = vst.msk [vmem:[%s1639_s29 + $0x10] sm:$0xff] %vm651_vm2, %v979_v16  ;;  %v839_v20 = vadd.f32 %v1631_v4, %v838_v19 }
 0x1cd   : > { %v982_v21 = vmax.f32 %v844_v18, 0.0 }
 0x1ce   : > { %v981_v22 = vmax.f32 %v839_v20, 0.0  ;;  %v1322_v23 = vpop.f32.mrb[6].mxu1 }
 0x1cf   : > { %1014 = vst.msk [vmem:[%s1639_s29 + $0x28] sm:$0xff] %vm651_vm2, %v982_v21  ;;  %v854_v24 = vadd.f32 %v1322_v23, %v1631_v4  ;;  %v848_v25 = vpop.f32.mrb[7].mxu1 }
 0x1d0   : > { %1013 = vst.msk [vmem:[%s1639_s29 + $0x20] sm:$0xff] %vm651_vm2, %v981_v22  ;;  %v849_v26 = vadd.f32 %v1631_v4, %v848_v25 }
 0x1d1   : > { %v984_v27 = vmax.f32 %v854_v24, 0.0 }
 0x1d2   : > { %v983_v28 = vmax.f32 %v849_v26, 0.0  ;;  %v1325_v29 = vpop.f32.mrb[8].mxu1 }
 0x1d3   : > { %1016 = vst.msk [vmem:[%s1639_s29 + $0x38] sm:$0xff] %vm651_vm2, %v984_v27  ;;  %v864_v30 = vadd.f32 %v1325_v29, %v1631_v4  ;;  %v858_v31 = vpop.f32.mrb[9].mxu1 }
 0x1d4   : > { %1015 = vst.msk [vmem:[%s1639_s29 + $0x30] sm:$0xff] %vm651_vm2, %v983_v28  ;;  %v859_v32 = vadd.f32 %v1631_v4, %v858_v31 }
 0x1d5   : > { %v986_v33 = vmax.f32 %v864_v30, 0.0 }
 0x1d6   : > { %v985_v34 = vmax.f32 %v859_v32, 0.0  ;;  %v1328_v35 = vpop.f32.mrb[10].mxu1 }
 0x1d7   : > { %1018 = vst.msk [vmem:[%s1639_s29 + $0x48] sm:$0xff] %vm651_vm2, %v986_v33  ;;  %v874_v36 = vadd.f32 %v1328_v35, %v1631_v4  ;;  %v868_v37 = vpop.f32.mrb[11].mxu1 }
 0x1d8   : > { %1017 = vst.msk [vmem:[%s1639_s29 + $0x40] sm:$0xff] %vm651_vm2, %v985_v34  ;;  %v869_v38 = vadd.f32 %v1631_v4, %v868_v37 }
 0x1d9   : > { %v988_v39 = vmax.f32 %v874_v36, 0.0 }
 0x1da   : > { %v987_v40 = vmax.f32 %v869_v38, 0.0  ;;  %v1331_v41 = vpop.f32.mrb[12].mxu1 }
 0x1db   : > { %1020 = vst.msk [vmem:[%s1639_s29 + $0x58] sm:$0xff] %vm651_vm2, %v988_v39  ;;  %v884_v42 = vadd.f32 %v1331_v41, %v1631_v4  ;;  %v878_v43 = vpop.f32.mrb[13].mxu1 }
 0x1dc   : > { %1019 = vst.msk [vmem:[%s1639_s29 + $0x50] sm:$0xff] %vm651_vm2, %v987_v40  ;;  %v879_v44 = vadd.f32 %v1631_v4, %v878_v43 }
 0x1dd   : > { %v990_v45 = vmax.f32 %v884_v42, 0.0 }
 0x1de   : > { %v989_v46 = vmax.f32 %v879_v44, 0.0  ;;  %v1334_v47 = vpop.f32.mrb[14].mxu1 }
 0x1df   : > { %1022 = vst.msk [vmem:[%s1639_s29 + $0x68] sm:$0xff] %vm651_vm2, %v990_v45  ;;  %v894_v48 = vadd.f32 %v1334_v47, %v1631_v4  ;;  %v888_v49 = vpop.f32.mrb[15].mxu1 }
 0x1e0   : > { %1021 = vst.msk [vmem:[%s1639_s29 + $0x60] sm:$0xff] %vm651_vm2, %v989_v46  ;;  %v889_v50 = vadd.f32 %v1631_v4, %v888_v49 }
 0x1e1   : > { %v992_v51 = vmax.f32 %v894_v48, 0.0 }
 0x1e2   : > { %v991_v52 = vmax.f32 %v889_v50, 0.0  ;;  %v1337_v53 = vpop.f32.mrb[16].mxu1 }
 0x1e3   : > { %1024 = vst.msk [vmem:[%s1639_s29 + $0x78] sm:$0xff] %vm651_vm2, %v992_v51  ;;  %v904_v54 = vadd.f32 %v1337_v53, %v1631_v4  ;;  %v898_v55 = vpop.f32.mrb[17].mxu1 }
 0x1e4   : > { %1023 = vst.msk [vmem:[%s1639_s29 + $0x70] sm:$0xff] %vm651_vm2, %v991_v52  ;;  %v899_v56 = vadd.f32 %v1631_v4, %v898_v55 }
 0x1e5   : > { %v994_v57 = vmax.f32 %v904_v54, 0.0 }
 0x1e6   : > { %v993_v58 = vmax.f32 %v899_v56, 0.0  ;;  %v1340_v59 = vpop.f32.mrb[18].mxu1 }
 0x1e7   : > { %1026 = vst.msk [vmem:[%s1639_s29 + $0x88] sm:$0xff] %vm651_vm2, %v994_v57  ;;  %v914_v60 = vadd.f32 %v1340_v59, %v1631_v4  ;;  %v908_v61 = vpop.f32.mrb[19].mxu1 }
 0x1e8   : > { %1025 = vst.msk [vmem:[%s1639_s29 + $0x80] sm:$0xff] %vm651_vm2, %v993_v58  ;;  %v909_v62 = vadd.f32 %v1631_v4, %v908_v61 }
 0x1e9   : > { %v996_v63 = vmax.f32 %v914_v60, 0.0 }
 0x1ea   : > { %v995_v0 = vmax.f32 %v909_v62, 0.0  ;;  %v1343_v1 = vpop.f32.mrb[20].mxu1 }
 0x1eb   : > { %1028 = vst.msk [vmem:[%s1639_s29 + $0x98] sm:$0xff] %vm651_vm2, %v996_v63  ;;  %v924_v2 = vadd.f32 %v1343_v1, %v1631_v4  ;;  %v918_v3 = vpop.f32.mrb[21].mxu1 }
 0x1ec   : > { %1027 = vst.msk [vmem:[%s1639_s29 + $0x90] sm:$0xff] %vm651_vm2, %v995_v0  ;;  %v919_v5 = vadd.f32 %v1631_v4, %v918_v3 }
 0x1ed   : > { %v998_v6 = vmax.f32 %v924_v2, 0.0 }
 0x1ee   : > { %v997_v7 = vmax.f32 %v919_v5, 0.0  ;;  %v1346_v8 = vpop.f32.mrb[22].mxu1 }
 0x1ef   : > { %1030 = vst.msk [vmem:[%s1639_s29 + $0xa8] sm:$0xff] %vm651_vm2, %v998_v6  ;;  %v934_v9 = vadd.f32 %v1346_v8, %v1631_v4  ;;  %v928_v10 = vpop.f32.mrb[23].mxu1 }
 0x1f0   : > { %1029 = vst.msk [vmem:[%s1639_s29 + $0xa0] sm:$0xff] %vm651_vm2, %v997_v7  ;;  %v929_v11 = vadd.f32 %v1631_v4, %v928_v10 }
 0x1f1   : > { %v1000_v12 = vmax.f32 %v934_v9, 0.0 }
 0x1f2   : > { %v999_v13 = vmax.f32 %v929_v11, 0.0  ;;  %v1349_v14 = vpop.f32.mrb[24].mxu1 }
 0x1f3   : > { %1032 = vst.msk [vmem:[%s1639_s29 + $0xb8] sm:$0xff] %vm651_vm2, %v1000_v12  ;;  %v944_v15 = vadd.f32 %v1349_v14, %v1631_v4  ;;  %v938_v16 = vpop.f32.mrb[25].mxu1 }
 0x1f4   : > { %1031 = vst.msk [vmem:[%s1639_s29 + $0xb0] sm:$0xff] %vm651_vm2, %v999_v13  ;;  %v939_v17 = vadd.f32 %v1631_v4, %v938_v16 }
 0x1f5   : > { %v1002_v18 = vmax.f32 %v944_v15, 0.0 }
 0x1f6   : > { %v1001_v19 = vmax.f32 %v939_v17, 0.0  ;;  %v1352_v20 = vpop.f32.mrb[26].mxu1 }
 0x1f7   : > { %1034 = vst.msk [vmem:[%s1639_s29 + $0xc8] sm:$0xff] %vm651_vm2, %v1002_v18  ;;  %v954_v21 = vadd.f32 %v1352_v20, %v1631_v4  ;;  %v948_v22 = vpop.f32.mrb[27].mxu1 }
 0x1f8   : > { %1033 = vst.msk [vmem:[%s1639_s29 + $0xc0] sm:$0xff] %vm651_vm2, %v1001_v19  ;;  %v949_v23 = vadd.f32 %v1631_v4, %v948_v22 }
 0x1f9   : > { %v1004_v24 = vmax.f32 %v954_v21, 0.0 }
 0x1fa   : > { %v1003_v25 = vmax.f32 %v949_v23, 0.0  ;;  %v1355_v26 = vpop.f32.mrb[28].mxu1 }
 0x1fb   : > { %1036 = vst.msk [vmem:[%s1639_s29 + $0xd8] sm:$0xff] %vm651_vm2, %v1004_v24  ;;  %v964_v27 = vadd.f32 %v1355_v26, %v1631_v4  ;;  %v958_v28 = vpop.f32.mrb[29].mxu1 }
 0x1fc   : > { %1035 = vst.msk [vmem:[%s1639_s29 + $0xd0] sm:$0xff] %vm651_vm2, %v1003_v25  ;;  %v959_v29 = vadd.f32 %v1631_v4, %v958_v28 }
 0x1fd   : > { %v1006_v30 = vmax.f32 %v964_v27, 0.0 }
 0x1fe   : > { %v1005_v31 = vmax.f32 %v959_v29, 0.0  ;;  %v1358_v32 = vpop.f32.mrb[30].mxu1 }
 0x1ff   : > { %1038 = vst.msk [vmem:[%s1639_s29 + $0xe8] sm:$0xff] %vm651_vm2, %v1006_v30  ;;  %v974_v33 = vadd.f32 %v1358_v32, %v1631_v4  ;;  %v968_v34 = vpop.f32.mrb[31].mxu1 }
 0x200   : > { %1037 = vst.msk [vmem:[%s1639_s29 + $0xe0] sm:$0xff] %vm651_vm2, %v1005_v31  ;;  %v969_v35 = vadd.f32 %v1631_v4, %v968_v34 }
 0x201   : > { %v1008_v36 = vmax.f32 %v974_v33, 0.0 }
 0x202   : > { %v1007_v37 = vmax.f32 %v969_v35, 0.0 }
 0x203   : > { %1040 = vst.msk [vmem:[%s1639_s29 + $0xf8] sm:$0xff] %vm651_vm2, %v1008_v36 }
 0x204   : > { %1039 = vst.msk [vmem:[%s1639_s29 + $0xf0] sm:$0xff] %vm651_vm2, %v1007_v37 }
 0x205 PF: > { %s15_s18 = sadd.s32 1, %s1379_s18  }
 0x206   : > { %p12_p4 = scmp.ge.s32.totalorder %s15_s18, 4  }
 0x208   :  { %14 = sbr.rel (!%p12_p4) target bundleno = 1 (0x1), region = 73 }

// kernel: hybrid_forward.12
= control target key start
LH: loop header
LB: loop body
LE: loop exit
PB: predicated region body
PF: predicated region fallthrough
CT: control target
= control target key end

     0   :  { %s2905_s18 = smov 0   ;;  %s4396_s0 = inlined_call_operand.vmem [shape: f32[2,18,18,4], index: 0, kind: input, shape index: {}]   ;;  %s4397_s1 = inlined_call_operand.vmem [shape: f32[9,4], index: 1, kind: input, shape index: {}]   ;;  %s4398_s2 = inlined_call_operand.vmem [shape: f32[1,4], index: 2, kind: input, shape index: {}]   ;;  %s4399_s3 = inlined_call_operand.vmem [shape: f32[4,4], index: 3, kind: input, shape index: {}]   ;;  %s4400_s4 = inlined_call_operand.vmem [shape: f32[1,4], index: 4, kind: input, shape index: {}]   ;;  %s4401_s5 = inlined_call_operand.vmem [shape: f32[2,16,16,4], index: 5, kind: output, shape index: {}]  }
   0x1 LB: > { %s2716_s19 = sadd.s32 4294967295, %s2873_s18   ;;  %p2720_p0 = scmp.ge.s32.totalorder %s2873_s18, 1  ;;  %s2873_s18 = sphi %s2905_s18, %s15_s18  }
   0x2   : > { %p187_p1 = scmp.lt.s32.totalorder %s2873_s18, 3 }
   0x4   : > { %p188_p2 = pnand %p2720_p0, %p187_p1 }
   0x5   : > { %v2295_v0 = vld [vmem:[%s4399_s3] sm:$0xf] (!%p188_p2)  ;;  %vm2368_vm0 = vcmask (!%p188_p2), 1043456   ;;  %p215_p3 = scmp.lt.s32.totalorder (!%p188_p2), %s2716_s19, 1  ;;  %v281_v1 = vlaneseq (!%p188_p2)  ;;  %vm449_vm1 = vcmask (!%p188_p2), 1046528   ;;  %vm694_vm2 = vcmask (!%p188_p2), 1045504  }
   0x6   : > { %191 = sbr.rel (%p188_p2) target bundleno = 579 (0x243), region = 40  ;;  %2796 = vmatprep.subr.msk.mxu0 (!%p188_p2), %vm2368_vm0, %v2295_v0  ;;  %2846 = vmatprep.subr.msk.mxu1 (!%p188_p2), %vm2368_vm0, %v2295_v0  ;;  %v279_v3 = vld [vmem:[%s4397_s1] sm:$0xff] (!%p188_p2)  ;;  %vm2022_vm3 = vcmask (!%p188_p2), 1040384   ;;  %vm2303_vm4 = vcmask (!%p188_p2), 31744  }
   0x7   : > { %2797 = vmatpush3.msk.msra.mxu0 (!%p188_p2), %vm2368_vm0, %v2295_v0  ;;  %2847 = vmatpush3.msk.msra.mxu1 (!%p188_p2), %vm2368_vm0, %v2295_v0  ;;  %v282_v2 = vshrl.u32 (!%p188_p2), %v281_v1, 7 }
   0x9   : > { %v283_v4 = vsub.s32 (!%p188_p2), 0, %v282_v2  ;;  %v351_v5 = vsub.s32 (!%p188_p2), 1, %v282_v2  ;;  %v596_v6 = vsub.s32 (!%p188_p2), 2, %v282_v2  ;;  %v841_v7 = vsub.s32 (!%p188_p2), 3, %v282_v2 }
   0xa   : > { %v909_v8 = vsub.s32 (!%p188_p2), 4, %v282_v2  ;;  %v1153_v9 = vsub.s32 (!%p188_p2), 5, %v282_v2  ;;  %v1397_v10 = vsub.s32 (!%p188_p2), 6, %v282_v2  ;;  %v1465_v11 = vsub.s32 (!%p188_p2), 7, %v282_v2 }
   0xb   : > { %v2927_v12 = vrot.slane (!%p188_p2), %v279_v3, %v283_v4  ;;  %v2929_v13 = vrot.slane (!%p188_p2), %v279_v3, %v351_v5  ;;  %v2931_v14 = vrot.slane (!%p188_p2), %v279_v3, %v596_v6  ;;  %v2933_v15 = vrot.slane (!%p188_p2), %v279_v3, %v841_v7 }
   0xc   : > { %v2938_v19 = vrot.slane (!%p188_p2), %v279_v3, %v909_v8  ;;  %v2940_v20 = vrot.slane (!%p188_p2), %v279_v3, %v1153_v9  ;;  %v2942_v21 = vrot.slane (!%p188_p2), %v279_v3, %v1397_v10  ;;  %v2944_v22 = vrot.slane (!%p188_p2), %v279_v3, %v1465_v11  ;;  %v3016_v8 = vld [vmem:[%s4397_s1 + $0x8] ss:$0 sm:$0xff] (!%p188_p2) }
   0xd   : > { %s4403_s19 = smov (!%p215_p3, %s2716_s19), 1 }
   0xe   : > { %s2848_s24 = smul.u32 432, %s4403_s19  ;;  %s2762_s17 = sshll.u32 %s4403_s19, 8 }
   0xf   : > { %s4276_s19 = scalar_lea.vmem %s4401_s5, %s2762_s17 }
  0x10   : > { %s2925_s27 = scalar_lea.vmem %s4396_s0, %s2848_s24 }
  0x11   : > { %v225_v16 = vld [vmem:[%s2925_s27] sm:$0xff]  ;;  %v226_v17 = vld [vmem:[%s2925_s27 + $0x8] sm:$0xff]  ;;  %v227_v18 = vld [vmem:[%s2925_s27 + $0x10] sm:$0x3] }
  0x12   : > { %v2947_v23 = vld [vmem:[%s2925_s27 + $0x18] sm:$0xff]  ;;  %v2950_v24 = vld [vmem:[%s2925_s27 + $0x20] sm:$0xff]  ;;  %v285_v25 = vmul.f32 %v2927_v12, %v225_v16  ;;  %v286_v26 = vmul.f32 %v2927_v12, %v226_v17  ;;  %v353_v27 = vmul.f32 %v2929_v13, %v225_v16  ;;  %v354_v28 = vmul.f32 %v2929_v13, %v226_v17  ;;  %v2985_v49 = vld [vmem:[%s2925_s27 + $0x28] sm:$0x3] }
  0x13   : > { %v2958_v29 = vmul.f32 %v2927_v12, %v2950_v24  ;;  %v355_v30 = vmul.f32 %v2929_v13, %v227_v18  ;;  %v2963_v31 = vmul.f32 %v2929_v13, %v2947_v23  ;;  %v2967_v32 = vmul.f32 %v2929_v13, %v2950_v24  ;;  %v3002_v62 = vld [vmem:[%s2925_s27 + $0x30] sm:$0xff]  ;;  %v3011_v7 = vld [vmem:[%s2925_s27 + $0x38] sm:$0xff] }
  0x14   : > { %v450_v33 = vrot.slane %v353_v27, 1  ;;  %v451_v34 = vrot.slane %v354_v28, 1  ;;  %v598_v35 = vmul.f32 %v2931_v14, %v225_v16  ;;  %v599_v36 = vmul.f32 %v2931_v14, %v226_v17  ;;  %v3021_v17 = vld [vmem:[%s2925_s27 + $0x40] sm:$0x3] }
  0x15   : > { %v453_v37 = vrot.slane %v355_v30, 1  ;;  %v455_v38 = vrot.slane %v2963_v31, 1  ;;  %v456_v39 = vrot.slane %v2967_v32, 1  ;;  %v600_v40 = vmul.f32 %v2931_v14, %v227_v18 }
  0x16   : > { %v452_v41 = vsel %vm449_vm1, %v450_v33, %v451_v34  ;;  %v2977_v42 = vmul.f32 %v2931_v14, %v2947_v23  ;;  %v2981_v43 = vmul.f32 %v2931_v14, %v2950_v24  ;;  %v695_v44 = vrot.slane %v598_v35, 2 }
  0x17   : > { %v454_v45 = vsel %vm449_vm1, %v451_v34, %v453_v37  ;;  %v562_v46 = vadd.f32 %v452_v41, %v285_v25  ;;  %v696_v47 = vrot.slane %v599_v36, 2  ;;  %v698_v48 = vrot.slane %v600_v40, 2 }
  0x18   : > { %v563_v50 = vadd.f32 %v454_v45, %v286_v26  ;;  %v843_v51 = vmul.f32 %v2933_v15, %v2947_v23  ;;  %v844_v52 = vmul.f32 %v2933_v15, %v2950_v24  ;;  %v911_v53 = vmul.f32 %v2938_v19, %v2947_v23 }
  0x19   : > { %v697_v54 = vsel %vm694_vm2, %v695_v44, %v696_v47  ;;  %v699_v55 = vsel %vm694_vm2, %v696_v47, %v698_v48  ;;  %v912_v56 = vmul.f32 %v2938_v19, %v2950_v24  ;;  %v913_v57 = vmul.f32 %v2938_v19, %v2985_v49  ;;  %v249_v47 = vld [vmem:[%s2925_s27 + $0xc0] sm:$0xff] }
  0x1a   : > { %v807_v58 = vadd.f32 %v697_v54, %v562_v46  ;;  %v808_v59 = vadd.f32 %v699_v55, %v563_v50  ;;  %v1007_v60 = vrot.slane %v911_v53, 1  ;;  %v1155_v61 = vmul.f32 %v2940_v20, %v2947_v23  ;;  %v251_v53 = vld [vmem:[%s2925_s27 + $0xd0] sm:$0x3] }
  0x1b   : > { %v1008_v63 = vrot.slane %v912_v56, 1  ;;  %v1010_v0 = vrot.slane %v913_v57, 1  ;;  %v1156_v1 = vmul.f32 %v2940_v20, %v2950_v24  ;;  %v1157_v2 = vmul.f32 %v2940_v20, %v2985_v49 }
  0x1c   : > { %v875_v3 = vadd.f32 %v843_v51, %v807_v58  ;;  %v876_v4 = vadd.f32 %v844_v52, %v808_v59  ;;  %v1251_v5 = vrot.slane %v1155_v61, 2  ;;  %v1399_v6 = vmul.f32 %v2942_v21, %v3002_v62  ;;  %v250_v52 = vld [vmem:[%s2925_s27 + $0xc8] sm:$0xff] }
  0x1d   : > { %v1009_v9 = vsel %vm449_vm1, %v1007_v60, %v1008_v63  ;;  %v1011_v10 = vsel %vm449_vm1, %v1008_v63, %v1010_v0  ;;  %v1252_v11 = vrot.slane %v1156_v1, 2  ;;  %v1254_v16 = vrot.slane %v1157_v2, 2  ;;  %v3052_v2 = vld [vmem:[%s4398_s2] ss:$0 sm:$0xff] }
  0x1e   : > { %v1119_v18 = vadd.f32 %v1009_v9, %v875_v3  ;;  %v1120_v25 = vadd.f32 %v1011_v10, %v876_v4  ;;  %v1400_v26 = vmul.f32 %v2942_v21, %v3011_v7  ;;  %v1467_v27 = vmul.f32 %v2944_v22, %v3002_v62 }
  0x1f   : > { %v1253_v28 = vsel %vm694_vm2, %v1251_v5, %v1252_v11  ;;  %v1255_v30 = vsel %vm694_vm2, %v1252_v11, %v1254_v16  ;;  %v1468_v33 = vmul.f32 %v2944_v22, %v3011_v7  ;;  %v1469_v34 = vmul.f32 %v2944_v22, %v3021_v17  ;;  %v3058_v11 = vld [vmem:[%s2925_s27 + $0xd8] sm:$0xff] }
  0x20   : > { %v1363_v35 = vadd.f32 %v1253_v28, %v1119_v18  ;;  %v1364_v36 = vadd.f32 %v1255_v30, %v1120_v25  ;;  %v1563_v37 = vrot.slane %v1467_v27, 1  ;;  %v1711_v40 = vmul.f32 %v3016_v8, %v3002_v62 }
  0x21   : > { %v1564_v41 = vrot.slane %v1468_v33, 1  ;;  %v1566_v44 = vrot.slane %v1469_v34, 1  ;;  %v1712_v45 = vmul.f32 %v3016_v8, %v3011_v7  ;;  %v1713_v46 = vmul.f32 %v3016_v8, %v3021_v17 }
  0x22   : > { %v1431_v48 = vadd.f32 %v1399_v6, %v1363_v35  ;;  %v1432_v50 = vadd.f32 %v1400_v26, %v1364_v36  ;;  %v1807_v51 = vrot.slane %v1711_v40, 2  ;;  %v301_v54 = vmul.f32 %v2927_v12, %v249_v47 }
  0x23   : > { %v1565_v55 = vsel %vm449_vm1, %v1563_v37, %v1564_v41  ;;  %v1567_v56 = vsel %vm449_vm1, %v1564_v41, %v1566_v44  ;;  %v1808_v57 = vrot.slane %v1712_v45, 2  ;;  %v1810_v58 = vrot.slane %v1713_v46, 2  ;;  %v3072_v44 = vld [vmem:[%s2925_s27 + $0xe0] sm:$0xff] }
  0x24   : > { %v1675_v59 = vadd.f32 %v1565_v55, %v1431_v48  ;;  %v1676_v60 = vadd.f32 %v1567_v56, %v1432_v50  ;;  %v302_v61 = vmul.f32 %v2927_v12, %v250_v52  ;;  %v377_v63 = vmul.f32 %v2929_v13, %v249_v47  ;;  %v3083_v55 = vld [vmem:[%s2925_s27 + $0xe8] sm:$0x3] }
  0x25   : > { %v1809_v0 = vsel %vm694_vm2, %v1807_v51, %v1808_v57  ;;  %v1811_v1 = vsel %vm694_vm2, %v1808_v57, %v1810_v58  ;;  %v378_v3 = vmul.f32 %v2929_v13, %v250_v52  ;;  %v379_v4 = vmul.f32 %v2929_v13, %v251_v53 }
  0x26   : > { %v1919_v5 = vadd.f32 %v1809_v0, %v1675_v59  ;;  %v1920_v6 = vadd.f32 %v1811_v1, %v1676_v60  ;;  %v490_v9 = vrot.slane %v377_v63, 1  ;;  %v622_v10 = vmul.f32 %v2931_v14, %v249_v47 }
  0x27   : > { %v491_v16 = vrot.slane %v378_v3, 1  ;;  %v493_v18 = vrot.slane %v379_v4, 1  ;;  %v623_v25 = vmul.f32 %v2931_v14, %v250_v52  ;;  %v624_v26 = vmul.f32 %v2931_v14, %v251_v53  ;;  %v3093_v4 = vld [vmem:[%s2925_s27 + $0xf0] sm:$0xff] }
  0x28   : > { %v1958_v27 = vadd.f32 %v3052_v2, %v1919_v5  ;;  %v3064_v28 = vadd.f32 %v3052_v2, %v1920_v6  ;;  %v735_v30 = vrot.slane %v622_v10, 2  ;;  %v859_v33 = vmul.f32 %v2933_v15, %v3058_v11  ;;  %v3096_v5 = vld [vmem:[%s2925_s27 + $0xf8] sm:$0xff] }
  0x29   : > { %v492_v34 = vsel %vm449_vm1, %v490_v9, %v491_v16  ;;  %v494_v35 = vsel %vm449_vm1, %v491_v16, %v493_v18  ;;  %v736_v36 = vrot.slane %v623_v25, 2  ;;  %v738_v37 = vrot.slane %v624_v26, 2 }
  0x2a   : > { %v2023_v40 = vrot.slane %v1958_v27, 7  ;;  %v2024_v41 = vrot.slane %v3064_v28, 7  ;;  %v578_v45 = vadd.f32 %v492_v34, %v301_v54  ;;  %v579_v46 = vadd.f32 %v494_v35, %v302_v61 }
  0x2b   : > { %v737_v47 = vsel %vm694_vm2, %v735_v30, %v736_v36  ;;  %v739_v48 = vsel %vm694_vm2, %v736_v36, %v738_v37  ;;  %v860_v50 = vmul.f32 %v2933_v15, %v3072_v44  ;;  %v935_v51 = vmul.f32 %v2938_v19, %v3058_v11 }
  0x2c   : > { %v2025_v52 = vsel %vm2022_vm3, %v2023_v40, %v2024_v41  ;;  %v2119_v53 = vadd.f32 %v2023_v40, %v2947_v23  ;;  %v823_v54 = vadd.f32 %v737_v47, %v578_v45  ;;  %v824_v56 = vadd.f32 %v739_v48, %v579_v46 }
  0x2d   : > { %v2120_v57 = vadd.f32 %v2025_v52, %v2950_v24  ;;  %v936_v58 = vmul.f32 %v2938_v19, %v3072_v44  ;;  %v937_v59 = vmul.f32 %v2938_v19, %v3083_v55  ;;  %v1047_v60 = vrot.slane %v935_v51, 1 }
  0x2e   : > { %v2215_v61 = vrot.slane %v2119_v53, 1  ;;  %v891_v63 = vadd.f32 %v859_v33, %v823_v54  ;;  %v892_v0 = vadd.f32 %v860_v50, %v824_v56  ;;  %v1179_v1 = vmul.f32 %v2940_v20, %v3058_v11  ;;  %v3111_v33 = vld [vmem:[%s2925_s27 + $0x100] sm:$0x3] }
  0x2f   : > { %v2216_v3 = vrot.slane %v2120_v57, 1  ;;  %v1048_v24 = vrot.slane %v936_v58, 1  ;;  %v1050_v6 = vrot.slane %v937_v59, 1  ;;  %v1180_v9 = vmul.f32 %v2940_v20, %v3072_v44 }
  0x30   : > { %v1181_v10 = vmul.f32 %v2940_v20, %v3083_v55  ;;  %v1291_v16 = vrot.slane %v1179_v1, 2  ;;  %v1415_v18 = vmul.f32 %v2942_v21, %v3093_v4  ;;  %v1416_v25 = vmul.f32 %v2942_v21, %v3096_v5 }
  0x31   : > { %v2217_v26 = vsel %vm449_vm1, %v2215_v61, %v2216_v3  ;;  %v1049_v27 = vsel %vm449_vm1, %v1047_v60, %v1048_v24  ;;  %v1051_v28 = vsel %vm449_vm1, %v1048_v24, %v1050_v6  ;;  %v1292_v30 = vrot.slane %v1180_v9, 2 }
  0x32   : > { %2798 = vmatprep.mubr.msk.f32.mxu0 %vm2303_vm4, %v2217_v26  ;;  %v1135_v34 = vadd.f32 %v1049_v27, %v891_v63  ;;  %v1136_v35 = vadd.f32 %v1051_v28, %v892_v0  ;;  %v1294_v36 = vrot.slane %v1181_v10, 2  ;;  %v1491_v37 = vmul.f32 %v2944_v22, %v3093_v4 }
  0x33   : > { %v1293_v40 = vsel %vm694_vm2, %v1291_v16, %v1292_v30  ;;  %v1492_v45 = vmul.f32 %v2944_v22, %v3096_v5  ;;  %v1493_v46 = vmul.f32 %v2944_v22, %v3111_v33  ;;  %v1735_v47 = vmul.f32 %v3016_v8, %v3093_v4 }
  0x34   : > { %v1295_v48 = vsel %vm694_vm2, %v1292_v30, %v1294_v36  ;;  %v1379_v50 = vadd.f32 %v1293_v40, %v1135_v34  ;;  %v1603_v51 = vrot.slane %v1491_v37, 1  ;;  %v1736_v52 = vmul.f32 %v3016_v8, %v3096_v5 }
  0x35   : > { %v1380_v53 = vadd.f32 %v1295_v48, %v1136_v35  ;;  %v1604_v54 = vrot.slane %v1492_v45, 1  ;;  %v1606_v56 = vrot.slane %v1493_v46, 1  ;;  %v1737_v57 = vmul.f32 %v3016_v8, %v3111_v33 }
  0x36   : > { %v1447_v58 = vadd.f32 %v1415_v18, %v1379_v50  ;;  %v1847_v59 = vrot.slane %v1735_v47, 2  ;;  %v1848_v60 = vrot.slane %v1736_v52, 2  ;;  %v2121_v61 = vadd.f32 %v2024_v41, %v2985_v49 }
  0x37   : > { %v1448_v63 = vadd.f32 %v1416_v25, %v1380_v53  ;;  %v1605_v0 = vsel %vm449_vm1, %v1603_v51, %v1604_v54  ;;  %v1607_v1 = vsel %vm449_vm1, %v1604_v54, %v1606_v56  ;;  %v1850_v24 = vrot.slane %v1737_v57, 2 }
  0x38   : > { %v1691_v6 = vadd.f32 %v1605_v0, %v1447_v58  ;;  %v1849_v9 = vsel %vm694_vm2, %v1847_v59, %v1848_v60  ;;  %v2218_v10 = vrot.slane %v2121_v61, 1  ;;  %v287_v16 = vmul.f32 %v2927_v12, %v2947_v23 }
  0x39   : > { %v1692_v26 = vadd.f32 %v1607_v1, %v1448_v63  ;;  %v1851_v18 = vsel %vm694_vm2, %v1848_v60, %v1850_v24  ;;  %v358_v27 = vmul.f32 %v2929_v13, %v2985_v49  ;;  %v457_v41 = vsel %vm449_vm1, %v455_v38, %v456_v39 }
  0x3a   : > { %v1935_v25 = vadd.f32 %v1849_v9, %v1691_v6  ;;  %v2219_v28 = vsel %vm449_vm1, %v2216_v3, %v2218_v10  ;;  %v564_v30 = vadd.f32 %v457_v41, %v287_v16  ;;  %v603_v34 = vmul.f32 %v2931_v14, %v2985_v49 }
  0x3b   : > { %v1936_v23 = vadd.f32 %v1851_v18, %v1692_v26  ;;  %2799 = vmatmul.mubr.msk.f32.vlgmr.msra.gmra.mrb[0].mxu0 %vm2303_vm4, %v2219_v28  ;;  %v458_v35 = vrot.slane %v358_v27, 1  ;;  %v700_v36 = vrot.slane %v2977_v42, 2  ;;  %v701_v37 = vrot.slane %v2981_v43, 2  ;;  %v3178_v26 = vld [vmem:[%s2925_s27 + $0x48] sm:$0xff]  ;;  %v3181_v18 = vld [vmem:[%s2925_s27 + $0x50] sm:$0xff] }
  0x3c   : > { %v1974_v40 = vadd.f32 %v3052_v2, %v1935_v25  ;;  %v703_v31 = vrot.slane %v603_v34, 2  ;;  %v845_v38 = vmul.f32 %v2933_v15, %v3002_v62  ;;  %v846_v3 = vmul.f32 %v2933_v15, %v3011_v7 }
  0x3d   : > { %v1975_v45 = vadd.f32 %v3052_v2, %v1936_v23  ;;  %v459_v49 = vsel %vm449_vm1, %v456_v39, %v458_v35  ;;  %v702_v46 = vsel %vm694_vm2, %v700_v36, %v701_v37  ;;  %v914_v42 = vmul.f32 %v2938_v19, %v3002_v62 }
  0x3e   : > { %v2047_v43 = vrot.slane %v1974_v40, 7  ;;  %v565_v47 = vadd.f32 %v459_v49, %v2958_v29  ;;  %v704_v48 = vsel %vm694_vm2, %v701_v37, %v703_v31  ;;  %v809_v50 = vadd.f32 %v702_v46, %v564_v30  ;;  %v3190_v37 = vld [vmem:[%s2925_s27 + $0x58] sm:$0x3] }
  0x3f   : > { %v2048_v51 = vrot.slane %v1975_v45, 7  ;;  %v915_v52 = vmul.f32 %v2938_v19, %v3011_v7  ;;  %v916_v32 = vmul.f32 %v2938_v19, %v3021_v17  ;;  %v1012_v53 = vrot.slane %v914_v42, 1 }
  0x40   : > { %v2143_v39 = vadd.f32 %v2047_v43, %v3058_v11  ;;  %v810_v54 = vadd.f32 %v704_v48, %v565_v47  ;;  %v877_v56 = vadd.f32 %v845_v38, %v809_v50  ;;  %v1158_v29 = vmul.f32 %v2940_v20, %v3002_v62 }
  0x41   : > { %v2049_v57 = vsel %vm2022_vm3, %v2047_v43, %v2048_v51  ;;  %v2145_v58 = vadd.f32 %v2048_v51, %v3083_v55  ;;  %v1013_v59 = vrot.slane %v915_v52, 1  ;;  %v1015_v60 = vrot.slane %v916_v32, 1 }
  0x42   : > { %v2144_v61 = vadd.f32 %v2049_v57, %v3072_v44  ;;  %v2255_v63 = vrot.slane %v2143_v39, 1  ;;  %v878_v0 = vadd.f32 %v846_v3, %v810_v54  ;;  %v1159_v1 = vmul.f32 %v2940_v20, %v3011_v7 }
  0x43   : > { %v2258_v24 = vrot.slane %v2145_v58, 1  ;;  %v1014_v6 = vsel %vm449_vm1, %v1012_v53, %v1013_v59  ;;  %v1016_v9 = vsel %vm449_vm1, %v1013_v59, %v1015_v60  ;;  %v1160_v10 = vmul.f32 %v2940_v20, %v3021_v17 }
  0x44   : > { %v2256_v16 = vrot.slane %v2144_v61, 1  ;;  %v1121_v27 = vadd.f32 %v1014_v6, %v877_v56  ;;  %v1122_v41 = vadd.f32 %v1016_v9, %v878_v0  ;;  %v1256_v25 = vrot.slane %v1158_v29, 2 }
  0x45   : > { %v1257_v28 = vrot.slane %v1159_v1, 2  ;;  %v1259_v30 = vrot.slane %v1160_v10, 2  ;;  %v1401_v34 = vmul.f32 %v2942_v21, %v3178_v26  ;;  %v1402_v23 = vmul.f32 %v2942_v21, %v3181_v18 }
  0x46   : > { %v2257_v35 = vsel %vm449_vm1, %v2255_v63, %v2256_v16  ;;  %v2259_v36 = vsel %vm449_vm1, %v2256_v16, %v2258_v24  ;;  %v1470_v40 = vmul.f32 %v2944_v22, %v3178_v26  ;;  %v1471_v31 = vmul.f32 %v2944_v22, %v3181_v18 }
  0x47   : > { %2822 = vmatprep.mubr.msk.f32.mxu1 %vm2303_vm4, %v2257_v35  ;;  %v1258_v38 = vsel %vm694_vm2, %v1256_v25, %v1257_v28  ;;  %v1260_v3 = vsel %vm694_vm2, %v1257_v28, %v1259_v30  ;;  %v1472_v45 = vmul.f32 %v2944_v22, %v3190_v37  ;;  %v1714_v49 = vmul.f32 %v3016_v8, %v3178_v26 }
  0x48   : > { %2823 = vmatmul.mubr.msk.f32.vlgmr.msra.gmra.mrb[0].mxu1 %vm2303_vm4, %v2259_v36  ;;  %v1365_v46 = vadd.f32 %v1258_v38, %v1121_v27  ;;  %v1366_v42 = vadd.f32 %v1260_v3, %v1122_v41  ;;  %v1568_v43 = vrot.slane %v1470_v40, 1  ;;  %v1569_v47 = vrot.slane %v1471_v31, 1 }
  0x49   : > { %v1571_v48 = vrot.slane %v1472_v45, 1  ;;  %v1715_v50 = vmul.f32 %v3016_v8, %v3181_v18  ;;  %v1716_v51 = vmul.f32 %v3016_v8, %v3190_v37  ;;  %v1812_v52 = vrot.slane %v1714_v49, 2 }
  0x4a   : > { %v1433_v32 = vadd.f32 %v1401_v34, %v1365_v46  ;;  %v1434_v53 = vadd.f32 %v1402_v23, %v1366_v42  ;;  %v1570_v39 = vsel %vm449_vm1, %v1568_v43, %v1569_v47  ;;  %v303_v54 = vmul.f32 %v2927_v12, %v3058_v11 }
  0x4b   : > { %v1572_v56 = vsel %vm449_vm1, %v1569_v47, %v1571_v48  ;;  %v1813_v29 = vrot.slane %v1715_v50, 2  ;;  %v1815_v57 = vrot.slane %v1716_v51, 2  ;;  %v304_v58 = vmul.f32 %v2927_v12, %v3072_v44 }
  0x4c   : > { %v1677_v59 = vadd.f32 %v1570_v39, %v1433_v32  ;;  %v1678_v60 = vadd.f32 %v1572_v56, %v1434_v53  ;;  %v380_v61 = vmul.f32 %v2929_v13, %v3058_v11  ;;  %v381_v63 = vmul.f32 %v2929_v13, %v3072_v44 }
  0x4d   : > { %v1814_v0 = vsel %vm694_vm2, %v1812_v52, %v1813_v29  ;;  %v1816_v1 = vsel %vm694_vm2, %v1813_v29, %v1815_v57  ;;  %v382_v24 = vmul.f32 %v2929_v13, %v3083_v55  ;;  %v625_v6 = vmul.f32 %v2931_v14, %v3058_v11 }
  0x4e   : > { %v1921_v9 = vadd.f32 %v1814_v0, %v1677_v59  ;;  %v1922_v10 = vadd.f32 %v1816_v1, %v1678_v60  ;;  %v495_v16 = vrot.slane %v380_v61, 1  ;;  %v496_v27 = vrot.slane %v381_v63, 1  ;;  %v3253_v59 = vld [vmem:[%s2925_s27 + $0x108] sm:$0xff]  ;;  %v3259_v0 = vld [vmem:[%s2925_s27 + $0x110] sm:$0xff] }
  0x4f   : > { %v498_v41 = vrot.slane %v382_v24, 1  ;;  %v626_v25 = vmul.f32 %v2931_v14, %v3072_v44  ;;  %v627_v28 = vmul.f32 %v2931_v14, %v3083_v55  ;;  %v740_v30 = vrot.slane %v625_v6, 2 }
  0x50   : > { %v1960_v34 = vadd.f32 %v3052_v2, %v1921_v9  ;;  %v3230_v23 = vadd.f32 %v3052_v2, %v1922_v10  ;;  %v497_v35 = vsel %vm449_vm1, %v495_v16, %v496_v27  ;;  %v861_v11 = vmul.f32 %v2933_v15, %v3093_v4 }
  0x51   : > { %v499_v36 = vsel %vm449_vm1, %v496_v27, %v498_v41  ;;  %v580_v40 = vadd.f32 %v497_v35, %v303_v54  ;;  %v741_v31 = vrot.slane %v626_v25, 2  ;;  %v743_v38 = vrot.slane %v627_v28, 2  ;;  %v3271_v25 = vld [vmem:[%s2925_s27 + $0x118] sm:$0x3] }
  0x52   : > { %v2026_v44 = vrot.slane %v1960_v34, 7  ;;  %v2027_v3 = vrot.slane %v3230_v23, 7  ;;  %v581_v55 = vadd.f32 %v499_v36, %v304_v58  ;;  %v862_v45 = vmul.f32 %v2933_v15, %v3096_v5 }
  0x53   : > { %v742_v49 = vsel %vm694_vm2, %v740_v30, %v741_v31  ;;  %v744_v46 = vsel %vm694_vm2, %v741_v31, %v743_v38  ;;  %v938_v42 = vmul.f32 %v2938_v19, %v3093_v4  ;;  %v939_v43 = vmul.f32 %v2938_v19, %v3096_v5 }
  0x54   : > { %v2028_v47 = vsel %vm2022_vm3, %v2026_v44, %v2027_v3  ;;  %v2122_v48 = vadd.f32 %v2026_v44, %v3002_v62  ;;  %v825_v50 = vadd.f32 %v742_v49, %v580_v40  ;;  %v826_v51 = vadd.f32 %v744_v46, %v581_v55 }
  0x55   : > { %v2123_v52 = vadd.f32 %v2028_v47, %v3011_v7  ;;  %v940_v32 = vmul.f32 %v2938_v19, %v3111_v33  ;;  %v1052_v53 = vrot.slane %v938_v42, 1  ;;  %v1053_v39 = vrot.slane %v939_v43, 1 }
  0x56   : > { %v2220_v54 = vrot.slane %v2122_v48, 1  ;;  %v893_v56 = vadd.f32 %v861_v11, %v825_v50  ;;  %v894_v29 = vadd.f32 %v862_v45, %v826_v51  ;;  %v1182_v57 = vmul.f32 %v2940_v20, %v3093_v4 }
  0x57   : > { %v2221_v58 = vrot.slane %v2123_v52, 1  ;;  %v1054_v60 = vsel %vm449_vm1, %v1052_v53, %v1053_v39  ;;  %v1055_v61 = vrot.slane %v940_v32, 1  ;;  %v1183_v63 = vmul.f32 %v2940_v20, %v3096_v5 }
  0x58   : > { %v1137_v1 = vadd.f32 %v1054_v60, %v893_v56  ;;  %v1184_v24 = vmul.f32 %v2940_v20, %v3111_v33  ;;  %v1296_v6 = vrot.slane %v1182_v57, 2  ;;  %v1417_v9 = vmul.f32 %v2942_v21, %v3253_v59 }
  0x59   : > { %v2222_v10 = vsel %vm449_vm1, %v2220_v54, %v2221_v58  ;;  %v1056_v16 = vsel %vm449_vm1, %v1053_v39, %v1055_v61  ;;  %v1297_v27 = vrot.slane %v1183_v63, 2  ;;  %v1418_v41 = vmul.f32 %v2942_v21, %v3259_v0 }
  0x5a   : > { %2801 = vmatprep.mubr.msk.f32.mxu0 %vm2303_vm4, %v2222_v10  ;;  %v1138_v28 = vadd.f32 %v1056_v16, %v894_v29  ;;  %v1299_v30 = vrot.slane %v1184_v24, 2  ;;  %v1494_v34 = vmul.f32 %v2944_v22, %v3253_v59  ;;  %v1495_v23 = vmul.f32 %v2944_v22, %v3259_v0 }
  0x5b   : > { %v1298_v35 = vsel %vm694_vm2, %v1296_v6, %v1297_v27  ;;  %v1496_v11 = vmul.f32 %v2944_v22, %v3271_v25  ;;  %v1738_v36 = vmul.f32 %v3016_v8, %v3253_v59  ;;  %v1739_v40 = vmul.f32 %v3016_v8, %v3259_v0 }
  0x5c   : > { %v1300_v31 = vsel %vm694_vm2, %v1297_v27, %v1299_v30  ;;  %v1381_v38 = vadd.f32 %v1298_v35, %v1137_v1  ;;  %v1608_v44 = vrot.slane %v1494_v34, 1  ;;  %v1609_v55 = vrot.slane %v1495_v23, 1 }
  0x5d   : > { %v1382_v45 = vadd.f32 %v1300_v31, %v1138_v28  ;;  %v1611_v49 = vrot.slane %v1496_v11, 1  ;;  %v1740_v46 = vmul.f32 %v3016_v8, %v3271_v25  ;;  %v1852_v42 = vrot.slane %v1738_v36, 2 }
  0x5e   : > { %v1449_v43 = vadd.f32 %v1417_v9, %v1381_v38  ;;  %v1610_v47 = vsel %vm449_vm1, %v1608_v44, %v1609_v55  ;;  %v1853_v48 = vrot.slane %v1739_v40, 2  ;;  %v2124_v50 = vadd.f32 %v2027_v3, %v3021_v17 }
  0x5f   : > { %v1450_v51 = vadd.f32 %v1418_v41, %v1382_v45  ;;  %v1612_v52 = vsel %vm449_vm1, %v1609_v55, %v1611_v49  ;;  %v1855_v32 = vrot.slane %v1740_v46, 2  ;;  %v289_v53 = vmul.f32 %v2927_v12, %v3002_v62 }
  0x60   : > { %v1693_v39 = vadd.f32 %v1610_v47, %v1449_v43  ;;  %v1854_v54 = vsel %vm694_vm2, %v1852_v42, %v1853_v48  ;;  %v2223_v56 = vrot.slane %v2124_v50, 1  ;;  %v290_v29 = vmul.f32 %v2927_v12, %v3011_v7 }
  0x61   : > { %v1694_v57 = vadd.f32 %v1612_v52, %v1450_v51  ;;  %v1856_v60 = vsel %vm694_vm2, %v1853_v48, %v1855_v32  ;;  %v359_v3 = vmul.f32 %v2929_v13, %v3002_v62  ;;  %v360_v61 = vmul.f32 %v2929_v13, %v3011_v7 }
  0x62   : > { %v1937_v63 = vadd.f32 %v1854_v54, %v1693_v39  ;;  %v2224_v1 = vsel %vm449_vm1, %v2221_v58, %v2223_v56  ;;  %v361_v24 = vmul.f32 %v2929_v13, %v3021_v17  ;;  %v604_v6 = vmul.f32 %v2931_v14, %v3002_v62 }
  0x63   : > { %v1938_v9 = vadd.f32 %v1856_v60, %v1694_v57  ;;  %2802 = vmatmul.mubr.msk.f32.gmra.mrb[2].mxu0 %vm2303_vm4, %v2224_v1  ;;  %v460_v10 = vrot.slane %v359_v3, 1  ;;  %v461_v16 = vrot.slane %v360_v61, 1  ;;  %v605_v27 = vmul.f32 %v2931_v14, %v3011_v7  ;;  %v3331_v57 = vld [vmem:[%s2925_s27 + $0x60] sm:$0xff]  ;;  %v3334_v60 = vld [vmem:[%s2925_s27 + $0x68] sm:$0xff] }
  0x64   : > { %v1976_v41 = vadd.f32 %v3052_v2, %v1937_v63  ;;  %v463_v28 = vrot.slane %v361_v24, 1  ;;  %v606_v58 = vmul.f32 %v2931_v14, %v3021_v17  ;;  %v705_v30 = vrot.slane %v604_v6, 2 }
  0x65   : > { %v1977_v34 = vadd.f32 %v3052_v2, %v1938_v9  ;;  %v462_v23 = vsel %vm449_vm1, %v460_v10, %v461_v16  ;;  %v706_v62 = vrot.slane %v605_v27, 2  ;;  %v847_v35 = vmul.f32 %v2933_v15, %v3178_v26 }
  0x66   : > { %v2050_v11 = vrot.slane %v1976_v41, 7  ;;  %v464_v36 = vsel %vm449_vm1, %v461_v16, %v463_v28  ;;  %v566_v40 = vadd.f32 %v462_v23, %v289_v53  ;;  %v708_v7 = vrot.slane %v606_v58, 2  ;;  %v3352_v28 = vld [vmem:[%s2925_s27 + $0x70] sm:$0x3] }
  0x67   : > { %v2051_v31 = vrot.slane %v1977_v34, 7  ;;  %v567_v38 = vadd.f32 %v464_v36, %v290_v29  ;;  %v707_v44 = vsel %vm694_vm2, %v705_v30, %v706_v62  ;;  %v848_v17 = vmul.f32 %v2933_v15, %v3181_v18 }
  0x68   : > { %v2146_v55 = vadd.f32 %v2050_v11, %v3093_v4  ;;  %v709_v45 = vsel %vm694_vm2, %v706_v62, %v708_v7  ;;  %v811_v49 = vadd.f32 %v707_v44, %v566_v40  ;;  %v917_v46 = vmul.f32 %v2938_v19, %v3178_v26 }
  0x69   : > { %v2052_v42 = vsel %vm2022_vm3, %v2050_v11, %v2051_v31  ;;  %v2148_v43 = vadd.f32 %v2051_v31, %v3111_v33  ;;  %v812_v47 = vadd.f32 %v709_v45, %v567_v38  ;;  %v918_v48 = vmul.f32 %v2938_v19, %v3181_v18 }
  0x6a   : > { %v2147_v50 = vadd.f32 %v2052_v42, %v3096_v5  ;;  %v2260_v51 = vrot.slane %v2146_v55, 1  ;;  %v879_v52 = vadd.f32 %v847_v35, %v811_v49  ;;  %v919_v32 = vmul.f32 %v2938_v19, %v3190_v37 }
  0x6b   : > { %v2263_v53 = vrot.slane %v2148_v43, 1  ;;  %v880_v39 = vadd.f32 %v848_v17, %v812_v47  ;;  %v1017_v54 = vrot.slane %v917_v46, 1  ;;  %v1018_v56 = vrot.slane %v918_v48, 1 }
  0x6c   : > { %v2261_v29 = vrot.slane %v2147_v50, 1  ;;  %v1020_v3 = vrot.slane %v919_v32, 1  ;;  %v1161_v61 = vmul.f32 %v2940_v20, %v3178_v26  ;;  %v1162_v63 = vmul.f32 %v2940_v20, %v3181_v18 }
  0x6d   : > { %v1019_v1 = vsel %vm449_vm1, %v1017_v54, %v1018_v56  ;;  %v1163_v24 = vmul.f32 %v2940_v20, %v3190_v37  ;;  %v1403_v6 = vmul.f32 %v2942_v21, %v3331_v57  ;;  %v1404_v9 = vmul.f32 %v2942_v21, %v3334_v60 }
  0x6e   : > { %v2262_v10 = vsel %vm449_vm1, %v2260_v51, %v2261_v29  ;;  %v2264_v16 = vsel %vm449_vm1, %v2261_v29, %v2263_v53  ;;  %v1021_v27 = vsel %vm449_vm1, %v1018_v56, %v1020_v3  ;;  %v1123_v41 = vadd.f32 %v1019_v1, %v879_v52 }
  0x6f   : > { %2825 = vmatprep.mubr.msk.f32.mxu1 %vm2303_vm4, %v2262_v10  ;;  %v1124_v58 = vadd.f32 %v1021_v27, %v880_v39  ;;  %v1261_v30 = vrot.slane %v1161_v61, 2  ;;  %v1262_v34 = vrot.slane %v1162_v63, 2  ;;  %v1264_v23 = vrot.slane %v1163_v24, 2 }
  0x70   : > { %2826 = vmatmul.mubr.msk.f32.gmra.mrb[2].mxu1 %vm2303_vm4, %v2264_v16  ;;  %v1473_v62 = vmul.f32 %v2944_v22, %v3331_v57  ;;  %v1474_v35 = vmul.f32 %v2944_v22, %v3334_v60  ;;  %v1475_v11 = vmul.f32 %v2944_v22, %v3352_v28  ;;  %v1717_v36 = vmul.f32 %v3016_v8, %v3331_v57 }
  0x71   : > { %v1263_v40 = vsel %vm694_vm2, %v1261_v30, %v1262_v34  ;;  %v1265_v7 = vsel %vm694_vm2, %v1262_v34, %v1264_v23  ;;  %v1718_v31 = vmul.f32 %v3016_v8, %v3334_v60  ;;  %v1719_v38 = vmul.f32 %v3016_v8, %v3352_v28 }
  0x72   : > { %v1367_v44 = vadd.f32 %v1263_v40, %v1123_v41  ;;  %v1368_v17 = vadd.f32 %v1265_v7, %v1124_v58  ;;  %v1573_v55 = vrot.slane %v1473_v62, 1  ;;  %v1574_v45 = vrot.slane %v1474_v35, 1 }
  0x73   : > { %v1576_v49 = vrot.slane %v1475_v11, 1  ;;  %v1817_v46 = vrot.slane %v1717_v36, 2  ;;  %v1818_v42 = vrot.slane %v1718_v31, 2  ;;  %v1820_v43 = vrot.slane %v1719_v38, 2 }
  0x74   : > { %v1435_v47 = vadd.f32 %v1403_v6, %v1367_v44  ;;  %v1436_v48 = vadd.f32 %v1404_v9, %v1368_v17  ;;  %v1575_v50 = vsel %vm449_vm1, %v1573_v55, %v1574_v45  ;;  %v305_v51 = vmul.f32 %v2927_v12, %v3093_v4 }
  0x75   : > { %v1577_v52 = vsel %vm449_vm1, %v1574_v45, %v1576_v49  ;;  %v1819_v32 = vsel %vm694_vm2, %v1817_v46, %v1818_v42  ;;  %v1821_v53 = vsel %vm694_vm2, %v1818_v42, %v1820_v43  ;;  %v306_v39 = vmul.f32 %v2927_v12, %v3096_v5 }
  0x76   : > { %v1679_v54 = vadd.f32 %v1575_v50, %v1435_v47  ;;  %v1680_v56 = vadd.f32 %v1577_v52, %v1436_v48  ;;  %v383_v29 = vmul.f32 %v2929_v13, %v3093_v4  ;;  %v384_v3 = vmul.f32 %v2929_v13, %v3096_v5 }
  0x77   : > { %v385_v61 = vmul.f32 %v2929_v13, %v3111_v33  ;;  %v628_v63 = vmul.f32 %v2931_v14, %v3093_v4  ;;  %v629_v1 = vmul.f32 %v2931_v14, %v3096_v5  ;;  %v630_v24 = vmul.f32 %v2931_v14, %v3111_v33 }
  0x78   : > { %v1923_v6 = vadd.f32 %v1819_v32, %v1679_v54  ;;  %v1924_v9 = vadd.f32 %v1821_v53, %v1680_v56  ;;  %v500_v10 = vrot.slane %v383_v29, 1  ;;  %v501_v16 = vrot.slane %v384_v3, 1  ;;  %v3416_v54 = vld [vmem:[%s2925_s27 + $0x120] sm:$0xff] }
  0x79   : > { %v503_v27 = vrot.slane %v385_v61, 1  ;;  %v745_v41 = vrot.slane %v628_v63, 2  ;;  %v746_v58 = vrot.slane %v629_v1, 2  ;;  %v748_v30 = vrot.slane %v630_v24, 2  ;;  %v3422_v61 = vld [vmem:[%s2925_s27 + $0x128] sm:$0xff] }
  0x7a   : > { %v1962_v34 = vadd.f32 %v3052_v2, %v1923_v6  ;;  %v3391_v23 = vadd.f32 %v3052_v2, %v1924_v9  ;;  %v502_v4 = vsel %vm449_vm1, %v500_v10, %v501_v16  ;;  %v863_v5 = vmul.f32 %v2933_v15, %v3253_v59  ;;  %v3429_v10 = vld [vmem:[%s2925_s27 + $0x130] sm:$0x3] }
  0x7b   : > { %v504_v33 = vsel %vm449_vm1, %v501_v16, %v503_v27  ;;  %v582_v62 = vadd.f32 %v502_v4, %v305_v51  ;;  %v747_v35 = vsel %vm694_vm2, %v745_v41, %v746_v58  ;;  %v749_v11 = vsel %vm694_vm2, %v746_v58, %v748_v30 }
  0x7c   : > { %v2029_v36 = vrot.slane %v1962_v34, 7  ;;  %v2030_v40 = vrot.slane %v3391_v23, 7  ;;  %v583_v7 = vadd.f32 %v504_v33, %v306_v39  ;;  %v864_v31 = vmul.f32 %v2933_v15, %v3259_v0 }
  0x7d   : > { %v827_v38 = vadd.f32 %v747_v35, %v582_v62  ;;  %v941_v44 = vmul.f32 %v2938_v19, %v3253_v59  ;;  %v942_v17 = vmul.f32 %v2938_v19, %v3259_v0  ;;  %v943_v55 = vmul.f32 %v2938_v19, %v3271_v25 }
  0x7e   : > { %v2031_v45 = vsel %vm2022_vm3, %v2029_v36, %v2030_v40  ;;  %v2125_v49 = vadd.f32 %v2029_v36, %v3178_v26  ;;  %v828_v46 = vadd.f32 %v749_v11, %v583_v7  ;;  %v1185_v42 = vmul.f32 %v2940_v20, %v3253_v59 }
  0x7f   : > { %v2126_v43 = vadd.f32 %v2031_v45, %v3181_v18  ;;  %v895_v47 = vadd.f32 %v863_v5, %v827_v38  ;;  %v1057_v48 = vrot.slane %v941_v44, 1  ;;  %v1058_v50 = vrot.slane %v942_v17, 1 }
  0x80   : > { %v2225_v51 = vrot.slane %v2125_v49, 1  ;;  %v896_v52 = vadd.f32 %v864_v31, %v828_v46  ;;  %v1060_v32 = vrot.slane %v943_v55, 1  ;;  %v1186_v53 = vmul.f32 %v2940_v20, %v3259_v0 }
  0x81   : > { %v2226_v39 = vrot.slane %v2126_v43, 1  ;;  %v1059_v56 = vsel %vm449_vm1, %v1057_v48, %v1058_v50  ;;  %v1187_v29 = vmul.f32 %v2940_v20, %v3271_v25  ;;  %v1301_v3 = vrot.slane %v1185_v42, 2 }
  0x82   : > { %v1061_v63 = vsel %vm449_vm1, %v1058_v50, %v1060_v32  ;;  %v1139_v1 = vadd.f32 %v1059_v56, %v895_v47  ;;  %v1302_v24 = vrot.slane %v1186_v53, 2  ;;  %v1419_v6 = vmul.f32 %v2942_v21, %v3416_v54 }
  0x83   : > { %v2227_v9 = vsel %vm449_vm1, %v2225_v51, %v2226_v39  ;;  %v1140_v16 = vadd.f32 %v1061_v63, %v896_v52  ;;  %v1304_v27 = vrot.slane %v1187_v29, 2  ;;  %v1420_v41 = vmul.f32 %v2942_v21, %v3422_v61 }
  0x84   : > { %2804 = vmatprep.mubr.msk.f32.mxu0 %vm2303_vm4, %v2227_v9  ;;  %v1303_v58 = vsel %vm694_vm2, %v1301_v3, %v1302_v24  ;;  %v1497_v30 = vmul.f32 %v2944_v22, %v3416_v54  ;;  %v1498_v34 = vmul.f32 %v2944_v22, %v3422_v61  ;;  %v1499_v23 = vmul.f32 %v2944_v22, %v3429_v10 }
  0x85   : > { %v1305_v4 = vsel %vm694_vm2, %v1302_v24, %v1304_v27  ;;  %v1383_v5 = vadd.f32 %v1303_v58, %v1139_v1  ;;  %v1741_v33 = vmul.f32 %v3016_v8, %v3416_v54  ;;  %v1742_v62 = vmul.f32 %v3016_v8, %v3422_v61 }
  0x86   : > { %v1384_v35 = vadd.f32 %v1305_v4, %v1140_v16  ;;  %v1613_v11 = vrot.slane %v1497_v30, 1  ;;  %v1614_v36 = vrot.slane %v1498_v34, 1  ;;  %v1616_v7 = vrot.slane %v1499_v23, 1 }
  0x87   : > { %v1451_v31 = vadd.f32 %v1419_v6, %v1383_v5  ;;  %v1743_v38 = vmul.f32 %v3016_v8, %v3429_v10  ;;  %v1857_v44 = vrot.slane %v1741_v33, 2  ;;  %v1858_v17 = vrot.slane %v1742_v62, 2 }
  0x88   : > { %v1452_v55 = vadd.f32 %v1420_v41, %v1384_v35  ;;  %v1615_v45 = vsel %vm449_vm1, %v1613_v11, %v1614_v36  ;;  %v1617_v49 = vsel %vm449_vm1, %v1614_v36, %v1616_v7  ;;  %v2127_v46 = vadd.f32 %v2030_v40, %v3190_v37 }
  0x89   : > { %v1695_v42 = vadd.f32 %v1615_v45, %v1451_v31  ;;  %v1859_v43 = vsel %vm694_vm2, %v1857_v44, %v1858_v17  ;;  %v1860_v47 = vrot.slane %v1743_v38, 2  ;;  %v291_v48 = vmul.f32 %v2927_v12, %v3178_v26 }
  0x8a   : > { %v1696_v50 = vadd.f32 %v1617_v49, %v1452_v55  ;;  %v2228_v51 = vrot.slane %v2127_v46, 1  ;;  %v292_v8 = vmul.f32 %v2927_v12, %v3181_v18  ;;  %v362_v52 = vmul.f32 %v2929_v13, %v3178_v26 }
  0x8b   : > { %v1861_v32 = vsel %vm694_vm2, %v1858_v17, %v1860_v47  ;;  %v1939_v53 = vadd.f32 %v1859_v43, %v1695_v42  ;;  %v363_v40 = vmul.f32 %v2929_v13, %v3181_v18  ;;  %v364_v56 = vmul.f32 %v2929_v13, %v3190_v37  ;;  %v3492_v47 = vld [vmem:[%s2925_s27 + $0x78] sm:$0xff] }
  0x8c   : > { %v1940_v29 = vadd.f32 %v1861_v32, %v1696_v50  ;;  %v2229_v3 = vsel %vm449_vm1, %v2226_v39, %v2228_v51  ;;  %v465_v63 = vrot.slane %v362_v52, 1  ;;  %v607_v1 = vmul.f32 %v2931_v14, %v3178_v26 }
  0x8d   : > { %v1978_v24 = vadd.f32 %v3052_v2, %v1939_v53  ;;  %2805 = vmatmul.mubr.msk.f32.gmra.mrb[4].mxu0 %vm2303_vm4, %v2229_v3  ;;  %v466_v6 = vrot.slane %v363_v40, 1  ;;  %v468_v9 = vrot.slane %v364_v56, 1  ;;  %v608_v16 = vmul.f32 %v2931_v14, %v3181_v18 }
  0x8e   : > { %v1979_v27 = vadd.f32 %v3052_v2, %v1940_v29  ;;  %v609_v41 = vmul.f32 %v2931_v14, %v3190_v37  ;;  %v710_v58 = vrot.slane %v607_v1, 2  ;;  %v849_v39 = vmul.f32 %v2933_v15, %v3331_v57 }
  0x8f   : > { %v2053_v30 = vrot.slane %v1978_v24, 7  ;;  %v467_v26 = vsel %vm449_vm1, %v465_v63, %v466_v6  ;;  %v469_v34 = vsel %vm449_vm1, %v466_v6, %v468_v9  ;;  %v711_v23 = vrot.slane %v608_v16, 2  ;;  %v3507_v63 = vld [vmem:[%s2925_s27 + $0x80] sm:$0xff]  ;;  %v3512_v16 = vld [vmem:[%s2925_s27 + $0x88] sm:$0x3] }
  0x90   : > { %v2054_v4 = vrot.slane %v1979_v27, 7  ;;  %v568_v5 = vadd.f32 %v467_v26, %v291_v48  ;;  %v569_v33 = vadd.f32 %v469_v34, %v292_v8  ;;  %v713_v62 = vrot.slane %v609_v41, 2 }
  0x91   : > { %v2149_v18 = vadd.f32 %v2053_v30, %v3253_v59  ;;  %v712_v2 = vsel %vm694_vm2, %v710_v58, %v711_v23  ;;  %v850_v37 = vmul.f32 %v2933_v15, %v3334_v60  ;;  %v920_v35 = vmul.f32 %v2938_v19, %v3331_v57 }
  0x92   : > { %v2055_v11 = vsel %vm2022_vm3, %v2053_v30, %v2054_v4  ;;  %v2151_v36 = vadd.f32 %v2054_v4, %v3271_v25  ;;  %v714_v7 = vsel %vm694_vm2, %v711_v23, %v713_v62  ;;  %v813_v31 = vadd.f32 %v712_v2, %v568_v5  ;;  %v3527_v23 = vld [vmem:[%s4397_s1 + $0x8] ss:$0 sm:$0xff] }
  0x93   : > { %v2150_v38 = vadd.f32 %v2055_v11, %v3259_v0  ;;  %v2265_v44 = vrot.slane %v2149_v18, 1  ;;  %v814_v17 = vadd.f32 %v714_v7, %v569_v33  ;;  %v921_v55 = vmul.f32 %v2938_v19, %v3334_v60 }
  0x94   : > { %v2268_v45 = vrot.slane %v2151_v36, 1  ;;  %v881_v49 = vadd.f32 %v849_v39, %v813_v31  ;;  %v922_v46 = vmul.f32 %v2938_v19, %v3352_v28  ;;  %v1022_v42 = vrot.slane %v920_v35, 1 }
  0x95   : > { %v2266_v43 = vrot.slane %v2150_v38, 1  ;;  %v882_v48 = vadd.f32 %v850_v37, %v814_v17  ;;  %v1023_v50 = vrot.slane %v921_v55, 1  ;;  %v1164_v51 = vmul.f32 %v2940_v20, %v3331_v57 }
  0x96   : > { %v1025_v8 = vrot.slane %v922_v46, 1  ;;  %v1165_v52 = vmul.f32 %v2940_v20, %v3334_v60  ;;  %v1166_v32 = vmul.f32 %v2940_v20, %v3352_v28  ;;  %v1405_v53 = vmul.f32 %v2942_v21, %v3492_v47 }
  0x97   : > { %v2267_v40 = vsel %vm449_vm1, %v2265_v44, %v2266_v43  ;;  %v2269_v56 = vsel %vm449_vm1, %v2266_v43, %v2268_v45  ;;  %v1024_v29 = vsel %vm449_vm1, %v1022_v42, %v1023_v50  ;;  %v1266_v3 = vrot.slane %v1164_v51, 2 }
  0x98   : > { %2828 = vmatprep.mubr.msk.f32.mxu1 %vm2303_vm4, %v2267_v40  ;;  %v1026_v1 = vsel %vm449_vm1, %v1023_v50, %v1025_v8  ;;  %v1125_v24 = vadd.f32 %v1024_v29, %v881_v49  ;;  %v1267_v6 = vrot.slane %v1165_v52, 2  ;;  %v1269_v9 = vrot.slane %v1166_v32, 2 }
  0x99   : > { %2829 = vmatmul.mubr.msk.f32.gmra.mrb[4].mxu1 %vm2303_vm4, %v2269_v56  ;;  %v1126_v27 = vadd.f32 %v1026_v1, %v882_v48  ;;  %v1406_v41 = vmul.f32 %v2942_v21, %v3507_v63  ;;  %v1476_v58 = vmul.f32 %v2944_v22, %v3492_v47  ;;  %v1477_v39 = vmul.f32 %v2944_v22, %v3507_v63 }
  0x9a   : > { %v1268_v30 = vsel %vm694_vm2, %v1266_v3, %v1267_v6  ;;  %v1270_v26 = vsel %vm694_vm2, %v1267_v6, %v1269_v9  ;;  %v1478_v34 = vmul.f32 %v2944_v22, %v3512_v16  ;;  %v1720_v4 = vmul.f32 %v3527_v23, %v3492_v47 }
  0x9b   : > { %v1369_v5 = vadd.f32 %v1268_v30, %v1125_v24  ;;  %v1370_v33 = vadd.f32 %v1270_v26, %v1126_v27  ;;  %v1578_v62 = vrot.slane %v1476_v58, 1  ;;  %v1579_v18 = vrot.slane %v1477_v39, 1  ;;  %v3558_v24 = vld [vmem:[%s4398_s2] ss:$0 sm:$0xff] }
  0x9c   : > { %v1581_v2 = vrot.slane %v1478_v34, 1  ;;  %v1721_v37 = vmul.f32 %v3527_v23, %v3507_v63  ;;  %v1722_v35 = vmul.f32 %v3527_v23, %v3512_v16  ;;  %v1822_v11 = vrot.slane %v1720_v4, 2 }
  0x9d   : > { %v1437_v36 = vadd.f32 %v1405_v53, %v1369_v5  ;;  %v1438_v7 = vadd.f32 %v1406_v41, %v1370_v33  ;;  %v1580_v31 = vsel %vm449_vm1, %v1578_v62, %v1579_v18  ;;  %v307_v38 = vmul.f32 %v2927_v12, %v3253_v59 }
  0x9e   : > { %v1582_v44 = vsel %vm449_vm1, %v1579_v18, %v1581_v2  ;;  %v1823_v17 = vrot.slane %v1721_v37, 2  ;;  %v1825_v55 = vrot.slane %v1722_v35, 2  ;;  %v308_v45 = vmul.f32 %v2927_v12, %v3259_v0 }
  0x9f   : > { %v1681_v49 = vadd.f32 %v1580_v31, %v1437_v36  ;;  %v1682_v46 = vadd.f32 %v1582_v44, %v1438_v7  ;;  %v386_v42 = vmul.f32 %v2929_v13, %v3253_v59  ;;  %v387_v43 = vmul.f32 %v2929_v13, %v3259_v0 }
  0xa0   : > { %v1824_v48 = vsel %vm694_vm2, %v1822_v11, %v1823_v17  ;;  %v1826_v50 = vsel %vm694_vm2, %v1823_v17, %v1825_v55  ;;  %v388_v51 = vmul.f32 %v2929_v13, %v3271_v25  ;;  %v631_v8 = vmul.f32 %v2931_v14, %v3253_v59 }
  0xa1   : > { %v1925_v52 = vadd.f32 %v1824_v48, %v1681_v49  ;;  %v1926_v32 = vadd.f32 %v1826_v50, %v1682_v46  ;;  %v505_v53 = vrot.slane %v386_v42, 1  ;;  %v506_v40 = vrot.slane %v387_v43, 1  ;;  %v3585_v49 = vld [vmem:[%s2925_s27 + $0x138] sm:$0xff]  ;;  %v3591_v48 = vld [vmem:[%s2925_s27 + $0x140] sm:$0xff] }
  0xa2   : > { %v508_v56 = vrot.slane %v388_v51, 1  ;;  %v632_v29 = vmul.f32 %v2931_v14, %v3259_v0  ;;  %v633_v3 = vmul.f32 %v2931_v14, %v3271_v25  ;;  %v750_v1 = vrot.slane %v631_v8, 2 }
  0xa3   : > { %v1964_v6 = vadd.f32 %v3558_v24, %v1925_v52  ;;  %v3562_v59 = vadd.f32 %v3558_v24, %v1926_v32  ;;  %v507_v9 = vsel %vm449_vm1, %v505_v53, %v506_v40  ;;  %v865_v27 = vmul.f32 %v2933_v15, %v3416_v54 }
  0xa4   : > { %v509_v0 = vsel %vm449_vm1, %v506_v40, %v508_v56  ;;  %v584_v41 = vadd.f32 %v507_v9, %v307_v38  ;;  %v751_v25 = vrot.slane %v632_v29, 2  ;;  %v753_v58 = vrot.slane %v633_v3, 2  ;;  %v3603_v29 = vld [vmem:[%s2925_s27 + $0x148] sm:$0x3] }
  0xa5   : > { %v2032_v39 = vrot.slane %v1964_v6, 7  ;;  %v2033_v30 = vrot.slane %v3562_v59, 7  ;;  %v585_v26 = vadd.f32 %v509_v0, %v308_v45  ;;  %v866_v34 = vmul.f32 %v2933_v15, %v3422_v61 }
  0xa6   : > { %v752_v4 = vsel %vm694_vm2, %v750_v1, %v751_v25  ;;  %v754_v5 = vsel %vm694_vm2, %v751_v25, %v753_v58  ;;  %v944_v33 = vmul.f32 %v2938_v19, %v3416_v54  ;;  %v945_v62 = vmul.f32 %v2938_v19, %v3422_v61 }
  0xa7   : > { %v2034_v18 = vsel %vm2022_vm3, %v2032_v39, %v2033_v30  ;;  %v2128_v2 = vadd.f32 %v2032_v39, %v3331_v57  ;;  %v829_v37 = vadd.f32 %v752_v4, %v584_v41  ;;  %v830_v35 = vadd.f32 %v754_v5, %v585_v26 }
  0xa8   : > { %v2129_v11 = vadd.f32 %v2034_v18, %v3334_v60  ;;  %v946_v36 = vmul.f32 %v2938_v19, %v3429_v10  ;;  %v1062_v7 = vrot.slane %v944_v33, 1  ;;  %v1063_v31 = vrot.slane %v945_v62, 1 }
  0xa9   : > { %v2230_v38 = vrot.slane %v2128_v2, 1  ;;  %v897_v44 = vadd.f32 %v865_v27, %v829_v37  ;;  %v898_v17 = vadd.f32 %v866_v34, %v830_v35  ;;  %v1188_v55 = vmul.f32 %v2940_v20, %v3416_v54 }
  0xaa   : > { %v2231_v45 = vrot.slane %v2129_v11, 1  ;;  %v1064_v46 = vsel %vm449_vm1, %v1062_v7, %v1063_v31  ;;  %v1065_v42 = vrot.slane %v946_v36, 1  ;;  %v1189_v43 = vmul.f32 %v2940_v20, %v3422_v61 }
  0xab   : > { %v1141_v50 = vadd.f32 %v1064_v46, %v897_v44  ;;  %v1190_v51 = vmul.f32 %v2940_v20, %v3429_v10  ;;  %v1306_v8 = vrot.slane %v1188_v55, 2  ;;  %v1421_v52 = vmul.f32 %v2942_v21, %v3585_v49 }
  0xac   : > { %v2232_v32 = vsel %vm449_vm1, %v2230_v38, %v2231_v45  ;;  %v1066_v53 = vsel %vm449_vm1, %v1063_v31, %v1065_v42  ;;  %v1307_v40 = vrot.slane %v1189_v43, 2  ;;  %v1422_v56 = vmul.f32 %v2942_v21, %v3591_v48 }
  0xad   : > { %2807 = vmatprep.mubr.msk.f32.mxu0 %vm2303_vm4, %v2232_v32  ;;  %v1142_v3 = vadd.f32 %v1066_v53, %v898_v17  ;;  %v1309_v1 = vrot.slane %v1190_v51, 2  ;;  %v1500_v6 = vmul.f32 %v2944_v22, %v3585_v49  ;;  %v1501_v59 = vmul.f32 %v2944_v22, %v3591_v48 }
  0xae   : > { %v1308_v9 = vsel %vm694_vm2, %v1306_v8, %v1307_v40  ;;  %v1502_v27 = vmul.f32 %v2944_v22, %v3603_v29  ;;  %v1744_v0 = vmul.f32 %v3527_v23, %v3585_v49  ;;  %v1745_v41 = vmul.f32 %v3527_v23, %v3591_v48 }
  0xaf   : > { %v1310_v25 = vsel %vm694_vm2, %v1307_v40, %v1309_v1  ;;  %v1385_v58 = vadd.f32 %v1308_v9, %v1141_v50  ;;  %v1618_v39 = vrot.slane %v1500_v6, 1  ;;  %v1619_v26 = vrot.slane %v1501_v59, 1 }
  0xb0   : > { %v1386_v34 = vadd.f32 %v1310_v25, %v1142_v3  ;;  %v1621_v4 = vrot.slane %v1502_v27, 1  ;;  %v1746_v5 = vmul.f32 %v3527_v23, %v3603_v29  ;;  %v1862_v33 = vrot.slane %v1744_v0, 2 }
  0xb1   : > { %v1453_v62 = vadd.f32 %v1421_v52, %v1385_v58  ;;  %v1620_v18 = vsel %vm449_vm1, %v1618_v39, %v1619_v26  ;;  %v1863_v2 = vrot.slane %v1745_v41, 2  ;;  %v2130_v37 = vadd.f32 %v2033_v30, %v3352_v28 }
  0xb2   : > { %v1454_v35 = vadd.f32 %v1422_v56, %v1386_v34  ;;  %v1622_v11 = vsel %vm449_vm1, %v1619_v26, %v1621_v4  ;;  %v1865_v36 = vrot.slane %v1746_v5, 2  ;;  %v293_v7 = vmul.f32 %v2927_v12, %v3331_v57 }
  0xb3   : > { %v1697_v31 = vadd.f32 %v1620_v18, %v1453_v62  ;;  %v1864_v38 = vsel %vm694_vm2, %v1862_v33, %v1863_v2  ;;  %v2233_v44 = vrot.slane %v2130_v37, 1  ;;  %v294_v17 = vmul.f32 %v2927_v12, %v3334_v60 }
  0xb4   : > { %v1698_v55 = vadd.f32 %v1622_v11, %v1454_v35  ;;  %v1866_v46 = vsel %vm694_vm2, %v1863_v2, %v1865_v36  ;;  %v365_v30 = vmul.f32 %v2929_v13, %v3331_v57  ;;  %v366_v42 = vmul.f32 %v2929_v13, %v3334_v60 }
  0xb5   : > { %v1941_v43 = vadd.f32 %v1864_v38, %v1697_v31  ;;  %v2234_v50 = vsel %vm449_vm1, %v2231_v45, %v2233_v44  ;;  %v367_v51 = vmul.f32 %v2929_v13, %v3352_v28  ;;  %v610_v8 = vmul.f32 %v2931_v14, %v3331_v57 }
  0xb6   : > { %v1942_v52 = vadd.f32 %v1866_v46, %v1698_v55  ;;  %2808 = vmatmul.mubr.msk.f32.gmra.mrb[6].mxu0 %vm2303_vm4, %v2234_v50  ;;  %v470_v32 = vrot.slane %v365_v30, 1  ;;  %v471_v53 = vrot.slane %v366_v42, 1  ;;  %v611_v40 = vmul.f32 %v2931_v14, %v3334_v60  ;;  %v3663_v55 = vld [vmem:[%s2925_s27 + $0x90] sm:$0xff]  ;;  %v3666_v46 = vld [vmem:[%s2925_s27 + $0x98] sm:$0xff] }
  0xb7   : > { %v1980_v56 = vadd.f32 %v3558_v24, %v1941_v43  ;;  %v473_v3 = vrot.slane %v367_v51, 1  ;;  %v612_v45 = vmul.f32 %v2931_v14, %v3352_v28  ;;  %v715_v1 = vrot.slane %v610_v8, 2 }
  0xb8   : > { %v1981_v6 = vadd.f32 %v3558_v24, %v1942_v52  ;;  %v472_v59 = vsel %vm449_vm1, %v470_v32, %v471_v53  ;;  %v716_v57 = vrot.slane %v611_v40, 2  ;;  %v851_v9 = vmul.f32 %v2933_v15, %v3492_v47 }
  0xb9   : > { %v2056_v27 = vrot.slane %v1980_v56, 7  ;;  %v474_v0 = vsel %vm449_vm1, %v471_v53, %v473_v3  ;;  %v570_v41 = vadd.f32 %v472_v59, %v293_v7  ;;  %v718_v60 = vrot.slane %v612_v45, 2  ;;  %v3684_v3 = vld [vmem:[%s2925_s27 + $0xa0] sm:$0x3] }
  0xba   : > { %v2057_v25 = vrot.slane %v1981_v6, 7  ;;  %v571_v58 = vadd.f32 %v474_v0, %v294_v17  ;;  %v717_v39 = vsel %vm694_vm2, %v715_v1, %v716_v57  ;;  %v852_v28 = vmul.f32 %v2933_v15, %v3507_v63 }
  0xbb   : > { %v2152_v26 = vadd.f32 %v2056_v27, %v3416_v54  ;;  %v719_v34 = vsel %vm694_vm2, %v716_v57, %v718_v60  ;;  %v815_v4 = vadd.f32 %v717_v39, %v570_v41  ;;  %v923_v5 = vmul.f32 %v2938_v19, %v3492_v47 }
  0xbc   : > { %v2058_v33 = vsel %vm2022_vm3, %v2056_v27, %v2057_v25  ;;  %v2154_v62 = vadd.f32 %v2057_v25, %v3429_v10  ;;  %v816_v18 = vadd.f32 %v719_v34, %v571_v58  ;;  %v924_v2 = vmul.f32 %v2938_v19, %v3507_v63 }
  0xbd   : > { %v2153_v37 = vadd.f32 %v2058_v33, %v3422_v61  ;;  %v2270_v35 = vrot.slane %v2152_v26, 1  ;;  %v883_v11 = vadd.f32 %v851_v9, %v815_v4  ;;  %v925_v36 = vmul.f32 %v2938_v19, %v3512_v16 }
  0xbe   : > { %v2273_v7 = vrot.slane %v2154_v62, 1  ;;  %v884_v31 = vadd.f32 %v852_v28, %v816_v18  ;;  %v1027_v38 = vrot.slane %v923_v5, 1  ;;  %v1028_v44 = vrot.slane %v924_v2, 1 }
  0xbf   : > { %v2271_v17 = vrot.slane %v2153_v37, 1  ;;  %v1030_v30 = vrot.slane %v925_v36, 1  ;;  %v1167_v42 = vmul.f32 %v2940_v20, %v3492_v47  ;;  %v1168_v43 = vmul.f32 %v2940_v20, %v3507_v63 }
  0xc0   : > { %v1029_v50 = vsel %vm449_vm1, %v1027_v38, %v1028_v44  ;;  %v1169_v51 = vmul.f32 %v2940_v20, %v3512_v16  ;;  %v1407_v8 = vmul.f32 %v2942_v21, %v3663_v55  ;;  %v1408_v52 = vmul.f32 %v2942_v21, %v3666_v46 }
  0xc1   : > { %v2272_v32 = vsel %vm449_vm1, %v2270_v35, %v2271_v17  ;;  %v2274_v53 = vsel %vm449_vm1, %v2271_v17, %v2273_v7  ;;  %v1031_v40 = vsel %vm449_vm1, %v1028_v44, %v1030_v30  ;;  %v1127_v56 = vadd.f32 %v1029_v50, %v883_v11 }
  0xc2   : > { %2831 = vmatprep.mubr.msk.f32.mxu1 %vm2303_vm4, %v2272_v32  ;;  %v1128_v45 = vadd.f32 %v1031_v40, %v884_v31  ;;  %v1271_v1 = vrot.slane %v1167_v42, 2  ;;  %v1272_v6 = vrot.slane %v1168_v43, 2  ;;  %v1274_v59 = vrot.slane %v1169_v51, 2 }
  0xc3   : > { %2832 = vmatmul.mubr.msk.f32.gmra.mrb[6].mxu1 %vm2303_vm4, %v2274_v53  ;;  %v1479_v57 = vmul.f32 %v2944_v22, %v3663_v55  ;;  %v1480_v9 = vmul.f32 %v2944_v22, %v3666_v46  ;;  %v1481_v27 = vmul.f32 %v2944_v22, %v3684_v3  ;;  %v1723_v0 = vmul.f32 %v3527_v23, %v3663_v55 }
  0xc4   : > { %v1273_v41 = vsel %vm694_vm2, %v1271_v1, %v1272_v6  ;;  %v1275_v60 = vsel %vm694_vm2, %v1272_v6, %v1274_v59  ;;  %v1724_v25 = vmul.f32 %v3527_v23, %v3666_v46  ;;  %v1725_v58 = vmul.f32 %v3527_v23, %v3684_v3 }
  0xc5   : > { %v1371_v39 = vadd.f32 %v1273_v41, %v1127_v56  ;;  %v1372_v28 = vadd.f32 %v1275_v60, %v1128_v45  ;;  %v1583_v26 = vrot.slane %v1479_v57, 1  ;;  %v1584_v34 = vrot.slane %v1480_v9, 1 }
  0xc6   : > { %v1586_v4 = vrot.slane %v1481_v27, 1  ;;  %v1827_v5 = vrot.slane %v1723_v0, 2  ;;  %v1828_v33 = vrot.slane %v1724_v25, 2  ;;  %v1830_v62 = vrot.slane %v1725_v58, 2 }
  0xc7   : > { %v1439_v18 = vadd.f32 %v1407_v8, %v1371_v39  ;;  %v1440_v2 = vadd.f32 %v1408_v52, %v1372_v28  ;;  %v1585_v37 = vsel %vm449_vm1, %v1583_v26, %v1584_v34  ;;  %v309_v35 = vmul.f32 %v2927_v12, %v3416_v54 }
  0xc8   : > { %v1587_v11 = vsel %vm449_vm1, %v1584_v34, %v1586_v4  ;;  %v1829_v36 = vsel %vm694_vm2, %v1827_v5, %v1828_v33  ;;  %v1831_v7 = vsel %vm694_vm2, %v1828_v33, %v1830_v62  ;;  %v310_v31 = vmul.f32 %v2927_v12, %v3422_v61 }
  0xc9   : > { %v1683_v38 = vadd.f32 %v1585_v37, %v1439_v18  ;;  %v1684_v44 = vadd.f32 %v1587_v11, %v1440_v2  ;;  %v389_v17 = vmul.f32 %v2929_v13, %v3416_v54  ;;  %v390_v30 = vmul.f32 %v2929_v13, %v3422_v61 }
  0xca   : > { %v391_v42 = vmul.f32 %v2929_v13, %v3429_v10  ;;  %v634_v43 = vmul.f32 %v2931_v14, %v3416_v54  ;;  %v635_v50 = vmul.f32 %v2931_v14, %v3422_v61  ;;  %v636_v51 = vmul.f32 %v2931_v14, %v3429_v10 }
  0xcb   : > { %v1927_v8 = vadd.f32 %v1829_v36, %v1683_v38  ;;  %v1928_v52 = vadd.f32 %v1831_v7, %v1684_v44  ;;  %v510_v32 = vrot.slane %v389_v17, 1  ;;  %v511_v53 = vrot.slane %v390_v30, 1  ;;  %v3748_v38 = vld [vmem:[%s2925_s27 + $0x150] sm:$0xff] }
  0xcc   : > { %v513_v40 = vrot.slane %v391_v42, 1  ;;  %v755_v56 = vrot.slane %v634_v43, 2  ;;  %v756_v45 = vrot.slane %v635_v50, 2  ;;  %v758_v1 = vrot.slane %v636_v51, 2  ;;  %v3754_v42 = vld [vmem:[%s2925_s27 + $0x158] sm:$0xff] }
  0xcd   : > { %v1966_v6 = vadd.f32 %v3558_v24, %v1927_v8  ;;  %v3723_v59 = vadd.f32 %v3558_v24, %v1928_v52  ;;  %v512_v54 = vsel %vm449_vm1, %v510_v32, %v511_v53  ;;  %v867_v61 = vmul.f32 %v2933_v15, %v3585_v49  ;;  %v3761_v32 = vld [vmem:[%s2925_s27 + $0x160] sm:$0x3] }
  0xce   : > { %v514_v10 = vsel %vm449_vm1, %v511_v53, %v513_v40  ;;  %v586_v57 = vadd.f32 %v512_v54, %v309_v35  ;;  %v757_v9 = vsel %vm694_vm2, %v755_v56, %v756_v45  ;;  %v759_v27 = vsel %vm694_vm2, %v756_v45, %v758_v1 }
  0xcf   : > { %v2035_v0 = vrot.slane %v1966_v6, 7  ;;  %v2036_v41 = vrot.slane %v3723_v59, 7  ;;  %v587_v60 = vadd.f32 %v514_v10, %v310_v31  ;;  %v868_v25 = vmul.f32 %v2933_v15, %v3591_v48 }
  0xd0   : > { %v831_v58 = vadd.f32 %v757_v9, %v586_v57  ;;  %v947_v39 = vmul.f32 %v2938_v19, %v3585_v49  ;;  %v948_v28 = vmul.f32 %v2938_v19, %v3591_v48  ;;  %v949_v26 = vmul.f32 %v2938_v19, %v3603_v29 }
  0xd1   : > { %v2037_v34 = vsel %vm2022_vm3, %v2035_v0, %v2036_v41  ;;  %v2131_v4 = vadd.f32 %v2035_v0, %v3492_v47  ;;  %v832_v5 = vadd.f32 %v759_v27, %v587_v60  ;;  %v1191_v33 = vmul.f32 %v2940_v20, %v3585_v49 }
  0xd2   : > { %v2132_v62 = vadd.f32 %v2037_v34, %v3507_v63  ;;  %v899_v18 = vadd.f32 %v867_v61, %v831_v58  ;;  %v1067_v2 = vrot.slane %v947_v39, 1  ;;  %v1068_v37 = vrot.slane %v948_v28, 1 }
  0xd3   : > { %v2235_v35 = vrot.slane %v2131_v4, 1  ;;  %v900_v11 = vadd.f32 %v868_v25, %v832_v5  ;;  %v1070_v36 = vrot.slane %v949_v26, 1  ;;  %v1192_v7 = vmul.f32 %v2940_v20, %v3591_v48 }
  0xd4   : > { %v2236_v31 = vrot.slane %v2132_v62, 1  ;;  %v1069_v44 = vsel %vm449_vm1, %v1067_v2, %v1068_v37  ;;  %v1193_v17 = vmul.f32 %v2940_v20, %v3603_v29  ;;  %v1311_v30 = vrot.slane %v1191_v33, 2 }
  0xd5   : > { %v1071_v43 = vsel %vm449_vm1, %v1068_v37, %v1070_v36  ;;  %v1143_v50 = vadd.f32 %v1069_v44, %v899_v18  ;;  %v1312_v51 = vrot.slane %v1192_v7, 2  ;;  %v1423_v8 = vmul.f32 %v2942_v21, %v3748_v38 }
  0xd6   : > { %v2237_v52 = vsel %vm449_vm1, %v2235_v35, %v2236_v31  ;;  %v1144_v53 = vadd.f32 %v1071_v43, %v900_v11  ;;  %v1314_v40 = vrot.slane %v1193_v17, 2  ;;  %v1424_v56 = vmul.f32 %v2942_v21, %v3754_v42 }
  0xd7   : > { %2810 = vmatprep.mubr.msk.f32.mxu0 %vm2303_vm4, %v2237_v52  ;;  %v1313_v45 = vsel %vm694_vm2, %v1311_v30, %v1312_v51  ;;  %v1503_v1 = vmul.f32 %v2944_v22, %v3748_v38  ;;  %v1504_v6 = vmul.f32 %v2944_v22, %v3754_v42  ;;  %v1505_v59 = vmul.f32 %v2944_v22, %v3761_v32 }
  0xd8   : > { %v1315_v54 = vsel %vm694_vm2, %v1312_v51, %v1314_v40  ;;  %v1387_v61 = vadd.f32 %v1313_v45, %v1143_v50  ;;  %v1747_v10 = vmul.f32 %v3527_v23, %v3748_v38  ;;  %v1748_v57 = vmul.f32 %v3527_v23, %v3754_v42 }
  0xd9   : > { %v1388_v9 = vadd.f32 %v1315_v54, %v1144_v53  ;;  %v1623_v27 = vrot.slane %v1503_v1, 1  ;;  %v1624_v0 = vrot.slane %v1504_v6, 1  ;;  %v1626_v60 = vrot.slane %v1505_v59, 1 }
  0xda   : > { %v1455_v25 = vadd.f32 %v1423_v8, %v1387_v61  ;;  %v1749_v58 = vmul.f32 %v3527_v23, %v3761_v32  ;;  %v1867_v39 = vrot.slane %v1747_v10, 2  ;;  %v1868_v28 = vrot.slane %v1748_v57, 2 }
  0xdb   : > { %v1456_v26 = vadd.f32 %v1424_v56, %v1388_v9  ;;  %v1625_v34 = vsel %vm449_vm1, %v1623_v27, %v1624_v0  ;;  %v1627_v4 = vsel %vm449_vm1, %v1624_v0, %v1626_v60  ;;  %v2133_v5 = vadd.f32 %v2036_v41, %v3512_v16 }
  0xdc   : > { %v1699_v33 = vadd.f32 %v1625_v34, %v1455_v25  ;;  %v1869_v62 = vsel %vm694_vm2, %v1867_v39, %v1868_v28  ;;  %v1870_v18 = vrot.slane %v1749_v58, 2  ;;  %v295_v2 = vmul.f32 %v2927_v12, %v3492_v47 }
  0xdd   : > { %v1700_v37 = vadd.f32 %v1627_v4, %v1456_v26  ;;  %v2238_v35 = vrot.slane %v2133_v5, 1  ;;  %v296_v11 = vmul.f32 %v2927_v12, %v3507_v63  ;;  %v368_v36 = vmul.f32 %v2929_v13, %v3492_v47 }
  0xde   : > { %v1871_v7 = vsel %vm694_vm2, %v1868_v28, %v1870_v18  ;;  %v1943_v44 = vadd.f32 %v1869_v62, %v1699_v33  ;;  %v369_v41 = vmul.f32 %v2929_v13, %v3507_v63  ;;  %v370_v17 = vmul.f32 %v2929_v13, %v3512_v16 }
  0xdf   : > { %v1944_v30 = vadd.f32 %v1871_v7, %v1700_v37  ;;  %v2239_v43 = vsel %vm449_vm1, %v2236_v31, %v2238_v35  ;;  %v475_v50 = vrot.slane %v368_v36, 1  ;;  %v613_v51 = vmul.f32 %v2931_v14, %v3492_v47  ;;  %v3824_v37 = vld [vmem:[%s2925_s27 + $0xa8] sm:$0xff] }
  0xe0   : > { %v1982_v8 = vadd.f32 %v3558_v24, %v1943_v44  ;;  %2811 = vmatmul.mubr.msk.f32.gmra.mrb[8].mxu0 %vm2303_vm4, %v2239_v43  ;;  %v476_v52 = vrot.slane %v369_v41, 1  ;;  %v478_v53 = vrot.slane %v370_v17, 1  ;;  %v614_v40 = vmul.f32 %v2931_v14, %v3507_v63 }
  0xe1   : > { %v1983_v56 = vadd.f32 %v3558_v24, %v1944_v30  ;;  %v615_v45 = vmul.f32 %v2931_v14, %v3512_v16  ;;  %v720_v1 = vrot.slane %v613_v51, 2  ;;  %v853_v31 = vmul.f32 %v2933_v15, %v3663_v55 }
  0xe2   : > { %v2059_v6 = vrot.slane %v1982_v8, 7  ;;  %v477_v47 = vsel %vm449_vm1, %v475_v50, %v476_v52  ;;  %v479_v59 = vsel %vm449_vm1, %v476_v52, %v478_v53  ;;  %v721_v54 = vrot.slane %v614_v40, 2  ;;  %v3839_v8 = vld [vmem:[%s2925_s27 + $0xb0] sm:$0xff] }
  0xe3   : > { %v2060_v61 = vrot.slane %v1983_v56, 7  ;;  %v572_v10 = vadd.f32 %v477_v47, %v295_v2  ;;  %v573_v57 = vadd.f32 %v479_v59, %v296_v11  ;;  %v723_v9 = vrot.slane %v615_v45, 2  ;;  %v3844_v45 = vld [vmem:[%s2925_s27 + $0xb8] sm:$0x3] }
  0xe4   : > { %v2155_v63 = vadd.f32 %v2059_v6, %v3585_v49  ;;  %v722_v27 = vsel %vm694_vm2, %v720_v1, %v721_v54  ;;  %v854_v16 = vmul.f32 %v2933_v15, %v3666_v46  ;;  %v926_v0 = vmul.f32 %v2938_v19, %v3663_v55 }
  0xe5   : > { %v2061_v60 = vsel %vm2022_vm3, %v2059_v6, %v2060_v61  ;;  %v2157_v25 = vadd.f32 %v2060_v61, %v3603_v29  ;;  %v724_v58 = vsel %vm694_vm2, %v721_v54, %v723_v9  ;;  %v817_v39 = vadd.f32 %v722_v27, %v572_v10 }
  0xe6   : > { %v2156_v28 = vadd.f32 %v2061_v60, %v3591_v48  ;;  %v2275_v26 = vrot.slane %v2155_v63, 1  ;;  %v818_v34 = vadd.f32 %v724_v58, %v573_v57  ;;  %v927_v4 = vmul.f32 %v2938_v19, %v3666_v46 }
  0xe7   : > { %v2278_v5 = vrot.slane %v2157_v25, 1  ;;  %v885_v33 = vadd.f32 %v853_v31, %v817_v39  ;;  %v928_v62 = vmul.f32 %v2938_v19, %v3684_v3  ;;  %v1032_v18 = vrot.slane %v926_v0, 1 }
  0xe8   : > { %v2276_v2 = vrot.slane %v2156_v28, 1  ;;  %v886_v35 = vadd.f32 %v854_v16, %v818_v34  ;;  %v1033_v11 = vrot.slane %v927_v4, 1  ;;  %v1170_v36 = vmul.f32 %v2940_v20, %v3663_v55 }
  0xe9   : > { %v1035_v7 = vrot.slane %v928_v62, 1  ;;  %v1171_v44 = vmul.f32 %v2940_v20, %v3666_v46  ;;  %v1172_v41 = vmul.f32 %v2940_v20, %v3684_v3  ;;  %v1409_v17 = vmul.f32 %v2942_v21, %v3824_v37 }
  0xea   : > { %v2277_v30 = vsel %vm449_vm1, %v2275_v26, %v2276_v2  ;;  %v2279_v43 = vsel %vm449_vm1, %v2276_v2, %v2278_v5  ;;  %v1034_v50 = vsel %vm449_vm1, %v1032_v18, %v1033_v11  ;;  %v1276_v51 = vrot.slane %v1170_v36, 2 }
  0xeb   : > { %2834 = vmatprep.mubr.msk.f32.mxu1 %vm2303_vm4, %v2277_v30  ;;  %v1036_v52 = vsel %vm449_vm1, %v1033_v11, %v1035_v7  ;;  %v1129_v53 = vadd.f32 %v1034_v50, %v885_v33  ;;  %v1277_v40 = vrot.slane %v1171_v44, 2  ;;  %v1279_v56 = vrot.slane %v1172_v41, 2 }
  0xec   : > { %2835 = vmatmul.mubr.msk.f32.gmra.mrb[8].mxu1 %vm2303_vm4, %v2279_v43  ;;  %v1130_v1 = vadd.f32 %v1036_v52, %v886_v35  ;;  %v1410_v31 = vmul.f32 %v2942_v21, %v3839_v8  ;;  %v1482_v6 = vmul.f32 %v2944_v22, %v3824_v37  ;;  %v1483_v47 = vmul.f32 %v2944_v22, %v3839_v8 }
  0xed   : > { %v1278_v59 = vsel %vm694_vm2, %v1276_v51, %v1277_v40  ;;  %v1280_v54 = vsel %vm694_vm2, %v1277_v40, %v1279_v56  ;;  %v1484_v61 = vmul.f32 %v2944_v22, %v3844_v45  ;;  %v1726_v10 = vmul.f32 %v3527_v23, %v3824_v37 }
  0xee   : > { %v1373_v57 = vadd.f32 %v1278_v59, %v1129_v53  ;;  %v1374_v9 = vadd.f32 %v1280_v54, %v1130_v1  ;;  %v1588_v63 = vrot.slane %v1482_v6, 1  ;;  %v1589_v27 = vrot.slane %v1483_v47, 1 }
  0xef   : > { %v1591_v16 = vrot.slane %v1484_v61, 1  ;;  %v1727_v0 = vmul.f32 %v3527_v23, %v3839_v8  ;;  %v1728_v60 = vmul.f32 %v3527_v23, %v3844_v45  ;;  %v1832_v25 = vrot.slane %v1726_v10, 2 }
  0xf0   : > { %v1441_v58 = vadd.f32 %v1409_v17, %v1373_v57  ;;  %v1442_v39 = vadd.f32 %v1410_v31, %v1374_v9  ;;  %v1590_v28 = vsel %vm449_vm1, %v1588_v63, %v1589_v27  ;;  %v311_v26 = vmul.f32 %v2927_v12, %v3585_v49 }
  0xf1   : > { %v1592_v34 = vsel %vm449_vm1, %v1589_v27, %v1591_v16  ;;  %v1833_v4 = vrot.slane %v1727_v0, 2  ;;  %v1835_v5 = vrot.slane %v1728_v60, 2  ;;  %v312_v33 = vmul.f32 %v2927_v12, %v3591_v48 }
  0xf2   : > { %v1685_v62 = vadd.f32 %v1590_v28, %v1441_v58  ;;  %v1686_v18 = vadd.f32 %v1592_v34, %v1442_v39  ;;  %v392_v2 = vmul.f32 %v2929_v13, %v3585_v49  ;;  %v393_v35 = vmul.f32 %v2929_v13, %v3591_v48 }
  0xf3   : > { %v1834_v11 = vsel %vm694_vm2, %v1832_v25, %v1833_v4  ;;  %v1836_v36 = vsel %vm694_vm2, %v1833_v4, %v1835_v5  ;;  %v394_v7 = vmul.f32 %v2929_v13, %v3603_v29  ;;  %v637_v44 = vmul.f32 %v2931_v14, %v3585_v49 }
  0xf4   : > { %v1929_v41 = vadd.f32 %v1834_v11, %v1685_v62  ;;  %v1930_v17 = vadd.f32 %v1836_v36, %v1686_v18  ;;  %v515_v30 = vrot.slane %v392_v2, 1  ;;  %v516_v43 = vrot.slane %v393_v35, 1  ;;  %v3907_v62 = vld [vmem:[%s2925_s27 + $0x168] sm:$0xff]  ;;  %v3913_v11 = vld [vmem:[%s2925_s27 + $0x170] sm:$0xff] }
  0xf5   : > { %v518_v50 = vrot.slane %v394_v7, 1  ;;  %v638_v51 = vmul.f32 %v2931_v14, %v3591_v48  ;;  %v639_v52 = vmul.f32 %v2931_v14, %v3603_v29  ;;  %v760_v53 = vrot.slane %v637_v44, 2 }
  0xf6   : > { %v1968_v40 = vadd.f32 %v3558_v24, %v1929_v41  ;;  %v3884_v56 = vadd.f32 %v3558_v24, %v1930_v17  ;;  %v517_v1 = vsel %vm449_vm1, %v515_v30, %v516_v43  ;;  %v869_v49 = vmul.f32 %v2933_v15, %v3748_v38 }
  0xf7   : > { %v519_v31 = vsel %vm449_vm1, %v516_v43, %v518_v50  ;;  %v588_v6 = vadd.f32 %v517_v1, %v311_v26  ;;  %v761_v47 = vrot.slane %v638_v51, 2  ;;  %v763_v59 = vrot.slane %v639_v52, 2  ;;  %v3925_v51 = vld [vmem:[%s2925_s27 + $0x178] sm:$0x3] }
  0xf8   : > { %v2038_v48 = vrot.slane %v1968_v40, 7  ;;  %v2039_v54 = vrot.slane %v3884_v56, 7  ;;  %v589_v29 = vadd.f32 %v519_v31, %v312_v33  ;;  %v870_v61 = vmul.f32 %v2933_v15, %v3754_v42 }
  0xf9   : > { %v762_v10 = vsel %vm694_vm2, %v760_v53, %v761_v47  ;;  %v764_v57 = vsel %vm694_vm2, %v761_v47, %v763_v59  ;;  %v950_v9 = vmul.f32 %v2938_v19, %v3748_v38  ;;  %v951_v63 = vmul.f32 %v2938_v19, %v3754_v42 }
  0xfa   : > { %v2040_v27 = vsel %vm2022_vm3, %v2038_v48, %v2039_v54  ;;  %v2134_v16 = vadd.f32 %v2038_v48, %v3663_v55  ;;  %v833_v0 = vadd.f32 %v762_v10, %v588_v6  ;;  %v834_v60 = vadd.f32 %v764_v57, %v589_v29 }
  0xfb   : > { %v2135_v25 = vadd.f32 %v2040_v27, %v3666_v46  ;;  %v952_v58 = vmul.f32 %v2938_v19, %v3761_v32  ;;  %v1072_v39 = vrot.slane %v950_v9, 1  ;;  %v1073_v28 = vrot.slane %v951_v63, 1 }
  0xfc   : > { %v2240_v26 = vrot.slane %v2134_v16, 1  ;;  %v901_v34 = vadd.f32 %v869_v49, %v833_v0  ;;  %v902_v4 = vadd.f32 %v870_v61, %v834_v60  ;;  %v1194_v5 = vmul.f32 %v2940_v20, %v3748_v38 }
  0xfd   : > { %v2241_v33 = vrot.slane %v2135_v25, 1  ;;  %v1074_v18 = vsel %vm449_vm1, %v1072_v39, %v1073_v28  ;;  %v1075_v2 = vrot.slane %v952_v58, 1  ;;  %v1195_v35 = vmul.f32 %v2940_v20, %v3754_v42 }
  0xfe   : > { %v1145_v36 = vadd.f32 %v1074_v18, %v901_v34  ;;  %v1196_v7 = vmul.f32 %v2940_v20, %v3761_v32  ;;  %v1316_v44 = vrot.slane %v1194_v5, 2  ;;  %v1425_v41 = vmul.f32 %v2942_v21, %v3907_v62 }
  0xff   : > { %v2242_v17 = vsel %vm449_vm1, %v2240_v26, %v2241_v33  ;;  %v1076_v30 = vsel %vm449_vm1, %v1073_v28, %v1075_v2  ;;  %v1317_v43 = vrot.slane %v1195_v35, 2  ;;  %v1426_v50 = vmul.f32 %v2942_v21, %v3913_v11 }
 0x100   : > { %2813 = vmatprep.mubr.msk.f32.mxu0 %vm2303_vm4, %v2242_v17  ;;  %v1146_v52 = vadd.f32 %v1076_v30, %v902_v4  ;;  %v1319_v53 = vrot.slane %v1196_v7, 2  ;;  %v1506_v40 = vmul.f32 %v2944_v22, %v3907_v62  ;;  %v1507_v56 = vmul.f32 %v2944_v22, %v3913_v11 }
 0x101   : > { %v1318_v1 = vsel %vm694_vm2, %v1316_v44, %v1317_v43  ;;  %v1508_v49 = vmul.f32 %v2944_v22, %v3925_v51  ;;  %v1750_v31 = vmul.f32 %v3527_v23, %v3907_v62  ;;  %v1751_v6 = vmul.f32 %v3527_v23, %v3913_v11 }
 0x102   : > { %v1320_v47 = vsel %vm694_vm2, %v1317_v43, %v1319_v53  ;;  %v1389_v59 = vadd.f32 %v1318_v1, %v1145_v36  ;;  %v1628_v48 = vrot.slane %v1506_v40, 1  ;;  %v1629_v29 = vrot.slane %v1507_v56, 1 }
 0x103   : > { %v1390_v61 = vadd.f32 %v1320_v47, %v1146_v52  ;;  %v1631_v10 = vrot.slane %v1508_v49, 1  ;;  %v1752_v57 = vmul.f32 %v3527_v23, %v3925_v51  ;;  %v1872_v9 = vrot.slane %v1750_v31, 2 }
 0x104   : > { %v1457_v63 = vadd.f32 %v1425_v41, %v1389_v59  ;;  %v1630_v27 = vsel %vm449_vm1, %v1628_v48, %v1629_v29  ;;  %v1873_v16 = vrot.slane %v1751_v6, 2  ;;  %v2136_v0 = vadd.f32 %v2039_v54, %v3684_v3 }
 0x105   : > { %v1458_v60 = vadd.f32 %v1426_v50, %v1390_v61  ;;  %v1632_v25 = vsel %vm449_vm1, %v1629_v29, %v1631_v10  ;;  %v1875_v58 = vrot.slane %v1752_v57, 2  ;;  %v297_v39 = vmul.f32 %v2927_v12, %v3663_v55 }
 0x106   : > { %v1701_v28 = vadd.f32 %v1630_v27, %v1457_v63  ;;  %v1874_v26 = vsel %vm694_vm2, %v1872_v9, %v1873_v16  ;;  %v2243_v34 = vrot.slane %v2136_v0, 1  ;;  %v298_v23 = vmul.f32 %v2927_v12, %v3666_v46 }
 0x107   : > { %v1702_v4 = vadd.f32 %v1632_v25, %v1458_v60  ;;  %v1876_v5 = vsel %vm694_vm2, %v1873_v16, %v1875_v58  ;;  %v371_v54 = vmul.f32 %v2929_v13, %v3663_v55  ;;  %v372_v18 = vmul.f32 %v2929_v13, %v3666_v46 }
 0x108   : > { %v1945_v2 = vadd.f32 %v1874_v26, %v1701_v28  ;;  %v2244_v35 = vsel %vm449_vm1, %v2241_v33, %v2243_v34  ;;  %v373_v36 = vmul.f32 %v2929_v13, %v3684_v3  ;;  %v616_v7 = vmul.f32 %v2931_v14, %v3663_v55 }
 0x109   : > { %v1946_v44 = vadd.f32 %v1876_v5, %v1702_v4  ;;  %2814 = vmatmul.mubr.msk.f32.gmra.mrb[10].mxu0 %vm2303_vm4, %v2244_v35  ;;  %v480_v41 = vrot.slane %v371_v54, 1  ;;  %v481_v17 = vrot.slane %v372_v18, 1  ;;  %v617_v30 = vmul.f32 %v2931_v14, %v3666_v46  ;;  %v3996_v35 = vld [vmem:[%s2925_s27 + $0xc0] sm:$0xff] }
 0x10a   : > { %v1984_v43 = vadd.f32 %v3558_v24, %v1945_v2  ;;  %v483_v50 = vrot.slane %v373_v36, 1  ;;  %v618_v33 = vmul.f32 %v2931_v14, %v3684_v3  ;;  %v725_v52 = vrot.slane %v616_v7, 2  ;;  %v4001_v7 = vld [vmem:[%s2925_s27 + $0xc8] sm:$0xff] }
 0x10b   : > { %v1985_v53 = vadd.f32 %v3558_v24, %v1946_v44  ;;  %v482_v40 = vsel %vm449_vm1, %v480_v41, %v481_v17  ;;  %v726_v55 = vrot.slane %v617_v30, 2  ;;  %v855_v56 = vmul.f32 %v2933_v15, %v3824_v37 }
 0x10c   : > { %v2062_v1 = vrot.slane %v1984_v43, 7  ;;  %v484_v49 = vsel %vm449_vm1, %v481_v17, %v483_v50  ;;  %v574_v31 = vadd.f32 %v482_v40, %v297_v39  ;;  %v728_v46 = vrot.slane %v618_v33, 2 }
 0x10d   : > { %v2063_v6 = vrot.slane %v1985_v53, 7  ;;  %v575_v47 = vadd.f32 %v484_v49, %v298_v23  ;;  %v727_v59 = vsel %vm694_vm2, %v725_v52, %v726_v55  ;;  %v856_v3 = vmul.f32 %v2933_v15, %v3839_v8  ;;  %v4022_v49 = vld [vmem:[%s4397_s1 + $0x8] ss:$0 sm:$0xff] }
 0x10e   : > { %v2158_v24 = vadd.f32 %v2062_v1, %v3748_v38  ;;  %v729_v48 = vsel %vm694_vm2, %v726_v55, %v728_v46  ;;  %v819_v29 = vadd.f32 %v727_v59, %v574_v31  ;;  %v929_v61 = vmul.f32 %v2938_v19, %v3824_v37  ;;  %v3977_v10 = vpop.f32.mrb[0].mxu0 }
 0x10f   : > { %v2064_v57 = vsel %vm2022_vm3, %v2062_v1, %v2063_v6  ;;  %v2160_v9 = vadd.f32 %v2063_v6, %v3761_v32  ;;  %v820_v63 = vadd.f32 %v729_v48, %v575_v47  ;;  %v930_v27 = vmul.f32 %v2938_v19, %v3839_v8  ;;  %v3983_v16 = vpop.f32.mrb[1].mxu0 }
 0x110   : > { %v2159_v0 = vadd.f32 %v2064_v57, %v3754_v42  ;;  %v2280_v60 = vrot.slane %v2158_v24, 1  ;;  %v887_v25 = vadd.f32 %v855_v56, %v819_v29  ;;  %v931_v58 = vmul.f32 %v2938_v19, %v3844_v45  ;;  %v4015_v56 = vld [vmem:[%s2925_s27 + $0xd0] sm:$0x3] }
 0x111   : > { %v2283_v39 = vrot.slane %v2160_v9, 1  ;;  %v888_v28 = vadd.f32 %v856_v3, %v820_v63  ;;  %v1037_v26 = vrot.slane %v929_v61, 1  ;;  %v1038_v34 = vrot.slane %v930_v27, 1 }
 0x112   : > { %v2281_v23 = vrot.slane %v2159_v0, 1  ;;  %v1040_v4 = vrot.slane %v931_v58, 1  ;;  %v1173_v5 = vmul.f32 %v2940_v20, %v3824_v37  ;;  %v1174_v54 = vmul.f32 %v2940_v20, %v3839_v8 }
 0x113   : > { %v1039_v18 = vsel %vm449_vm1, %v1037_v26, %v1038_v34  ;;  %v1175_v2 = vmul.f32 %v2940_v20, %v3844_v45  ;;  %v1411_v36 = vmul.f32 %v3996_v35, %v2942_v21  ;;  %v1412_v44 = vmul.f32 %v4001_v7, %v2942_v21 }
 0x114   : > { %v2282_v41 = vsel %vm449_vm1, %v2280_v60, %v2281_v23  ;;  %v2284_v17 = vsel %vm449_vm1, %v2281_v23, %v2283_v39  ;;  %v1041_v30 = vsel %vm449_vm1, %v1038_v34, %v1040_v4  ;;  %v1131_v43 = vadd.f32 %v1039_v18, %v887_v25 }
 0x115   : > { %2837 = vmatprep.mubr.msk.f32.mxu1 %vm2303_vm4, %v2282_v41  ;;  %v1132_v50 = vadd.f32 %v1041_v30, %v888_v28  ;;  %v1281_v33 = vrot.slane %v1173_v5, 2  ;;  %v1282_v52 = vrot.slane %v1174_v54, 2  ;;  %v1284_v53 = vrot.slane %v1175_v2, 2 }
 0x116   : > { %2838 = vmatmul.mubr.msk.f32.gmra.mrb[10].mxu1 %vm2303_vm4, %v2284_v17  ;;  %v1485_v40 = vmul.f32 %v3996_v35, %v2944_v22  ;;  %v1486_v55 = vmul.f32 %v4001_v7, %v2944_v22  ;;  %v1487_v1 = vmul.f32 %v4015_v56, %v2944_v22  ;;  %v1729_v31 = vmul.f32 %v4022_v49, %v3996_v35 }
 0x117   : > { %v1283_v46 = vsel %vm694_vm2, %v1281_v33, %v1282_v52  ;;  %v1285_v6 = vsel %vm694_vm2, %v1282_v52, %v1284_v53  ;;  %v1730_v47 = vmul.f32 %v4022_v49, %v4001_v7  ;;  %v1731_v59 = vmul.f32 %v4022_v49, %v4015_v56 }
 0x118   : > { %v1375_v3 = vadd.f32 %v1283_v46, %v1131_v43  ;;  %v1376_v24 = vadd.f32 %v1285_v6, %v1132_v50  ;;  %v1593_v48 = vrot.slane %v1485_v40, 1  ;;  %v1594_v29 = vrot.slane %v1486_v55, 1  ;;  %v4059_v55 = vld [vmem:[%s4398_s2] ss:$0 sm:$0xff] }
 0x119   : > { %v1596_v61 = vrot.slane %v1487_v1, 1  ;;  %v1837_v57 = vrot.slane %v1729_v31, 2  ;;  %v1838_v9 = vrot.slane %v1730_v47, 2  ;;  %v1840_v63 = vrot.slane %v1731_v59, 2 }
 0x11a   : > { %v1443_v27 = vadd.f32 %v1411_v36, %v1375_v3  ;;  %v1444_v0 = vadd.f32 %v1412_v44, %v1376_v24  ;;  %v1595_v60 = vsel %vm449_vm1, %v1593_v48, %v1594_v29  ;;  %v313_v25 = vmul.f32 %v2927_v12, %v3748_v38 }
 0x11b   : > { %v1597_v58 = vsel %vm449_vm1, %v1594_v29, %v1596_v61  ;;  %v1839_v39 = vsel %vm694_vm2, %v1837_v57, %v1838_v9  ;;  %v1841_v28 = vsel %vm694_vm2, %v1838_v9, %v1840_v63  ;;  %v314_v26 = vmul.f32 %v2927_v12, %v3754_v42  ;;  %v4040_v34 = vpop.f32.mrb[0].mxu1 }
 0x11c   : > { %v1687_v23 = vadd.f32 %v1595_v60, %v1443_v27  ;;  %v1688_v4 = vadd.f32 %v1597_v58, %v1444_v0  ;;  %v395_v5 = vmul.f32 %v2929_v13, %v3748_v38  ;;  %v396_v54 = vmul.f32 %v2929_v13, %v3754_v42  ;;  %v4046_v18 = vpop.f32.mrb[1].mxu1 }
 0x11d   : > { %v397_v2 = vmul.f32 %v2929_v13, %v3761_v32  ;;  %v640_v36 = vmul.f32 %v2931_v14, %v3748_v38  ;;  %v641_v44 = vmul.f32 %v2931_v14, %v3754_v42  ;;  %v642_v41 = vmul.f32 %v2931_v14, %v3761_v32 }
 0x11e   : > { %v1931_v17 = vadd.f32 %v1839_v39, %v1687_v23  ;;  %v1932_v30 = vadd.f32 %v1841_v28, %v1688_v4  ;;  %v520_v43 = vrot.slane %v395_v5, 1  ;;  %v521_v50 = vrot.slane %v396_v54, 1 }
 0x11f   : > { %v523_v33 = vrot.slane %v397_v2, 1  ;;  %v765_v52 = vrot.slane %v640_v36, 2  ;;  %v766_v53 = vrot.slane %v641_v44, 2  ;;  %v768_v40 = vrot.slane %v642_v41, 2  ;;  %v4088_v2 = vld [vmem:[%s2925_s27 + $0x180] sm:$0xff] }
 0x120   : > { %v1970_v38 = vadd.f32 %v4059_v55, %v1931_v17  ;;  %v4063_v42 = vadd.f32 %v4059_v55, %v1932_v30  ;;  %v522_v32 = vsel %vm449_vm1, %v520_v43, %v521_v50  ;;  %v871_v1 = vmul.f32 %v2933_v15, %v3907_v62  ;;  %v4094_v17 = vld [vmem:[%s2925_s27 + $0x188] sm:$0xff] }
 0x121   : > { %v524_v31 = vsel %vm449_vm1, %v521_v50, %v523_v33  ;;  %v590_v46 = vadd.f32 %v522_v32, %v313_v25  ;;  %v767_v6 = vsel %vm694_vm2, %v765_v52, %v766_v53  ;;  %v769_v47 = vsel %vm694_vm2, %v766_v53, %v768_v40  ;;  %v4101_v53 = vld [vmem:[%s2925_s27 + $0x190] sm:$0x3] }
 0x122   : > { %v2041_v59 = vrot.slane %v1970_v38, 7  ;;  %v2042_v3 = vrot.slane %v4063_v42, 7  ;;  %v591_v24 = vadd.f32 %v524_v31, %v314_v26  ;;  %v872_v48 = vmul.f32 %v2933_v15, %v3913_v11 }
 0x123   : > { %v835_v29 = vadd.f32 %v767_v6, %v590_v46  ;;  %v953_v61 = vmul.f32 %v2938_v19, %v3907_v62  ;;  %v954_v57 = vmul.f32 %v2938_v19, %v3913_v11  ;;  %v955_v9 = vmul.f32 %v2938_v19, %v3925_v51 }
 0x124   : > { %v2043_v63 = vsel %vm2022_vm3, %v2041_v59, %v2042_v3  ;;  %v2137_v27 = vadd.f32 %v2041_v59, %v3824_v37  ;;  %v836_v0 = vadd.f32 %v769_v47, %v591_v24  ;;  %v1197_v60 = vmul.f32 %v2940_v20, %v3907_v62 }
 0x125   : > { %v2138_v25 = vadd.f32 %v2043_v63, %v3839_v8  ;;  %v903_v58 = vadd.f32 %v871_v1, %v835_v29  ;;  %v1077_v39 = vrot.slane %v953_v61, 1  ;;  %v1078_v28 = vrot.slane %v954_v57, 1 }
 0x126   : > { %v2245_v26 = vrot.slane %v2137_v27, 1  ;;  %v904_v23 = vadd.f32 %v872_v48, %v836_v0  ;;  %v1080_v4 = vrot.slane %v955_v9, 1  ;;  %v1198_v5 = vmul.f32 %v2940_v20, %v3913_v11 }
 0x127   : > { %v2246_v54 = vrot.slane %v2138_v25, 1  ;;  %v1079_v36 = vsel %vm449_vm1, %v1077_v39, %v1078_v28  ;;  %v1199_v44 = vmul.f32 %v2940_v20, %v3925_v51  ;;  %v1321_v41 = vrot.slane %v1197_v60, 2 }
 0x128   : > { %v1081_v30 = vsel %vm449_vm1, %v1078_v28, %v1080_v4  ;;  %v1147_v43 = vadd.f32 %v1079_v36, %v903_v58  ;;  %v1322_v50 = vrot.slane %v1198_v5, 2  ;;  %v1427_v33 = vmul.f32 %v2942_v21, %v4088_v2 }
 0x129   : > { %v2247_v52 = vsel %vm449_vm1, %v2245_v26, %v2246_v54  ;;  %v1148_v40 = vadd.f32 %v1081_v30, %v904_v23  ;;  %v1324_v38 = vrot.slane %v1199_v44, 2  ;;  %v1428_v42 = vmul.f32 %v2942_v21, %v4094_v17 }
 0x12a   : > { %2816 = vmatprep.mubr.msk.f32.mxu0 %vm2303_vm4, %v2247_v52  ;;  %v1323_v32 = vsel %vm694_vm2, %v1321_v41, %v1322_v50  ;;  %v1509_v1 = vmul.f32 %v2944_v22, %v4088_v2  ;;  %v1510_v31 = vmul.f32 %v2944_v22, %v4094_v17  ;;  %v1511_v46 = vmul.f32 %v2944_v22, %v4101_v53 }
 0x12b   : > { %v1325_v6 = vsel %vm694_vm2, %v1322_v50, %v1324_v38  ;;  %v1391_v47 = vadd.f32 %v1323_v32, %v1147_v43  ;;  %v1753_v59 = vmul.f32 %v4022_v49, %v4088_v2  ;;  %v1754_v24 = vmul.f32 %v4022_v49, %v4094_v17 }
 0x12c   : > { %v1392_v48 = vadd.f32 %v1325_v6, %v1148_v40  ;;  %v1633_v29 = vrot.slane %v1509_v1, 1  ;;  %v1634_v61 = vrot.slane %v1510_v31, 1  ;;  %v1636_v57 = vrot.slane %v1511_v46, 1 }
 0x12d   : > { %v1459_v9 = vadd.f32 %v1427_v33, %v1391_v47  ;;  %v1755_v63 = vmul.f32 %v4022_v49, %v4101_v53  ;;  %v1877_v27 = vrot.slane %v1753_v59, 2  ;;  %v1878_v0 = vrot.slane %v1754_v24, 2 }
 0x12e   : > { %v1460_v60 = vadd.f32 %v1428_v42, %v1392_v48  ;;  %v1635_v25 = vsel %vm449_vm1, %v1633_v29, %v1634_v61  ;;  %v1637_v58 = vsel %vm449_vm1, %v1634_v61, %v1636_v57  ;;  %v2139_v39 = vadd.f32 %v2042_v3, %v3844_v45 }
 0x12f   : > { %v1703_v28 = vadd.f32 %v1635_v25, %v1459_v9  ;;  %v1879_v26 = vsel %vm694_vm2, %v1877_v27, %v1878_v0  ;;  %v1880_v23 = vrot.slane %v1755_v63, 2  ;;  %v299_v4 = vmul.f32 %v2927_v12, %v3824_v37 }
 0x130   : > { %v1704_v5 = vadd.f32 %v1637_v58, %v1460_v60  ;;  %v2248_v36 = vrot.slane %v2139_v39, 1  ;;  %v300_v44 = vmul.f32 %v2927_v12, %v3839_v8  ;;  %v374_v41 = vmul.f32 %v2929_v13, %v3824_v37 }
 0x131   : > { %v1881_v30 = vsel %vm694_vm2, %v1878_v0, %v1880_v23  ;;  %v1947_v43 = vadd.f32 %v1879_v26, %v1703_v28  ;;  %v375_v3 = vmul.f32 %v2929_v13, %v3839_v8  ;;  %v376_v50 = vmul.f32 %v2929_v13, %v3844_v45 }
 0x132   : > { %v1948_v33 = vadd.f32 %v1881_v30, %v1704_v5  ;;  %v2249_v52 = vsel %vm449_vm1, %v2246_v54, %v2248_v36  ;;  %v485_v40 = vrot.slane %v374_v41, 1  ;;  %v619_v38 = vmul.f32 %v2931_v14, %v3824_v37 }
 0x133   : > { %v1986_v42 = vadd.f32 %v4059_v55, %v1947_v43  ;;  %2817 = vmatmul.mubr.msk.f32.gmra.mrb[12].mxu0 %vm2303_vm4, %v2249_v52  ;;  %v486_v32 = vrot.slane %v375_v3, 1  ;;  %v488_v1 = vrot.slane %v376_v50, 1  ;;  %v620_v31 = vmul.f32 %v2931_v14, %v3839_v8 }
 0x134   : > { %v1987_v46 = vadd.f32 %v4059_v55, %v1948_v33  ;;  %v621_v6 = vmul.f32 %v2931_v14, %v3844_v45  ;;  %v730_v47 = vrot.slane %v619_v38, 2  ;;  %v857_v54 = vmul.f32 %v3996_v35, %v2933_v15 }
 0x135   : > { %v2065_v59 = vrot.slane %v1986_v42, 7  ;;  %v487_v37 = vsel %vm449_vm1, %v485_v40, %v486_v32  ;;  %v489_v24 = vsel %vm449_vm1, %v486_v32, %v488_v1  ;;  %v731_v48 = vrot.slane %v620_v31, 2  ;;  %v2864_v42 = vld [vmem:[%s2925_s27 + $0xd8] sm:$0xff] }
 0x136   : > { %v2066_v29 = vrot.slane %v1987_v46, 7  ;;  %v576_v61 = vadd.f32 %v487_v37, %v299_v4  ;;  %v577_v57 = vadd.f32 %v489_v24, %v300_v44  ;;  %v733_v9 = vrot.slane %v621_v6, 2  ;;  %v4149_v8 = vpop.f32.mrb[2].mxu0 }
 0x137   : > { %v2161_v63 = vadd.f32 %v2065_v59, %v3907_v62  ;;  %v732_v45 = vsel %vm694_vm2, %v730_v47, %v731_v48  ;;  %v858_v27 = vmul.f32 %v4001_v7, %v2933_v15  ;;  %v932_v0 = vmul.f32 %v3996_v35, %v2938_v19  ;;  %v4157_v60 = vpop.f32.mrb[3].mxu0 }
 0x138   : > { %v2067_v25 = vsel %vm2022_vm3, %v2065_v59, %v2066_v29  ;;  %v2163_v58 = vadd.f32 %v2066_v29, %v3925_v51  ;;  %v734_v39 = vsel %vm694_vm2, %v731_v48, %v733_v9  ;;  %v821_v28 = vadd.f32 %v732_v45, %v576_v61  ;;  %v2865_v48 = vld [vmem:[%s2925_s27 + $0xe0] sm:$0xff]  ;;  %v2866_v45 = vld [vmem:[%s2925_s27 + $0xe8] sm:$0x3] }
 0x139   : > { %v2162_v26 = vadd.f32 %v2067_v25, %v3913_v11  ;;  %v2285_v23 = vrot.slane %v2161_v63, 1  ;;  %v822_v4 = vadd.f32 %v734_v39, %v577_v57  ;;  %v933_v5 = vmul.f32 %v4001_v7, %v2938_v19 }
 0x13a   : > { %v2288_v36 = vrot.slane %v2163_v58, 1  ;;  %v889_v44 = vadd.f32 %v857_v54, %v821_v28  ;;  %v934_v41 = vmul.f32 %v4015_v56, %v2938_v19  ;;  %v1042_v30 = vrot.slane %v932_v0, 1 }
 0x13b   : > { %v2286_v43 = vrot.slane %v2162_v26, 1  ;;  %v890_v3 = vadd.f32 %v858_v27, %v822_v4  ;;  %v1043_v50 = vrot.slane %v933_v5, 1  ;;  %v1176_v33 = vmul.f32 %v3996_v35, %v2940_v20 }
 0x13c   : > { %v1045_v52 = vrot.slane %v934_v41, 1  ;;  %v1177_v40 = vmul.f32 %v4001_v7, %v2940_v20  ;;  %v1178_v38 = vmul.f32 %v4015_v56, %v2940_v20  ;;  %v1413_v32 = vmul.f32 %v2864_v42, %v2942_v21 }
 0x13d   : > { %v2287_v1 = vsel %vm449_vm1, %v2285_v23, %v2286_v43  ;;  %v2289_v31 = vsel %vm449_vm1, %v2286_v43, %v2288_v36  ;;  %v1044_v46 = vsel %vm449_vm1, %v1042_v30, %v1043_v50  ;;  %v1286_v6 = vrot.slane %v1176_v33, 2 }
 0x13e   : > { %2840 = vmatprep.mubr.msk.f32.mxu1 %vm2303_vm4, %v2287_v1  ;;  %v1046_v47 = vsel %vm449_vm1, %v1043_v50, %v1045_v52  ;;  %v1133_v54 = vadd.f32 %v1044_v46, %v889_v44  ;;  %v1287_v59 = vrot.slane %v1177_v40, 2  ;;  %v1289_v37 = vrot.slane %v1178_v38, 2 }
 0x13f   : > { %2841 = vmatmul.mubr.msk.f32.gmra.mrb[12].mxu1 %vm2303_vm4, %v2289_v31  ;;  %v1134_v24 = vadd.f32 %v1046_v47, %v890_v3  ;;  %v1414_v29 = vmul.f32 %v2865_v48, %v2942_v21  ;;  %v1488_v61 = vmul.f32 %v2864_v42, %v2944_v22  ;;  %v1489_v57 = vmul.f32 %v2865_v48, %v2944_v22 }
 0x140   : > { %v1288_v9 = vsel %vm694_vm2, %v1286_v6, %v1287_v59  ;;  %v1290_v63 = vsel %vm694_vm2, %v1287_v59, %v1289_v37  ;;  %v1490_v27 = vmul.f32 %v2866_v45, %v2944_v22  ;;  %v1732_v0 = vmul.f32 %v2864_v42, %v4022_v49 }
 0x141   : > { %v1377_v25 = vadd.f32 %v1288_v9, %v1133_v54  ;;  %v1378_v58 = vadd.f32 %v1290_v63, %v1134_v24  ;;  %v1598_v39 = vrot.slane %v1488_v61, 1  ;;  %v1599_v28 = vrot.slane %v1489_v57, 1 }
 0x142   : > { %v1601_v26 = vrot.slane %v1490_v27, 1  ;;  %v1733_v23 = vmul.f32 %v2865_v48, %v4022_v49  ;;  %v1734_v4 = vmul.f32 %v2866_v45, %v4022_v49  ;;  %v1842_v5 = vrot.slane %v1732_v0, 2 }
 0x143   : > { %v1445_v36 = vadd.f32 %v1413_v32, %v1377_v25  ;;  %v1446_v44 = vadd.f32 %v1414_v29, %v1378_v58  ;;  %v1600_v41 = vsel %vm449_vm1, %v1598_v39, %v1599_v28  ;;  %v315_v30 = vmul.f32 %v2927_v12, %v3907_v62  ;;  %v4195_v43 = vpop.f32.mrb[2].mxu1 }
 0x144   : > { %v1602_v3 = vsel %vm449_vm1, %v1599_v28, %v1601_v26  ;;  %v1843_v50 = vrot.slane %v1733_v23, 2  ;;  %v1845_v33 = vrot.slane %v1734_v4, 2  ;;  %v316_v52 = vmul.f32 %v2927_v12, %v3913_v11  ;;  %v4200_v40 = vpop.f32.mrb[3].mxu1 }
 0x145   : > { %v1689_v38 = vadd.f32 %v1600_v41, %v1445_v36  ;;  %v1690_v42 = vadd.f32 %v1602_v3, %v1446_v44  ;;  %v398_v32 = vmul.f32 %v2929_v13, %v3907_v62  ;;  %v399_v1 = vmul.f32 %v2929_v13, %v3913_v11 }
 0x146   : > { %v1844_v31 = vsel %vm694_vm2, %v1842_v5, %v1843_v50  ;;  %v1846_v46 = vsel %vm694_vm2, %v1843_v50, %v1845_v33  ;;  %v400_v6 = vmul.f32 %v2929_v13, %v3925_v51  ;;  %v643_v12 = vmul.f32 %v2931_v14, %v3907_v62  ;;  %v277_v33 = vld [vmem:[%s2925_s27 + $0x1a0] sm:$0xff] }
 0x147   : > { %v1933_v47 = vadd.f32 %v1844_v31, %v1689_v38  ;;  %v1934_v54 = vadd.f32 %v1846_v46, %v1690_v42  ;;  %v525_v59 = vrot.slane %v398_v32, 1  ;;  %v526_v37 = vrot.slane %v399_v1, 1  ;;  %v278_v31 = vld [vmem:[%s2925_s27 + $0x1a8] sm:$0x3] }
 0x148   : > { %v528_v24 = vrot.slane %v400_v6, 1  ;;  %v644_v48 = vmul.f32 %v2931_v14, %v3913_v11  ;;  %v645_v29 = vmul.f32 %v2931_v14, %v3925_v51  ;;  %v770_v61 = vrot.slane %v643_v12, 2 }
 0x149   : > { %v1972_v57 = vadd.f32 %v4059_v55, %v1933_v47  ;;  %v4218_v9 = vadd.f32 %v4059_v55, %v1934_v54  ;;  %v527_v13 = vsel %vm449_vm1, %v525_v59, %v526_v37  ;;  %v873_v62 = vmul.f32 %v2933_v15, %v4088_v2 }
 0x14a   : > { %v529_v63 = vsel %vm449_vm1, %v526_v37, %v528_v24  ;;  %v592_v45 = vadd.f32 %v527_v13, %v315_v30  ;;  %v771_v27 = vrot.slane %v644_v48, 2  ;;  %v773_v11 = vrot.slane %v645_v29, 2 }
 0x14b   : > { %v2044_v0 = vrot.slane %v1972_v57, 7  ;;  %v2045_v14 = vrot.slane %v4218_v9, 7  ;;  %v593_v51 = vadd.f32 %v529_v63, %v316_v52  ;;  %v874_v25 = vmul.f32 %v2933_v15, %v4094_v17  ;;  %v276_v15 = vld [vmem:[%s2925_s27 + $0x198] sm:$0xff] }
 0x14c   : > { %v772_v58 = vsel %vm694_vm2, %v770_v61, %v771_v27  ;;  %v774_v39 = vsel %vm694_vm2, %v771_v27, %v773_v11  ;;  %v956_v28 = vmul.f32 %v2938_v19, %v4088_v2  ;;  %v957_v26 = vmul.f32 %v2938_v19, %v4094_v17  ;;  %v4263_v27 = vld [vmem:[%s4400_s4] ss:$0 sm:$0xff] }
 0x14d   : > { %v2046_v23 = vsel %vm2022_vm3, %v2044_v0, %v2045_v14  ;;  %v2140_v4 = vadd.f32 %v3996_v35, %v2044_v0  ;;  %v837_v5 = vadd.f32 %v772_v58, %v592_v45  ;;  %v838_v36 = vadd.f32 %v774_v39, %v593_v51 }
 0x14e   : > { %v2141_v44 = vadd.f32 %v4001_v7, %v2046_v23  ;;  %v958_v41 = vmul.f32 %v2938_v19, %v4101_v53  ;;  %v1082_v30 = vrot.slane %v956_v28, 1  ;;  %v1083_v3 = vrot.slane %v957_v26, 1 }
 0x14f   : > { %v2250_v50 = vrot.slane %v2140_v4, 1  ;;  %v905_v52 = vadd.f32 %v873_v62, %v837_v5  ;;  %v906_v38 = vadd.f32 %v874_v25, %v838_v36  ;;  %v1200_v42 = vmul.f32 %v2940_v20, %v4088_v2 }
 0x150   : > { %v2251_v32 = vrot.slane %v2141_v44, 1  ;;  %v1084_v35 = vsel %vm449_vm1, %v1082_v30, %v1083_v3  ;;  %v1085_v1 = vrot.slane %v958_v41, 1  ;;  %v1201_v7 = vmul.f32 %v2940_v20, %v4094_v17 }
 0x151   : > { %v1149_v46 = vadd.f32 %v1084_v35, %v905_v52  ;;  %v1202_v19 = vmul.f32 %v2940_v20, %v4101_v53  ;;  %v1326_v6 = vrot.slane %v1200_v42, 2  ;;  %v1429_v12 = vmul.f32 %v2942_v21, %v276_v15 }
 0x152   : > { %v2252_v47 = vsel %vm449_vm1, %v2250_v50, %v2251_v32  ;;  %v1086_v54 = vsel %vm449_vm1, %v1083_v3, %v1085_v1  ;;  %v1327_v59 = vrot.slane %v1201_v7, 2  ;;  %v1430_v37 = vmul.f32 %v2942_v21, %v277_v33 }
 0x153   : > { %2819 = vmatprep.mubr.msk.f32.mxu0 %vm2303_vm4, %v2252_v47  ;;  %v1150_v24 = vadd.f32 %v1086_v54, %v906_v38  ;;  %v1329_v48 = vrot.slane %v1202_v19, 2  ;;  %v1512_v29 = vmul.f32 %v2944_v22, %v276_v15  ;;  %v1513_v61 = vmul.f32 %v2944_v22, %v277_v33 }
 0x154   : > { %v1328_v20 = vsel %vm694_vm2, %v1326_v6, %v1327_v59  ;;  %v1514_v57 = vmul.f32 %v2944_v22, %v278_v31  ;;  %v1756_v9 = vmul.f32 %v4022_v49, %v276_v15  ;;  %v1757_v13 = vmul.f32 %v4022_v49, %v277_v33 }
 0x155   : > { %v1330_v62 = vsel %vm694_vm2, %v1327_v59, %v1329_v48  ;;  %v1393_v21 = vadd.f32 %v1328_v20, %v1149_v46  ;;  %v1638_v63 = vrot.slane %v1512_v29, 1  ;;  %v1639_v45 = vrot.slane %v1513_v61, 1 }
 0x156   : > { %v1394_v11 = vadd.f32 %v1330_v62, %v1150_v24  ;;  %v1641_v0 = vrot.slane %v1514_v57, 1  ;;  %v1758_v51 = vmul.f32 %v4022_v49, %v278_v31  ;;  %v1882_v25 = vrot.slane %v1756_v9, 2 }
 0x157   : > { %v1461_v22 = vadd.f32 %v1429_v12, %v1393_v21  ;;  %v1640_v58 = vsel %vm449_vm1, %v1638_v63, %v1639_v45  ;;  %v1883_v39 = vrot.slane %v1757_v13, 2  ;;  %v2142_v28 = vadd.f32 %v4015_v56, %v2045_v14 }
 0x158   : > { %v1462_v26 = vadd.f32 %v1430_v37, %v1394_v11  ;;  %v1642_v23 = vsel %vm449_vm1, %v1639_v45, %v1641_v0  ;;  %v1885_v4 = vrot.slane %v1758_v51, 2  ;;  %v2444_v5 = vadd.f32 %v3977_v10, %v4263_v27 }
 0x159   : > { %v1705_v36 = vadd.f32 %v1640_v58, %v1461_v22  ;;  %v1884_v44 = vsel %vm694_vm2, %v1882_v25, %v1883_v39  ;;  %v2253_v15 = vrot.slane %v2142_v28, 1  ;;  %v2524_v56 = vadd.f32 %v4040_v34, %v4263_v27 }
 0x15a   : > { %v1706_v49 = vadd.f32 %v1642_v23, %v1462_v26  ;;  %v1886_v14 = vsel %vm694_vm2, %v1883_v39, %v1885_v4  ;;  %v2598_v41 = vmax.f32 %v2444_v5, 0.0  ;;  %v2439_v10 = vadd.f32 %v4263_v27, %v3983_v16 }
 0x15b   : > { %v1949_v30 = vadd.f32 %v1884_v44, %v1705_v36  ;;  %v2254_v3 = vsel %vm449_vm1, %v2251_v32, %v2253_v15  ;;  %v2614_v50 = vmax.f32 %v2524_v56, 0.0  ;;  %v2519_v33 = vadd.f32 %v4263_v27, %v4046_v18 }
 0x15c   : > { %v1950_v52 = vadd.f32 %v1886_v14, %v1706_v49  ;;  %2820 = vmatmul.mubr.msk.f32.gmra.mrb[14].mxu0 %vm2303_vm4, %v2254_v3  ;;  %2630 = vst.msk [vmem:[%s4276_s19 + $0x8] sm:$0xff] %vm2303_vm4, %v2598_v41  ;;  %v2597_v34 = vmax.f32 %v2439_v10, 0.0  ;;  %v2454_v38 = vadd.f32 %v4149_v8, %v4263_v27  ;;  %v2534_v16 = vadd.f32 %v4195_v43, %v4263_v27 }
 0x15d   : > { %v1988_v42 = vadd.f32 %v4059_v55, %v1949_v30  ;;  %2646 = vst.msk [vmem:[%s4276_s19 + $0x88] sm:$0xff] %vm2303_vm4, %v2614_v50  ;;  %v2613_v18 = vmax.f32 %v2519_v33, 0.0  ;;  %v2449_v32 = vadd.f32 %v4263_v27, %v4157_v60  ;;  %v2529_v35 = vadd.f32 %v4263_v27, %v4200_v40 }
 0x15e   : > { %v1989_v8 = vadd.f32 %v4059_v55, %v1950_v52  ;;  %2629 = vst.msk [vmem:[%s4276_s19] sm:$0xff] %vm2303_vm4, %v2597_v34  ;;  %v2600_v1 = vmax.f32 %v2454_v38, 0.0  ;;  %v2616_v43 = vmax.f32 %v2534_v16, 0.0 }
 0x15f   : > { %v2068_v7 = vrot.slane %v1988_v42, 7  ;;  %2645 = vst.msk [vmem:[%s4276_s19 + $0x80] sm:$0xff] %vm2303_vm4, %v2613_v18  ;;  %v2599_v31 = vmax.f32 %v2449_v32, 0.0  ;;  %v2615_v46 = vmax.f32 %v2529_v35, 0.0 }
 0x160   : > { %v2069_v19 = vrot.slane %v1989_v8, 7  ;;  %2632 = vst.msk [vmem:[%s4276_s19 + $0x18] sm:$0xff] %vm2303_vm4, %v2600_v1  ;;  %2648 = vst.msk [vmem:[%s4276_s19 + $0x98] sm:$0xff] %vm2303_vm4, %v2616_v43  ;;  %v2806_v60 = vpop.f32.mrb[4].mxu0 }
 0x161   : > { %v2164_v40 = vadd.f32 %v2068_v7, %v4088_v2  ;;  %2631 = vst.msk [vmem:[%s4276_s19 + $0x10] sm:$0xff] %vm2303_vm4, %v2599_v31  ;;  %2647 = vst.msk [vmem:[%s4276_s19 + $0x90] sm:$0xff] %vm2303_vm4, %v2615_v46  ;;  %v2464_v55 = vadd.f32 %v2806_v60, %v4263_v27  ;;  %v2458_v6 = vpop.f32.mrb[5].mxu0 }
 0x162   : > { %v2070_v12 = vsel %vm2022_vm3, %v2068_v7, %v2069_v19  ;;  %v2166_v47 = vadd.f32 %v2069_v19, %v4101_v53  ;;  %v2459_v54 = vadd.f32 %v4263_v27, %v2458_v6 }
 0x163   : > { %v2165_v59 = vadd.f32 %v2070_v12, %v4094_v17  ;;  %v2290_v37 = vrot.slane %v2164_v40, 1  ;;  %v2602_v24 = vmax.f32 %v2464_v55, 0.0 }
 0x164   : > { %v2293_v48 = vrot.slane %v2166_v47, 1  ;;  %v2601_v2 = vmax.f32 %v2459_v54, 0.0 }
 0x165   : > { %v2291_v29 = vrot.slane %v2165_v59, 1  ;;  %2634 = vst.msk [vmem:[%s4276_s19 + $0x28] sm:$0xff] %vm2303_vm4, %v2602_v24 }
 0x166   : > { %2633 = vst.msk [vmem:[%s4276_s19 + $0x20] sm:$0xff] %vm2303_vm4, %v2601_v2 }
 0x167   : > { %v2292_v61 = vsel %vm449_vm1, %v2290_v37, %v2291_v29  ;;  %v2294_v20 = vsel %vm449_vm1, %v2291_v29, %v2293_v48 }
 0x168   : > { %2843 = vmatprep.mubr.msk.f32.mxu1 %vm2303_vm4, %v2292_v61 }
 0x169   : > { %2844 = vmatmul.mubr.msk.f32.gmra.mrb[14].mxu1 %vm2303_vm4, %v2294_v20 }
 0x16c   : > { %v2830_v17 = vpop.f32.mrb[4].mxu1 }
 0x16d   : > { %v2544_v53 = vadd.f32 %v2830_v17, %v4263_v27  ;;  %v2538_v57 = vpop.f32.mrb[5].mxu1 }
 0x16e   : > { %v2539_v9 = vadd.f32 %v4263_v27, %v2538_v57 }
 0x16f   : > { %v2618_v13 = vmax.f32 %v2544_v53, 0.0 }
 0x170   : > { %v2617_v62 = vmax.f32 %v2539_v9, 0.0 }
 0x171   : > { %2650 = vst.msk [vmem:[%s4276_s19 + $0xa8] sm:$0xff] %vm2303_vm4, %v2618_v13 }
 0x172   : > { %2649 = vst.msk [vmem:[%s4276_s19 + $0xa0] sm:$0xff] %vm2303_vm4, %v2617_v62 }
 0x189   : > { %v2809_v21 = vpop.f32.mrb[6].mxu0 }
 0x18a   : > { %v2474_v63 = vadd.f32 %v2809_v21, %v4263_v27  ;;  %v2468_v45 = vpop.f32.mrb[7].mxu0 }
 0x18b   : > { %v2469_v11 = vadd.f32 %v4263_v27, %v2468_v45 }
 0x18c   : > { %v2604_v0 = vmax.f32 %v2474_v63, 0.0 }
 0x18d   : > { %v2603_v51 = vmax.f32 %v2469_v11, 0.0 }
 0x18e   : > { %2636 = vst.msk [vmem:[%s4276_s19 + $0x38] sm:$0xff] %vm2303_vm4, %v2604_v0 }
 0x18f   : > { %2635 = vst.msk [vmem:[%s4276_s19 + $0x30] sm:$0xff] %vm2303_vm4, %v2603_v51 }
 0x196   : > { %v2833_v25 = vpop.f32.mrb[6].mxu1 }
 0x197   : > { %v2554_v22 = vadd.f32 %v2833_v25, %v4263_v27  ;;  %v2548_v58 = vpop.f32.mrb[7].mxu1 }
 0x198   : > { %v2549_v39 = vadd.f32 %v4263_v27, %v2548_v58 }
 0x199   : > { %v2620_v28 = vmax.f32 %v2554_v22, 0.0 }
 0x19a   : > { %v2619_v26 = vmax.f32 %v2549_v39, 0.0 }
 0x19b   : > { %2652 = vst.msk [vmem:[%s4276_s19 + $0xb8] sm:$0xff] %vm2303_vm4, %v2620_v28 }
 0x19c   : > { %2651 = vst.msk [vmem:[%s4276_s19 + $0xb0] sm:$0xff] %vm2303_vm4, %v2619_v26 }
 0x1b3   : > { %v2812_v23 = vpop.f32.mrb[8].mxu0 }
 0x1b4   : > { %v2484_v4 = vadd.f32 %v2812_v23, %v4263_v27  ;;  %v2478_v5 = vpop.f32.mrb[9].mxu0 }
 0x1b5   : > { %v2479_v36 = vadd.f32 %v4263_v27, %v2478_v5 }
 0x1b6   : > { %v2606_v44 = vmax.f32 %v2484_v4, 0.0 }
 0x1b7   : > { %v2605_v15 = vmax.f32 %v2479_v36, 0.0 }
 0x1b8   : > { %2638 = vst.msk [vmem:[%s4276_s19 + $0x48] sm:$0xff] %vm2303_vm4, %v2606_v44 }
 0x1b9   : > { %2637 = vst.msk [vmem:[%s4276_s19 + $0x40] sm:$0xff] %vm2303_vm4, %v2605_v15 }
 0x1bf   : > { %v2836_v56 = vpop.f32.mrb[8].mxu1 }
 0x1c0   : > { %v2564_v49 = vadd.f32 %v2836_v56, %v4263_v27  ;;  %v2558_v14 = vpop.f32.mrb[9].mxu1 }
 0x1c1   : > { %v2559_v41 = vadd.f32 %v4263_v27, %v2558_v14 }
 0x1c2   : > { %v2622_v10 = vmax.f32 %v2564_v49, 0.0 }
 0x1c3   : > { %v2621_v30 = vmax.f32 %v2559_v41, 0.0 }
 0x1c4   : > { %2654 = vst.msk [vmem:[%s4276_s19 + $0xc8] sm:$0xff] %vm2303_vm4, %v2622_v10 }
 0x1c5   : > { %2653 = vst.msk [vmem:[%s4276_s19 + $0xc0] sm:$0xff] %vm2303_vm4, %v2621_v30 }
 0x1dc   : > { %v2815_v3 = vpop.f32.mrb[10].mxu0 }
 0x1dd   : > { %v2494_v50 = vadd.f32 %v2815_v3, %v4263_v27  ;;  %v2488_v33 = vpop.f32.mrb[11].mxu0 }
 0x1de   : > { %v2489_v52 = vadd.f32 %v4263_v27, %v2488_v33 }
 0x1df   : > { %v2608_v34 = vmax.f32 %v2494_v50, 0.0 }
 0x1e0   : > { %v2607_v38 = vmax.f32 %v2489_v52, 0.0 }
 0x1e1   : > { %2640 = vst.msk [vmem:[%s4276_s19 + $0x58] sm:$0xff] %vm2303_vm4, %v2608_v34 }
 0x1e2   : > { %2639 = vst.msk [vmem:[%s4276_s19 + $0x50] sm:$0xff] %vm2303_vm4, %v2607_v38 }
 0x1e9   : > { %v2839_v16 = vpop.f32.mrb[10].mxu1 }
 0x1ea   : > { %v2574_v42 = vadd.f32 %v2839_v16, %v4263_v27  ;;  %v2568_v18 = vpop.f32.mrb[11].mxu1 }
 0x1eb   : > { %v2569_v32 = vadd.f32 %v4263_v27, %v2568_v18 }
 0x1ec   : > { %v2624_v35 = vmax.f32 %v2574_v42, 0.0 }
 0x1ed   : > { %v2623_v8 = vmax.f32 %v2569_v32, 0.0 }
 0x1ee   : > { %2656 = vst.msk [vmem:[%s4276_s19 + $0xd8] sm:$0xff] %vm2303_vm4, %v2624_v35 }
 0x1ef   : > { %2655 = vst.msk [vmem:[%s4276_s19 + $0xd0] sm:$0xff] %vm2303_vm4, %v2623_v8 }
 0x206   : > { %v2818_v1 = vpop.f32.mrb[12].mxu0 }
 0x207   : > { %v2504_v43 = vadd.f32 %v2818_v1, %v4263_v27  ;;  %v2498_v7 = vpop.f32.mrb[13].mxu0 }
 0x208   : > { %v2499_v31 = vadd.f32 %v4263_v27, %v2498_v7 }
 0x209   : > { %v2610_v46 = vmax.f32 %v2504_v43, 0.0 }
 0x20a   : > { %v2609_v19 = vmax.f32 %v2499_v31, 0.0 }
 0x20b   : > { %2642 = vst.msk [vmem:[%s4276_s19 + $0x68] sm:$0xff] %vm2303_vm4, %v2610_v46 }
 0x20c   : > { %2641 = vst.msk [vmem:[%s4276_s19 + $0x60] sm:$0xff] %vm2303_vm4, %v2609_v19 }
 0x212   : > { %v2842_v60 = vpop.f32.mrb[12].mxu1 }
 0x213   : > { %v2584_v40 = vadd.f32 %v2842_v60, %v4263_v27  ;;  %v2578_v55 = vpop.f32.mrb[13].mxu1 }
 0x214   : > { %v2579_v6 = vadd.f32 %v4263_v27, %v2578_v55 }
 0x215   : > { %v2626_v12 = vmax.f32 %v2584_v40, 0.0 }
 0x216   : > { %v2625_v47 = vmax.f32 %v2579_v6, 0.0 }
 0x217   : > { %2658 = vst.msk [vmem:[%s4276_s19 + $0xe8] sm:$0xff] %vm2303_vm4, %v2626_v12 }
 0x218   : > { %2657 = vst.msk [vmem:[%s4276_s19 + $0xe0] sm:$0xff] %vm2303_vm4, %v2625_v47 }
 0x22f   : > { %v2821_v54 = vpop.f32.mrb[14].mxu0 }
 0x230   : > { %v2514_v59 = vadd.f32 %v2821_v54, %v4263_v27  ;;  %v2508_v37 = vpop.f32.mrb[15].mxu0 }
 0x231   : > { %v2509_v24 = vadd.f32 %v4263_v27, %v2508_v37 }
 0x232   : > { %v2612_v48 = vmax.f32 %v2514_v59, 0.0 }
 0x233   : > { %v2611_v2 = vmax.f32 %v2509_v24, 0.0 }
 0x234   : > { %2644 = vst.msk [vmem:[%s4276_s19 + $0x78] sm:$0xff] %vm2303_vm4, %v2612_v48 }
 0x235   : > { %2643 = vst.msk [vmem:[%s4276_s19 + $0x70] sm:$0xff] %vm2303_vm4, %v2611_v2 }
 0x23c   : > { %v2845_v29 = vpop.f32.mrb[14].mxu1 }
 0x23d   : > { %v2594_v61 = vadd.f32 %v2845_v29, %v4263_v27  ;;  %v2588_v20 = vpop.f32.mrb[15].mxu1 }
 0x23e   : > { %v2589_v17 = vadd.f32 %v4263_v27, %v2588_v20 }
 0x23f   : > { %v2628_v53 = vmax.f32 %v2594_v61, 0.0 }
 0x240   : > { %v2627_v57 = vmax.f32 %v2589_v17, 0.0 }
 0x241   : > { %2660 = vst.msk [vmem:[%s4276_s19 + $0xf8] sm:$0xff] %vm2303_vm4, %v2628_v53 }
 0x242   : > { %2659 = vst.msk [vmem:[%s4276_s19 + $0xf0] sm:$0xff] %vm2303_vm4, %v2627_v57 }
 0x243 PF: > { %s15_s18 = sadd.s32 1, %s2873_s18  }
 0x244   : > { %p12_p4 = scmp.ge.s32.totalorder %s15_s18, 4  }
 0x246   :  { %14 = sbr.rel (!%p12_p4) target bundleno = 1 (0x1), region = 70 }

// kernel: hybrid_forward.13
= control target key start
LH: loop header
LB: loop body
LE: loop exit
PB: predicated region body
PF: predicated region fallthrough
CT: control target
= control target key end

     0   :  { %s3167_s24 = smov 0   ;;  %s4740_s0 = inlined_call_operand.vmem [shape: f32[2,18,18,4], index: 0, kind: input, shape index: {}]   ;;  %s4741_s1 = inlined_call_operand.vmem [shape: f32[9,4], index: 1, kind: input, shape index: {}]   ;;  %s4742_s2 = inlined_call_operand.vmem [shape: f32[1,4], index: 2, kind: input, shape index: {}]   ;;  %s4743_s3 = inlined_call_operand.vmem [shape: f32[4,4], index: 3, kind: input, shape index: {}]   ;;  %s4744_s4 = inlined_call_operand.vmem [shape: f32[1,4], index: 4, kind: input, shape index: {}]   ;;  %s4745_s5 = inlined_call_operand.vmem [shape: f32[2,16,16,4], index: 5, kind: input, shape index: {}]   ;;  %s4746_s6 = inlined_call_operand.vmem [shape: f32[2,16,16,4], index: 6, kind: input, shape index: {}]   ;;  %s4747_s7 = inlined_call_operand.vmem [shape: f32[2,16,16,4], index: 7, kind: output, shape index: {}]  }
   0x1 LB: > { %s2962_s25 = sadd.s32 4294967295, %s3125_s24   ;;  %p2966_p0 = scmp.ge.s32.totalorder %s3125_s24, 1  ;;  %s3125_s24 = sphi %s3167_s24, %s17_s24  }
   0x2   : > { %p257_p1 = scmp.lt.s32.totalorder %s3125_s24, 3 }
   0x4   : > { %p258_p2 = pnand %p2966_p0, %p257_p1 }
   0x5   : > { %v2389_v0 = vld [vmem:[%s4743_s3] sm:$0xf] (!%p258_p2)  ;;  %vm2462_vm0 = vcmask (!%p258_p2), 1043456   ;;  %p299_p3 = scmp.lt.s32.totalorder (!%p258_p2), %s2962_s25, 1  ;;  %v375_v1 = vlaneseq (!%p258_p2)  ;;  %vm543_vm1 = vcmask (!%p258_p2), 1046528   ;;  %vm788_vm2 = vcmask (!%p258_p2), 1045504  }
   0x6   : > { %261 = sbr.rel (%p258_p2) target bundleno = 583 (0x247), region = 48  ;;  %3048 = vmatprep.subr.msk.mxu0 (!%p258_p2), %vm2462_vm0, %v2389_v0  ;;  %3098 = vmatprep.subr.msk.mxu1 (!%p258_p2), %vm2462_vm0, %v2389_v0  ;;  %v373_v3 = vld [vmem:[%s4741_s1] sm:$0xff] (!%p258_p2)  ;;  %vm2116_vm3 = vcmask (!%p258_p2), 1040384   ;;  %vm2397_vm4 = vcmask (!%p258_p2), 31744  }
   0x7   : > { %3049 = vmatpush3.msk.msra.mxu0 (!%p258_p2), %vm2462_vm0, %v2389_v0  ;;  %3099 = vmatpush3.msk.msra.mxu1 (!%p258_p2), %vm2462_vm0, %v2389_v0  ;;  %v376_v2 = vshrl.u32 (!%p258_p2), %v375_v1, 7 }
   0x9   : > { %v377_v4 = vsub.s32 (!%p258_p2), 0, %v376_v2  ;;  %v445_v5 = vsub.s32 (!%p258_p2), 1, %v376_v2  ;;  %v690_v6 = vsub.s32 (!%p258_p2), 2, %v376_v2  ;;  %v935_v7 = vsub.s32 (!%p258_p2), 3, %v376_v2 }
   0xa   : > { %v1003_v8 = vsub.s32 (!%p258_p2), 4, %v376_v2  ;;  %v1247_v9 = vsub.s32 (!%p258_p2), 5, %v376_v2  ;;  %v1491_v10 = vsub.s32 (!%p258_p2), 6, %v376_v2  ;;  %v1559_v11 = vsub.s32 (!%p258_p2), 7, %v376_v2 }
   0xb   : > { %v3189_v12 = vrot.slane (!%p258_p2), %v373_v3, %v377_v4  ;;  %v3191_v13 = vrot.slane (!%p258_p2), %v373_v3, %v445_v5  ;;  %v3193_v14 = vrot.slane (!%p258_p2), %v373_v3, %v690_v6  ;;  %v3195_v15 = vrot.slane (!%p258_p2), %v373_v3, %v935_v7 }
   0xc   : > { %v3200_v19 = vrot.slane (!%p258_p2), %v373_v3, %v1003_v8  ;;  %v3202_v20 = vrot.slane (!%p258_p2), %v373_v3, %v1247_v9  ;;  %v3204_v21 = vrot.slane (!%p258_p2), %v373_v3, %v1491_v10  ;;  %v3206_v22 = vrot.slane (!%p258_p2), %v373_v3, %v1559_v11  ;;  %v3278_v8 = vld [vmem:[%s4741_s1 + $0x8] ss:$0 sm:$0xff] (!%p258_p2) }
   0xd   : > { %s4749_s25 = smov (!%p299_p3, %s2962_s25), 1 }
   0xe   : > { %s3100_s30 = smul.u32 432, %s4749_s25  ;;  %s4515_s23 = sshll.u32 %s4749_s25, 8 }
   0xf   : > { %s4531_s27 = scalar_lea.vmem %s4745_s5, %s4515_s23  ;;  %s4544_s9 = scalar_lea.vmem %s4746_s6, %s4515_s23 }
  0x10   : > { %s3187_s10 = scalar_lea.vmem %s4740_s0, %s3100_s30  ;;  %s4578_s12 = scalar_lea.vmem %s4747_s7, %s4515_s23 }
  0x11   : > { %v319_v16 = vld [vmem:[%s3187_s10] sm:$0xff]  ;;  %v320_v17 = vld [vmem:[%s3187_s10 + $0x8] sm:$0xff]  ;;  %v321_v18 = vld [vmem:[%s3187_s10 + $0x10] sm:$0x3] }
  0x12   : > { %v3209_v23 = vld [vmem:[%s3187_s10 + $0x18] sm:$0xff]  ;;  %v3212_v24 = vld [vmem:[%s3187_s10 + $0x20] sm:$0xff]  ;;  %v379_v25 = vmul.f32 %v3189_v12, %v319_v16  ;;  %v380_v26 = vmul.f32 %v3189_v12, %v320_v17  ;;  %v447_v27 = vmul.f32 %v3191_v13, %v319_v16  ;;  %v448_v28 = vmul.f32 %v3191_v13, %v320_v17  ;;  %v3247_v49 = vld [vmem:[%s3187_s10 + $0x28] sm:$0x3] }
  0x13   : > { %v3220_v29 = vmul.f32 %v3189_v12, %v3212_v24  ;;  %v449_v30 = vmul.f32 %v3191_v13, %v321_v18  ;;  %v3225_v31 = vmul.f32 %v3191_v13, %v3209_v23  ;;  %v3229_v32 = vmul.f32 %v3191_v13, %v3212_v24  ;;  %v3264_v62 = vld [vmem:[%s3187_s10 + $0x30] sm:$0xff]  ;;  %v3273_v7 = vld [vmem:[%s3187_s10 + $0x38] sm:$0xff] }
  0x14   : > { %v544_v33 = vrot.slane %v447_v27, 1  ;;  %v545_v34 = vrot.slane %v448_v28, 1  ;;  %v692_v35 = vmul.f32 %v3193_v14, %v319_v16  ;;  %v693_v36 = vmul.f32 %v3193_v14, %v320_v17  ;;  %v3283_v17 = vld [vmem:[%s3187_s10 + $0x40] sm:$0x3] }
  0x15   : > { %v547_v37 = vrot.slane %v449_v30, 1  ;;  %v549_v38 = vrot.slane %v3225_v31, 1  ;;  %v550_v39 = vrot.slane %v3229_v32, 1  ;;  %v694_v40 = vmul.f32 %v3193_v14, %v321_v18 }
  0x16   : > { %v546_v41 = vsel %vm543_vm1, %v544_v33, %v545_v34  ;;  %v3239_v42 = vmul.f32 %v3193_v14, %v3209_v23  ;;  %v3243_v43 = vmul.f32 %v3193_v14, %v3212_v24  ;;  %v789_v44 = vrot.slane %v692_v35, 2 }
  0x17   : > { %v548_v45 = vsel %vm543_vm1, %v545_v34, %v547_v37  ;;  %v656_v46 = vadd.f32 %v546_v41, %v379_v25  ;;  %v790_v47 = vrot.slane %v693_v36, 2  ;;  %v792_v48 = vrot.slane %v694_v40, 2 }
  0x18   : > { %v657_v50 = vadd.f32 %v548_v45, %v380_v26  ;;  %v937_v51 = vmul.f32 %v3195_v15, %v3209_v23  ;;  %v938_v52 = vmul.f32 %v3195_v15, %v3212_v24  ;;  %v1005_v53 = vmul.f32 %v3200_v19, %v3209_v23 }
  0x19   : > { %v791_v54 = vsel %vm788_vm2, %v789_v44, %v790_v47  ;;  %v793_v55 = vsel %vm788_vm2, %v790_v47, %v792_v48  ;;  %v1006_v56 = vmul.f32 %v3200_v19, %v3212_v24  ;;  %v1007_v57 = vmul.f32 %v3200_v19, %v3247_v49  ;;  %v343_v47 = vld [vmem:[%s3187_s10 + $0xc0] sm:$0xff] }
  0x1a   : > { %v901_v58 = vadd.f32 %v791_v54, %v656_v46  ;;  %v902_v59 = vadd.f32 %v793_v55, %v657_v50  ;;  %v1101_v60 = vrot.slane %v1005_v53, 1  ;;  %v1249_v61 = vmul.f32 %v3202_v20, %v3209_v23  ;;  %v345_v53 = vld [vmem:[%s3187_s10 + $0xd0] sm:$0x3] }
  0x1b   : > { %v1102_v63 = vrot.slane %v1006_v56, 1  ;;  %v1104_v0 = vrot.slane %v1007_v57, 1  ;;  %v1250_v1 = vmul.f32 %v3202_v20, %v3212_v24  ;;  %v1251_v2 = vmul.f32 %v3202_v20, %v3247_v49 }
  0x1c   : > { %v969_v3 = vadd.f32 %v937_v51, %v901_v58  ;;  %v970_v4 = vadd.f32 %v938_v52, %v902_v59  ;;  %v1345_v5 = vrot.slane %v1249_v61, 2  ;;  %v1493_v6 = vmul.f32 %v3204_v21, %v3264_v62  ;;  %v344_v52 = vld [vmem:[%s3187_s10 + $0xc8] sm:$0xff] }
  0x1d   : > { %v1103_v9 = vsel %vm543_vm1, %v1101_v60, %v1102_v63  ;;  %v1105_v10 = vsel %vm543_vm1, %v1102_v63, %v1104_v0  ;;  %v1346_v11 = vrot.slane %v1250_v1, 2  ;;  %v1348_v16 = vrot.slane %v1251_v2, 2  ;;  %v3314_v2 = vld [vmem:[%s4742_s2] ss:$0 sm:$0xff] }
  0x1e   : > { %v1213_v18 = vadd.f32 %v1103_v9, %v969_v3  ;;  %v1214_v25 = vadd.f32 %v1105_v10, %v970_v4  ;;  %v1494_v26 = vmul.f32 %v3204_v21, %v3273_v7  ;;  %v1561_v27 = vmul.f32 %v3206_v22, %v3264_v62 }
  0x1f   : > { %v1347_v28 = vsel %vm788_vm2, %v1345_v5, %v1346_v11  ;;  %v1349_v30 = vsel %vm788_vm2, %v1346_v11, %v1348_v16  ;;  %v1562_v33 = vmul.f32 %v3206_v22, %v3273_v7  ;;  %v1563_v34 = vmul.f32 %v3206_v22, %v3283_v17  ;;  %v3320_v11 = vld [vmem:[%s3187_s10 + $0xd8] sm:$0xff] }
  0x20   : > { %v1457_v35 = vadd.f32 %v1347_v28, %v1213_v18  ;;  %v1458_v36 = vadd.f32 %v1349_v30, %v1214_v25  ;;  %v1657_v37 = vrot.slane %v1561_v27, 1  ;;  %v1805_v40 = vmul.f32 %v3278_v8, %v3264_v62 }
  0x21   : > { %v1658_v41 = vrot.slane %v1562_v33, 1  ;;  %v1660_v44 = vrot.slane %v1563_v34, 1  ;;  %v1806_v45 = vmul.f32 %v3278_v8, %v3273_v7  ;;  %v1807_v46 = vmul.f32 %v3278_v8, %v3283_v17 }
  0x22   : > { %v1525_v48 = vadd.f32 %v1493_v6, %v1457_v35  ;;  %v1526_v50 = vadd.f32 %v1494_v26, %v1458_v36  ;;  %v1901_v51 = vrot.slane %v1805_v40, 2  ;;  %v395_v54 = vmul.f32 %v3189_v12, %v343_v47 }
  0x23   : > { %v1659_v55 = vsel %vm543_vm1, %v1657_v37, %v1658_v41  ;;  %v1661_v56 = vsel %vm543_vm1, %v1658_v41, %v1660_v44  ;;  %v1902_v57 = vrot.slane %v1806_v45, 2  ;;  %v1904_v58 = vrot.slane %v1807_v46, 2  ;;  %v3334_v44 = vld [vmem:[%s3187_s10 + $0xe0] sm:$0xff] }
  0x24   : > { %v1769_v59 = vadd.f32 %v1659_v55, %v1525_v48  ;;  %v1770_v60 = vadd.f32 %v1661_v56, %v1526_v50  ;;  %v396_v61 = vmul.f32 %v3189_v12, %v344_v52  ;;  %v471_v63 = vmul.f32 %v3191_v13, %v343_v47  ;;  %v3345_v55 = vld [vmem:[%s3187_s10 + $0xe8] sm:$0x3] }
  0x25   : > { %v1903_v0 = vsel %vm788_vm2, %v1901_v51, %v1902_v57  ;;  %v1905_v1 = vsel %vm788_vm2, %v1902_v57, %v1904_v58  ;;  %v472_v3 = vmul.f32 %v3191_v13, %v344_v52  ;;  %v473_v4 = vmul.f32 %v3191_v13, %v345_v53 }
  0x26   : > { %v2013_v5 = vadd.f32 %v1903_v0, %v1769_v59  ;;  %v2014_v6 = vadd.f32 %v1905_v1, %v1770_v60  ;;  %v584_v9 = vrot.slane %v471_v63, 1  ;;  %v716_v10 = vmul.f32 %v3193_v14, %v343_v47 }
  0x27   : > { %v585_v16 = vrot.slane %v472_v3, 1  ;;  %v587_v18 = vrot.slane %v473_v4, 1  ;;  %v717_v25 = vmul.f32 %v3193_v14, %v344_v52  ;;  %v718_v26 = vmul.f32 %v3193_v14, %v345_v53  ;;  %v3355_v4 = vld [vmem:[%s3187_s10 + $0xf0] sm:$0xff] }
  0x28   : > { %v2052_v27 = vadd.f32 %v3314_v2, %v2013_v5  ;;  %v3326_v28 = vadd.f32 %v3314_v2, %v2014_v6  ;;  %v829_v30 = vrot.slane %v716_v10, 2  ;;  %v953_v33 = vmul.f32 %v3195_v15, %v3320_v11  ;;  %v3358_v5 = vld [vmem:[%s3187_s10 + $0xf8] sm:$0xff] }
  0x29   : > { %v586_v34 = vsel %vm543_vm1, %v584_v9, %v585_v16  ;;  %v588_v35 = vsel %vm543_vm1, %v585_v16, %v587_v18  ;;  %v830_v36 = vrot.slane %v717_v25, 2  ;;  %v832_v37 = vrot.slane %v718_v26, 2 }
  0x2a   : > { %v2117_v40 = vrot.slane %v2052_v27, 7  ;;  %v2118_v41 = vrot.slane %v3326_v28, 7  ;;  %v672_v45 = vadd.f32 %v586_v34, %v395_v54  ;;  %v673_v46 = vadd.f32 %v588_v35, %v396_v61 }
  0x2b   : > { %v831_v47 = vsel %vm788_vm2, %v829_v30, %v830_v36  ;;  %v833_v48 = vsel %vm788_vm2, %v830_v36, %v832_v37  ;;  %v954_v50 = vmul.f32 %v3195_v15, %v3334_v44  ;;  %v1029_v51 = vmul.f32 %v3200_v19, %v3320_v11 }
  0x2c   : > { %v2119_v52 = vsel %vm2116_vm3, %v2117_v40, %v2118_v41  ;;  %v2213_v53 = vadd.f32 %v2117_v40, %v3209_v23  ;;  %v917_v54 = vadd.f32 %v831_v47, %v672_v45  ;;  %v918_v56 = vadd.f32 %v833_v48, %v673_v46 }
  0x2d   : > { %v2214_v57 = vadd.f32 %v2119_v52, %v3212_v24  ;;  %v1030_v58 = vmul.f32 %v3200_v19, %v3334_v44  ;;  %v1031_v59 = vmul.f32 %v3200_v19, %v3345_v55  ;;  %v1141_v60 = vrot.slane %v1029_v51, 1 }
  0x2e   : > { %v2309_v61 = vrot.slane %v2213_v53, 1  ;;  %v985_v63 = vadd.f32 %v953_v33, %v917_v54  ;;  %v986_v0 = vadd.f32 %v954_v50, %v918_v56  ;;  %v1273_v1 = vmul.f32 %v3202_v20, %v3320_v11  ;;  %v3373_v33 = vld [vmem:[%s3187_s10 + $0x100] sm:$0x3] }
  0x2f   : > { %v2310_v3 = vrot.slane %v2214_v57, 1  ;;  %v1142_v24 = vrot.slane %v1030_v58, 1  ;;  %v1144_v6 = vrot.slane %v1031_v59, 1  ;;  %v1274_v9 = vmul.f32 %v3202_v20, %v3334_v44 }
  0x30   : > { %v1275_v10 = vmul.f32 %v3202_v20, %v3345_v55  ;;  %v1385_v16 = vrot.slane %v1273_v1, 2  ;;  %v1509_v18 = vmul.f32 %v3204_v21, %v3355_v4  ;;  %v1510_v25 = vmul.f32 %v3204_v21, %v3358_v5 }
  0x31   : > { %v2311_v26 = vsel %vm543_vm1, %v2309_v61, %v2310_v3  ;;  %v1143_v27 = vsel %vm543_vm1, %v1141_v60, %v1142_v24  ;;  %v1145_v28 = vsel %vm543_vm1, %v1142_v24, %v1144_v6  ;;  %v1386_v30 = vrot.slane %v1274_v9, 2 }
  0x32   : > { %3050 = vmatprep.mubr.msk.f32.mxu0 %vm2397_vm4, %v2311_v26  ;;  %v1229_v34 = vadd.f32 %v1143_v27, %v985_v63  ;;  %v1230_v35 = vadd.f32 %v1145_v28, %v986_v0  ;;  %v1388_v36 = vrot.slane %v1275_v10, 2  ;;  %v1585_v37 = vmul.f32 %v3206_v22, %v3355_v4 }
  0x33   : > { %v1387_v40 = vsel %vm788_vm2, %v1385_v16, %v1386_v30  ;;  %v1586_v45 = vmul.f32 %v3206_v22, %v3358_v5  ;;  %v1587_v46 = vmul.f32 %v3206_v22, %v3373_v33  ;;  %v1829_v47 = vmul.f32 %v3278_v8, %v3355_v4 }
  0x34   : > { %v1389_v48 = vsel %vm788_vm2, %v1386_v30, %v1388_v36  ;;  %v1473_v50 = vadd.f32 %v1387_v40, %v1229_v34  ;;  %v1697_v51 = vrot.slane %v1585_v37, 1  ;;  %v1830_v52 = vmul.f32 %v3278_v8, %v3358_v5 }
  0x35   : > { %v1474_v53 = vadd.f32 %v1389_v48, %v1230_v35  ;;  %v1698_v54 = vrot.slane %v1586_v45, 1  ;;  %v1700_v56 = vrot.slane %v1587_v46, 1  ;;  %v1831_v57 = vmul.f32 %v3278_v8, %v3373_v33 }
  0x36   : > { %v1541_v58 = vadd.f32 %v1509_v18, %v1473_v50  ;;  %v1941_v59 = vrot.slane %v1829_v47, 2  ;;  %v1942_v60 = vrot.slane %v1830_v52, 2  ;;  %v2215_v61 = vadd.f32 %v2118_v41, %v3247_v49 }
  0x37   : > { %v1542_v63 = vadd.f32 %v1510_v25, %v1474_v53  ;;  %v1699_v0 = vsel %vm543_vm1, %v1697_v51, %v1698_v54  ;;  %v1701_v1 = vsel %vm543_vm1, %v1698_v54, %v1700_v56  ;;  %v1944_v24 = vrot.slane %v1831_v57, 2 }
  0x38   : > { %v1785_v6 = vadd.f32 %v1699_v0, %v1541_v58  ;;  %v1943_v9 = vsel %vm788_vm2, %v1941_v59, %v1942_v60  ;;  %v2312_v10 = vrot.slane %v2215_v61, 1  ;;  %v381_v16 = vmul.f32 %v3189_v12, %v3209_v23 }
  0x39   : > { %v1786_v26 = vadd.f32 %v1701_v1, %v1542_v63  ;;  %v1945_v18 = vsel %vm788_vm2, %v1942_v60, %v1944_v24  ;;  %v452_v27 = vmul.f32 %v3191_v13, %v3247_v49  ;;  %v551_v41 = vsel %vm543_vm1, %v549_v38, %v550_v39 }
  0x3a   : > { %v2029_v25 = vadd.f32 %v1943_v9, %v1785_v6  ;;  %v2313_v28 = vsel %vm543_vm1, %v2310_v3, %v2312_v10  ;;  %v658_v30 = vadd.f32 %v551_v41, %v381_v16  ;;  %v697_v34 = vmul.f32 %v3193_v14, %v3247_v49 }
  0x3b   : > { %v2030_v23 = vadd.f32 %v1945_v18, %v1786_v26  ;;  %3051 = vmatmul.mubr.msk.f32.vlgmr.msra.gmra.mrb[0].mxu0 %vm2397_vm4, %v2313_v28  ;;  %v552_v35 = vrot.slane %v452_v27, 1  ;;  %v794_v36 = vrot.slane %v3239_v42, 2  ;;  %v795_v37 = vrot.slane %v3243_v43, 2  ;;  %v3440_v26 = vld [vmem:[%s3187_s10 + $0x48] sm:$0xff]  ;;  %v3443_v18 = vld [vmem:[%s3187_s10 + $0x50] sm:$0xff] }
  0x3c   : > { %v2068_v40 = vadd.f32 %v3314_v2, %v2029_v25  ;;  %v797_v31 = vrot.slane %v697_v34, 2  ;;  %v939_v38 = vmul.f32 %v3195_v15, %v3264_v62  ;;  %v940_v3 = vmul.f32 %v3195_v15, %v3273_v7 }
  0x3d   : > { %v2069_v45 = vadd.f32 %v3314_v2, %v2030_v23  ;;  %v553_v49 = vsel %vm543_vm1, %v550_v39, %v552_v35  ;;  %v796_v46 = vsel %vm788_vm2, %v794_v36, %v795_v37  ;;  %v1008_v42 = vmul.f32 %v3200_v19, %v3264_v62 }
  0x3e   : > { %v2141_v43 = vrot.slane %v2068_v40, 7  ;;  %v659_v47 = vadd.f32 %v553_v49, %v3220_v29  ;;  %v798_v48 = vsel %vm788_vm2, %v795_v37, %v797_v31  ;;  %v903_v50 = vadd.f32 %v796_v46, %v658_v30  ;;  %v3452_v37 = vld [vmem:[%s3187_s10 + $0x58] sm:$0x3] }
  0x3f   : > { %v2142_v51 = vrot.slane %v2069_v45, 7  ;;  %v1009_v52 = vmul.f32 %v3200_v19, %v3273_v7  ;;  %v1010_v32 = vmul.f32 %v3200_v19, %v3283_v17  ;;  %v1106_v53 = vrot.slane %v1008_v42, 1 }
  0x40   : > { %v2237_v39 = vadd.f32 %v2141_v43, %v3320_v11  ;;  %v904_v54 = vadd.f32 %v798_v48, %v659_v47  ;;  %v971_v56 = vadd.f32 %v939_v38, %v903_v50  ;;  %v1252_v29 = vmul.f32 %v3202_v20, %v3264_v62 }
  0x41   : > { %v2143_v57 = vsel %vm2116_vm3, %v2141_v43, %v2142_v51  ;;  %v2239_v58 = vadd.f32 %v2142_v51, %v3345_v55  ;;  %v1107_v59 = vrot.slane %v1009_v52, 1  ;;  %v1109_v60 = vrot.slane %v1010_v32, 1 }
  0x42   : > { %v2238_v61 = vadd.f32 %v2143_v57, %v3334_v44  ;;  %v2349_v63 = vrot.slane %v2237_v39, 1  ;;  %v972_v0 = vadd.f32 %v940_v3, %v904_v54  ;;  %v1253_v1 = vmul.f32 %v3202_v20, %v3273_v7 }
  0x43   : > { %v2352_v24 = vrot.slane %v2239_v58, 1  ;;  %v1108_v6 = vsel %vm543_vm1, %v1106_v53, %v1107_v59  ;;  %v1110_v9 = vsel %vm543_vm1, %v1107_v59, %v1109_v60  ;;  %v1254_v10 = vmul.f32 %v3202_v20, %v3283_v17 }
  0x44   : > { %v2350_v16 = vrot.slane %v2238_v61, 1  ;;  %v1215_v27 = vadd.f32 %v1108_v6, %v971_v56  ;;  %v1216_v41 = vadd.f32 %v1110_v9, %v972_v0  ;;  %v1350_v25 = vrot.slane %v1252_v29, 2 }
  0x45   : > { %v1351_v28 = vrot.slane %v1253_v1, 2  ;;  %v1353_v30 = vrot.slane %v1254_v10, 2  ;;  %v1495_v34 = vmul.f32 %v3204_v21, %v3440_v26  ;;  %v1496_v23 = vmul.f32 %v3204_v21, %v3443_v18 }
  0x46   : > { %v2351_v35 = vsel %vm543_vm1, %v2349_v63, %v2350_v16  ;;  %v2353_v36 = vsel %vm543_vm1, %v2350_v16, %v2352_v24  ;;  %v1564_v40 = vmul.f32 %v3206_v22, %v3440_v26  ;;  %v1565_v31 = vmul.f32 %v3206_v22, %v3443_v18 }
  0x47   : > { %3074 = vmatprep.mubr.msk.f32.mxu1 %vm2397_vm4, %v2351_v35  ;;  %v1352_v38 = vsel %vm788_vm2, %v1350_v25, %v1351_v28  ;;  %v1354_v3 = vsel %vm788_vm2, %v1351_v28, %v1353_v30  ;;  %v1566_v45 = vmul.f32 %v3206_v22, %v3452_v37  ;;  %v1808_v49 = vmul.f32 %v3278_v8, %v3440_v26 }
  0x48   : > { %3075 = vmatmul.mubr.msk.f32.vlgmr.msra.gmra.mrb[0].mxu1 %vm2397_vm4, %v2353_v36  ;;  %v1459_v46 = vadd.f32 %v1352_v38, %v1215_v27  ;;  %v1460_v42 = vadd.f32 %v1354_v3, %v1216_v41  ;;  %v1662_v43 = vrot.slane %v1564_v40, 1  ;;  %v1663_v47 = vrot.slane %v1565_v31, 1 }
  0x49   : > { %v1665_v48 = vrot.slane %v1566_v45, 1  ;;  %v1809_v50 = vmul.f32 %v3278_v8, %v3443_v18  ;;  %v1810_v51 = vmul.f32 %v3278_v8, %v3452_v37  ;;  %v1906_v52 = vrot.slane %v1808_v49, 2 }
  0x4a   : > { %v1527_v32 = vadd.f32 %v1495_v34, %v1459_v46  ;;  %v1528_v53 = vadd.f32 %v1496_v23, %v1460_v42  ;;  %v1664_v39 = vsel %vm543_vm1, %v1662_v43, %v1663_v47  ;;  %v397_v54 = vmul.f32 %v3189_v12, %v3320_v11 }
  0x4b   : > { %v1666_v56 = vsel %vm543_vm1, %v1663_v47, %v1665_v48  ;;  %v1907_v29 = vrot.slane %v1809_v50, 2  ;;  %v1909_v57 = vrot.slane %v1810_v51, 2  ;;  %v398_v58 = vmul.f32 %v3189_v12, %v3334_v44 }
  0x4c   : > { %v1771_v59 = vadd.f32 %v1664_v39, %v1527_v32  ;;  %v1772_v60 = vadd.f32 %v1666_v56, %v1528_v53  ;;  %v474_v61 = vmul.f32 %v3191_v13, %v3320_v11  ;;  %v475_v63 = vmul.f32 %v3191_v13, %v3334_v44 }
  0x4d   : > { %v1908_v0 = vsel %vm788_vm2, %v1906_v52, %v1907_v29  ;;  %v1910_v1 = vsel %vm788_vm2, %v1907_v29, %v1909_v57  ;;  %v476_v24 = vmul.f32 %v3191_v13, %v3345_v55  ;;  %v719_v6 = vmul.f32 %v3193_v14, %v3320_v11 }
  0x4e   : > { %v2015_v9 = vadd.f32 %v1908_v0, %v1771_v59  ;;  %v2016_v10 = vadd.f32 %v1910_v1, %v1772_v60  ;;  %v589_v16 = vrot.slane %v474_v61, 1  ;;  %v590_v27 = vrot.slane %v475_v63, 1  ;;  %v3515_v59 = vld [vmem:[%s3187_s10 + $0x108] sm:$0xff]  ;;  %v3521_v0 = vld [vmem:[%s3187_s10 + $0x110] sm:$0xff] }
  0x4f   : > { %v592_v41 = vrot.slane %v476_v24, 1  ;;  %v720_v25 = vmul.f32 %v3193_v14, %v3334_v44  ;;  %v721_v28 = vmul.f32 %v3193_v14, %v3345_v55  ;;  %v834_v30 = vrot.slane %v719_v6, 2 }
  0x50   : > { %v2054_v34 = vadd.f32 %v3314_v2, %v2015_v9  ;;  %v3492_v23 = vadd.f32 %v3314_v2, %v2016_v10  ;;  %v591_v35 = vsel %vm543_vm1, %v589_v16, %v590_v27  ;;  %v955_v11 = vmul.f32 %v3195_v15, %v3355_v4 }
  0x51   : > { %v593_v36 = vsel %vm543_vm1, %v590_v27, %v592_v41  ;;  %v674_v40 = vadd.f32 %v591_v35, %v397_v54  ;;  %v835_v31 = vrot.slane %v720_v25, 2  ;;  %v837_v38 = vrot.slane %v721_v28, 2  ;;  %v3533_v25 = vld [vmem:[%s3187_s10 + $0x118] sm:$0x3] }
  0x52   : > { %v2120_v44 = vrot.slane %v2054_v34, 7  ;;  %v2121_v3 = vrot.slane %v3492_v23, 7  ;;  %v675_v55 = vadd.f32 %v593_v36, %v398_v58  ;;  %v956_v45 = vmul.f32 %v3195_v15, %v3358_v5 }
  0x53   : > { %v836_v49 = vsel %vm788_vm2, %v834_v30, %v835_v31  ;;  %v838_v46 = vsel %vm788_vm2, %v835_v31, %v837_v38  ;;  %v1032_v42 = vmul.f32 %v3200_v19, %v3355_v4  ;;  %v1033_v43 = vmul.f32 %v3200_v19, %v3358_v5 }
  0x54   : > { %v2122_v47 = vsel %vm2116_vm3, %v2120_v44, %v2121_v3  ;;  %v2216_v48 = vadd.f32 %v2120_v44, %v3264_v62  ;;  %v919_v50 = vadd.f32 %v836_v49, %v674_v40  ;;  %v920_v51 = vadd.f32 %v838_v46, %v675_v55 }
  0x55   : > { %v2217_v52 = vadd.f32 %v2122_v47, %v3273_v7  ;;  %v1034_v32 = vmul.f32 %v3200_v19, %v3373_v33  ;;  %v1146_v53 = vrot.slane %v1032_v42, 1  ;;  %v1147_v39 = vrot.slane %v1033_v43, 1 }
  0x56   : > { %v2314_v54 = vrot.slane %v2216_v48, 1  ;;  %v987_v56 = vadd.f32 %v955_v11, %v919_v50  ;;  %v988_v29 = vadd.f32 %v956_v45, %v920_v51  ;;  %v1276_v57 = vmul.f32 %v3202_v20, %v3355_v4 }
  0x57   : > { %v2315_v58 = vrot.slane %v2217_v52, 1  ;;  %v1148_v60 = vsel %vm543_vm1, %v1146_v53, %v1147_v39  ;;  %v1149_v61 = vrot.slane %v1034_v32, 1  ;;  %v1277_v63 = vmul.f32 %v3202_v20, %v3358_v5 }
  0x58   : > { %v1231_v1 = vadd.f32 %v1148_v60, %v987_v56  ;;  %v1278_v24 = vmul.f32 %v3202_v20, %v3373_v33  ;;  %v1390_v6 = vrot.slane %v1276_v57, 2  ;;  %v1511_v9 = vmul.f32 %v3204_v21, %v3515_v59 }
  0x59   : > { %v2316_v10 = vsel %vm543_vm1, %v2314_v54, %v2315_v58  ;;  %v1150_v16 = vsel %vm543_vm1, %v1147_v39, %v1149_v61  ;;  %v1391_v27 = vrot.slane %v1277_v63, 2  ;;  %v1512_v41 = vmul.f32 %v3204_v21, %v3521_v0 }
  0x5a   : > { %3053 = vmatprep.mubr.msk.f32.mxu0 %vm2397_vm4, %v2316_v10  ;;  %v1232_v28 = vadd.f32 %v1150_v16, %v988_v29  ;;  %v1393_v30 = vrot.slane %v1278_v24, 2  ;;  %v1588_v34 = vmul.f32 %v3206_v22, %v3515_v59  ;;  %v1589_v23 = vmul.f32 %v3206_v22, %v3521_v0 }
  0x5b   : > { %v1392_v35 = vsel %vm788_vm2, %v1390_v6, %v1391_v27  ;;  %v1590_v11 = vmul.f32 %v3206_v22, %v3533_v25  ;;  %v1832_v36 = vmul.f32 %v3278_v8, %v3515_v59  ;;  %v1833_v40 = vmul.f32 %v3278_v8, %v3521_v0 }
  0x5c   : > { %v1394_v31 = vsel %vm788_vm2, %v1391_v27, %v1393_v30  ;;  %v1475_v38 = vadd.f32 %v1392_v35, %v1231_v1  ;;  %v1702_v44 = vrot.slane %v1588_v34, 1  ;;  %v1703_v55 = vrot.slane %v1589_v23, 1 }
  0x5d   : > { %v1476_v45 = vadd.f32 %v1394_v31, %v1232_v28  ;;  %v1705_v49 = vrot.slane %v1590_v11, 1  ;;  %v1834_v46 = vmul.f32 %v3278_v8, %v3533_v25  ;;  %v1946_v42 = vrot.slane %v1832_v36, 2 }
  0x5e   : > { %v1543_v43 = vadd.f32 %v1511_v9, %v1475_v38  ;;  %v1704_v47 = vsel %vm543_vm1, %v1702_v44, %v1703_v55  ;;  %v1947_v48 = vrot.slane %v1833_v40, 2  ;;  %v2218_v50 = vadd.f32 %v2121_v3, %v3283_v17 }
  0x5f   : > { %v1544_v51 = vadd.f32 %v1512_v41, %v1476_v45  ;;  %v1706_v52 = vsel %vm543_vm1, %v1703_v55, %v1705_v49  ;;  %v1949_v32 = vrot.slane %v1834_v46, 2  ;;  %v383_v53 = vmul.f32 %v3189_v12, %v3264_v62 }
  0x60   : > { %v1787_v39 = vadd.f32 %v1704_v47, %v1543_v43  ;;  %v1948_v54 = vsel %vm788_vm2, %v1946_v42, %v1947_v48  ;;  %v2317_v56 = vrot.slane %v2218_v50, 1  ;;  %v384_v29 = vmul.f32 %v3189_v12, %v3273_v7 }
  0x61   : > { %v1788_v57 = vadd.f32 %v1706_v52, %v1544_v51  ;;  %v1950_v60 = vsel %vm788_vm2, %v1947_v48, %v1949_v32  ;;  %v453_v3 = vmul.f32 %v3191_v13, %v3264_v62  ;;  %v454_v61 = vmul.f32 %v3191_v13, %v3273_v7 }
  0x62   : > { %v2031_v63 = vadd.f32 %v1948_v54, %v1787_v39  ;;  %v2318_v1 = vsel %vm543_vm1, %v2315_v58, %v2317_v56  ;;  %v455_v24 = vmul.f32 %v3191_v13, %v3283_v17  ;;  %v698_v6 = vmul.f32 %v3193_v14, %v3264_v62 }
  0x63   : > { %v2032_v9 = vadd.f32 %v1950_v60, %v1788_v57  ;;  %3054 = vmatmul.mubr.msk.f32.gmra.mrb[2].mxu0 %vm2397_vm4, %v2318_v1  ;;  %v554_v10 = vrot.slane %v453_v3, 1  ;;  %v555_v16 = vrot.slane %v454_v61, 1  ;;  %v699_v27 = vmul.f32 %v3193_v14, %v3273_v7  ;;  %v3593_v57 = vld [vmem:[%s3187_s10 + $0x60] sm:$0xff]  ;;  %v3596_v60 = vld [vmem:[%s3187_s10 + $0x68] sm:$0xff] }
  0x64   : > { %v2070_v41 = vadd.f32 %v3314_v2, %v2031_v63  ;;  %v557_v28 = vrot.slane %v455_v24, 1  ;;  %v700_v58 = vmul.f32 %v3193_v14, %v3283_v17  ;;  %v799_v30 = vrot.slane %v698_v6, 2 }
  0x65   : > { %v2071_v34 = vadd.f32 %v3314_v2, %v2032_v9  ;;  %v556_v23 = vsel %vm543_vm1, %v554_v10, %v555_v16  ;;  %v800_v62 = vrot.slane %v699_v27, 2  ;;  %v941_v35 = vmul.f32 %v3195_v15, %v3440_v26 }
  0x66   : > { %v2144_v11 = vrot.slane %v2070_v41, 7  ;;  %v558_v36 = vsel %vm543_vm1, %v555_v16, %v557_v28  ;;  %v660_v40 = vadd.f32 %v556_v23, %v383_v53  ;;  %v802_v7 = vrot.slane %v700_v58, 2  ;;  %v3614_v28 = vld [vmem:[%s3187_s10 + $0x70] sm:$0x3] }
  0x67   : > { %v2145_v31 = vrot.slane %v2071_v34, 7  ;;  %v661_v38 = vadd.f32 %v558_v36, %v384_v29  ;;  %v801_v44 = vsel %vm788_vm2, %v799_v30, %v800_v62  ;;  %v942_v17 = vmul.f32 %v3195_v15, %v3443_v18 }
  0x68   : > { %v2240_v55 = vadd.f32 %v2144_v11, %v3355_v4  ;;  %v803_v45 = vsel %vm788_vm2, %v800_v62, %v802_v7  ;;  %v905_v49 = vadd.f32 %v801_v44, %v660_v40  ;;  %v1011_v46 = vmul.f32 %v3200_v19, %v3440_v26 }
  0x69   : > { %v2146_v42 = vsel %vm2116_vm3, %v2144_v11, %v2145_v31  ;;  %v2242_v43 = vadd.f32 %v2145_v31, %v3373_v33  ;;  %v906_v47 = vadd.f32 %v803_v45, %v661_v38  ;;  %v1012_v48 = vmul.f32 %v3200_v19, %v3443_v18 }
  0x6a   : > { %v2241_v50 = vadd.f32 %v2146_v42, %v3358_v5  ;;  %v2354_v51 = vrot.slane %v2240_v55, 1  ;;  %v973_v52 = vadd.f32 %v941_v35, %v905_v49  ;;  %v1013_v32 = vmul.f32 %v3200_v19, %v3452_v37 }
  0x6b   : > { %v2357_v53 = vrot.slane %v2242_v43, 1  ;;  %v974_v39 = vadd.f32 %v942_v17, %v906_v47  ;;  %v1111_v54 = vrot.slane %v1011_v46, 1  ;;  %v1112_v56 = vrot.slane %v1012_v48, 1 }
  0x6c   : > { %v2355_v29 = vrot.slane %v2241_v50, 1  ;;  %v1114_v3 = vrot.slane %v1013_v32, 1  ;;  %v1255_v61 = vmul.f32 %v3202_v20, %v3440_v26  ;;  %v1256_v63 = vmul.f32 %v3202_v20, %v3443_v18 }
  0x6d   : > { %v1113_v1 = vsel %vm543_vm1, %v1111_v54, %v1112_v56  ;;  %v1257_v24 = vmul.f32 %v3202_v20, %v3452_v37  ;;  %v1497_v6 = vmul.f32 %v3204_v21, %v3593_v57  ;;  %v1498_v9 = vmul.f32 %v3204_v21, %v3596_v60 }
  0x6e   : > { %v2356_v10 = vsel %vm543_vm1, %v2354_v51, %v2355_v29  ;;  %v2358_v16 = vsel %vm543_vm1, %v2355_v29, %v2357_v53  ;;  %v1115_v27 = vsel %vm543_vm1, %v1112_v56, %v1114_v3  ;;  %v1217_v41 = vadd.f32 %v1113_v1, %v973_v52 }
  0x6f   : > { %3077 = vmatprep.mubr.msk.f32.mxu1 %vm2397_vm4, %v2356_v10  ;;  %v1218_v58 = vadd.f32 %v1115_v27, %v974_v39  ;;  %v1355_v30 = vrot.slane %v1255_v61, 2  ;;  %v1356_v34 = vrot.slane %v1256_v63, 2  ;;  %v1358_v23 = vrot.slane %v1257_v24, 2 }
  0x70   : > { %3078 = vmatmul.mubr.msk.f32.gmra.mrb[2].mxu1 %vm2397_vm4, %v2358_v16  ;;  %v1567_v62 = vmul.f32 %v3206_v22, %v3593_v57  ;;  %v1568_v35 = vmul.f32 %v3206_v22, %v3596_v60  ;;  %v1569_v11 = vmul.f32 %v3206_v22, %v3614_v28  ;;  %v1811_v36 = vmul.f32 %v3278_v8, %v3593_v57 }
  0x71   : > { %v1357_v40 = vsel %vm788_vm2, %v1355_v30, %v1356_v34  ;;  %v1359_v7 = vsel %vm788_vm2, %v1356_v34, %v1358_v23  ;;  %v1812_v31 = vmul.f32 %v3278_v8, %v3596_v60  ;;  %v1813_v38 = vmul.f32 %v3278_v8, %v3614_v28 }
  0x72   : > { %v1461_v44 = vadd.f32 %v1357_v40, %v1217_v41  ;;  %v1462_v17 = vadd.f32 %v1359_v7, %v1218_v58  ;;  %v1667_v55 = vrot.slane %v1567_v62, 1  ;;  %v1668_v45 = vrot.slane %v1568_v35, 1 }
  0x73   : > { %v1670_v49 = vrot.slane %v1569_v11, 1  ;;  %v1911_v46 = vrot.slane %v1811_v36, 2  ;;  %v1912_v42 = vrot.slane %v1812_v31, 2  ;;  %v1914_v43 = vrot.slane %v1813_v38, 2 }
  0x74   : > { %v1529_v47 = vadd.f32 %v1497_v6, %v1461_v44  ;;  %v1530_v48 = vadd.f32 %v1498_v9, %v1462_v17  ;;  %v1669_v50 = vsel %vm543_vm1, %v1667_v55, %v1668_v45  ;;  %v399_v51 = vmul.f32 %v3189_v12, %v3355_v4 }
  0x75   : > { %v1671_v52 = vsel %vm543_vm1, %v1668_v45, %v1670_v49  ;;  %v1913_v32 = vsel %vm788_vm2, %v1911_v46, %v1912_v42  ;;  %v1915_v53 = vsel %vm788_vm2, %v1912_v42, %v1914_v43  ;;  %v400_v39 = vmul.f32 %v3189_v12, %v3358_v5 }
  0x76   : > { %v1773_v54 = vadd.f32 %v1669_v50, %v1529_v47  ;;  %v1774_v56 = vadd.f32 %v1671_v52, %v1530_v48  ;;  %v477_v29 = vmul.f32 %v3191_v13, %v3355_v4  ;;  %v478_v3 = vmul.f32 %v3191_v13, %v3358_v5 }
  0x77   : > { %v479_v61 = vmul.f32 %v3191_v13, %v3373_v33  ;;  %v722_v63 = vmul.f32 %v3193_v14, %v3355_v4  ;;  %v723_v1 = vmul.f32 %v3193_v14, %v3358_v5  ;;  %v724_v24 = vmul.f32 %v3193_v14, %v3373_v33 }
  0x78   : > { %v2017_v6 = vadd.f32 %v1913_v32, %v1773_v54  ;;  %v2018_v9 = vadd.f32 %v1915_v53, %v1774_v56  ;;  %v594_v10 = vrot.slane %v477_v29, 1  ;;  %v595_v16 = vrot.slane %v478_v3, 1  ;;  %v3678_v54 = vld [vmem:[%s3187_s10 + $0x120] sm:$0xff] }
  0x79   : > { %v597_v27 = vrot.slane %v479_v61, 1  ;;  %v839_v41 = vrot.slane %v722_v63, 2  ;;  %v840_v58 = vrot.slane %v723_v1, 2  ;;  %v842_v30 = vrot.slane %v724_v24, 2  ;;  %v3684_v61 = vld [vmem:[%s3187_s10 + $0x128] sm:$0xff] }
  0x7a   : > { %v2056_v34 = vadd.f32 %v3314_v2, %v2017_v6  ;;  %v3653_v23 = vadd.f32 %v3314_v2, %v2018_v9  ;;  %v596_v4 = vsel %vm543_vm1, %v594_v10, %v595_v16  ;;  %v957_v5 = vmul.f32 %v3195_v15, %v3515_v59  ;;  %v3691_v10 = vld [vmem:[%s3187_s10 + $0x130] sm:$0x3] }
  0x7b   : > { %v598_v33 = vsel %vm543_vm1, %v595_v16, %v597_v27  ;;  %v676_v62 = vadd.f32 %v596_v4, %v399_v51  ;;  %v841_v35 = vsel %vm788_vm2, %v839_v41, %v840_v58  ;;  %v843_v11 = vsel %vm788_vm2, %v840_v58, %v842_v30 }
  0x7c   : > { %v2123_v36 = vrot.slane %v2056_v34, 7  ;;  %v2124_v40 = vrot.slane %v3653_v23, 7  ;;  %v677_v7 = vadd.f32 %v598_v33, %v400_v39  ;;  %v958_v31 = vmul.f32 %v3195_v15, %v3521_v0 }
  0x7d   : > { %v921_v38 = vadd.f32 %v841_v35, %v676_v62  ;;  %v1035_v44 = vmul.f32 %v3200_v19, %v3515_v59  ;;  %v1036_v17 = vmul.f32 %v3200_v19, %v3521_v0  ;;  %v1037_v55 = vmul.f32 %v3200_v19, %v3533_v25 }
  0x7e   : > { %v2125_v45 = vsel %vm2116_vm3, %v2123_v36, %v2124_v40  ;;  %v2219_v49 = vadd.f32 %v2123_v36, %v3440_v26  ;;  %v922_v46 = vadd.f32 %v843_v11, %v677_v7  ;;  %v1279_v42 = vmul.f32 %v3202_v20, %v3515_v59 }
  0x7f   : > { %v2220_v43 = vadd.f32 %v2125_v45, %v3443_v18  ;;  %v989_v47 = vadd.f32 %v957_v5, %v921_v38  ;;  %v1151_v48 = vrot.slane %v1035_v44, 1  ;;  %v1152_v50 = vrot.slane %v1036_v17, 1 }
  0x80   : > { %v2319_v51 = vrot.slane %v2219_v49, 1  ;;  %v990_v52 = vadd.f32 %v958_v31, %v922_v46  ;;  %v1154_v32 = vrot.slane %v1037_v55, 1  ;;  %v1280_v53 = vmul.f32 %v3202_v20, %v3521_v0 }
  0x81   : > { %v2320_v39 = vrot.slane %v2220_v43, 1  ;;  %v1153_v56 = vsel %vm543_vm1, %v1151_v48, %v1152_v50  ;;  %v1281_v29 = vmul.f32 %v3202_v20, %v3533_v25  ;;  %v1395_v3 = vrot.slane %v1279_v42, 2 }
  0x82   : > { %v1155_v63 = vsel %vm543_vm1, %v1152_v50, %v1154_v32  ;;  %v1233_v1 = vadd.f32 %v1153_v56, %v989_v47  ;;  %v1396_v24 = vrot.slane %v1280_v53, 2  ;;  %v1513_v6 = vmul.f32 %v3204_v21, %v3678_v54 }
  0x83   : > { %v2321_v9 = vsel %vm543_vm1, %v2319_v51, %v2320_v39  ;;  %v1234_v16 = vadd.f32 %v1155_v63, %v990_v52  ;;  %v1398_v27 = vrot.slane %v1281_v29, 2  ;;  %v1514_v41 = vmul.f32 %v3204_v21, %v3684_v61 }
  0x84   : > { %3056 = vmatprep.mubr.msk.f32.mxu0 %vm2397_vm4, %v2321_v9  ;;  %v1397_v58 = vsel %vm788_vm2, %v1395_v3, %v1396_v24  ;;  %v1591_v30 = vmul.f32 %v3206_v22, %v3678_v54  ;;  %v1592_v34 = vmul.f32 %v3206_v22, %v3684_v61  ;;  %v1593_v23 = vmul.f32 %v3206_v22, %v3691_v10 }
  0x85   : > { %v1399_v4 = vsel %vm788_vm2, %v1396_v24, %v1398_v27  ;;  %v1477_v5 = vadd.f32 %v1397_v58, %v1233_v1  ;;  %v1835_v33 = vmul.f32 %v3278_v8, %v3678_v54  ;;  %v1836_v62 = vmul.f32 %v3278_v8, %v3684_v61 }
  0x86   : > { %v1478_v35 = vadd.f32 %v1399_v4, %v1234_v16  ;;  %v1707_v11 = vrot.slane %v1591_v30, 1  ;;  %v1708_v36 = vrot.slane %v1592_v34, 1  ;;  %v1710_v7 = vrot.slane %v1593_v23, 1 }
  0x87   : > { %v1545_v31 = vadd.f32 %v1513_v6, %v1477_v5  ;;  %v1837_v38 = vmul.f32 %v3278_v8, %v3691_v10  ;;  %v1951_v44 = vrot.slane %v1835_v33, 2  ;;  %v1952_v17 = vrot.slane %v1836_v62, 2 }
  0x88   : > { %v1546_v55 = vadd.f32 %v1514_v41, %v1478_v35  ;;  %v1709_v45 = vsel %vm543_vm1, %v1707_v11, %v1708_v36  ;;  %v1711_v49 = vsel %vm543_vm1, %v1708_v36, %v1710_v7  ;;  %v2221_v46 = vadd.f32 %v2124_v40, %v3452_v37 }
  0x89   : > { %v1789_v42 = vadd.f32 %v1709_v45, %v1545_v31  ;;  %v1953_v43 = vsel %vm788_vm2, %v1951_v44, %v1952_v17  ;;  %v1954_v47 = vrot.slane %v1837_v38, 2  ;;  %v385_v48 = vmul.f32 %v3189_v12, %v3440_v26 }
  0x8a   : > { %v1790_v50 = vadd.f32 %v1711_v49, %v1546_v55  ;;  %v2322_v51 = vrot.slane %v2221_v46, 1  ;;  %v386_v8 = vmul.f32 %v3189_v12, %v3443_v18  ;;  %v456_v52 = vmul.f32 %v3191_v13, %v3440_v26 }
  0x8b   : > { %v1955_v32 = vsel %vm788_vm2, %v1952_v17, %v1954_v47  ;;  %v2033_v53 = vadd.f32 %v1953_v43, %v1789_v42  ;;  %v457_v40 = vmul.f32 %v3191_v13, %v3443_v18  ;;  %v458_v56 = vmul.f32 %v3191_v13, %v3452_v37  ;;  %v3754_v47 = vld [vmem:[%s3187_s10 + $0x78] sm:$0xff] }
  0x8c   : > { %v2034_v29 = vadd.f32 %v1955_v32, %v1790_v50  ;;  %v2323_v3 = vsel %vm543_vm1, %v2320_v39, %v2322_v51  ;;  %v559_v63 = vrot.slane %v456_v52, 1  ;;  %v701_v1 = vmul.f32 %v3193_v14, %v3440_v26 }
  0x8d   : > { %v2072_v24 = vadd.f32 %v3314_v2, %v2033_v53  ;;  %3057 = vmatmul.mubr.msk.f32.gmra.mrb[4].mxu0 %vm2397_vm4, %v2323_v3  ;;  %v560_v6 = vrot.slane %v457_v40, 1  ;;  %v562_v9 = vrot.slane %v458_v56, 1  ;;  %v702_v16 = vmul.f32 %v3193_v14, %v3443_v18 }
  0x8e   : > { %v2073_v27 = vadd.f32 %v3314_v2, %v2034_v29  ;;  %v703_v41 = vmul.f32 %v3193_v14, %v3452_v37  ;;  %v804_v58 = vrot.slane %v701_v1, 2  ;;  %v943_v39 = vmul.f32 %v3195_v15, %v3593_v57 }
  0x8f   : > { %v2147_v30 = vrot.slane %v2072_v24, 7  ;;  %v561_v26 = vsel %vm543_vm1, %v559_v63, %v560_v6  ;;  %v563_v34 = vsel %vm543_vm1, %v560_v6, %v562_v9  ;;  %v805_v23 = vrot.slane %v702_v16, 2  ;;  %v3769_v63 = vld [vmem:[%s3187_s10 + $0x80] sm:$0xff]  ;;  %v3774_v16 = vld [vmem:[%s3187_s10 + $0x88] sm:$0x3] }
  0x90   : > { %v2148_v4 = vrot.slane %v2073_v27, 7  ;;  %v662_v5 = vadd.f32 %v561_v26, %v385_v48  ;;  %v663_v33 = vadd.f32 %v563_v34, %v386_v8  ;;  %v807_v62 = vrot.slane %v703_v41, 2 }
  0x91   : > { %v2243_v18 = vadd.f32 %v2147_v30, %v3515_v59  ;;  %v806_v2 = vsel %vm788_vm2, %v804_v58, %v805_v23  ;;  %v944_v37 = vmul.f32 %v3195_v15, %v3596_v60  ;;  %v1014_v35 = vmul.f32 %v3200_v19, %v3593_v57 }
  0x92   : > { %v2149_v11 = vsel %vm2116_vm3, %v2147_v30, %v2148_v4  ;;  %v2245_v36 = vadd.f32 %v2148_v4, %v3533_v25  ;;  %v808_v7 = vsel %vm788_vm2, %v805_v23, %v807_v62  ;;  %v907_v31 = vadd.f32 %v806_v2, %v662_v5  ;;  %v3789_v23 = vld [vmem:[%s4741_s1 + $0x8] ss:$0 sm:$0xff] }
  0x93   : > { %v2244_v38 = vadd.f32 %v2149_v11, %v3521_v0  ;;  %v2359_v44 = vrot.slane %v2243_v18, 1  ;;  %v908_v17 = vadd.f32 %v808_v7, %v663_v33  ;;  %v1015_v55 = vmul.f32 %v3200_v19, %v3596_v60 }
  0x94   : > { %v2362_v45 = vrot.slane %v2245_v36, 1  ;;  %v975_v49 = vadd.f32 %v943_v39, %v907_v31  ;;  %v1016_v46 = vmul.f32 %v3200_v19, %v3614_v28  ;;  %v1116_v42 = vrot.slane %v1014_v35, 1 }
  0x95   : > { %v2360_v43 = vrot.slane %v2244_v38, 1  ;;  %v976_v48 = vadd.f32 %v944_v37, %v908_v17  ;;  %v1117_v50 = vrot.slane %v1015_v55, 1  ;;  %v1258_v51 = vmul.f32 %v3202_v20, %v3593_v57 }
  0x96   : > { %v1119_v8 = vrot.slane %v1016_v46, 1  ;;  %v1259_v52 = vmul.f32 %v3202_v20, %v3596_v60  ;;  %v1260_v32 = vmul.f32 %v3202_v20, %v3614_v28  ;;  %v1499_v53 = vmul.f32 %v3204_v21, %v3754_v47 }
  0x97   : > { %v2361_v40 = vsel %vm543_vm1, %v2359_v44, %v2360_v43  ;;  %v2363_v56 = vsel %vm543_vm1, %v2360_v43, %v2362_v45  ;;  %v1118_v29 = vsel %vm543_vm1, %v1116_v42, %v1117_v50  ;;  %v1360_v3 = vrot.slane %v1258_v51, 2 }
  0x98   : > { %3080 = vmatprep.mubr.msk.f32.mxu1 %vm2397_vm4, %v2361_v40  ;;  %v1120_v1 = vsel %vm543_vm1, %v1117_v50, %v1119_v8  ;;  %v1219_v24 = vadd.f32 %v1118_v29, %v975_v49  ;;  %v1361_v6 = vrot.slane %v1259_v52, 2  ;;  %v1363_v9 = vrot.slane %v1260_v32, 2 }
  0x99   : > { %3081 = vmatmul.mubr.msk.f32.gmra.mrb[4].mxu1 %vm2397_vm4, %v2363_v56  ;;  %v1220_v27 = vadd.f32 %v1120_v1, %v976_v48  ;;  %v1500_v41 = vmul.f32 %v3204_v21, %v3769_v63  ;;  %v1570_v58 = vmul.f32 %v3206_v22, %v3754_v47  ;;  %v1571_v39 = vmul.f32 %v3206_v22, %v3769_v63 }
  0x9a   : > { %v1362_v30 = vsel %vm788_vm2, %v1360_v3, %v1361_v6  ;;  %v1364_v26 = vsel %vm788_vm2, %v1361_v6, %v1363_v9  ;;  %v1572_v34 = vmul.f32 %v3206_v22, %v3774_v16  ;;  %v1814_v4 = vmul.f32 %v3789_v23, %v3754_v47 }
  0x9b   : > { %v1463_v5 = vadd.f32 %v1362_v30, %v1219_v24  ;;  %v1464_v33 = vadd.f32 %v1364_v26, %v1220_v27  ;;  %v1672_v62 = vrot.slane %v1570_v58, 1  ;;  %v1673_v18 = vrot.slane %v1571_v39, 1  ;;  %v3820_v24 = vld [vmem:[%s4742_s2] ss:$0 sm:$0xff] }
  0x9c   : > { %v1675_v2 = vrot.slane %v1572_v34, 1  ;;  %v1815_v37 = vmul.f32 %v3789_v23, %v3769_v63  ;;  %v1816_v35 = vmul.f32 %v3789_v23, %v3774_v16  ;;  %v1916_v11 = vrot.slane %v1814_v4, 2 }
  0x9d   : > { %v1531_v36 = vadd.f32 %v1499_v53, %v1463_v5  ;;  %v1532_v7 = vadd.f32 %v1500_v41, %v1464_v33  ;;  %v1674_v31 = vsel %vm543_vm1, %v1672_v62, %v1673_v18  ;;  %v401_v38 = vmul.f32 %v3189_v12, %v3515_v59 }
  0x9e   : > { %v1676_v44 = vsel %vm543_vm1, %v1673_v18, %v1675_v2  ;;  %v1917_v17 = vrot.slane %v1815_v37, 2  ;;  %v1919_v55 = vrot.slane %v1816_v35, 2  ;;  %v402_v45 = vmul.f32 %v3189_v12, %v3521_v0 }
  0x9f   : > { %v1775_v49 = vadd.f32 %v1674_v31, %v1531_v36  ;;  %v1776_v46 = vadd.f32 %v1676_v44, %v1532_v7  ;;  %v480_v42 = vmul.f32 %v3191_v13, %v3515_v59  ;;  %v481_v43 = vmul.f32 %v3191_v13, %v3521_v0 }
  0xa0   : > { %v1918_v48 = vsel %vm788_vm2, %v1916_v11, %v1917_v17  ;;  %v1920_v50 = vsel %vm788_vm2, %v1917_v17, %v1919_v55  ;;  %v482_v51 = vmul.f32 %v3191_v13, %v3533_v25  ;;  %v725_v8 = vmul.f32 %v3193_v14, %v3515_v59 }
  0xa1   : > { %v2019_v52 = vadd.f32 %v1918_v48, %v1775_v49  ;;  %v2020_v32 = vadd.f32 %v1920_v50, %v1776_v46  ;;  %v599_v53 = vrot.slane %v480_v42, 1  ;;  %v600_v40 = vrot.slane %v481_v43, 1  ;;  %v3847_v49 = vld [vmem:[%s3187_s10 + $0x138] sm:$0xff]  ;;  %v3853_v48 = vld [vmem:[%s3187_s10 + $0x140] sm:$0xff] }
  0xa2   : > { %v602_v56 = vrot.slane %v482_v51, 1  ;;  %v726_v29 = vmul.f32 %v3193_v14, %v3521_v0  ;;  %v727_v3 = vmul.f32 %v3193_v14, %v3533_v25  ;;  %v844_v1 = vrot.slane %v725_v8, 2 }
  0xa3   : > { %v2058_v6 = vadd.f32 %v3820_v24, %v2019_v52  ;;  %v3824_v59 = vadd.f32 %v3820_v24, %v2020_v32  ;;  %v601_v9 = vsel %vm543_vm1, %v599_v53, %v600_v40  ;;  %v959_v27 = vmul.f32 %v3195_v15, %v3678_v54 }
  0xa4   : > { %v603_v0 = vsel %vm543_vm1, %v600_v40, %v602_v56  ;;  %v678_v41 = vadd.f32 %v601_v9, %v401_v38  ;;  %v845_v25 = vrot.slane %v726_v29, 2  ;;  %v847_v58 = vrot.slane %v727_v3, 2  ;;  %v3865_v29 = vld [vmem:[%s3187_s10 + $0x148] sm:$0x3] }
  0xa5   : > { %v2126_v39 = vrot.slane %v2058_v6, 7  ;;  %v2127_v30 = vrot.slane %v3824_v59, 7  ;;  %v679_v26 = vadd.f32 %v603_v0, %v402_v45  ;;  %v960_v34 = vmul.f32 %v3195_v15, %v3684_v61 }
  0xa6   : > { %v846_v4 = vsel %vm788_vm2, %v844_v1, %v845_v25  ;;  %v848_v5 = vsel %vm788_vm2, %v845_v25, %v847_v58  ;;  %v1038_v33 = vmul.f32 %v3200_v19, %v3678_v54  ;;  %v1039_v62 = vmul.f32 %v3200_v19, %v3684_v61 }
  0xa7   : > { %v2128_v18 = vsel %vm2116_vm3, %v2126_v39, %v2127_v30  ;;  %v2222_v2 = vadd.f32 %v2126_v39, %v3593_v57  ;;  %v923_v37 = vadd.f32 %v846_v4, %v678_v41  ;;  %v924_v35 = vadd.f32 %v848_v5, %v679_v26 }
  0xa8   : > { %v2223_v11 = vadd.f32 %v2128_v18, %v3596_v60  ;;  %v1040_v36 = vmul.f32 %v3200_v19, %v3691_v10  ;;  %v1156_v7 = vrot.slane %v1038_v33, 1  ;;  %v1157_v31 = vrot.slane %v1039_v62, 1 }
  0xa9   : > { %v2324_v38 = vrot.slane %v2222_v2, 1  ;;  %v991_v44 = vadd.f32 %v959_v27, %v923_v37  ;;  %v992_v17 = vadd.f32 %v960_v34, %v924_v35  ;;  %v1282_v55 = vmul.f32 %v3202_v20, %v3678_v54 }
  0xaa   : > { %v2325_v45 = vrot.slane %v2223_v11, 1  ;;  %v1158_v46 = vsel %vm543_vm1, %v1156_v7, %v1157_v31  ;;  %v1159_v42 = vrot.slane %v1040_v36, 1  ;;  %v1283_v43 = vmul.f32 %v3202_v20, %v3684_v61 }
  0xab   : > { %v1235_v50 = vadd.f32 %v1158_v46, %v991_v44  ;;  %v1284_v51 = vmul.f32 %v3202_v20, %v3691_v10  ;;  %v1400_v8 = vrot.slane %v1282_v55, 2  ;;  %v1515_v52 = vmul.f32 %v3204_v21, %v3847_v49 }
  0xac   : > { %v2326_v32 = vsel %vm543_vm1, %v2324_v38, %v2325_v45  ;;  %v1160_v53 = vsel %vm543_vm1, %v1157_v31, %v1159_v42  ;;  %v1401_v40 = vrot.slane %v1283_v43, 2  ;;  %v1516_v56 = vmul.f32 %v3204_v21, %v3853_v48 }
  0xad   : > { %3059 = vmatprep.mubr.msk.f32.mxu0 %vm2397_vm4, %v2326_v32  ;;  %v1236_v3 = vadd.f32 %v1160_v53, %v992_v17  ;;  %v1403_v1 = vrot.slane %v1284_v51, 2  ;;  %v1594_v6 = vmul.f32 %v3206_v22, %v3847_v49  ;;  %v1595_v59 = vmul.f32 %v3206_v22, %v3853_v48 }
  0xae   : > { %v1402_v9 = vsel %vm788_vm2, %v1400_v8, %v1401_v40  ;;  %v1596_v27 = vmul.f32 %v3206_v22, %v3865_v29  ;;  %v1838_v0 = vmul.f32 %v3789_v23, %v3847_v49  ;;  %v1839_v41 = vmul.f32 %v3789_v23, %v3853_v48 }
  0xaf   : > { %v1404_v25 = vsel %vm788_vm2, %v1401_v40, %v1403_v1  ;;  %v1479_v58 = vadd.f32 %v1402_v9, %v1235_v50  ;;  %v1712_v39 = vrot.slane %v1594_v6, 1  ;;  %v1713_v26 = vrot.slane %v1595_v59, 1 }
  0xb0   : > { %v1480_v34 = vadd.f32 %v1404_v25, %v1236_v3  ;;  %v1715_v4 = vrot.slane %v1596_v27, 1  ;;  %v1840_v5 = vmul.f32 %v3789_v23, %v3865_v29  ;;  %v1956_v33 = vrot.slane %v1838_v0, 2 }
  0xb1   : > { %v1547_v62 = vadd.f32 %v1515_v52, %v1479_v58  ;;  %v1714_v18 = vsel %vm543_vm1, %v1712_v39, %v1713_v26  ;;  %v1957_v2 = vrot.slane %v1839_v41, 2  ;;  %v2224_v37 = vadd.f32 %v2127_v30, %v3614_v28 }
  0xb2   : > { %v1548_v35 = vadd.f32 %v1516_v56, %v1480_v34  ;;  %v1716_v11 = vsel %vm543_vm1, %v1713_v26, %v1715_v4  ;;  %v1959_v36 = vrot.slane %v1840_v5, 2  ;;  %v387_v7 = vmul.f32 %v3189_v12, %v3593_v57 }
  0xb3   : > { %v1791_v31 = vadd.f32 %v1714_v18, %v1547_v62  ;;  %v1958_v38 = vsel %vm788_vm2, %v1956_v33, %v1957_v2  ;;  %v2327_v44 = vrot.slane %v2224_v37, 1  ;;  %v388_v17 = vmul.f32 %v3189_v12, %v3596_v60 }
  0xb4   : > { %v1792_v55 = vadd.f32 %v1716_v11, %v1548_v35  ;;  %v1960_v46 = vsel %vm788_vm2, %v1957_v2, %v1959_v36  ;;  %v459_v30 = vmul.f32 %v3191_v13, %v3593_v57  ;;  %v460_v42 = vmul.f32 %v3191_v13, %v3596_v60 }
  0xb5   : > { %v2035_v43 = vadd.f32 %v1958_v38, %v1791_v31  ;;  %v2328_v50 = vsel %vm543_vm1, %v2325_v45, %v2327_v44  ;;  %v461_v51 = vmul.f32 %v3191_v13, %v3614_v28  ;;  %v704_v8 = vmul.f32 %v3193_v14, %v3593_v57 }
  0xb6   : > { %v2036_v52 = vadd.f32 %v1960_v46, %v1792_v55  ;;  %3060 = vmatmul.mubr.msk.f32.gmra.mrb[6].mxu0 %vm2397_vm4, %v2328_v50  ;;  %v564_v32 = vrot.slane %v459_v30, 1  ;;  %v565_v53 = vrot.slane %v460_v42, 1  ;;  %v705_v40 = vmul.f32 %v3193_v14, %v3596_v60  ;;  %v3925_v55 = vld [vmem:[%s3187_s10 + $0x90] sm:$0xff]  ;;  %v3928_v46 = vld [vmem:[%s3187_s10 + $0x98] sm:$0xff] }
  0xb7   : > { %v2074_v56 = vadd.f32 %v3820_v24, %v2035_v43  ;;  %v567_v3 = vrot.slane %v461_v51, 1  ;;  %v706_v45 = vmul.f32 %v3193_v14, %v3614_v28  ;;  %v809_v1 = vrot.slane %v704_v8, 2 }
  0xb8   : > { %v2075_v6 = vadd.f32 %v3820_v24, %v2036_v52  ;;  %v566_v59 = vsel %vm543_vm1, %v564_v32, %v565_v53  ;;  %v810_v57 = vrot.slane %v705_v40, 2  ;;  %v945_v9 = vmul.f32 %v3195_v15, %v3754_v47 }
  0xb9   : > { %v2150_v27 = vrot.slane %v2074_v56, 7  ;;  %v568_v0 = vsel %vm543_vm1, %v565_v53, %v567_v3  ;;  %v664_v41 = vadd.f32 %v566_v59, %v387_v7  ;;  %v812_v60 = vrot.slane %v706_v45, 2  ;;  %v3946_v3 = vld [vmem:[%s3187_s10 + $0xa0] sm:$0x3] }
  0xba   : > { %v2151_v25 = vrot.slane %v2075_v6, 7  ;;  %v665_v58 = vadd.f32 %v568_v0, %v388_v17  ;;  %v811_v39 = vsel %vm788_vm2, %v809_v1, %v810_v57  ;;  %v946_v28 = vmul.f32 %v3195_v15, %v3769_v63 }
  0xbb   : > { %v2246_v26 = vadd.f32 %v2150_v27, %v3678_v54  ;;  %v813_v34 = vsel %vm788_vm2, %v810_v57, %v812_v60  ;;  %v909_v4 = vadd.f32 %v811_v39, %v664_v41  ;;  %v1017_v5 = vmul.f32 %v3200_v19, %v3754_v47 }
  0xbc   : > { %v2152_v33 = vsel %vm2116_vm3, %v2150_v27, %v2151_v25  ;;  %v2248_v62 = vadd.f32 %v2151_v25, %v3691_v10  ;;  %v910_v18 = vadd.f32 %v813_v34, %v665_v58  ;;  %v1018_v2 = vmul.f32 %v3200_v19, %v3769_v63 }
  0xbd   : > { %v2247_v37 = vadd.f32 %v2152_v33, %v3684_v61  ;;  %v2364_v35 = vrot.slane %v2246_v26, 1  ;;  %v977_v11 = vadd.f32 %v945_v9, %v909_v4  ;;  %v1019_v36 = vmul.f32 %v3200_v19, %v3774_v16 }
  0xbe   : > { %v2367_v7 = vrot.slane %v2248_v62, 1  ;;  %v978_v31 = vadd.f32 %v946_v28, %v910_v18  ;;  %v1121_v38 = vrot.slane %v1017_v5, 1  ;;  %v1122_v44 = vrot.slane %v1018_v2, 1 }
  0xbf   : > { %v2365_v17 = vrot.slane %v2247_v37, 1  ;;  %v1124_v30 = vrot.slane %v1019_v36, 1  ;;  %v1261_v42 = vmul.f32 %v3202_v20, %v3754_v47  ;;  %v1262_v43 = vmul.f32 %v3202_v20, %v3769_v63 }
  0xc0   : > { %v1123_v50 = vsel %vm543_vm1, %v1121_v38, %v1122_v44  ;;  %v1263_v51 = vmul.f32 %v3202_v20, %v3774_v16  ;;  %v1501_v8 = vmul.f32 %v3204_v21, %v3925_v55  ;;  %v1502_v52 = vmul.f32 %v3204_v21, %v3928_v46 }
  0xc1   : > { %v2366_v32 = vsel %vm543_vm1, %v2364_v35, %v2365_v17  ;;  %v2368_v53 = vsel %vm543_vm1, %v2365_v17, %v2367_v7  ;;  %v1125_v40 = vsel %vm543_vm1, %v1122_v44, %v1124_v30  ;;  %v1221_v56 = vadd.f32 %v1123_v50, %v977_v11 }
  0xc2   : > { %3083 = vmatprep.mubr.msk.f32.mxu1 %vm2397_vm4, %v2366_v32  ;;  %v1222_v45 = vadd.f32 %v1125_v40, %v978_v31  ;;  %v1365_v1 = vrot.slane %v1261_v42, 2  ;;  %v1366_v6 = vrot.slane %v1262_v43, 2  ;;  %v1368_v59 = vrot.slane %v1263_v51, 2 }
  0xc3   : > { %3084 = vmatmul.mubr.msk.f32.gmra.mrb[6].mxu1 %vm2397_vm4, %v2368_v53  ;;  %v1573_v57 = vmul.f32 %v3206_v22, %v3925_v55  ;;  %v1574_v9 = vmul.f32 %v3206_v22, %v3928_v46  ;;  %v1575_v27 = vmul.f32 %v3206_v22, %v3946_v3  ;;  %v1817_v0 = vmul.f32 %v3789_v23, %v3925_v55 }
  0xc4   : > { %v1367_v41 = vsel %vm788_vm2, %v1365_v1, %v1366_v6  ;;  %v1369_v60 = vsel %vm788_vm2, %v1366_v6, %v1368_v59  ;;  %v1818_v25 = vmul.f32 %v3789_v23, %v3928_v46  ;;  %v1819_v58 = vmul.f32 %v3789_v23, %v3946_v3 }
  0xc5   : > { %v1465_v39 = vadd.f32 %v1367_v41, %v1221_v56  ;;  %v1466_v28 = vadd.f32 %v1369_v60, %v1222_v45  ;;  %v1677_v26 = vrot.slane %v1573_v57, 1  ;;  %v1678_v34 = vrot.slane %v1574_v9, 1 }
  0xc6   : > { %v1680_v4 = vrot.slane %v1575_v27, 1  ;;  %v1921_v5 = vrot.slane %v1817_v0, 2  ;;  %v1922_v33 = vrot.slane %v1818_v25, 2  ;;  %v1924_v62 = vrot.slane %v1819_v58, 2 }
  0xc7   : > { %v1533_v18 = vadd.f32 %v1501_v8, %v1465_v39  ;;  %v1534_v2 = vadd.f32 %v1502_v52, %v1466_v28  ;;  %v1679_v37 = vsel %vm543_vm1, %v1677_v26, %v1678_v34  ;;  %v403_v35 = vmul.f32 %v3189_v12, %v3678_v54 }
  0xc8   : > { %v1681_v11 = vsel %vm543_vm1, %v1678_v34, %v1680_v4  ;;  %v1923_v36 = vsel %vm788_vm2, %v1921_v5, %v1922_v33  ;;  %v1925_v7 = vsel %vm788_vm2, %v1922_v33, %v1924_v62  ;;  %v404_v31 = vmul.f32 %v3189_v12, %v3684_v61 }
  0xc9   : > { %v1777_v38 = vadd.f32 %v1679_v37, %v1533_v18  ;;  %v1778_v44 = vadd.f32 %v1681_v11, %v1534_v2  ;;  %v483_v17 = vmul.f32 %v3191_v13, %v3678_v54  ;;  %v484_v30 = vmul.f32 %v3191_v13, %v3684_v61 }
  0xca   : > { %v485_v42 = vmul.f32 %v3191_v13, %v3691_v10  ;;  %v728_v43 = vmul.f32 %v3193_v14, %v3678_v54  ;;  %v729_v50 = vmul.f32 %v3193_v14, %v3684_v61  ;;  %v730_v51 = vmul.f32 %v3193_v14, %v3691_v10 }
  0xcb   : > { %v2021_v8 = vadd.f32 %v1923_v36, %v1777_v38  ;;  %v2022_v52 = vadd.f32 %v1925_v7, %v1778_v44  ;;  %v604_v32 = vrot.slane %v483_v17, 1  ;;  %v605_v53 = vrot.slane %v484_v30, 1  ;;  %v4010_v38 = vld [vmem:[%s3187_s10 + $0x150] sm:$0xff] }
  0xcc   : > { %v607_v40 = vrot.slane %v485_v42, 1  ;;  %v849_v56 = vrot.slane %v728_v43, 2  ;;  %v850_v45 = vrot.slane %v729_v50, 2  ;;  %v852_v1 = vrot.slane %v730_v51, 2  ;;  %v4016_v42 = vld [vmem:[%s3187_s10 + $0x158] sm:$0xff] }
  0xcd   : > { %v2060_v6 = vadd.f32 %v3820_v24, %v2021_v8  ;;  %v3985_v59 = vadd.f32 %v3820_v24, %v2022_v52  ;;  %v606_v54 = vsel %vm543_vm1, %v604_v32, %v605_v53  ;;  %v961_v61 = vmul.f32 %v3195_v15, %v3847_v49  ;;  %v4023_v32 = vld [vmem:[%s3187_s10 + $0x160] sm:$0x3] }
  0xce   : > { %v608_v10 = vsel %vm543_vm1, %v605_v53, %v607_v40  ;;  %v680_v57 = vadd.f32 %v606_v54, %v403_v35  ;;  %v851_v9 = vsel %vm788_vm2, %v849_v56, %v850_v45  ;;  %v853_v27 = vsel %vm788_vm2, %v850_v45, %v852_v1 }
  0xcf   : > { %v2129_v0 = vrot.slane %v2060_v6, 7  ;;  %v2130_v41 = vrot.slane %v3985_v59, 7  ;;  %v681_v60 = vadd.f32 %v608_v10, %v404_v31  ;;  %v962_v25 = vmul.f32 %v3195_v15, %v3853_v48 }
  0xd0   : > { %v925_v58 = vadd.f32 %v851_v9, %v680_v57  ;;  %v1041_v39 = vmul.f32 %v3200_v19, %v3847_v49  ;;  %v1042_v28 = vmul.f32 %v3200_v19, %v3853_v48  ;;  %v1043_v26 = vmul.f32 %v3200_v19, %v3865_v29 }
  0xd1   : > { %v2131_v34 = vsel %vm2116_vm3, %v2129_v0, %v2130_v41  ;;  %v2225_v4 = vadd.f32 %v2129_v0, %v3754_v47  ;;  %v926_v5 = vadd.f32 %v853_v27, %v681_v60  ;;  %v1285_v33 = vmul.f32 %v3202_v20, %v3847_v49 }
  0xd2   : > { %v2226_v62 = vadd.f32 %v2131_v34, %v3769_v63  ;;  %v993_v18 = vadd.f32 %v961_v61, %v925_v58  ;;  %v1161_v2 = vrot.slane %v1041_v39, 1  ;;  %v1162_v37 = vrot.slane %v1042_v28, 1 }
  0xd3   : > { %v2329_v35 = vrot.slane %v2225_v4, 1  ;;  %v994_v11 = vadd.f32 %v962_v25, %v926_v5  ;;  %v1164_v36 = vrot.slane %v1043_v26, 1  ;;  %v1286_v7 = vmul.f32 %v3202_v20, %v3853_v48 }
  0xd4   : > { %v2330_v31 = vrot.slane %v2226_v62, 1  ;;  %v1163_v44 = vsel %vm543_vm1, %v1161_v2, %v1162_v37  ;;  %v1287_v17 = vmul.f32 %v3202_v20, %v3865_v29  ;;  %v1405_v30 = vrot.slane %v1285_v33, 2 }
  0xd5   : > { %v1165_v43 = vsel %vm543_vm1, %v1162_v37, %v1164_v36  ;;  %v1237_v50 = vadd.f32 %v1163_v44, %v993_v18  ;;  %v1406_v51 = vrot.slane %v1286_v7, 2  ;;  %v1517_v8 = vmul.f32 %v3204_v21, %v4010_v38 }
  0xd6   : > { %v2331_v52 = vsel %vm543_vm1, %v2329_v35, %v2330_v31  ;;  %v1238_v53 = vadd.f32 %v1165_v43, %v994_v11  ;;  %v1408_v40 = vrot.slane %v1287_v17, 2  ;;  %v1518_v56 = vmul.f32 %v3204_v21, %v4016_v42 }
  0xd7   : > { %3062 = vmatprep.mubr.msk.f32.mxu0 %vm2397_vm4, %v2331_v52  ;;  %v1407_v45 = vsel %vm788_vm2, %v1405_v30, %v1406_v51  ;;  %v1597_v1 = vmul.f32 %v3206_v22, %v4010_v38  ;;  %v1598_v6 = vmul.f32 %v3206_v22, %v4016_v42  ;;  %v1599_v59 = vmul.f32 %v3206_v22, %v4023_v32 }
  0xd8   : > { %v1409_v54 = vsel %vm788_vm2, %v1406_v51, %v1408_v40  ;;  %v1481_v61 = vadd.f32 %v1407_v45, %v1237_v50  ;;  %v1841_v10 = vmul.f32 %v3789_v23, %v4010_v38  ;;  %v1842_v57 = vmul.f32 %v3789_v23, %v4016_v42 }
  0xd9   : > { %v1482_v9 = vadd.f32 %v1409_v54, %v1238_v53  ;;  %v1717_v27 = vrot.slane %v1597_v1, 1  ;;  %v1718_v0 = vrot.slane %v1598_v6, 1  ;;  %v1720_v60 = vrot.slane %v1599_v59, 1 }
  0xda   : > { %v1549_v25 = vadd.f32 %v1517_v8, %v1481_v61  ;;  %v1843_v58 = vmul.f32 %v3789_v23, %v4023_v32  ;;  %v1961_v39 = vrot.slane %v1841_v10, 2  ;;  %v1962_v28 = vrot.slane %v1842_v57, 2 }
  0xdb   : > { %v1550_v26 = vadd.f32 %v1518_v56, %v1482_v9  ;;  %v1719_v34 = vsel %vm543_vm1, %v1717_v27, %v1718_v0  ;;  %v1721_v4 = vsel %vm543_vm1, %v1718_v0, %v1720_v60  ;;  %v2227_v5 = vadd.f32 %v2130_v41, %v3774_v16 }
  0xdc   : > { %v1793_v33 = vadd.f32 %v1719_v34, %v1549_v25  ;;  %v1963_v62 = vsel %vm788_vm2, %v1961_v39, %v1962_v28  ;;  %v1964_v18 = vrot.slane %v1843_v58, 2  ;;  %v389_v2 = vmul.f32 %v3189_v12, %v3754_v47 }
  0xdd   : > { %v1794_v37 = vadd.f32 %v1721_v4, %v1550_v26  ;;  %v2332_v35 = vrot.slane %v2227_v5, 1  ;;  %v390_v11 = vmul.f32 %v3189_v12, %v3769_v63  ;;  %v462_v36 = vmul.f32 %v3191_v13, %v3754_v47 }
  0xde   : > { %v1965_v7 = vsel %vm788_vm2, %v1962_v28, %v1964_v18  ;;  %v2037_v44 = vadd.f32 %v1963_v62, %v1793_v33  ;;  %v463_v41 = vmul.f32 %v3191_v13, %v3769_v63  ;;  %v464_v17 = vmul.f32 %v3191_v13, %v3774_v16 }
  0xdf   : > { %v2038_v30 = vadd.f32 %v1965_v7, %v1794_v37  ;;  %v2333_v43 = vsel %vm543_vm1, %v2330_v31, %v2332_v35  ;;  %v569_v50 = vrot.slane %v462_v36, 1  ;;  %v707_v51 = vmul.f32 %v3193_v14, %v3754_v47  ;;  %v4086_v37 = vld [vmem:[%s3187_s10 + $0xa8] sm:$0xff] }
  0xe0   : > { %v2076_v8 = vadd.f32 %v3820_v24, %v2037_v44  ;;  %3063 = vmatmul.mubr.msk.f32.gmra.mrb[8].mxu0 %vm2397_vm4, %v2333_v43  ;;  %v570_v52 = vrot.slane %v463_v41, 1  ;;  %v572_v53 = vrot.slane %v464_v17, 1  ;;  %v708_v40 = vmul.f32 %v3193_v14, %v3769_v63 }
  0xe1   : > { %v2077_v56 = vadd.f32 %v3820_v24, %v2038_v30  ;;  %v709_v45 = vmul.f32 %v3193_v14, %v3774_v16  ;;  %v814_v1 = vrot.slane %v707_v51, 2  ;;  %v947_v31 = vmul.f32 %v3195_v15, %v3925_v55 }
  0xe2   : > { %v2153_v6 = vrot.slane %v2076_v8, 7  ;;  %v571_v47 = vsel %vm543_vm1, %v569_v50, %v570_v52  ;;  %v573_v59 = vsel %vm543_vm1, %v570_v52, %v572_v53  ;;  %v815_v54 = vrot.slane %v708_v40, 2  ;;  %v4101_v8 = vld [vmem:[%s3187_s10 + $0xb0] sm:$0xff] }
  0xe3   : > { %v2154_v61 = vrot.slane %v2077_v56, 7  ;;  %v666_v10 = vadd.f32 %v571_v47, %v389_v2  ;;  %v667_v57 = vadd.f32 %v573_v59, %v390_v11  ;;  %v817_v9 = vrot.slane %v709_v45, 2  ;;  %v4106_v45 = vld [vmem:[%s3187_s10 + $0xb8] sm:$0x3] }
  0xe4   : > { %v2249_v63 = vadd.f32 %v2153_v6, %v3847_v49  ;;  %v816_v27 = vsel %vm788_vm2, %v814_v1, %v815_v54  ;;  %v948_v16 = vmul.f32 %v3195_v15, %v3928_v46  ;;  %v1020_v0 = vmul.f32 %v3200_v19, %v3925_v55 }
  0xe5   : > { %v2155_v60 = vsel %vm2116_vm3, %v2153_v6, %v2154_v61  ;;  %v2251_v25 = vadd.f32 %v2154_v61, %v3865_v29  ;;  %v818_v58 = vsel %vm788_vm2, %v815_v54, %v817_v9  ;;  %v911_v39 = vadd.f32 %v816_v27, %v666_v10 }
  0xe6   : > { %v2250_v28 = vadd.f32 %v2155_v60, %v3853_v48  ;;  %v2369_v26 = vrot.slane %v2249_v63, 1  ;;  %v912_v34 = vadd.f32 %v818_v58, %v667_v57  ;;  %v1021_v4 = vmul.f32 %v3200_v19, %v3928_v46 }
  0xe7   : > { %v2372_v5 = vrot.slane %v2251_v25, 1  ;;  %v979_v33 = vadd.f32 %v947_v31, %v911_v39  ;;  %v1022_v62 = vmul.f32 %v3200_v19, %v3946_v3  ;;  %v1126_v18 = vrot.slane %v1020_v0, 1 }
  0xe8   : > { %v2370_v2 = vrot.slane %v2250_v28, 1  ;;  %v980_v35 = vadd.f32 %v948_v16, %v912_v34  ;;  %v1127_v11 = vrot.slane %v1021_v4, 1  ;;  %v1264_v36 = vmul.f32 %v3202_v20, %v3925_v55 }
  0xe9   : > { %v1129_v7 = vrot.slane %v1022_v62, 1  ;;  %v1265_v44 = vmul.f32 %v3202_v20, %v3928_v46  ;;  %v1266_v41 = vmul.f32 %v3202_v20, %v3946_v3  ;;  %v1503_v17 = vmul.f32 %v3204_v21, %v4086_v37 }
  0xea   : > { %v2371_v30 = vsel %vm543_vm1, %v2369_v26, %v2370_v2  ;;  %v2373_v43 = vsel %vm543_vm1, %v2370_v2, %v2372_v5  ;;  %v1128_v50 = vsel %vm543_vm1, %v1126_v18, %v1127_v11  ;;  %v1370_v51 = vrot.slane %v1264_v36, 2 }
  0xeb   : > { %3086 = vmatprep.mubr.msk.f32.mxu1 %vm2397_vm4, %v2371_v30  ;;  %v1130_v52 = vsel %vm543_vm1, %v1127_v11, %v1129_v7  ;;  %v1223_v53 = vadd.f32 %v1128_v50, %v979_v33  ;;  %v1371_v40 = vrot.slane %v1265_v44, 2  ;;  %v1373_v56 = vrot.slane %v1266_v41, 2 }
  0xec   : > { %3087 = vmatmul.mubr.msk.f32.gmra.mrb[8].mxu1 %vm2397_vm4, %v2373_v43  ;;  %v1224_v1 = vadd.f32 %v1130_v52, %v980_v35  ;;  %v1504_v31 = vmul.f32 %v3204_v21, %v4101_v8  ;;  %v1576_v6 = vmul.f32 %v3206_v22, %v4086_v37  ;;  %v1577_v47 = vmul.f32 %v3206_v22, %v4101_v8 }
  0xed   : > { %v1372_v59 = vsel %vm788_vm2, %v1370_v51, %v1371_v40  ;;  %v1374_v54 = vsel %vm788_vm2, %v1371_v40, %v1373_v56  ;;  %v1578_v61 = vmul.f32 %v3206_v22, %v4106_v45  ;;  %v1820_v10 = vmul.f32 %v3789_v23, %v4086_v37 }
  0xee   : > { %v1467_v57 = vadd.f32 %v1372_v59, %v1223_v53  ;;  %v1468_v9 = vadd.f32 %v1374_v54, %v1224_v1  ;;  %v1682_v63 = vrot.slane %v1576_v6, 1  ;;  %v1683_v27 = vrot.slane %v1577_v47, 1 }
  0xef   : > { %v1685_v16 = vrot.slane %v1578_v61, 1  ;;  %v1821_v0 = vmul.f32 %v3789_v23, %v4101_v8  ;;  %v1822_v60 = vmul.f32 %v3789_v23, %v4106_v45  ;;  %v1926_v25 = vrot.slane %v1820_v10, 2 }
  0xf0   : > { %v1535_v58 = vadd.f32 %v1503_v17, %v1467_v57  ;;  %v1536_v39 = vadd.f32 %v1504_v31, %v1468_v9  ;;  %v1684_v28 = vsel %vm543_vm1, %v1682_v63, %v1683_v27  ;;  %v405_v26 = vmul.f32 %v3189_v12, %v3847_v49 }
  0xf1   : > { %v1686_v34 = vsel %vm543_vm1, %v1683_v27, %v1685_v16  ;;  %v1927_v4 = vrot.slane %v1821_v0, 2  ;;  %v1929_v5 = vrot.slane %v1822_v60, 2  ;;  %v406_v33 = vmul.f32 %v3189_v12, %v3853_v48 }
  0xf2   : > { %v1779_v62 = vadd.f32 %v1684_v28, %v1535_v58  ;;  %v1780_v18 = vadd.f32 %v1686_v34, %v1536_v39  ;;  %v486_v2 = vmul.f32 %v3191_v13, %v3847_v49  ;;  %v487_v35 = vmul.f32 %v3191_v13, %v3853_v48 }
  0xf3   : > { %v1928_v11 = vsel %vm788_vm2, %v1926_v25, %v1927_v4  ;;  %v1930_v36 = vsel %vm788_vm2, %v1927_v4, %v1929_v5  ;;  %v488_v7 = vmul.f32 %v3191_v13, %v3865_v29  ;;  %v731_v44 = vmul.f32 %v3193_v14, %v3847_v49 }
  0xf4   : > { %v2023_v41 = vadd.f32 %v1928_v11, %v1779_v62  ;;  %v2024_v17 = vadd.f32 %v1930_v36, %v1780_v18  ;;  %v609_v30 = vrot.slane %v486_v2, 1  ;;  %v610_v43 = vrot.slane %v487_v35, 1  ;;  %v4169_v62 = vld [vmem:[%s3187_s10 + $0x168] sm:$0xff]  ;;  %v4175_v11 = vld [vmem:[%s3187_s10 + $0x170] sm:$0xff] }
  0xf5   : > { %v612_v50 = vrot.slane %v488_v7, 1  ;;  %v732_v51 = vmul.f32 %v3193_v14, %v3853_v48  ;;  %v733_v52 = vmul.f32 %v3193_v14, %v3865_v29  ;;  %v854_v53 = vrot.slane %v731_v44, 2 }
  0xf6   : > { %v2062_v40 = vadd.f32 %v3820_v24, %v2023_v41  ;;  %v4146_v56 = vadd.f32 %v3820_v24, %v2024_v17  ;;  %v611_v1 = vsel %vm543_vm1, %v609_v30, %v610_v43  ;;  %v963_v49 = vmul.f32 %v3195_v15, %v4010_v38 }
  0xf7   : > { %v613_v31 = vsel %vm543_vm1, %v610_v43, %v612_v50  ;;  %v682_v6 = vadd.f32 %v611_v1, %v405_v26  ;;  %v855_v47 = vrot.slane %v732_v51, 2  ;;  %v857_v59 = vrot.slane %v733_v52, 2  ;;  %v4187_v51 = vld [vmem:[%s3187_s10 + $0x178] sm:$0x3] }
  0xf8   : > { %v2132_v48 = vrot.slane %v2062_v40, 7  ;;  %v2133_v54 = vrot.slane %v4146_v56, 7  ;;  %v683_v29 = vadd.f32 %v613_v31, %v406_v33  ;;  %v964_v61 = vmul.f32 %v3195_v15, %v4016_v42 }
  0xf9   : > { %v856_v10 = vsel %vm788_vm2, %v854_v53, %v855_v47  ;;  %v858_v57 = vsel %vm788_vm2, %v855_v47, %v857_v59  ;;  %v1044_v9 = vmul.f32 %v3200_v19, %v4010_v38  ;;  %v1045_v63 = vmul.f32 %v3200_v19, %v4016_v42 }
  0xfa   : > { %v2134_v27 = vsel %vm2116_vm3, %v2132_v48, %v2133_v54  ;;  %v2228_v16 = vadd.f32 %v2132_v48, %v3925_v55  ;;  %v927_v0 = vadd.f32 %v856_v10, %v682_v6  ;;  %v928_v60 = vadd.f32 %v858_v57, %v683_v29 }
  0xfb   : > { %v2229_v25 = vadd.f32 %v2134_v27, %v3928_v46  ;;  %v1046_v58 = vmul.f32 %v3200_v19, %v4023_v32  ;;  %v1166_v39 = vrot.slane %v1044_v9, 1  ;;  %v1167_v28 = vrot.slane %v1045_v63, 1 }
  0xfc   : > { %v2334_v26 = vrot.slane %v2228_v16, 1  ;;  %v995_v34 = vadd.f32 %v963_v49, %v927_v0  ;;  %v996_v4 = vadd.f32 %v964_v61, %v928_v60  ;;  %v1288_v5 = vmul.f32 %v3202_v20, %v4010_v38 }
  0xfd   : > { %v2335_v33 = vrot.slane %v2229_v25, 1  ;;  %v1168_v18 = vsel %vm543_vm1, %v1166_v39, %v1167_v28  ;;  %v1169_v2 = vrot.slane %v1046_v58, 1  ;;  %v1289_v35 = vmul.f32 %v3202_v20, %v4016_v42 }
  0xfe   : > { %v1239_v36 = vadd.f32 %v1168_v18, %v995_v34  ;;  %v1290_v7 = vmul.f32 %v3202_v20, %v4023_v32  ;;  %v1410_v44 = vrot.slane %v1288_v5, 2  ;;  %v1519_v41 = vmul.f32 %v3204_v21, %v4169_v62 }
  0xff   : > { %v2336_v17 = vsel %vm543_vm1, %v2334_v26, %v2335_v33  ;;  %v1170_v30 = vsel %vm543_vm1, %v1167_v28, %v1169_v2  ;;  %v1411_v43 = vrot.slane %v1289_v35, 2  ;;  %v1520_v50 = vmul.f32 %v3204_v21, %v4175_v11 }
 0x100   : > { %3065 = vmatprep.mubr.msk.f32.mxu0 %vm2397_vm4, %v2336_v17  ;;  %v1240_v52 = vadd.f32 %v1170_v30, %v996_v4  ;;  %v1413_v53 = vrot.slane %v1290_v7, 2  ;;  %v1600_v40 = vmul.f32 %v3206_v22, %v4169_v62  ;;  %v1601_v56 = vmul.f32 %v3206_v22, %v4175_v11 }
 0x101   : > { %v1412_v1 = vsel %vm788_vm2, %v1410_v44, %v1411_v43  ;;  %v1602_v49 = vmul.f32 %v3206_v22, %v4187_v51  ;;  %v1844_v31 = vmul.f32 %v3789_v23, %v4169_v62  ;;  %v1845_v6 = vmul.f32 %v3789_v23, %v4175_v11 }
 0x102   : > { %v1414_v47 = vsel %vm788_vm2, %v1411_v43, %v1413_v53  ;;  %v1483_v59 = vadd.f32 %v1412_v1, %v1239_v36  ;;  %v1722_v48 = vrot.slane %v1600_v40, 1  ;;  %v1723_v29 = vrot.slane %v1601_v56, 1 }
 0x103   : > { %v1484_v61 = vadd.f32 %v1414_v47, %v1240_v52  ;;  %v1725_v10 = vrot.slane %v1602_v49, 1  ;;  %v1846_v57 = vmul.f32 %v3789_v23, %v4187_v51  ;;  %v1966_v9 = vrot.slane %v1844_v31, 2 }
 0x104   : > { %v1551_v63 = vadd.f32 %v1519_v41, %v1483_v59  ;;  %v1724_v27 = vsel %vm543_vm1, %v1722_v48, %v1723_v29  ;;  %v1967_v16 = vrot.slane %v1845_v6, 2  ;;  %v2230_v0 = vadd.f32 %v2133_v54, %v3946_v3 }
 0x105   : > { %v1552_v60 = vadd.f32 %v1520_v50, %v1484_v61  ;;  %v1726_v25 = vsel %vm543_vm1, %v1723_v29, %v1725_v10  ;;  %v1969_v58 = vrot.slane %v1846_v57, 2  ;;  %v391_v39 = vmul.f32 %v3189_v12, %v3925_v55 }
 0x106   : > { %v1795_v28 = vadd.f32 %v1724_v27, %v1551_v63  ;;  %v1968_v26 = vsel %vm788_vm2, %v1966_v9, %v1967_v16  ;;  %v2337_v34 = vrot.slane %v2230_v0, 1  ;;  %v392_v23 = vmul.f32 %v3189_v12, %v3928_v46 }
 0x107   : > { %v1796_v4 = vadd.f32 %v1726_v25, %v1552_v60  ;;  %v1970_v5 = vsel %vm788_vm2, %v1967_v16, %v1969_v58  ;;  %v465_v54 = vmul.f32 %v3191_v13, %v3925_v55  ;;  %v466_v18 = vmul.f32 %v3191_v13, %v3928_v46 }
 0x108   : > { %v2039_v2 = vadd.f32 %v1968_v26, %v1795_v28  ;;  %v2338_v35 = vsel %vm543_vm1, %v2335_v33, %v2337_v34  ;;  %v467_v36 = vmul.f32 %v3191_v13, %v3946_v3  ;;  %v710_v7 = vmul.f32 %v3193_v14, %v3925_v55 }
 0x109   : > { %v2040_v44 = vadd.f32 %v1970_v5, %v1796_v4  ;;  %3066 = vmatmul.mubr.msk.f32.gmra.mrb[10].mxu0 %vm2397_vm4, %v2338_v35  ;;  %v574_v41 = vrot.slane %v465_v54, 1  ;;  %v575_v17 = vrot.slane %v466_v18, 1  ;;  %v711_v30 = vmul.f32 %v3193_v14, %v3928_v46  ;;  %v4258_v35 = vld [vmem:[%s3187_s10 + $0xc0] sm:$0xff] }
 0x10a   : > { %v2078_v43 = vadd.f32 %v3820_v24, %v2039_v2  ;;  %v577_v50 = vrot.slane %v467_v36, 1  ;;  %v712_v33 = vmul.f32 %v3193_v14, %v3946_v3  ;;  %v819_v52 = vrot.slane %v710_v7, 2  ;;  %v4263_v7 = vld [vmem:[%s3187_s10 + $0xc8] sm:$0xff] }
 0x10b   : > { %v2079_v53 = vadd.f32 %v3820_v24, %v2040_v44  ;;  %v576_v40 = vsel %vm543_vm1, %v574_v41, %v575_v17  ;;  %v820_v55 = vrot.slane %v711_v30, 2  ;;  %v949_v56 = vmul.f32 %v3195_v15, %v4086_v37 }
 0x10c   : > { %v2156_v1 = vrot.slane %v2078_v43, 7  ;;  %v578_v49 = vsel %vm543_vm1, %v575_v17, %v577_v50  ;;  %v668_v31 = vadd.f32 %v576_v40, %v391_v39  ;;  %v822_v46 = vrot.slane %v712_v33, 2 }
 0x10d   : > { %v2157_v6 = vrot.slane %v2079_v53, 7  ;;  %v669_v47 = vadd.f32 %v578_v49, %v392_v23  ;;  %v821_v59 = vsel %vm788_vm2, %v819_v52, %v820_v55  ;;  %v950_v3 = vmul.f32 %v3195_v15, %v4101_v8  ;;  %v4284_v49 = vld [vmem:[%s4741_s1 + $0x8] ss:$0 sm:$0xff] }
 0x10e   : > { %v2252_v24 = vadd.f32 %v2156_v1, %v4010_v38  ;;  %v823_v48 = vsel %vm788_vm2, %v820_v55, %v822_v46  ;;  %v913_v29 = vadd.f32 %v821_v59, %v668_v31  ;;  %v1023_v61 = vmul.f32 %v3200_v19, %v4086_v37  ;;  %v4239_v10 = vpop.f32.mrb[0].mxu0 }
 0x10f   : > { %v2158_v57 = vsel %vm2116_vm3, %v2156_v1, %v2157_v6  ;;  %v2254_v9 = vadd.f32 %v2157_v6, %v4023_v32  ;;  %v914_v63 = vadd.f32 %v823_v48, %v669_v47  ;;  %v1024_v27 = vmul.f32 %v3200_v19, %v4101_v8  ;;  %v4245_v16 = vpop.f32.mrb[1].mxu0 }
 0x110   : > { %v2253_v0 = vadd.f32 %v2158_v57, %v4016_v42  ;;  %v2374_v60 = vrot.slane %v2252_v24, 1  ;;  %v981_v25 = vadd.f32 %v949_v56, %v913_v29  ;;  %v1025_v58 = vmul.f32 %v3200_v19, %v4106_v45  ;;  %v4277_v56 = vld [vmem:[%s3187_s10 + $0xd0] sm:$0x3] }
 0x111   : > { %v2377_v39 = vrot.slane %v2254_v9, 1  ;;  %v982_v28 = vadd.f32 %v950_v3, %v914_v63  ;;  %v1131_v26 = vrot.slane %v1023_v61, 1  ;;  %v1132_v34 = vrot.slane %v1024_v27, 1 }
 0x112   : > { %v2375_v23 = vrot.slane %v2253_v0, 1  ;;  %v1134_v4 = vrot.slane %v1025_v58, 1  ;;  %v1267_v5 = vmul.f32 %v3202_v20, %v4086_v37  ;;  %v1268_v54 = vmul.f32 %v3202_v20, %v4101_v8 }
 0x113   : > { %v1133_v18 = vsel %vm543_vm1, %v1131_v26, %v1132_v34  ;;  %v1269_v2 = vmul.f32 %v3202_v20, %v4106_v45  ;;  %v1505_v36 = vmul.f32 %v4258_v35, %v3204_v21  ;;  %v1506_v44 = vmul.f32 %v4263_v7, %v3204_v21 }
 0x114   : > { %v2376_v41 = vsel %vm543_vm1, %v2374_v60, %v2375_v23  ;;  %v2378_v17 = vsel %vm543_vm1, %v2375_v23, %v2377_v39  ;;  %v1135_v30 = vsel %vm543_vm1, %v1132_v34, %v1134_v4  ;;  %v1225_v43 = vadd.f32 %v1133_v18, %v981_v25 }
 0x115   : > { %3089 = vmatprep.mubr.msk.f32.mxu1 %vm2397_vm4, %v2376_v41  ;;  %v1226_v50 = vadd.f32 %v1135_v30, %v982_v28  ;;  %v1375_v33 = vrot.slane %v1267_v5, 2  ;;  %v1376_v52 = vrot.slane %v1268_v54, 2  ;;  %v1378_v53 = vrot.slane %v1269_v2, 2 }
 0x116   : > { %3090 = vmatmul.mubr.msk.f32.gmra.mrb[10].mxu1 %vm2397_vm4, %v2378_v17  ;;  %v1579_v40 = vmul.f32 %v4258_v35, %v3206_v22  ;;  %v1580_v55 = vmul.f32 %v4263_v7, %v3206_v22  ;;  %v1581_v1 = vmul.f32 %v4277_v56, %v3206_v22  ;;  %v1823_v31 = vmul.f32 %v4284_v49, %v4258_v35 }
 0x117   : > { %v1377_v46 = vsel %vm788_vm2, %v1375_v33, %v1376_v52  ;;  %v1379_v6 = vsel %vm788_vm2, %v1376_v52, %v1378_v53  ;;  %v1824_v47 = vmul.f32 %v4284_v49, %v4263_v7  ;;  %v1825_v59 = vmul.f32 %v4284_v49, %v4277_v56 }
 0x118   : > { %v1469_v3 = vadd.f32 %v1377_v46, %v1225_v43  ;;  %v1470_v24 = vadd.f32 %v1379_v6, %v1226_v50  ;;  %v1687_v48 = vrot.slane %v1579_v40, 1  ;;  %v1688_v29 = vrot.slane %v1580_v55, 1  ;;  %v4321_v55 = vld [vmem:[%s4742_s2] ss:$0 sm:$0xff] }
 0x119   : > { %v1690_v61 = vrot.slane %v1581_v1, 1  ;;  %v1931_v57 = vrot.slane %v1823_v31, 2  ;;  %v1932_v9 = vrot.slane %v1824_v47, 2  ;;  %v1934_v63 = vrot.slane %v1825_v59, 2 }
 0x11a   : > { %v1537_v27 = vadd.f32 %v1505_v36, %v1469_v3  ;;  %v1538_v0 = vadd.f32 %v1506_v44, %v1470_v24  ;;  %v1689_v60 = vsel %vm543_vm1, %v1687_v48, %v1688_v29  ;;  %v407_v25 = vmul.f32 %v3189_v12, %v4010_v38 }
 0x11b   : > { %v1691_v58 = vsel %vm543_vm1, %v1688_v29, %v1690_v61  ;;  %v1933_v39 = vsel %vm788_vm2, %v1931_v57, %v1932_v9  ;;  %v1935_v28 = vsel %vm788_vm2, %v1932_v9, %v1934_v63  ;;  %v408_v26 = vmul.f32 %v3189_v12, %v4016_v42  ;;  %v4302_v34 = vpop.f32.mrb[0].mxu1 }
 0x11c   : > { %v1781_v23 = vadd.f32 %v1689_v60, %v1537_v27  ;;  %v1782_v4 = vadd.f32 %v1691_v58, %v1538_v0  ;;  %v489_v5 = vmul.f32 %v3191_v13, %v4010_v38  ;;  %v490_v54 = vmul.f32 %v3191_v13, %v4016_v42  ;;  %v4308_v18 = vpop.f32.mrb[1].mxu1 }
 0x11d   : > { %v491_v2 = vmul.f32 %v3191_v13, %v4023_v32  ;;  %v734_v36 = vmul.f32 %v3193_v14, %v4010_v38  ;;  %v735_v44 = vmul.f32 %v3193_v14, %v4016_v42  ;;  %v736_v41 = vmul.f32 %v3193_v14, %v4023_v32 }
 0x11e   : > { %v2025_v17 = vadd.f32 %v1933_v39, %v1781_v23  ;;  %v2026_v30 = vadd.f32 %v1935_v28, %v1782_v4  ;;  %v614_v43 = vrot.slane %v489_v5, 1  ;;  %v615_v50 = vrot.slane %v490_v54, 1 }
 0x11f   : > { %v617_v33 = vrot.slane %v491_v2, 1  ;;  %v859_v52 = vrot.slane %v734_v36, 2  ;;  %v860_v53 = vrot.slane %v735_v44, 2  ;;  %v862_v40 = vrot.slane %v736_v41, 2  ;;  %v4350_v2 = vld [vmem:[%s3187_s10 + $0x180] sm:$0xff] }
 0x120   : > { %v2064_v38 = vadd.f32 %v4321_v55, %v2025_v17  ;;  %v4325_v42 = vadd.f32 %v4321_v55, %v2026_v30  ;;  %v616_v32 = vsel %vm543_vm1, %v614_v43, %v615_v50  ;;  %v965_v1 = vmul.f32 %v3195_v15, %v4169_v62  ;;  %v4356_v17 = vld [vmem:[%s3187_s10 + $0x188] sm:$0xff] }
 0x121   : > { %v618_v31 = vsel %vm543_vm1, %v615_v50, %v617_v33  ;;  %v684_v46 = vadd.f32 %v616_v32, %v407_v25  ;;  %v861_v6 = vsel %vm788_vm2, %v859_v52, %v860_v53  ;;  %v863_v47 = vsel %vm788_vm2, %v860_v53, %v862_v40  ;;  %v4363_v53 = vld [vmem:[%s3187_s10 + $0x190] sm:$0x3] }
 0x122   : > { %v2135_v59 = vrot.slane %v2064_v38, 7  ;;  %v2136_v3 = vrot.slane %v4325_v42, 7  ;;  %v685_v24 = vadd.f32 %v618_v31, %v408_v26  ;;  %v966_v48 = vmul.f32 %v3195_v15, %v4175_v11 }
 0x123   : > { %v929_v29 = vadd.f32 %v861_v6, %v684_v46  ;;  %v1047_v61 = vmul.f32 %v3200_v19, %v4169_v62  ;;  %v1048_v57 = vmul.f32 %v3200_v19, %v4175_v11  ;;  %v1049_v9 = vmul.f32 %v3200_v19, %v4187_v51 }
 0x124   : > { %v2137_v63 = vsel %vm2116_vm3, %v2135_v59, %v2136_v3  ;;  %v2231_v27 = vadd.f32 %v2135_v59, %v4086_v37  ;;  %v930_v0 = vadd.f32 %v863_v47, %v685_v24  ;;  %v1291_v60 = vmul.f32 %v3202_v20, %v4169_v62 }
 0x125   : > { %v2232_v25 = vadd.f32 %v2137_v63, %v4101_v8  ;;  %v997_v58 = vadd.f32 %v965_v1, %v929_v29  ;;  %v1171_v39 = vrot.slane %v1047_v61, 1  ;;  %v1172_v28 = vrot.slane %v1048_v57, 1 }
 0x126   : > { %v2339_v26 = vrot.slane %v2231_v27, 1  ;;  %v998_v23 = vadd.f32 %v966_v48, %v930_v0  ;;  %v1174_v4 = vrot.slane %v1049_v9, 1  ;;  %v1292_v5 = vmul.f32 %v3202_v20, %v4175_v11 }
 0x127   : > { %v2340_v54 = vrot.slane %v2232_v25, 1  ;;  %v1173_v36 = vsel %vm543_vm1, %v1171_v39, %v1172_v28  ;;  %v1293_v44 = vmul.f32 %v3202_v20, %v4187_v51  ;;  %v1415_v41 = vrot.slane %v1291_v60, 2 }
 0x128   : > { %v1175_v30 = vsel %vm543_vm1, %v1172_v28, %v1174_v4  ;;  %v1241_v43 = vadd.f32 %v1173_v36, %v997_v58  ;;  %v1416_v50 = vrot.slane %v1292_v5, 2  ;;  %v1521_v33 = vmul.f32 %v3204_v21, %v4350_v2 }
 0x129   : > { %v2341_v52 = vsel %vm543_vm1, %v2339_v26, %v2340_v54  ;;  %v1242_v40 = vadd.f32 %v1175_v30, %v998_v23  ;;  %v1418_v38 = vrot.slane %v1293_v44, 2  ;;  %v1522_v42 = vmul.f32 %v3204_v21, %v4356_v17 }
 0x12a   : > { %3068 = vmatprep.mubr.msk.f32.mxu0 %vm2397_vm4, %v2341_v52  ;;  %v1417_v32 = vsel %vm788_vm2, %v1415_v41, %v1416_v50  ;;  %v1603_v1 = vmul.f32 %v3206_v22, %v4350_v2  ;;  %v1604_v31 = vmul.f32 %v3206_v22, %v4356_v17  ;;  %v1605_v46 = vmul.f32 %v3206_v22, %v4363_v53 }
 0x12b   : > { %v1419_v6 = vsel %vm788_vm2, %v1416_v50, %v1418_v38  ;;  %v1485_v47 = vadd.f32 %v1417_v32, %v1241_v43  ;;  %v1847_v59 = vmul.f32 %v4284_v49, %v4350_v2  ;;  %v1848_v24 = vmul.f32 %v4284_v49, %v4356_v17 }
 0x12c   : > { %v1486_v48 = vadd.f32 %v1419_v6, %v1242_v40  ;;  %v1727_v29 = vrot.slane %v1603_v1, 1  ;;  %v1728_v61 = vrot.slane %v1604_v31, 1  ;;  %v1730_v57 = vrot.slane %v1605_v46, 1 }
 0x12d   : > { %v1553_v9 = vadd.f32 %v1521_v33, %v1485_v47  ;;  %v1849_v63 = vmul.f32 %v4284_v49, %v4363_v53  ;;  %v1971_v27 = vrot.slane %v1847_v59, 2  ;;  %v1972_v0 = vrot.slane %v1848_v24, 2 }
 0x12e   : > { %v1554_v60 = vadd.f32 %v1522_v42, %v1486_v48  ;;  %v1729_v25 = vsel %vm543_vm1, %v1727_v29, %v1728_v61  ;;  %v1731_v58 = vsel %vm543_vm1, %v1728_v61, %v1730_v57  ;;  %v2233_v39 = vadd.f32 %v2136_v3, %v4106_v45 }
 0x12f   : > { %v1797_v28 = vadd.f32 %v1729_v25, %v1553_v9  ;;  %v1973_v26 = vsel %vm788_vm2, %v1971_v27, %v1972_v0  ;;  %v1974_v23 = vrot.slane %v1849_v63, 2  ;;  %v393_v4 = vmul.f32 %v3189_v12, %v4086_v37 }
 0x130   : > { %v1798_v5 = vadd.f32 %v1731_v58, %v1554_v60  ;;  %v2342_v36 = vrot.slane %v2233_v39, 1  ;;  %v394_v44 = vmul.f32 %v3189_v12, %v4101_v8  ;;  %v468_v41 = vmul.f32 %v3191_v13, %v4086_v37 }
 0x131   : > { %v1975_v30 = vsel %vm788_vm2, %v1972_v0, %v1974_v23  ;;  %v2041_v43 = vadd.f32 %v1973_v26, %v1797_v28  ;;  %v469_v3 = vmul.f32 %v3191_v13, %v4101_v8  ;;  %v470_v50 = vmul.f32 %v3191_v13, %v4106_v45 }
 0x132   : > { %v2042_v33 = vadd.f32 %v1975_v30, %v1798_v5  ;;  %v2343_v52 = vsel %vm543_vm1, %v2340_v54, %v2342_v36  ;;  %v579_v40 = vrot.slane %v468_v41, 1  ;;  %v713_v38 = vmul.f32 %v3193_v14, %v4086_v37 }
 0x133   : > { %v2080_v42 = vadd.f32 %v4321_v55, %v2041_v43  ;;  %3069 = vmatmul.mubr.msk.f32.gmra.mrb[12].mxu0 %vm2397_vm4, %v2343_v52  ;;  %v580_v32 = vrot.slane %v469_v3, 1  ;;  %v582_v1 = vrot.slane %v470_v50, 1  ;;  %v714_v31 = vmul.f32 %v3193_v14, %v4101_v8 }
 0x134   : > { %v2081_v46 = vadd.f32 %v4321_v55, %v2042_v33  ;;  %v715_v6 = vmul.f32 %v3193_v14, %v4106_v45  ;;  %v824_v47 = vrot.slane %v713_v38, 2  ;;  %v951_v54 = vmul.f32 %v4258_v35, %v3195_v15 }
 0x135   : > { %v2159_v59 = vrot.slane %v2080_v42, 7  ;;  %v581_v37 = vsel %vm543_vm1, %v579_v40, %v580_v32  ;;  %v583_v24 = vsel %vm543_vm1, %v580_v32, %v582_v1  ;;  %v825_v48 = vrot.slane %v714_v31, 2  ;;  %v3116_v42 = vld [vmem:[%s3187_s10 + $0xd8] sm:$0xff] }
 0x136   : > { %v2160_v29 = vrot.slane %v2081_v46, 7  ;;  %v670_v61 = vadd.f32 %v581_v37, %v393_v4  ;;  %v671_v57 = vadd.f32 %v583_v24, %v394_v44  ;;  %v827_v9 = vrot.slane %v715_v6, 2  ;;  %v4411_v8 = vpop.f32.mrb[2].mxu0 }
 0x137   : > { %v2255_v63 = vadd.f32 %v2159_v59, %v4169_v62  ;;  %v826_v45 = vsel %vm788_vm2, %v824_v47, %v825_v48  ;;  %v952_v27 = vmul.f32 %v4263_v7, %v3195_v15  ;;  %v1026_v0 = vmul.f32 %v4258_v35, %v3200_v19  ;;  %v4419_v60 = vpop.f32.mrb[3].mxu0 }
 0x138   : > { %v2161_v25 = vsel %vm2116_vm3, %v2159_v59, %v2160_v29  ;;  %v2257_v58 = vadd.f32 %v2160_v29, %v4187_v51  ;;  %v828_v39 = vsel %vm788_vm2, %v825_v48, %v827_v9  ;;  %v915_v28 = vadd.f32 %v826_v45, %v670_v61  ;;  %v3117_v48 = vld [vmem:[%s3187_s10 + $0xe0] sm:$0xff]  ;;  %v3118_v45 = vld [vmem:[%s3187_s10 + $0xe8] sm:$0x3] }
 0x139   : > { %v2256_v26 = vadd.f32 %v2161_v25, %v4175_v11  ;;  %v2379_v23 = vrot.slane %v2255_v63, 1  ;;  %v916_v4 = vadd.f32 %v828_v39, %v671_v57  ;;  %v1027_v5 = vmul.f32 %v4263_v7, %v3200_v19 }
 0x13a   : > { %v2382_v36 = vrot.slane %v2257_v58, 1  ;;  %v983_v44 = vadd.f32 %v951_v54, %v915_v28  ;;  %v1028_v41 = vmul.f32 %v4277_v56, %v3200_v19  ;;  %v1136_v30 = vrot.slane %v1026_v0, 1 }
 0x13b   : > { %v2380_v43 = vrot.slane %v2256_v26, 1  ;;  %v984_v3 = vadd.f32 %v952_v27, %v916_v4  ;;  %v1137_v50 = vrot.slane %v1027_v5, 1  ;;  %v1270_v33 = vmul.f32 %v4258_v35, %v3202_v20 }
 0x13c   : > { %v1139_v52 = vrot.slane %v1028_v41, 1  ;;  %v1271_v40 = vmul.f32 %v4263_v7, %v3202_v20  ;;  %v1272_v38 = vmul.f32 %v4277_v56, %v3202_v20  ;;  %v1507_v32 = vmul.f32 %v3116_v42, %v3204_v21 }
 0x13d   : > { %v2381_v1 = vsel %vm543_vm1, %v2379_v23, %v2380_v43  ;;  %v2383_v31 = vsel %vm543_vm1, %v2380_v43, %v2382_v36  ;;  %v1138_v46 = vsel %vm543_vm1, %v1136_v30, %v1137_v50  ;;  %v1380_v6 = vrot.slane %v1270_v33, 2 }
 0x13e   : > { %3092 = vmatprep.mubr.msk.f32.mxu1 %vm2397_vm4, %v2381_v1  ;;  %v1140_v47 = vsel %vm543_vm1, %v1137_v50, %v1139_v52  ;;  %v1227_v54 = vadd.f32 %v1138_v46, %v983_v44  ;;  %v1381_v59 = vrot.slane %v1271_v40, 2  ;;  %v1383_v37 = vrot.slane %v1272_v38, 2 }
 0x13f   : > { %3093 = vmatmul.mubr.msk.f32.gmra.mrb[12].mxu1 %vm2397_vm4, %v2383_v31  ;;  %v1228_v24 = vadd.f32 %v1140_v47, %v984_v3  ;;  %v1508_v29 = vmul.f32 %v3117_v48, %v3204_v21  ;;  %v1582_v61 = vmul.f32 %v3116_v42, %v3206_v22  ;;  %v1583_v57 = vmul.f32 %v3117_v48, %v3206_v22 }
 0x140   : > { %v1382_v9 = vsel %vm788_vm2, %v1380_v6, %v1381_v59  ;;  %v1384_v63 = vsel %vm788_vm2, %v1381_v59, %v1383_v37  ;;  %v1584_v27 = vmul.f32 %v3118_v45, %v3206_v22  ;;  %v1826_v0 = vmul.f32 %v3116_v42, %v4284_v49 }
 0x141   : > { %v1471_v25 = vadd.f32 %v1382_v9, %v1227_v54  ;;  %v1472_v58 = vadd.f32 %v1384_v63, %v1228_v24  ;;  %v1692_v39 = vrot.slane %v1582_v61, 1  ;;  %v1693_v28 = vrot.slane %v1583_v57, 1 }
 0x142   : > { %v1695_v26 = vrot.slane %v1584_v27, 1  ;;  %v1827_v23 = vmul.f32 %v3117_v48, %v4284_v49  ;;  %v1828_v4 = vmul.f32 %v3118_v45, %v4284_v49  ;;  %v1936_v5 = vrot.slane %v1826_v0, 2 }
 0x143   : > { %v1539_v36 = vadd.f32 %v1507_v32, %v1471_v25  ;;  %v1540_v44 = vadd.f32 %v1508_v29, %v1472_v58  ;;  %v1694_v41 = vsel %vm543_vm1, %v1692_v39, %v1693_v28  ;;  %v409_v30 = vmul.f32 %v3189_v12, %v4169_v62  ;;  %v4457_v43 = vpop.f32.mrb[2].mxu1 }
 0x144   : > { %v1696_v3 = vsel %vm543_vm1, %v1693_v28, %v1695_v26  ;;  %v1937_v50 = vrot.slane %v1827_v23, 2  ;;  %v1939_v33 = vrot.slane %v1828_v4, 2  ;;  %v410_v52 = vmul.f32 %v3189_v12, %v4175_v11  ;;  %v4462_v40 = vpop.f32.mrb[3].mxu1 }
 0x145   : > { %v1783_v38 = vadd.f32 %v1694_v41, %v1539_v36  ;;  %v1784_v42 = vadd.f32 %v1696_v3, %v1540_v44  ;;  %v492_v32 = vmul.f32 %v3191_v13, %v4169_v62  ;;  %v493_v1 = vmul.f32 %v3191_v13, %v4175_v11 }
 0x146   : > { %v1938_v31 = vsel %vm788_vm2, %v1936_v5, %v1937_v50  ;;  %v1940_v46 = vsel %vm788_vm2, %v1937_v50, %v1939_v33  ;;  %v494_v6 = vmul.f32 %v3191_v13, %v4187_v51  ;;  %v737_v12 = vmul.f32 %v3193_v14, %v4169_v62  ;;  %v371_v33 = vld [vmem:[%s3187_s10 + $0x1a0] sm:$0xff] }
 0x147   : > { %v2027_v47 = vadd.f32 %v1938_v31, %v1783_v38  ;;  %v2028_v54 = vadd.f32 %v1940_v46, %v1784_v42  ;;  %v619_v59 = vrot.slane %v492_v32, 1  ;;  %v620_v37 = vrot.slane %v493_v1, 1  ;;  %v372_v31 = vld [vmem:[%s3187_s10 + $0x1a8] sm:$0x3] }
 0x148   : > { %v622_v24 = vrot.slane %v494_v6, 1  ;;  %v738_v48 = vmul.f32 %v3193_v14, %v4175_v11  ;;  %v739_v29 = vmul.f32 %v3193_v14, %v4187_v51  ;;  %v864_v61 = vrot.slane %v737_v12, 2 }
 0x149   : > { %v2066_v57 = vadd.f32 %v4321_v55, %v2027_v47  ;;  %v4480_v9 = vadd.f32 %v4321_v55, %v2028_v54  ;;  %v621_v13 = vsel %vm543_vm1, %v619_v59, %v620_v37  ;;  %v967_v62 = vmul.f32 %v3195_v15, %v4350_v2 }
 0x14a   : > { %v623_v63 = vsel %vm543_vm1, %v620_v37, %v622_v24  ;;  %v686_v45 = vadd.f32 %v621_v13, %v409_v30  ;;  %v865_v27 = vrot.slane %v738_v48, 2  ;;  %v867_v11 = vrot.slane %v739_v29, 2 }
 0x14b   : > { %v2138_v0 = vrot.slane %v2066_v57, 7  ;;  %v2139_v14 = vrot.slane %v4480_v9, 7  ;;  %v687_v51 = vadd.f32 %v623_v63, %v410_v52  ;;  %v968_v25 = vmul.f32 %v3195_v15, %v4356_v17  ;;  %v370_v15 = vld [vmem:[%s3187_s10 + $0x198] sm:$0xff] }
 0x14c   : > { %v866_v58 = vsel %vm788_vm2, %v864_v61, %v865_v27  ;;  %v868_v39 = vsel %vm788_vm2, %v865_v27, %v867_v11  ;;  %v1050_v28 = vmul.f32 %v3200_v19, %v4350_v2  ;;  %v1051_v26 = vmul.f32 %v3200_v19, %v4356_v17 }
 0x14d   : > { %v2140_v23 = vsel %vm2116_vm3, %v2138_v0, %v2139_v14  ;;  %v2234_v4 = vadd.f32 %v4258_v35, %v2138_v0  ;;  %v931_v5 = vadd.f32 %v866_v58, %v686_v45  ;;  %v932_v36 = vadd.f32 %v868_v39, %v687_v51 }
 0x14e   : > { %v4498_v44 = vadd.f32 %v4263_v7, %v2140_v23  ;;  %v1052_v41 = vmul.f32 %v3200_v19, %v4363_v53  ;;  %v1176_v30 = vrot.slane %v1050_v28, 1  ;;  %v1177_v3 = vrot.slane %v1051_v26, 1  ;;  %v2692_v26 = vld [vmem:[%s4531_s27 + $0x8] sm:$0xff] }
 0x14f   : > { %v2344_v50 = vrot.slane %v2234_v4, 1  ;;  %v999_v52 = vadd.f32 %v967_v62, %v931_v5  ;;  %v1000_v38 = vadd.f32 %v968_v25, %v932_v36  ;;  %v1294_v35 = vmul.f32 %v3202_v20, %v4350_v2  ;;  %v2708_v36 = vld [vmem:[%s4531_s27 + $0x88] sm:$0xff] }
 0x150   : > { %v2345_v42 = vrot.slane %v4498_v44, 1  ;;  %v1178_v32 = vsel %vm543_vm1, %v1176_v30, %v1177_v3  ;;  %v1179_v7 = vrot.slane %v1052_v41, 1  ;;  %v1295_v1 = vmul.f32 %v3202_v20, %v4356_v17  ;;  %v2756_v30 = vld [vmem:[%s4544_s9 + $0x8] sm:$0xff] }
 0x151   : > { %v1243_v19 = vadd.f32 %v1178_v32, %v999_v52  ;;  %v1296_v46 = vmul.f32 %v3202_v20, %v4363_v53  ;;  %v1420_v6 = vrot.slane %v1294_v35, 2  ;;  %v1523_v12 = vmul.f32 %v3204_v21, %v370_v15  ;;  %v2772_v52 = vld [vmem:[%s4544_s9 + $0x88] sm:$0xff] }
 0x152   : > { %v2346_v47 = vsel %vm543_vm1, %v2344_v50, %v2345_v42  ;;  %v1180_v54 = vsel %vm543_vm1, %v1177_v3, %v1179_v7  ;;  %v1421_v59 = vrot.slane %v1295_v1, 2  ;;  %v1524_v37 = vmul.f32 %v3204_v21, %v371_v33  ;;  %v2755_v1 = vld [vmem:[%s4544_s9] sm:$0xff] }
 0x153   : > { %3071 = vmatprep.mubr.msk.f32.mxu0 %vm2397_vm4, %v2346_v47  ;;  %v1244_v24 = vadd.f32 %v1180_v54, %v1000_v38  ;;  %v1423_v48 = vrot.slane %v1296_v46, 2  ;;  %v1606_v29 = vmul.f32 %v3206_v22, %v370_v15  ;;  %v1607_v20 = vmul.f32 %v3206_v22, %v371_v33  ;;  %v2707_v38 = vld [vmem:[%s4531_s27 + $0x80] sm:$0xff]  ;;  %v2710_v47 = vld [vmem:[%s4531_s27 + $0x98] sm:$0xff] }
 0x154   : > { %v1422_v61 = vsel %vm788_vm2, %v1420_v6, %v1421_v59  ;;  %v1608_v57 = vmul.f32 %v3206_v22, %v372_v31  ;;  %v1850_v9 = vmul.f32 %v4284_v49, %v370_v15  ;;  %v1851_v13 = vmul.f32 %v4284_v49, %v371_v33  ;;  %v4537_v22 = vld [vmem:[%s4744_s4] ss:$0 sm:$0xff] }
 0x155   : > { %v1424_v21 = vsel %vm788_vm2, %v1421_v59, %v1423_v48  ;;  %v1487_v62 = vadd.f32 %v1422_v61, %v1243_v19  ;;  %v1732_v63 = vrot.slane %v1606_v29, 1  ;;  %v1733_v45 = vrot.slane %v1607_v20, 1  ;;  %v2758_v59 = vld [vmem:[%s4544_s9 + $0x18] sm:$0xff] }
 0x156   : > { %v1488_v27 = vadd.f32 %v1424_v21, %v1244_v24  ;;  %v1735_v11 = vrot.slane %v1608_v57, 1  ;;  %v1852_v0 = vmul.f32 %v4284_v49, %v372_v31  ;;  %v1976_v51 = vrot.slane %v1850_v9, 2  ;;  %v2694_v31 = vld [vmem:[%s4531_s27 + $0x18] sm:$0xff]  ;;  %v2693_v21 = vld [vmem:[%s4531_s27 + $0x10] sm:$0xff] }
 0x157   : > { %v1555_v25 = vadd.f32 %v1523_v12, %v1487_v62  ;;  %v1734_v58 = vsel %vm543_vm1, %v1732_v63, %v1733_v45  ;;  %v1977_v39 = vrot.slane %v1851_v13, 2  ;;  %v2236_v28 = vadd.f32 %v4277_v56, %v2139_v14  ;;  %v2691_v14 = vld [vmem:[%s4531_s27] sm:$0xff]  ;;  %v2774_v20 = vld [vmem:[%s4544_s9 + $0x98] sm:$0xff] }
 0x158   : > { %v1556_v23 = vadd.f32 %v1524_v37, %v1488_v27  ;;  %v1736_v49 = vsel %vm543_vm1, %v1733_v45, %v1735_v11  ;;  %v1979_v4 = vrot.slane %v1852_v0, 2  ;;  %v2538_v5 = vadd.f32 %v4239_v10, %v4537_v22  ;;  %v2771_v12 = vld [vmem:[%s4544_s9 + $0x80] sm:$0xff]  ;;  %v2709_v45 = vld [vmem:[%s4531_s27 + $0x90] sm:$0xff] }
 0x159   : > { %v1799_v44 = vadd.f32 %v1734_v58, %v1555_v25  ;;  %v1978_v15 = vsel %vm788_vm2, %v1976_v51, %v1977_v39  ;;  %v2347_v41 = vrot.slane %v2236_v28, 1  ;;  %v2618_v56 = vadd.f32 %v4302_v34, %v4537_v22  ;;  %v2757_v25 = vld [vmem:[%s4544_s9 + $0x10] sm:$0xff] }
 0x15a   : > { %v1800_v3 = vadd.f32 %v1736_v49, %v1556_v23  ;;  %v1980_v50 = vsel %vm788_vm2, %v1977_v39, %v1979_v4  ;;  %v2724_v33 = vadd.f32 %v2692_v26, %v2538_v5  ;;  %v2533_v10 = vadd.f32 %v4537_v22, %v4245_v16  ;;  %v2773_v23 = vld [vmem:[%s4544_s9 + $0x90] sm:$0xff] }
 0x15b   : > { %v2043_v35 = vadd.f32 %v1978_v15, %v1799_v44  ;;  %v2348_v32 = vsel %vm543_vm1, %v2345_v42, %v2347_v41  ;;  %v2740_v7 = vadd.f32 %v2708_v36, %v2618_v56  ;;  %v2613_v34 = vadd.f32 %v4537_v22, %v4308_v18  ;;  %v2696_v36 = vld [vmem:[%s4531_s27 + $0x28] sm:$0xff]  ;;  %v2695_v44 = vld [vmem:[%s4531_s27 + $0x20] sm:$0xff] }
 0x15c   : > { %v2044_v19 = vadd.f32 %v1980_v50, %v1800_v3  ;;  %3072 = vmatmul.mubr.msk.f32.gmra.mrb[14].mxu0 %vm2397_vm4, %v2348_v32  ;;  %v2788_v46 = vadd.f32 %v2756_v30, %v2724_v33  ;;  %v2723_v6 = vadd.f32 %v2691_v14, %v2533_v10  ;;  %v2548_v16 = vadd.f32 %v4411_v8, %v4537_v22  ;;  %v2760_v14 = vld [vmem:[%s4544_s9 + $0x28] sm:$0xff]  ;;  %v2759_v3 = vld [vmem:[%s4544_s9 + $0x20] sm:$0xff] }
 0x15d   : > { %v2082_v42 = vadd.f32 %v4321_v55, %v2043_v35  ;;  %v2804_v18 = vadd.f32 %v2772_v52, %v2740_v7  ;;  %v2739_v54 = vadd.f32 %v2707_v38, %v2613_v34  ;;  %v2628_v37 = vadd.f32 %v4457_v43, %v4537_v22 }
 0x15e   : > { %v2083_v24 = vadd.f32 %v4321_v55, %v2044_v19  ;;  %v2820_v8 = vadd.f32 %v2788_v46, %v2756_v30  ;;  %v2787_v48 = vadd.f32 %v2755_v1, %v2723_v6  ;;  %v2726_v29 = vadd.f32 %v2694_v31, %v2548_v16  ;;  %v2712_v19 = vld [vmem:[%s4531_s27 + $0xa8] sm:$0xff] }
 0x15f   : > { %v2162_v61 = vrot.slane %v2082_v42, 7  ;;  %v2836_v57 = vadd.f32 %v2804_v18, %v2772_v52  ;;  %v2803_v9 = vadd.f32 %v2771_v12, %v2739_v54  ;;  %v2742_v13 = vadd.f32 %v2710_v47, %v2628_v37  ;;  %v2776_v16 = vld [vmem:[%s4544_s9 + $0xa8] sm:$0xff]  ;;  %v2775_v18 = vld [vmem:[%s4544_s9 + $0xa0] sm:$0xff] }
 0x160   : > { %v2163_v62 = vrot.slane %v2083_v24, 7  ;;  %2852 = vst.msk [vmem:[%s4578_s12 + $0x8] sm:$0xff] %vm2397_vm4, %v2820_v8  ;;  %v2819_v63 = vadd.f32 %v2787_v48, %v2755_v1  ;;  %v2790_v43 = vadd.f32 %v2758_v59, %v2726_v29  ;;  %v2543_v55 = vadd.f32 %v4537_v22, %v4419_v60  ;;  %v3058_v27 = vpop.f32.mrb[4].mxu0  ;;  %v2698_v29 = vld [vmem:[%s4531_s27 + $0x38] sm:$0xff] }
 0x161   : > { %v2258_v11 = vadd.f32 %v2162_v61, %v4350_v2  ;;  %2868 = vst.msk [vmem:[%s4578_s12 + $0x88] sm:$0xff] %vm2397_vm4, %v2836_v57  ;;  %v2835_v0 = vadd.f32 %v2803_v9, %v2771_v12  ;;  %v2806_v51 = vadd.f32 %v2774_v20, %v2742_v13  ;;  %v2623_v58 = vadd.f32 %v4537_v22, %v4462_v40  ;;  %v2552_v39 = vpop.f32.mrb[5].mxu0  ;;  %v2711_v12 = vld [vmem:[%s4531_s27 + $0xa0] sm:$0xff]  ;;  %v2697_v57 = vld [vmem:[%s4531_s27 + $0x30] sm:$0xff]  ;;  %v2762_v9 = vld [vmem:[%s4544_s9 + $0x38] sm:$0xff] }
 0x162   : > { %v2164_v28 = vsel %vm2116_vm3, %v2162_v61, %v2163_v62  ;;  %v2260_v60 = vadd.f32 %v2163_v62, %v4363_v53  ;;  %2851 = vst.msk [vmem:[%s4578_s12] sm:$0xff] %vm2397_vm4, %v2819_v63  ;;  %v2822_v26 = vadd.f32 %v2790_v43, %v2758_v59  ;;  %v2725_v2 = vadd.f32 %v2693_v21, %v2543_v55  ;;  %v2761_v62 = vld [vmem:[%s4544_s9 + $0x30] sm:$0xff] }
 0x163   : > { %v2259_v49 = vadd.f32 %v2164_v28, %v4356_v17  ;;  %v2384_v4 = vrot.slane %v2258_v11, 1  ;;  %2867 = vst.msk [vmem:[%s4578_s12 + $0x80] sm:$0xff] %vm2397_vm4, %v2835_v0  ;;  %v2838_v40 = vadd.f32 %v2806_v51, %v2774_v20  ;;  %v2741_v5 = vadd.f32 %v2709_v45, %v2623_v58  ;;  %v2714_v0 = vld [vmem:[%s4531_s27 + $0xb8] sm:$0xff]  ;;  %v2713_v58 = vld [vmem:[%s4531_s27 + $0xb0] sm:$0xff] }
 0x164   : > { %v2387_v15 = vrot.slane %v2260_v60, 1  ;;  %2854 = vst.msk [vmem:[%s4578_s12 + $0x18] sm:$0xff] %vm2397_vm4, %v2822_v26  ;;  %v2789_v53 = vadd.f32 %v2757_v25, %v2725_v2  ;;  %v2558_v41 = vadd.f32 %v3058_v27, %v4537_v22  ;;  %v2553_v30 = vadd.f32 %v4537_v22, %v2552_v39  ;;  %v2778_v39 = vld [vmem:[%s4544_s9 + $0xb8] sm:$0xff]  ;;  %v2777_v26 = vld [vmem:[%s4544_s9 + $0xb0] sm:$0xff] }
 0x165   : > { %v2385_v56 = vrot.slane %v2259_v49, 1  ;;  %2870 = vst.msk [vmem:[%s4578_s12 + $0x98] sm:$0xff] %vm2397_vm4, %v2838_v40  ;;  %v2805_v17 = vadd.f32 %v2773_v23, %v2741_v5 }
 0x166   : > { %v2821_v50 = vadd.f32 %v2789_v53, %v2757_v25  ;;  %v2728_v33 = vadd.f32 %v2696_v36, %v2558_v41  ;;  %v2727_v52 = vadd.f32 %v2695_v44, %v2553_v30  ;;  %v2700_v36 = vld [vmem:[%s4531_s27 + $0x48] sm:$0xff]  ;;  %v2699_v53 = vld [vmem:[%s4531_s27 + $0x40] sm:$0xff] }
 0x167   : > { %v2386_v10 = vsel %vm543_vm1, %v2384_v4, %v2385_v56  ;;  %v2388_v38 = vsel %vm543_vm1, %v2385_v56, %v2387_v15  ;;  %v2837_v35 = vadd.f32 %v2805_v17, %v2773_v23  ;;  %v2764_v41 = vld [vmem:[%s4544_s9 + $0x48] sm:$0xff]  ;;  %v2763_v17 = vld [vmem:[%s4544_s9 + $0x40] sm:$0xff] }
 0x168   : > { %3095 = vmatprep.mubr.msk.f32.mxu1 %vm2397_vm4, %v2386_v10  ;;  %2853 = vst.msk [vmem:[%s4578_s12 + $0x10] sm:$0xff] %vm2397_vm4, %v2821_v50  ;;  %v2792_v32 = vadd.f32 %v2760_v14, %v2728_v33  ;;  %v2791_v7 = vadd.f32 %v2759_v3, %v2727_v52 }
 0x169   : > { %3096 = vmatmul.mubr.msk.f32.gmra.mrb[14].mxu1 %vm2397_vm4, %v2388_v38  ;;  %2869 = vst.msk [vmem:[%s4578_s12 + $0x90] sm:$0xff] %vm2397_vm4, %v2837_v35  ;;  %v2716_v38 = vld [vmem:[%s4531_s27 + $0xc8] sm:$0xff] }
 0x16a   : > { %v2824_v1 = vadd.f32 %v2792_v32, %v2760_v14  ;;  %v2823_v34 = vadd.f32 %v2791_v7, %v2759_v3  ;;  %v2715_v7 = vld [vmem:[%s4531_s27 + $0xc0] sm:$0xff] }
 0x16c   : > { %2856 = vst.msk [vmem:[%s4578_s12 + $0x28] sm:$0xff] %vm2397_vm4, %v2824_v1  ;;  %v3082_v31 = vpop.f32.mrb[4].mxu1  ;;  %2855 = vst.msk [vmem:[%s4578_s12 + $0x20] sm:$0xff] %vm2397_vm4, %v2823_v34  ;;  %v2780_v1 = vld [vmem:[%s4544_s9 + $0xc8] sm:$0xff] }
 0x16d   : > { %v2638_v46 = vadd.f32 %v3082_v31, %v4537_v22  ;;  %v2632_v6 = vpop.f32.mrb[5].mxu1 }
 0x16e   : > { %v2633_v47 = vadd.f32 %v4537_v22, %v2632_v6 }
 0x16f   : > { %v2744_v42 = vadd.f32 %v2712_v19, %v2638_v46  ;;  %v2779_v19 = vld [vmem:[%s4544_s9 + $0xc0] sm:$0xff] }
 0x170   : > { %v2743_v54 = vadd.f32 %v2711_v12, %v2633_v47 }
 0x171   : > { %v2808_v59 = vadd.f32 %v2776_v16, %v2744_v42 }
 0x172   : > { %v2807_v37 = vadd.f32 %v2775_v18, %v2743_v54 }
 0x173   : > { %v2840_v24 = vadd.f32 %v2808_v59, %v2776_v16 }
 0x174   : > { %v2839_v8 = vadd.f32 %v2807_v37, %v2775_v18  ;;  %v2702_v18 = vld [vmem:[%s4531_s27 + $0x58] sm:$0xff]  ;;  %v2701_v37 = vld [vmem:[%s4531_s27 + $0x50] sm:$0xff] }
 0x175   : > { %2872 = vst.msk [vmem:[%s4578_s12 + $0xa8] sm:$0xff] %vm2397_vm4, %v2840_v24  ;;  %v2766_v24 = vld [vmem:[%s4544_s9 + $0x58] sm:$0xff] }
 0x176   : > { %2871 = vst.msk [vmem:[%s4578_s12 + $0xa0] sm:$0xff] %vm2397_vm4, %v2839_v8 }
 0x189   : > { %v3061_v48 = vpop.f32.mrb[6].mxu0 }
 0x18a   : > { %v2568_v20 = vadd.f32 %v3061_v48, %v4537_v22  ;;  %v2562_v61 = vpop.f32.mrb[7].mxu0 }
 0x18b   : > { %v2563_v13 = vadd.f32 %v4537_v22, %v2562_v61 }
 0x18c   : > { %v2730_v21 = vadd.f32 %v2698_v29, %v2568_v20  ;;  %v2765_v29 = vld [vmem:[%s4544_s9 + $0x50] sm:$0xff] }
 0x18d   : > { %v2729_v63 = vadd.f32 %v2697_v57, %v2563_v13 }
 0x18e   : > { %v2794_v43 = vadd.f32 %v2762_v9, %v2730_v21 }
 0x18f   : > { %v2793_v55 = vadd.f32 %v2761_v62, %v2729_v63 }
 0x190   : > { %v2826_v45 = vadd.f32 %v2794_v43, %v2762_v9 }
 0x191   : > { %v2825_v27 = vadd.f32 %v2793_v55, %v2761_v62  ;;  %v2718_v62 = vld [vmem:[%s4531_s27 + $0xd8] sm:$0xff]  ;;  %v2717_v55 = vld [vmem:[%s4531_s27 + $0xd0] sm:$0xff] }
 0x192   : > { %2858 = vst.msk [vmem:[%s4578_s12 + $0x38] sm:$0xff] %vm2397_vm4, %v2826_v45  ;;  %v2782_v45 = vld [vmem:[%s4544_s9 + $0xd8] sm:$0xff] }
 0x193   : > { %2857 = vst.msk [vmem:[%s4578_s12 + $0x30] sm:$0xff] %vm2397_vm4, %v2825_v27 }
 0x196   : > { %v3085_v11 = vpop.f32.mrb[6].mxu1 }
 0x197   : > { %v2648_v51 = vadd.f32 %v3085_v11, %v4537_v22  ;;  %v2642_v25 = vpop.f32.mrb[7].mxu1 }
 0x198   : > { %v2643_v28 = vadd.f32 %v4537_v22, %v2642_v25 }
 0x199   : > { %v2746_v60 = vadd.f32 %v2714_v0, %v2648_v51  ;;  %v2781_v0 = vld [vmem:[%s4544_s9 + $0xd0] sm:$0xff] }
 0x19a   : > { %v2745_v2 = vadd.f32 %v2713_v58, %v2643_v28 }
 0x19b   : > { %v2810_v23 = vadd.f32 %v2778_v39, %v2746_v60 }
 0x19c   : > { %v2809_v49 = vadd.f32 %v2777_v26, %v2745_v2 }
 0x19d   : > { %v2842_v4 = vadd.f32 %v2810_v23, %v2778_v39 }
 0x19e   : > { %v2841_v40 = vadd.f32 %v2809_v49, %v2777_v26  ;;  %v2704_v26 = vld [vmem:[%s4531_s27 + $0x68] sm:$0xff]  ;;  %v2703_v49 = vld [vmem:[%s4531_s27 + $0x60] sm:$0xff] }
 0x19f   : > { %2874 = vst.msk [vmem:[%s4578_s12 + $0xb8] sm:$0xff] %vm2397_vm4, %v2842_v4  ;;  %v2768_v4 = vld [vmem:[%s4544_s9 + $0x68] sm:$0xff] }
 0x1a0   : > { %2873 = vst.msk [vmem:[%s4578_s12 + $0xb0] sm:$0xff] %vm2397_vm4, %v2841_v40 }
 0x1b3   : > { %v3064_v5 = vpop.f32.mrb[8].mxu0 }
 0x1b4   : > { %v2578_v44 = vadd.f32 %v3064_v5, %v4537_v22  ;;  %v2572_v15 = vpop.f32.mrb[9].mxu0 }
 0x1b5   : > { %v2573_v30 = vadd.f32 %v4537_v22, %v2572_v15 }
 0x1b6   : > { %v2732_v56 = vadd.f32 %v2700_v36, %v2578_v44  ;;  %v2767_v36 = vld [vmem:[%s4544_s9 + $0x60] sm:$0xff] }
 0x1b7   : > { %v2731_v14 = vadd.f32 %v2699_v53, %v2573_v30 }
 0x1b8   : > { %v2796_v3 = vadd.f32 %v2764_v41, %v2732_v56 }
 0x1b9   : > { %v2795_v50 = vadd.f32 %v2763_v17, %v2731_v14 }
 0x1ba   : > { %v2828_v33 = vadd.f32 %v2796_v3, %v2764_v41 }
 0x1bb   : > { %v2827_v52 = vadd.f32 %v2795_v50, %v2763_v17  ;;  %v2720_v17 = vld [vmem:[%s4531_s27 + $0xe8] sm:$0xff]  ;;  %v2719_v50 = vld [vmem:[%s4531_s27 + $0xe0] sm:$0xff] }
 0x1bc   : > { %2860 = vst.msk [vmem:[%s4578_s12 + $0x48] sm:$0xff] %vm2397_vm4, %v2828_v33  ;;  %v2784_v33 = vld [vmem:[%s4544_s9 + $0xe8] sm:$0xff] }
 0x1bd   : > { %2859 = vst.msk [vmem:[%s4578_s12 + $0x40] sm:$0xff] %vm2397_vm4, %v2827_v52 }
 0x1bf   : > { %v3088_v10 = vpop.f32.mrb[8].mxu1 }
 0x1c0   : > { %v2658_v35 = vadd.f32 %v3088_v10, %v4537_v22  ;;  %v2652_v32 = vpop.f32.mrb[9].mxu1 }
 0x1c1   : > { %v2653_v34 = vadd.f32 %v4537_v22, %v2652_v32 }
 0x1c2   : > { %v2748_v31 = vadd.f32 %v2716_v38, %v2658_v35  ;;  %v2783_v38 = vld [vmem:[%s4544_s9 + $0xe0] sm:$0xff] }
 0x1c3   : > { %v2747_v46 = vadd.f32 %v2715_v7, %v2653_v34 }
 0x1c4   : > { %v2812_v6 = vadd.f32 %v2780_v1, %v2748_v31 }
 0x1c5   : > { %v2811_v12 = vadd.f32 %v2779_v19, %v2747_v46 }
 0x1c6   : > { %v2844_v16 = vadd.f32 %v2812_v6, %v2780_v1 }
 0x1c7   : > { %v2843_v47 = vadd.f32 %v2811_v12, %v2779_v19  ;;  %v2706_v19 = vld [vmem:[%s4531_s27 + $0x78] sm:$0xff]  ;;  %v2705_v12 = vld [vmem:[%s4531_s27 + $0x70] sm:$0xff] }
 0x1c8   : > { %2876 = vst.msk [vmem:[%s4578_s12 + $0xc8] sm:$0xff] %vm2397_vm4, %v2844_v16  ;;  %v2770_v16 = vld [vmem:[%s4544_s9 + $0x78] sm:$0xff] }
 0x1c9   : > { %2875 = vst.msk [vmem:[%s4578_s12 + $0xc0] sm:$0xff] %vm2397_vm4, %v2843_v47 }
 0x1dc   : > { %v3067_v42 = vpop.f32.mrb[10].mxu0 }
 0x1dd   : > { %v2588_v54 = vadd.f32 %v3067_v42, %v4537_v22  ;;  %v2582_v59 = vpop.f32.mrb[11].mxu0 }
 0x1de   : > { %v2583_v8 = vadd.f32 %v4537_v22, %v2582_v59 }
 0x1df   : > { %v2734_v48 = vadd.f32 %v2702_v18, %v2588_v54  ;;  %v2769_v18 = vld [vmem:[%s4544_s9 + $0x70] sm:$0xff] }
 0x1e0   : > { %v2733_v20 = vadd.f32 %v2701_v37, %v2583_v8 }
 0x1e1   : > { %v2798_v61 = vadd.f32 %v2766_v24, %v2734_v48 }
 0x1e2   : > { %v2797_v57 = vadd.f32 %v2765_v29, %v2733_v20 }
 0x1e3   : > { %v2830_v9 = vadd.f32 %v2798_v61, %v2766_v24 }
 0x1e4   : > { %v2829_v13 = vadd.f32 %v2797_v57, %v2765_v29  ;;  %v2722_v29 = vld [vmem:[%s4531_s27 + $0xf8] sm:$0xff]  ;;  %v2721_v57 = vld [vmem:[%s4531_s27 + $0xf0] sm:$0xff] }
 0x1e5   : > { %2862 = vst.msk [vmem:[%s4578_s12 + $0x58] sm:$0xff] %vm2397_vm4, %v2830_v9  ;;  %v2786_v9 = vld [vmem:[%s4544_s9 + $0xf8] sm:$0xff] }
 0x1e6   : > { %2861 = vst.msk [vmem:[%s4578_s12 + $0x50] sm:$0xff] %vm2397_vm4, %v2829_v13 }
 0x1e9   : > { %v3091_v21 = vpop.f32.mrb[10].mxu1 }
 0x1ea   : > { %v2668_v63 = vadd.f32 %v3091_v21, %v4537_v22  ;;  %v2662_v43 = vpop.f32.mrb[11].mxu1 }
 0x1eb   : > { %v2663_v27 = vadd.f32 %v4537_v22, %v2662_v43 }
 0x1ec   : > { %v2750_v11 = vadd.f32 %v2718_v62, %v2668_v63  ;;  %v2785_v62 = vld [vmem:[%s4544_s9 + $0xf0] sm:$0xff] }
 0x1ed   : > { %v2749_v51 = vadd.f32 %v2717_v55, %v2663_v27 }
 0x1ee   : > { %v2814_v25 = vadd.f32 %v2782_v45, %v2750_v11 }
 0x1ef   : > { %v2813_v58 = vadd.f32 %v2781_v0, %v2749_v51 }
 0x1f0   : > { %v2846_v39 = vadd.f32 %v2814_v25, %v2782_v45 }
 0x1f1   : > { %v2845_v28 = vadd.f32 %v2813_v58, %v2781_v0 }
 0x1f2   : > { %2878 = vst.msk [vmem:[%s4578_s12 + $0xd8] sm:$0xff] %vm2397_vm4, %v2846_v39 }
 0x1f3   : > { %2877 = vst.msk [vmem:[%s4578_s12 + $0xd0] sm:$0xff] %vm2397_vm4, %v2845_v28 }
 0x206   : > { %v3070_v60 = vpop.f32.mrb[12].mxu0 }
 0x207   : > { %v2598_v2 = vadd.f32 %v3070_v60, %v4537_v22  ;;  %v2592_v23 = vpop.f32.mrb[13].mxu0 }
 0x208   : > { %v2593_v40 = vadd.f32 %v4537_v22, %v2592_v23 }
 0x209   : > { %v2736_v5 = vadd.f32 %v2704_v26, %v2598_v2 }
 0x20a   : > { %v2735_v44 = vadd.f32 %v2703_v49, %v2593_v40 }
 0x20b   : > { %v2800_v15 = vadd.f32 %v2768_v4, %v2736_v5 }
 0x20c   : > { %v2799_v53 = vadd.f32 %v2767_v36, %v2735_v44 }
 0x20d   : > { %v2832_v41 = vadd.f32 %v2800_v15, %v2768_v4 }
 0x20e   : > { %v2831_v30 = vadd.f32 %v2799_v53, %v2767_v36 }
 0x20f   : > { %2864 = vst.msk [vmem:[%s4578_s12 + $0x68] sm:$0xff] %vm2397_vm4, %v2832_v41 }
 0x210   : > { %2863 = vst.msk [vmem:[%s4578_s12 + $0x60] sm:$0xff] %vm2397_vm4, %v2831_v30 }
 0x212   : > { %v3094_v56 = vpop.f32.mrb[12].mxu1 }
 0x213   : > { %v2678_v14 = vadd.f32 %v3094_v56, %v4537_v22  ;;  %v2672_v3 = vpop.f32.mrb[13].mxu1 }
 0x214   : > { %v2673_v52 = vadd.f32 %v4537_v22, %v2672_v3 }
 0x215   : > { %v2752_v10 = vadd.f32 %v2720_v17, %v2678_v14 }
 0x216   : > { %v2751_v35 = vadd.f32 %v2719_v50, %v2673_v52 }
 0x217   : > { %v2816_v32 = vadd.f32 %v2784_v33, %v2752_v10 }
 0x218   : > { %v2815_v7 = vadd.f32 %v2783_v38, %v2751_v35 }
 0x219   : > { %v2848_v1 = vadd.f32 %v2816_v32, %v2784_v33 }
 0x21a   : > { %v2847_v34 = vadd.f32 %v2815_v7, %v2783_v38 }
 0x21b   : > { %2880 = vst.msk [vmem:[%s4578_s12 + $0xe8] sm:$0xff] %vm2397_vm4, %v2848_v1 }
 0x21c   : > { %2879 = vst.msk [vmem:[%s4578_s12 + $0xe0] sm:$0xff] %vm2397_vm4, %v2847_v34 }
 0x22f   : > { %v3073_v31 = vpop.f32.mrb[14].mxu0 }
 0x230   : > { %v2608_v46 = vadd.f32 %v3073_v31, %v4537_v22  ;;  %v2602_v6 = vpop.f32.mrb[15].mxu0 }
 0x231   : > { %v2603_v47 = vadd.f32 %v4537_v22, %v2602_v6 }
 0x232   : > { %v2738_v42 = vadd.f32 %v2706_v19, %v2608_v46 }
 0x233   : > { %v2737_v54 = vadd.f32 %v2705_v12, %v2603_v47 }
 0x234   : > { %v2802_v59 = vadd.f32 %v2770_v16, %v2738_v42 }
 0x235   : > { %v2801_v37 = vadd.f32 %v2769_v18, %v2737_v54 }
 0x236   : > { %v2834_v24 = vadd.f32 %v2802_v59, %v2770_v16 }
 0x237   : > { %v2833_v8 = vadd.f32 %v2801_v37, %v2769_v18 }
 0x238   : > { %2866 = vst.msk [vmem:[%s4578_s12 + $0x78] sm:$0xff] %vm2397_vm4, %v2834_v24 }
 0x239   : > { %2865 = vst.msk [vmem:[%s4578_s12 + $0x70] sm:$0xff] %vm2397_vm4, %v2833_v8 }
 0x23c   : > { %v3097_v48 = vpop.f32.mrb[14].mxu1 }
 0x23d   : > { %v2688_v20 = vadd.f32 %v3097_v48, %v4537_v22  ;;  %v2682_v61 = vpop.f32.mrb[15].mxu1 }
 0x23e   : > { %v2683_v13 = vadd.f32 %v4537_v22, %v2682_v61 }
 0x23f   : > { %v2754_v21 = vadd.f32 %v2722_v29, %v2688_v20 }
 0x240   : > { %v2753_v63 = vadd.f32 %v2721_v57, %v2683_v13 }
 0x241   : > { %v2818_v43 = vadd.f32 %v2786_v9, %v2754_v21 }
 0x242   : > { %v2817_v55 = vadd.f32 %v2785_v62, %v2753_v63 }
 0x243   : > { %v2850_v45 = vadd.f32 %v2818_v43, %v2786_v9 }
 0x244   : > { %v2849_v27 = vadd.f32 %v2817_v55, %v2785_v62 }
 0x245   : > { %2882 = vst.msk [vmem:[%s4578_s12 + $0xf8] sm:$0xff] %vm2397_vm4, %v2850_v45 }
 0x246   : > { %2881 = vst.msk [vmem:[%s4578_s12 + $0xf0] sm:$0xff] %vm2397_vm4, %v2849_v27 }
 0x247 PF: > { %s17_s24 = sadd.s32 1, %s3125_s24  }
 0x248   : > { %p14_p4 = scmp.ge.s32.totalorder %s17_s24, 4  }
 0x24a   :  { %16 = sbr.rel (!%p14_p4) target bundleno = 1 (0x1), region = 84 }

</bundles_post_ra>
